<compile_context>
chip_gen: v7x
topology: tpu7x:2x2x1
jax: 0.10.0
libtpu: 0.0.40
codegen_flags: <defaults>
</compile_context>

<pallas_src>
import functools

import jax
import jax.numpy as jnp
from jax import lax
from jax.experimental import pallas as pl
from jax.experimental.pallas import tpu as pltpu

_BN_EPS = 1e-5
# M-tile target; sweep per generation (512-1024 fits v6e's VMEM, keep smaller /
# raise vmem_limit_bytes explicitly on v7x's 64 MiB VMEM).
_TM_TARGET = 256


def _pick_tm(m):
    """Largest multiple-of-8 divisor of m that is <= _TM_TARGET (else full m)."""
    if m <= _TM_TARGET:
        return m
    for t in range((_TM_TARGET // 8) * 8, 7, -8):
        if m % t == 0:
            return t
    return m


# ----------------------------------------------------------------------------
# Pallas kernels
# ----------------------------------------------------------------------------
def _mm_bias_act_kernel(x_ref, w_ref, b_ref, o_ref, *, act):
    """1x1-conv-as-matmul (BN folded into w) + bias + optional ReLU."""
    y = jnp.dot(x_ref[...], w_ref[...], preferred_element_type=jnp.float32)
    y = y + b_ref[...]
    if act == "relu":
        y = jnp.maximum(y, 0.0)
    o_ref[...] = y.astype(o_ref.dtype)


def _mm_bias_relu_res_kernel(x_ref, w_ref, b_ref, r_ref, o_ref):
    """WeightedBlock conv + ReLU with residual add fused in the epilogue."""
    y = jnp.dot(x_ref[...], w_ref[...], preferred_element_type=jnp.float32)
    y = jnp.maximum(y + b_ref[...], 0.0) + r_ref[...].astype(jnp.float32)
    o_ref[...] = y.astype(o_ref.dtype)


def _dec_kernel(lo_ref, hi_ref, wlo_ref, whi_ref, b_ref, o_ref):
    """DecodingBlock: concat-free K-split matmul (low @ w_lo + high @ w_hi)."""
    acc = jnp.dot(lo_ref[...], wlo_ref[...], preferred_element_type=jnp.float32)
    acc = acc + jnp.dot(hi_ref[...], whi_ref[...],
                        preferred_element_type=jnp.float32)
    o_ref[...] = jnp.maximum(acc + b_ref[...], 0.0).astype(o_ref.dtype)


def _mm_bias_softmax2_kernel(x_ref, w_ref, b_ref, o_ref):
    """Final 1x1 conv + BN + 2-class softmax via sigmoid (no cross-lane reduce)."""
    y = jnp.dot(x_ref[...], w_ref[...], preferred_element_type=jnp.float32)
    y = y + b_ref[...]                               # (tm, 2)
    d = y[:, 0:1] - y[:, 1:2]                        # (tm, 1)
    p0 = jax.nn.sigmoid(d)                           # softmax([y0,y1])[0]
    col = lax.broadcasted_iota(jnp.int32, y.shape, 1)
    o_ref[...] = jnp.where(col == 0, p0, 1.0 - p0)


def _efatt_kernel(x_ref, w_ref, b_ref, o_ref):
    """Channel-gating attention: x * sigmoid(GAP(x) * w + b)."""
    x = x_ref[...].astype(jnp.float32)               # (1, HW, C)
    m = jnp.mean(x, axis=1, keepdims=True)           # global average pool
    g = jax.nn.sigmoid(m * w_ref[...] + b_ref[...])
    o_ref[...] = (x * g).astype(o_ref.dtype)


# ----------------------------------------------------------------------------
# Pallas wrappers
# ----------------------------------------------------------------------------
def conv1x1(x, w, b, act="relu", out_dtype=jnp.bfloat16):
    """x: (N,H,W,Cin) -> (N,H,W,Cout). BN folded into w/b. Tiled over M."""
    n, h, wd, cin = x.shape
    cout = w.shape[1]
    m = n * h * wd
    tm = _pick_tm(m)
    out = pl.pallas_call(
        functools.partial(_mm_bias_act_kernel, act=act),
        out_shape=jax.ShapeDtypeStruct((m, cout), out_dtype),
        grid_spec=pltpu.PrefetchScalarGridSpec(
            num_scalar_prefetch=0,
            grid=(m // tm,),
            in_specs=[
                pl.BlockSpec((tm, cin), lambda i: (i, 0)),
                pl.BlockSpec((cin, cout), lambda i: (0, 0)),
                pl.BlockSpec((1, cout), lambda i: (0, 0)),
            ],
            out_specs=pl.BlockSpec((tm, cout), lambda i: (i, 0)),
        ),
        compiler_params=pltpu.CompilerParams(
            dimension_semantics=("parallel",)),
    )(x.reshape(m, cin).astype(jnp.bfloat16),
      w.astype(jnp.bfloat16),
      b.reshape(1, cout).astype(jnp.float32))
    return out.reshape(n, h, wd, cout)


def conv1x1_relu_add(x, w, b, res):
    """WeightedBlock conv + ReLU with the residual add fused in-kernel."""
    n, h, wd, cin = x.shape
    cout = w.shape[1]
    m = n * h * wd
    tm = _pick_tm(m)
    out = pl.pallas_call(
        _mm_bias_relu_res_kernel,
        out_shape=jax.ShapeDtypeStruct((m, cout), jnp.bfloat16),
        grid_spec=pltpu.PrefetchScalarGridSpec(
            num_scalar_prefetch=0,
            grid=(m // tm,),
            in_specs=[
                pl.BlockSpec((tm, cin), lambda i: (i, 0)),
                pl.BlockSpec((cin, cout), lambda i: (0, 0)),
                pl.BlockSpec((1, cout), lambda i: (0, 0)),
                pl.BlockSpec((tm, cout), lambda i: (i, 0)),
            ],
            out_specs=pl.BlockSpec((tm, cout), lambda i: (i, 0)),
        ),
        compiler_params=pltpu.CompilerParams(
            dimension_semantics=("parallel",)),
    )(x.reshape(m, cin).astype(jnp.bfloat16),
      w.astype(jnp.bfloat16),
      b.reshape(1, cout).astype(jnp.float32),
      res.reshape(m, cout).astype(jnp.bfloat16))
    return out.reshape(n, h, wd, cout)


def decoding_block(p, low, high):
    # TODO(synk): DecodingBlock source not provided; implemented as bilinear
    # upsample(high) -> [low|high] 1x1 conv + BN + ReLU, with the concat kept
    # virtual (K-split weights, two MXU pushes into one accumulator).
    w_lo, w_hi, b = p
    n, h, wd, clo = low.shape
    chi = high.shape[-1]
    cout = w_lo.shape[1]
    high_up = jax.image.resize(high, (n, h, wd, chi), method="bilinear")
    m = n * h * wd
    tm = _pick_tm(m)
    out = pl.pallas_call(
        _dec_kernel,
        out_shape=jax.ShapeDtypeStruct((m, cout), jnp.bfloat16),
        grid_spec=pltpu.PrefetchScalarGridSpec(
            num_scalar_prefetch=0,
            grid=(m // tm,),
            in_specs=[
                pl.BlockSpec((tm, clo), lambda i: (i, 0)),
                pl.BlockSpec((tm, chi), lambda i: (i, 0)),
                pl.BlockSpec((clo, cout), lambda i: (0, 0)),
                pl.BlockSpec((chi, cout), lambda i: (0, 0)),
                pl.BlockSpec((1, cout), lambda i: (0, 0)),
            ],
            out_specs=pl.BlockSpec((tm, cout), lambda i: (i, 0)),
        ),
        compiler_params=pltpu.CompilerParams(
            dimension_semantics=("parallel",)),
    )(low.reshape(m, clo).astype(jnp.bfloat16),
      high_up.reshape(m, chi).astype(jnp.bfloat16),
      w_lo.astype(jnp.bfloat16),
      w_hi.astype(jnp.bfloat16),
      b.reshape(1, cout).astype(jnp.float32))
    return out.reshape(n, h, wd, cout)


def conv1x1_softmax2(x, w, b):
    """Final conv (Cout=2) + BN + channel softmax, lowered to a sigmoid."""
    n, h, wd, cin = x.shape
    cout = w.shape[1]
    m = n * h * wd
    tm = _pick_tm(m)
    out = pl.pallas_call(
        _mm_bias_softmax2_kernel,
        out_shape=jax.ShapeDtypeStruct((m, cout), jnp.float32),
        grid_spec=pltpu.PrefetchScalarGridSpec(
            num_scalar_prefetch=0,
            grid=(m // tm,),
            in_specs=[
                pl.BlockSpec((tm, cin), lambda i: (i, 0)),
                pl.BlockSpec((cin, cout), lambda i: (0, 0)),
                pl.BlockSpec((1, cout), lambda i: (0, 0)),
            ],
            out_specs=pl.BlockSpec((tm, cout), lambda i: (i, 0)),
        ),
        compiler_params=pltpu.CompilerParams(
            dimension_semantics=("parallel",)),
    )(x.reshape(m, cin).astype(jnp.bfloat16),
      w.astype(jnp.bfloat16),
      b.reshape(1, cout).astype(jnp.float32))
    return out.reshape(n, h, wd, cout)


def ef_attention(x, w, b):
    # TODO(synk): EFAttention source not provided; implemented as global-avg-
    # pool channel gating x * sigmoid(mean(x)*w + b) inside a Pallas kernel.
    n, h, wd, c = x.shape
    hw = h * wd
    out = pl.pallas_call(
        _efatt_kernel,
        out_shape=jax.ShapeDtypeStruct((n, hw, c), jnp.bfloat16),
        grid_spec=pltpu.PrefetchScalarGridSpec(
            num_scalar_prefetch=0,
            grid=(n,),
            in_specs=[
                pl.BlockSpec((1, hw, c), lambda i: (i, 0, 0)),
                pl.BlockSpec((1, 1, c), lambda i: (0, 0, 0)),
                pl.BlockSpec((1, 1, c), lambda i: (0, 0, 0)),
            ],
            out_specs=pl.BlockSpec((1, hw, c), lambda i: (i, 0, 0)),
        ),
        compiler_params=pltpu.CompilerParams(dimension_semantics=("parallel",)),
    )(x.reshape(n, hw, c).astype(jnp.bfloat16),
      w.reshape(1, 1, c).astype(jnp.float32),
      b.reshape(1, 1, c).astype(jnp.float32))
    return out.reshape(n, h, wd, c)


# ----------------------------------------------------------------------------
# Plain-JAX glue (resize / pool) and parameter setup
# ----------------------------------------------------------------------------
def up2(x):
    # nn.Upsample(scale_factor=2, mode='bilinear', align_corners=False)
    n, h, w, c = x.shape
    return jax.image.resize(x, (n, 2 * h, 2 * w, c), method="bilinear")


def avg_pool2(x):
    n, h, w, c = x.shape
    return x.reshape(n, h // 2, 2, w // 2, 2, c).mean(axis=(2, 4))


def _init_conv_bn(key, cin, cout):
    w = 0.1 * jax.random.normal(key, (cin, cout), jnp.float32)
    # eval-mode BN (gamma=1, beta=0, mean=0, var=1) folded into weight / bias:
    bn_scale = 1.0 / jnp.sqrt(1.0 + _BN_EPS)
    w_folded = (w * bn_scale).astype(jnp.bfloat16)
    bias = jnp.zeros((cout,), jnp.float32)
    return w_folded, bias


def _init_dec(key, clo, chi, cout):
    w, b = _init_conv_bn(key, clo + chi, cout)
    return w[:clo], w[clo:], b          # K-split for the concat-free kernel


def init_params(key):
    params = {}
    k = key

    def nk():
        nonlocal k
        k, sub = jax.random.split(k)
        return sub

    enc_chans = [8, 32, 64, 96, 128, 160]   # input padded 3 -> 8 channels
    for i in range(5):
        params[f"enc{i + 1}"] = _init_conv_bn(nk(), enc_chans[i], enc_chans[i + 1])

    for i, c in enumerate([32, 64, 96, 128, 160], 1):
        params[f"att{i}_w"] = 1.0 + 0.05 * jax.random.normal(nk(), (c,), jnp.float32)
        params[f"att{i}_b"] = jnp.zeros((c,), jnp.float32)

    dec_specs = [(128, 160, 128), (96, 128, 96), (64, 96, 64), (32, 64, 32)]
    for i, (lo, hi, out) in enumerate(dec_specs, 1):
        params[f"dec{i}"] = _init_dec(nk(), lo, hi, out)

    for i, cin in enumerate([128, 96, 64, 32], 1):
        params[f"wblk{i}"] = _init_conv_bn(nk(), cin, 32)

    params["out_a"] = _init_conv_bn(nk(), 32, 32)
    params["out_b"] = _init_conv_bn(nk(), 32, 2)
    return params


def lanet_forward(params, x_nchw):
    x = jnp.transpose(x_nchw, (0, 2, 3, 1)).astype(jnp.bfloat16)  # NCHW -> NHWC
    # Pad RGB (Cin=3) to 8 channels so the first matmul's K dim is aligned.
    x = jnp.pad(x, ((0, 0), (0, 0), (0, 0), (0, 8 - x.shape[-1])))

    # TODO(synk): mobile_vit_small internals (3x3 convs, MV2 blocks, transformer
    # mixing) are not in the provided source; replaced by a deterministic
    # avg-pool-stride-2 + 1x1-conv pyramid producing (32,64,96,128,160)-channel
    # feature maps at /2,/4,/8,/16,/32 resolution, as the decoder expects.
    feats = []
    h = x
    for i in range(5):
        h = avg_pool2(h)
        w, b = params[f"enc{i + 1}"]
        h = conv1x1(h, w, b, act="relu")
        feats.append(h)
    enc_1, enc_2, enc_3, enc_4, enc_5 = feats

    enc_1 = ef_attention(enc_1, params["att1_w"], params["att1_b"])
    enc_2 = ef_attention(enc_2, params["att2_w"], params["att2_b"])
    enc_3 = ef_attention(enc_3, params["att3_w"], params["att3_b"])
    enc_4 = ef_attention(enc_4, params["att4_w"], params["att4_b"])
    enc_5 = ef_attention(enc_5, params["att5_w"], params["att5_b"])

    dec_1 = decoding_block(params["dec1"], enc_4, enc_5)
    dec_2 = decoding_block(params["dec2"], enc_3, dec_1)
    dec_3 = decoding_block(params["dec3"], enc_2, dec_2)
    dec_4 = decoding_block(params["dec4"], enc_1, dec_3)

    # TODO(synk): WeightedBlock source not provided; implemented as a 1x1 conv
    # + BN + ReLU projection to 32 channels; the residual adds are fused into
    # the conv epilogues (no standalone elementwise kernels).
    weight_1 = up2(conv1x1(dec_1, *params["wblk1"], act="relu"))
    weight_2 = up2(conv1x1_relu_add(dec_2, *params["wblk2"], res=weight_1))
    weight_3 = up2(conv1x1_relu_add(dec_3, *params["wblk3"], res=weight_2))
    weight_4 = conv1x1_relu_add(dec_4, *params["wblk4"], res=weight_3)

    # output_conv: Conv1x1 -> BN -> ReLU -> Upsample x2 -> Conv1x1 -> BN -> Softmax(ch)
    y = conv1x1(weight_4, *params["out_a"], act="relu")
    y = up2(y)
    pred = conv1x1_softmax2(y, *params["out_b"])
    return jnp.transpose(pred, (0, 3, 1, 2))  # back to NCHW: (N, 2, H, W)


if __name__ == "__main__":
    key = jax.random.PRNGKey(0)
    pkey, xkey = jax.random.split(key)
    params = init_params(pkey)
    x = jax.random.normal(xkey, (2, 3, 32, 32), jnp.float32)  # NCHW like PyTorch

    pred = jax.jit(lanet_forward)(params, x)
    pred = jax.block_until_ready(pred)

    assert pred.shape == (2, 2, 32, 32), pred.shape
    # softmax over dim=1 must sum to 1
    assert jnp.allclose(jnp.sum(pred, axis=1), 1.0, atol=1e-4)
    print("KERNEL_OK")
</pallas_src>

<mosaic_0001>
module attributes {stable_mosaic.version = 11 : i64} {
  func.func @_mm_bias_act_kernel(%arg0: i32, %arg1: memref<256x8xbf16, #tpu.memory_space<vmem>>, %arg2: memref<8x32xbf16, #tpu.memory_space<vmem>>, %arg3: memref<1x32xf32, #tpu.memory_space<vmem>>, %arg4: memref<256x32xbf16, #tpu.memory_space<vmem>>) attributes {dimension_semantics = [#tpu.dimension_semantics<parallel>], iteration_bounds = array<i64: 2>, scalar_prefetch = 0 : i64, scratch_operands = 0 : i64, tpu.core_type = #tpu.core_type<tc>, window_params = [{transform_indices = @transform_0, window_bounds = array<i64: 256, 8>}, {pipeline_mode = #tpu.pipeline_mode<synchronous>, transform_indices = @transform_1, window_bounds = array<i64: 8, 32>}, {pipeline_mode = #tpu.pipeline_mode<synchronous>, transform_indices = @transform_2, window_bounds = array<i64: 1, 32>}, {transform_indices = @transform_3, window_bounds = array<i64: 256, 32>}]} {
    %c0 = arith.constant 0 : index
    %c0_0 = arith.constant 0 : index
    %0 = vector.load %arg1[%c0, %c0_0] : memref<256x8xbf16, #tpu.memory_space<vmem>>, vector<256x8xbf16>
    %c0_1 = arith.constant 0 : index
    %c0_2 = arith.constant 0 : index
    %1 = vector.load %arg2[%c0_1, %c0_2] : memref<8x32xbf16, #tpu.memory_space<vmem>>, vector<8x32xbf16>
    %cst = arith.constant dense<0.000000e+00> : vector<256x32xf32>
    %2 = tpu.matmul %0, %1, %cst {dimension_numbers = #tpu.dot_dimension_numbers<[1], [0], [0], [1], [0, 0, 1, 1], [], []>} : vector<256x8xbf16>, vector<8x32xbf16>, vector<256x32xf32> -> vector<256x32xf32>
    %c0_3 = arith.constant 0 : index
    %c0_4 = arith.constant 0 : index
    %3 = vector.load %arg3[%c0_3, %c0_4] : memref<1x32xf32, #tpu.memory_space<vmem>>, vector<1x32xf32>
    %4 = vector.broadcast %3 : vector<1x32xf32> to vector<256x32xf32>
    %5 = arith.addf %2, %4 : vector<256x32xf32>
    %cst_5 = arith.constant 0.000000e+00 : f32
    %6 = vector.broadcast %cst_5 : f32 to vector<256x32xf32>
    %7 = arith.maximumf %5, %6 : vector<256x32xf32>
    %8 = arith.truncf %7 : vector<256x32xf32> to vector<256x32xbf16>
    %c0_6 = arith.constant 0 : index
    %c0_7 = arith.constant 0 : index
    %9 = vector.load %arg4[%c0_6, %c0_7] : memref<256x32xbf16, #tpu.memory_space<vmem>>, vector<256x32xbf16>
    tpu.vector_store %arg4[%c0_6, %c0_7], %8 {strides = array<i32>} : memref<256x32xbf16, #tpu.memory_space<vmem>>, vector<256x32xbf16>,
    return
  }
  func.func @transform_0(%arg0: i32) -> (i32, i32) {
    %c0_i32 = arith.constant 0 : i32
    %c0_i32_0 = arith.constant 0 : i32
    return %arg0, %c0_i32 : i32, i32
  }
  func.func @transform_1(%arg0: i32) -> (i32, i32) {
    %c0_i32 = arith.constant 0 : i32
    %c0_i32_0 = arith.constant 0 : i32
    %c0_i32_1 = arith.constant 0 : i32
    return %c0_i32, %c0_i32_0 : i32, i32
  }
  func.func @transform_2(%arg0: i32) -> (i32, i32) {
    %c0_i32 = arith.constant 0 : i32
    %c0_i32_0 = arith.constant 0 : i32
    %c0_i32_1 = arith.constant 0 : i32
    return %c0_i32, %c0_i32_0 : i32, i32
  }
  func.func @transform_3(%arg0: i32) -> (i32, i32) {
    %c0_i32 = arith.constant 0 : i32
    %c0_i32_0 = arith.constant 0 : i32
    return %arg0, %c0_i32 : i32, i32
  }
}

module attributes {stable_mosaic.version = 11 : i64} {
  func.func @_efatt_kernel(%arg0: i32, %arg1: memref<1x256x32xbf16, #tpu.memory_space<vmem>>, %arg2: memref<1x1x32xf32, #tpu.memory_space<vmem>>, %arg3: memref<1x1x32xf32, #tpu.memory_space<vmem>>, %arg4: memref<1x256x32xbf16, #tpu.memory_space<vmem>>) attributes {dimension_semantics = [#tpu.dimension_semantics<parallel>], iteration_bounds = array<i64: 2>, scalar_prefetch = 0 : i64, scratch_operands = 0 : i64, tpu.core_type = #tpu.core_type<tc>, window_params = [{transform_indices = @transform_0, window_bounds = array<i64: 1, 256, 32>}, {pipeline_mode = #tpu.pipeline_mode<synchronous>, transform_indices = @transform_1, window_bounds = array<i64: 1, 1, 32>}, {pipeline_mode = #tpu.pipeline_mode<synchronous>, transform_indices = @transform_2, window_bounds = array<i64: 1, 1, 32>}, {transform_indices = @transform_3, window_bounds = array<i64: 1, 256, 32>}]} {
    %c0 = arith.constant 0 : index
    %c0_0 = arith.constant 0 : index
    %c0_1 = arith.constant 0 : index
    %0 = vector.load %arg1[%c0, %c0_0, %c0_1] : memref<1x256x32xbf16, #tpu.memory_space<vmem>>, vector<1x256x32xbf16>
    %1 = arith.extf %0 : vector<1x256x32xbf16> to vector<1x256x32xf32>
    %cst = arith.constant dense<0.000000e+00> : vector<1x32xf32>
    %2 = vector.multi_reduction <add>, %1, %cst [1] : vector<1x256x32xf32> to vector<1x32xf32>
    %3 = vector.shape_cast %2 : vector<1x32xf32> to vector<1x1x32xf32>
    %cst_2 = arith.constant 2.560000e+02 : f32
    %4 = vector.broadcast %cst_2 : f32 to vector<1x1x32xf32>
    %5 = arith.divf %3, %4 : vector<1x1x32xf32>
    %c0_3 = arith.constant 0 : index
    %c0_4 = arith.constant 0 : index
    %c0_5 = arith.constant 0 : index
    %6 = vector.load %arg2[%c0_3, %c0_4, %c0_5] : memref<1x1x32xf32, #tpu.memory_space<vmem>>, vector<1x1x32xf32>
    %7 = arith.mulf %5, %6 : vector<1x1x32xf32>
    %c0_6 = arith.constant 0 : index
    %c0_7 = arith.constant 0 : index
    %c0_8 = arith.constant 0 : index
    %8 = vector.load %arg3[%c0_6, %c0_7, %c0_8] : memref<1x1x32xf32, #tpu.memory_space<vmem>>, vector<1x1x32xf32>
    %9 = arith.addf %7, %8 : vector<1x1x32xf32>
    %10 = arith.negf %9 : vector<1x1x32xf32>
    %11 = math.exp %10 : vector<1x1x32xf32>
    %cst_9 = arith.constant 1.000000e+00 : f32
    %12 = vector.broadcast %cst_9 : f32 to vector<1x1x32xf32>
    %13 = arith.addf %12, %11 : vector<1x1x32xf32>
    %14 = arith.divf %12, %13 : vector<1x1x32xf32>
    %15 = vector.broadcast %14 : vector<1x1x32xf32> to vector<1x256x32xf32>
    %16 = arith.mulf %1, %15 : vector<1x256x32xf32>
    %17 = arith.truncf %16 : vector<1x256x32xf32> to vector<1x256x32xbf16>
    %c0_10 = arith.constant 0 : index
    %c0_11 = arith.constant 0 : index
    %c0_12 = arith.constant 0 : index
    %18 = vector.load %arg4[%c0_10, %c0_11, %c0_12] : memref<1x256x32xbf16, #tpu.memory_space<vmem>>, vector<1x256x32xbf16>
    tpu.vector_store %arg4[%c0_10, %c0_11, %c0_12], %17 {strides = array<i32>} : memref<1x256x32xbf16, #tpu.memory_space<vmem>>, vector<1x256x32xbf16>,
    return
  }
  func.func @transform_0(%arg0: i32) -> (i32, i32, i32) {
    %c0_i32 = arith.constant 0 : i32
    %c0_i32_0 = arith.constant 0 : i32
    %c0_i32_1 = arith.constant 0 : i32
    return %arg0, %c0_i32, %c0_i32_0 : i32, i32, i32
  }
  func.func @transform_1(%arg0: i32) -> (i32, i32, i32) {
    %c0_i32 = arith.constant 0 : i32
    %c0_i32_0 = arith.constant 0 : i32
    %c0_i32_1 = arith.constant 0 : i32
    %c0_i32_2 = arith.constant 0 : i32
    return %c0_i32, %c0_i32_0, %c0_i32_1 : i32, i32, i32
  }
  func.func @transform_2(%arg0: i32) -> (i32, i32, i32) {
    %c0_i32 = arith.constant 0 : i32
    %c0_i32_0 = arith.constant 0 : i32
    %c0_i32_1 = arith.constant 0 : i32
    %c0_i32_2 = arith.constant 0 : i32
    return %c0_i32, %c0_i32_0, %c0_i32_1 : i32, i32, i32
  }
  func.func @transform_3(%arg0: i32) -> (i32, i32, i32) {
    %c0_i32 = arith.constant 0 : i32
    %c0_i32_0 = arith.constant 0 : i32
    %c0_i32_1 = arith.constant 0 : i32
    return %arg0, %c0_i32, %c0_i32_0 : i32, i32, i32
  }
}

module attributes {stable_mosaic.version = 11 : i64} {
  func.func @_mm_bias_act_kernel(%arg0: i32, %arg1: memref<128x32xbf16, #tpu.memory_space<vmem>>, %arg2: memref<32x64xbf16, #tpu.memory_space<vmem>>, %arg3: memref<1x64xf32, #tpu.memory_space<vmem>>, %arg4: memref<128x64xbf16, #tpu.memory_space<vmem>>) attributes {dimension_semantics = [#tpu.dimension_semantics<parallel>], iteration_bounds = array<i64: 1>, scalar_prefetch = 0 : i64, scratch_operands = 0 : i64, tpu.core_type = #tpu.core_type<tc>, window_params = [{transform_indices = @transform_0, window_bounds = array<i64: 128, 32>}, {pipeline_mode = #tpu.pipeline_mode<synchronous>, transform_indices = @transform_1, window_bounds = array<i64: 32, 64>}, {pipeline_mode = #tpu.pipeline_mode<synchronous>, transform_indices = @transform_2, window_bounds = array<i64: 1, 64>}, {transform_indices = @transform_3, window_bounds = array<i64: 128, 64>}]} {
    %c0 = arith.constant 0 : index
    %c0_0 = arith.constant 0 : index
    %0 = vector.load %arg1[%c0, %c0_0] : memref<128x32xbf16, #tpu.memory_space<vmem>>, vector<128x32xbf16>
    %c0_1 = arith.constant 0 : index
    %c0_2 = arith.constant 0 : index
    %1 = vector.load %arg2[%c0_1, %c0_2] : memref<32x64xbf16, #tpu.memory_space<vmem>>, vector<32x64xbf16>
    %cst = arith.constant dense<0.000000e+00> : vector<128x64xf32>
    %2 = tpu.matmul %0, %1, %cst {dimension_numbers = #tpu.dot_dimension_numbers<[1], [0], [0], [1], [0, 0, 1, 1], [], []>} : vector<128x32xbf16>, vector<32x64xbf16>, vector<128x64xf32> -> vector<128x64xf32>
    %c0_3 = arith.constant 0 : index
    %c0_4 = arith.constant 0 : index
    %3 = vector.load %arg3[%c0_3, %c0_4] : memref<1x64xf32, #tpu.memory_space<vmem>>, vector<1x64xf32>
    %4 = vector.broadcast %3 : vector<1x64xf32> to vector<128x64xf32>
    %5 = arith.addf %2, %4 : vector<128x64xf32>
    %cst_5 = arith.constant 0.000000e+00 : f32
    %6 = vector.broadcast %cst_5 : f32 to vector<128x64xf32>
    %7 = arith.maximumf %5, %6 : vector<128x64xf32>
    %8 = arith.truncf %7 : vector<128x64xf32> to vector<128x64xbf16>
    %c0_6 = arith.constant 0 : index
    %c0_7 = arith.constant 0 : index
    %9 = vector.load %arg4[%c0_6, %c0_7] : memref<128x64xbf16, #tpu.memory_space<vmem>>, vector<128x64xbf16>
    tpu.vector_store %arg4[%c0_6, %c0_7], %8 {strides = array<i32>} : memref<128x64xbf16, #tpu.memory_space<vmem>>, vector<128x64xbf16>,
    return
  }
  func.func @transform_0(%arg0: i32) -> (i32, i32) {
    %c0_i32 = arith.constant 0 : i32
    %c0_i32_0 = arith.constant 0 : i32
    return %arg0, %c0_i32 : i32, i32
  }
  func.func @transform_1(%arg0: i32) -> (i32, i32) {
    %c0_i32 = arith.constant 0 : i32
    %c0_i32_0 = arith.constant 0 : i32
    %c0_i32_1 = arith.constant 0 : i32
    return %c0_i32, %c0_i32_0 : i32, i32
  }
  func.func @transform_2(%arg0: i32) -> (i32, i32) {
    %c0_i32 = arith.constant 0 : i32
    %c0_i32_0 = arith.constant 0 : i32
    %c0_i32_1 = arith.constant 0 : i32
    return %c0_i32, %c0_i32_0 : i32, i32
  }
  func.func @transform_3(%arg0: i32) -> (i32, i32) {
    %c0_i32 = arith.constant 0 : i32
    %c0_i32_0 = arith.constant 0 : i32
    return %arg0, %c0_i32 : i32, i32
  }
}

module attributes {stable_mosaic.version = 11 : i64} {
  func.func @_efatt_kernel(%arg0: i32, %arg1: memref<1x64x64xbf16, #tpu.memory_space<vmem>>, %arg2: memref<1x1x64xf32, #tpu.memory_space<vmem>>, %arg3: memref<1x1x64xf32, #tpu.memory_space<vmem>>, %arg4: memref<1x64x64xbf16, #tpu.memory_space<vmem>>) attributes {dimension_semantics = [#tpu.dimension_semantics<parallel>], iteration_bounds = array<i64: 2>, scalar_prefetch = 0 : i64, scratch_operands = 0 : i64, tpu.core_type = #tpu.core_type<tc>, window_params = [{transform_indices = @transform_0, window_bounds = array<i64: 1, 64, 64>}, {pipeline_mode = #tpu.pipeline_mode<synchronous>, transform_indices = @transform_1, window_bounds = array<i64: 1, 1, 64>}, {pipeline_mode = #tpu.pipeline_mode<synchronous>, transform_indices = @transform_2, window_bounds = array<i64: 1, 1, 64>}, {transform_indices = @transform_3, window_bounds = array<i64: 1, 64, 64>}]} {
    %c0 = arith.constant 0 : index
    %c0_0 = arith.constant 0 : index
    %c0_1 = arith.constant 0 : index
    %0 = vector.load %arg1[%c0, %c0_0, %c0_1] : memref<1x64x64xbf16, #tpu.memory_space<vmem>>, vector<1x64x64xbf16>
    %1 = arith.extf %0 : vector<1x64x64xbf16> to vector<1x64x64xf32>
    %cst = arith.constant dense<0.000000e+00> : vector<1x64xf32>
    %2 = vector.multi_reduction <add>, %1, %cst [1] : vector<1x64x64xf32> to vector<1x64xf32>
    %3 = vector.shape_cast %2 : vector<1x64xf32> to vector<1x1x64xf32>
    %cst_2 = arith.constant 6.400000e+01 : f32
    %4 = vector.broadcast %cst_2 : f32 to vector<1x1x64xf32>
    %5 = arith.divf %3, %4 : vector<1x1x64xf32>
    %c0_3 = arith.constant 0 : index
    %c0_4 = arith.constant 0 : index
    %c0_5 = arith.constant 0 : index
    %6 = vector.load %arg2[%c0_3, %c0_4, %c0_5] : memref<1x1x64xf32, #tpu.memory_space<vmem>>, vector<1x1x64xf32>
    %7 = arith.mulf %5, %6 : vector<1x1x64xf32>
    %c0_6 = arith.constant 0 : index
    %c0_7 = arith.constant 0 : index
    %c0_8 = arith.constant 0 : index
    %8 = vector.load %arg3[%c0_6, %c0_7, %c0_8] : memref<1x1x64xf32, #tpu.memory_space<vmem>>, vector<1x1x64xf32>
    %9 = arith.addf %7, %8 : vector<1x1x64xf32>
    %10 = arith.negf %9 : vector<1x1x64xf32>
    %11 = math.exp %10 : vector<1x1x64xf32>
    %cst_9 = arith.constant 1.000000e+00 : f32
    %12 = vector.broadcast %cst_9 : f32 to vector<1x1x64xf32>
    %13 = arith.addf %12, %11 : vector<1x1x64xf32>
    %14 = arith.divf %12, %13 : vector<1x1x64xf32>
    %15 = vector.broadcast %14 : vector<1x1x64xf32> to vector<1x64x64xf32>
    %16 = arith.mulf %1, %15 : vector<1x64x64xf32>
    %17 = arith.truncf %16 : vector<1x64x64xf32> to vector<1x64x64xbf16>
    %c0_10 = arith.constant 0 : index
    %c0_11 = arith.constant 0 : index
    %c0_12 = arith.constant 0 : index
    %18 = vector.load %arg4[%c0_10, %c0_11, %c0_12] : memref<1x64x64xbf16, #tpu.memory_space<vmem>>, vector<1x64x64xbf16>
    tpu.vector_store %arg4[%c0_10, %c0_11, %c0_12], %17 {strides = array<i32>} : memref<1x64x64xbf16, #tpu.memory_space<vmem>>, vector<1x64x64xbf16>,
    return
  }
  func.func @transform_0(%arg0: i32) -> (i32, i32, i32) {
    %c0_i32 = arith.constant 0 : i32
    %c0_i32_0 = arith.constant 0 : i32
    %c0_i32_1 = arith.constant 0 : i32
    return %arg0, %c0_i32, %c0_i32_0 : i32, i32, i32
  }
  func.func @transform_1(%arg0: i32) -> (i32, i32, i32) {
    %c0_i32 = arith.constant 0 : i32
    %c0_i32_0 = arith.constant 0 : i32
    %c0_i32_1 = arith.constant 0 : i32
    %c0_i32_2 = arith.constant 0 : i32
    return %c0_i32, %c0_i32_0, %c0_i32_1 : i32, i32, i32
  }
  func.func @transform_2(%arg0: i32) -> (i32, i32, i32) {
    %c0_i32 = arith.constant 0 : i32
    %c0_i32_0 = arith.constant 0 : i32
    %c0_i32_1 = arith.constant 0 : i32
    %c0_i32_2 = arith.constant 0 : i32
    return %c0_i32, %c0_i32_0, %c0_i32_1 : i32, i32, i32
  }
  func.func @transform_3(%arg0: i32) -> (i32, i32, i32) {
    %c0_i32 = arith.constant 0 : i32
    %c0_i32_0 = arith.constant 0 : i32
    %c0_i32_1 = arith.constant 0 : i32
    return %arg0, %c0_i32, %c0_i32_0 : i32, i32, i32
  }
}

module attributes {stable_mosaic.version = 11 : i64} {
  func.func @_mm_bias_act_kernel(%arg0: i32, %arg1: memref<32x64xbf16, #tpu.memory_space<vmem>>, %arg2: memref<64x96xbf16, #tpu.memory_space<vmem>>, %arg3: memref<1x96xf32, #tpu.memory_space<vmem>>, %arg4: memref<32x96xbf16, #tpu.memory_space<vmem>>) attributes {dimension_semantics = [#tpu.dimension_semantics<parallel>], iteration_bounds = array<i64: 1>, scalar_prefetch = 0 : i64, scratch_operands = 0 : i64, tpu.core_type = #tpu.core_type<tc>, window_params = [{transform_indices = @transform_0, window_bounds = array<i64: 32, 64>}, {pipeline_mode = #tpu.pipeline_mode<synchronous>, transform_indices = @transform_1, window_bounds = array<i64: 64, 96>}, {pipeline_mode = #tpu.pipeline_mode<synchronous>, transform_indices = @transform_2, window_bounds = array<i64: 1, 96>}, {transform_indices = @transform_3, window_bounds = array<i64: 32, 96>}]} {
    %c0 = arith.constant 0 : index
    %c0_0 = arith.constant 0 : index
    %0 = vector.load %arg1[%c0, %c0_0] : memref<32x64xbf16, #tpu.memory_space<vmem>>, vector<32x64xbf16>
    %c0_1 = arith.constant 0 : index
    %c0_2 = arith.constant 0 : index
    %1 = vector.load %arg2[%c0_1, %c0_2] : memref<64x96xbf16, #tpu.memory_space<vmem>>, vector<64x96xbf16>
    %cst = arith.constant dense<0.000000e+00> : vector<32x96xf32>
    %2 = tpu.matmul %0, %1, %cst {dimension_numbers = #tpu.dot_dimension_numbers<[1], [0], [0], [1], [0, 0, 1, 1], [], []>} : vector<32x64xbf16>, vector<64x96xbf16>, vector<32x96xf32> -> vector<32x96xf32>
    %c0_3 = arith.constant 0 : index
    %c0_4 = arith.constant 0 : index
    %3 = vector.load %arg3[%c0_3, %c0_4] : memref<1x96xf32, #tpu.memory_space<vmem>>, vector<1x96xf32>
    %4 = vector.broadcast %3 : vector<1x96xf32> to vector<32x96xf32>
    %5 = arith.addf %2, %4 : vector<32x96xf32>
    %cst_5 = arith.constant 0.000000e+00 : f32
    %6 = vector.broadcast %cst_5 : f32 to vector<32x96xf32>
    %7 = arith.maximumf %5, %6 : vector<32x96xf32>
    %8 = arith.truncf %7 : vector<32x96xf32> to vector<32x96xbf16>
    %c0_6 = arith.constant 0 : index
    %c0_7 = arith.constant 0 : index
    %9 = vector.load %arg4[%c0_6, %c0_7] : memref<32x96xbf16, #tpu.memory_space<vmem>>, vector<32x96xbf16>
    tpu.vector_store %arg4[%c0_6, %c0_7], %8 {strides = array<i32>} : memref<32x96xbf16, #tpu.memory_space<vmem>>, vector<32x96xbf16>,
    return
  }
  func.func @transform_0(%arg0: i32) -> (i32, i32) {
    %c0_i32 = arith.constant 0 : i32
    %c0_i32_0 = arith.constant 0 : i32
    return %arg0, %c0_i32 : i32, i32
  }
  func.func @transform_1(%arg0: i32) -> (i32, i32) {
    %c0_i32 = arith.constant 0 : i32
    %c0_i32_0 = arith.constant 0 : i32
    %c0_i32_1 = arith.constant 0 : i32
    return %c0_i32, %c0_i32_0 : i32, i32
  }
  func.func @transform_2(%arg0: i32) -> (i32, i32) {
    %c0_i32 = arith.constant 0 : i32
    %c0_i32_0 = arith.constant 0 : i32
    %c0_i32_1 = arith.constant 0 : i32
    return %c0_i32, %c0_i32_0 : i32, i32
  }
  func.func @transform_3(%arg0: i32) -> (i32, i32) {
    %c0_i32 = arith.constant 0 : i32
    %c0_i32_0 = arith.constant 0 : i32
    return %arg0, %c0_i32 : i32, i32
  }
}

module attributes {stable_mosaic.version = 11 : i64} {
  func.func @_efatt_kernel(%arg0: i32, %arg1: memref<1x16x96xbf16, #tpu.memory_space<vmem>>, %arg2: memref<1x1x96xf32, #tpu.memory_space<vmem>>, %arg3: memref<1x1x96xf32, #tpu.memory_space<vmem>>, %arg4: memref<1x16x96xbf16, #tpu.memory_space<vmem>>) attributes {dimension_semantics = [#tpu.dimension_semantics<parallel>], iteration_bounds = array<i64: 2>, scalar_prefetch = 0 : i64, scratch_operands = 0 : i64, tpu.core_type = #tpu.core_type<tc>, window_params = [{transform_indices = @transform_0, window_bounds = array<i64: 1, 16, 96>}, {pipeline_mode = #tpu.pipeline_mode<synchronous>, transform_indices = @transform_1, window_bounds = array<i64: 1, 1, 96>}, {pipeline_mode = #tpu.pipeline_mode<synchronous>, transform_indices = @transform_2, window_bounds = array<i64: 1, 1, 96>}, {transform_indices = @transform_3, window_bounds = array<i64: 1, 16, 96>}]} {
    %c0 = arith.constant 0 : index
    %c0_0 = arith.constant 0 : index
    %c0_1 = arith.constant 0 : index
    %0 = vector.load %arg1[%c0, %c0_0, %c0_1] : memref<1x16x96xbf16, #tpu.memory_space<vmem>>, vector<1x16x96xbf16>
    %1 = arith.extf %0 : vector<1x16x96xbf16> to vector<1x16x96xf32>
    %cst = arith.constant dense<0.000000e+00> : vector<1x96xf32>
    %2 = vector.multi_reduction <add>, %1, %cst [1] : vector<1x16x96xf32> to vector<1x96xf32>
    %3 = vector.shape_cast %2 : vector<1x96xf32> to vector<1x1x96xf32>
    %cst_2 = arith.constant 1.600000e+01 : f32
    %4 = vector.broadcast %cst_2 : f32 to vector<1x1x96xf32>
    %5 = arith.divf %3, %4 : vector<1x1x96xf32>
    %c0_3 = arith.constant 0 : index
    %c0_4 = arith.constant 0 : index
    %c0_5 = arith.constant 0 : index
    %6 = vector.load %arg2[%c0_3, %c0_4, %c0_5] : memref<1x1x96xf32, #tpu.memory_space<vmem>>, vector<1x1x96xf32>
    %7 = arith.mulf %5, %6 : vector<1x1x96xf32>
    %c0_6 = arith.constant 0 : index
    %c0_7 = arith.constant 0 : index
    %c0_8 = arith.constant 0 : index
    %8 = vector.load %arg3[%c0_6, %c0_7, %c0_8] : memref<1x1x96xf32, #tpu.memory_space<vmem>>, vector<1x1x96xf32>
    %9 = arith.addf %7, %8 : vector<1x1x96xf32>
    %10 = arith.negf %9 : vector<1x1x96xf32>
    %11 = math.exp %10 : vector<1x1x96xf32>
    %cst_9 = arith.constant 1.000000e+00 : f32
    %12 = vector.broadcast %cst_9 : f32 to vector<1x1x96xf32>
    %13 = arith.addf %12, %11 : vector<1x1x96xf32>
    %14 = arith.divf %12, %13 : vector<1x1x96xf32>
    %15 = vector.broadcast %14 : vector<1x1x96xf32> to vector<1x16x96xf32>
    %16 = arith.mulf %1, %15 : vector<1x16x96xf32>
    %17 = arith.truncf %16 : vector<1x16x96xf32> to vector<1x16x96xbf16>
    %c0_10 = arith.constant 0 : index
    %c0_11 = arith.constant 0 : index
    %c0_12 = arith.constant 0 : index
    %18 = vector.load %arg4[%c0_10, %c0_11, %c0_12] : memref<1x16x96xbf16, #tpu.memory_space<vmem>>, vector<1x16x96xbf16>
    tpu.vector_store %arg4[%c0_10, %c0_11, %c0_12], %17 {strides = array<i32>} : memref<1x16x96xbf16, #tpu.memory_space<vmem>>, vector<1x16x96xbf16>,
    return
  }
  func.func @transform_0(%arg0: i32) -> (i32, i32, i32) {
    %c0_i32 = arith.constant 0 : i32
    %c0_i32_0 = arith.constant 0 : i32
    %c0_i32_1 = arith.constant 0 : i32
    return %arg0, %c0_i32, %c0_i32_0 : i32, i32, i32
  }
  func.func @transform_1(%arg0: i32) -> (i32, i32, i32) {
    %c0_i32 = arith.constant 0 : i32
    %c0_i32_0 = arith.constant 0 : i32
    %c0_i32_1 = arith.constant 0 : i32
    %c0_i32_2 = arith.constant 0 : i32
    return %c0_i32, %c0_i32_0, %c0_i32_1 : i32, i32, i32
  }
  func.func @transform_2(%arg0: i32) -> (i32, i32, i32) {
    %c0_i32 = arith.constant 0 : i32
    %c0_i32_0 = arith.constant 0 : i32
    %c0_i32_1 = arith.constant 0 : i32
    %c0_i32_2 = arith.constant 0 : i32
    return %c0_i32, %c0_i32_0, %c0_i32_1 : i32, i32, i32
  }
  func.func @transform_3(%arg0: i32) -> (i32, i32, i32) {
    %c0_i32 = arith.constant 0 : i32
    %c0_i32_0 = arith.constant 0 : i32
    %c0_i32_1 = arith.constant 0 : i32
    return %arg0, %c0_i32, %c0_i32_0 : i32, i32, i32
  }
}

module attributes {stable_mosaic.version = 11 : i64} {
  func.func @_efatt_kernel(%arg0: i32, %arg1: memref<1x4x128xbf16, #tpu.memory_space<vmem>>, %arg2: memref<1x1x128xf32, #tpu.memory_space<vmem>>, %arg3: memref<1x1x128xf32, #tpu.memory_space<vmem>>, %arg4: memref<1x4x128xbf16, #tpu.memory_space<vmem>>) attributes {dimension_semantics = [#tpu.dimension_semantics<parallel>], iteration_bounds = array<i64: 2>, scalar_prefetch = 0 : i64, scratch_operands = 0 : i64, tpu.core_type = #tpu.core_type<tc>, window_params = [{transform_indices = @transform_0, window_bounds = array<i64: 1, 4, 128>}, {pipeline_mode = #tpu.pipeline_mode<synchronous>, transform_indices = @transform_1, window_bounds = array<i64: 1, 1, 128>}, {pipeline_mode = #tpu.pipeline_mode<synchronous>, transform_indices = @transform_2, window_bounds = array<i64: 1, 1, 128>}, {transform_indices = @transform_3, window_bounds = array<i64: 1, 4, 128>}]} {
    %c0 = arith.constant 0 : index
    %c0_0 = arith.constant 0 : index
    %c0_1 = arith.constant 0 : index
    %0 = vector.load %arg1[%c0, %c0_0, %c0_1] : memref<1x4x128xbf16, #tpu.memory_space<vmem>>, vector<1x4x128xbf16>
    %1 = arith.extf %0 : vector<1x4x128xbf16> to vector<1x4x128xf32>
    %cst = arith.constant dense<0.000000e+00> : vector<1x128xf32>
    %2 = vector.multi_reduction <add>, %1, %cst [1] : vector<1x4x128xf32> to vector<1x128xf32>
    %3 = vector.shape_cast %2 : vector<1x128xf32> to vector<1x1x128xf32>
    %cst_2 = arith.constant 4.000000e+00 : f32
    %4 = vector.broadcast %cst_2 : f32 to vector<1x1x128xf32>
    %5 = arith.divf %3, %4 : vector<1x1x128xf32>
    %c0_3 = arith.constant 0 : index
    %c0_4 = arith.constant 0 : index
    %c0_5 = arith.constant 0 : index
    %6 = vector.load %arg2[%c0_3, %c0_4, %c0_5] : memref<1x1x128xf32, #tpu.memory_space<vmem>>, vector<1x1x128xf32>
    %7 = arith.mulf %5, %6 : vector<1x1x128xf32>
    %c0_6 = arith.constant 0 : index
    %c0_7 = arith.constant 0 : index
    %c0_8 = arith.constant 0 : index
    %8 = vector.load %arg3[%c0_6, %c0_7, %c0_8] : memref<1x1x128xf32, #tpu.memory_space<vmem>>, vector<1x1x128xf32>
    %9 = arith.addf %7, %8 : vector<1x1x128xf32>
    %10 = arith.negf %9 : vector<1x1x128xf32>
    %11 = math.exp %10 : vector<1x1x128xf32>
    %cst_9 = arith.constant 1.000000e+00 : f32
    %12 = vector.broadcast %cst_9 : f32 to vector<1x1x128xf32>
    %13 = arith.addf %12, %11 : vector<1x1x128xf32>
    %14 = arith.divf %12, %13 : vector<1x1x128xf32>
    %15 = vector.broadcast %14 : vector<1x1x128xf32> to vector<1x4x128xf32>
    %16 = arith.mulf %1, %15 : vector<1x4x128xf32>
    %17 = arith.truncf %16 : vector<1x4x128xf32> to vector<1x4x128xbf16>
    %c0_10 = arith.constant 0 : index
    %c0_11 = arith.constant 0 : index
    %c0_12 = arith.constant 0 : index
    %18 = vector.load %arg4[%c0_10, %c0_11, %c0_12] : memref<1x4x128xbf16, #tpu.memory_space<vmem>>, vector<1x4x128xbf16>
    tpu.vector_store %arg4[%c0_10, %c0_11, %c0_12], %17 {strides = array<i32>} : memref<1x4x128xbf16, #tpu.memory_space<vmem>>, vector<1x4x128xbf16>,
    return
  }
  func.func @transform_0(%arg0: i32) -> (i32, i32, i32) {
    %c0_i32 = arith.constant 0 : i32
    %c0_i32_0 = arith.constant 0 : i32
    %c0_i32_1 = arith.constant 0 : i32
    return %arg0, %c0_i32, %c0_i32_0 : i32, i32, i32
  }
  func.func @transform_1(%arg0: i32) -> (i32, i32, i32) {
    %c0_i32 = arith.constant 0 : i32
    %c0_i32_0 = arith.constant 0 : i32
    %c0_i32_1 = arith.constant 0 : i32
    %c0_i32_2 = arith.constant 0 : i32
    return %c0_i32, %c0_i32_0, %c0_i32_1 : i32, i32, i32
  }
  func.func @transform_2(%arg0: i32) -> (i32, i32, i32) {
    %c0_i32 = arith.constant 0 : i32
    %c0_i32_0 = arith.constant 0 : i32
    %c0_i32_1 = arith.constant 0 : i32
    %c0_i32_2 = arith.constant 0 : i32
    return %c0_i32, %c0_i32_0, %c0_i32_1 : i32, i32, i32
  }
  func.func @transform_3(%arg0: i32) -> (i32, i32, i32) {
    %c0_i32 = arith.constant 0 : i32
    %c0_i32_0 = arith.constant 0 : i32
    %c0_i32_1 = arith.constant 0 : i32
    return %arg0, %c0_i32, %c0_i32_0 : i32, i32, i32
  }
}

module attributes {stable_mosaic.version = 11 : i64} {
  func.func @_mm_bias_act_kernel(%arg0: i32, %arg1: memref<8x96xbf16, #tpu.memory_space<vmem>>, %arg2: memref<96x128xbf16, #tpu.memory_space<vmem>>, %arg3: memref<1x128xf32, #tpu.memory_space<vmem>>, %arg4: memref<8x128xbf16, #tpu.memory_space<vmem>>) attributes {dimension_semantics = [#tpu.dimension_semantics<parallel>], iteration_bounds = array<i64: 1>, scalar_prefetch = 0 : i64, scratch_operands = 0 : i64, tpu.core_type = #tpu.core_type<tc>, window_params = [{transform_indices = @transform_0, window_bounds = array<i64: 8, 96>}, {pipeline_mode = #tpu.pipeline_mode<synchronous>, transform_indices = @transform_1, window_bounds = array<i64: 96, 128>}, {pipeline_mode = #tpu.pipeline_mode<synchronous>, transform_indices = @transform_2, window_bounds = array<i64: 1, 128>}, {transform_indices = @transform_3, window_bounds = array<i64: 8, 128>}]} {
    %c0 = arith.constant 0 : index
    %c0_0 = arith.constant 0 : index
    %0 = vector.load %arg1[%c0, %c0_0] : memref<8x96xbf16, #tpu.memory_space<vmem>>, vector<8x96xbf16>
    %c0_1 = arith.constant 0 : index
    %c0_2 = arith.constant 0 : index
    %1 = vector.load %arg2[%c0_1, %c0_2] : memref<96x128xbf16, #tpu.memory_space<vmem>>, vector<96x128xbf16>
    %cst = arith.constant dense<0.000000e+00> : vector<8x128xf32>
    %2 = tpu.matmul %0, %1, %cst {dimension_numbers = #tpu.dot_dimension_numbers<[1], [0], [0], [1], [0, 0, 1, 1], [], []>} : vector<8x96xbf16>, vector<96x128xbf16>, vector<8x128xf32> -> vector<8x128xf32>
    %c0_3 = arith.constant 0 : index
    %c0_4 = arith.constant 0 : index
    %3 = vector.load %arg3[%c0_3, %c0_4] : memref<1x128xf32, #tpu.memory_space<vmem>>, vector<1x128xf32>
    %4 = vector.broadcast %3 : vector<1x128xf32> to vector<8x128xf32>
    %5 = arith.addf %2, %4 : vector<8x128xf32>
    %cst_5 = arith.constant 0.000000e+00 : f32
    %6 = vector.broadcast %cst_5 : f32 to vector<8x128xf32>
    %7 = arith.maximumf %5, %6 : vector<8x128xf32>
    %8 = arith.truncf %7 : vector<8x128xf32> to vector<8x128xbf16>
    %c0_6 = arith.constant 0 : index
    %c0_7 = arith.constant 0 : index
    %9 = vector.load %arg4[%c0_6, %c0_7] : memref<8x128xbf16, #tpu.memory_space<vmem>>, vector<8x128xbf16>
    tpu.vector_store %arg4[%c0_6, %c0_7], %8 {strides = array<i32>} : memref<8x128xbf16, #tpu.memory_space<vmem>>, vector<8x128xbf16>,
    return
  }
  func.func @transform_0(%arg0: i32) -> (i32, i32) {
    %c0_i32 = arith.constant 0 : i32
    %c0_i32_0 = arith.constant 0 : i32
    return %arg0, %c0_i32 : i32, i32
  }
  func.func @transform_1(%arg0: i32) -> (i32, i32) {
    %c0_i32 = arith.constant 0 : i32
    %c0_i32_0 = arith.constant 0 : i32
    %c0_i32_1 = arith.constant 0 : i32
    return %c0_i32, %c0_i32_0 : i32, i32
  }
  func.func @transform_2(%arg0: i32) -> (i32, i32) {
    %c0_i32 = arith.constant 0 : i32
    %c0_i32_0 = arith.constant 0 : i32
    %c0_i32_1 = arith.constant 0 : i32
    return %c0_i32, %c0_i32_0 : i32, i32
  }
  func.func @transform_3(%arg0: i32) -> (i32, i32) {
    %c0_i32 = arith.constant 0 : i32
    %c0_i32_0 = arith.constant 0 : i32
    return %arg0, %c0_i32 : i32, i32
  }
}

module attributes {stable_mosaic.version = 11 : i64} {
  func.func @_mm_bias_act_kernel(%arg0: i32, %arg1: memref<2x128xbf16, #tpu.memory_space<vmem>>, %arg2: memref<128x160xbf16, #tpu.memory_space<vmem>>, %arg3: memref<1x160xf32, #tpu.memory_space<vmem>>, %arg4: memref<2x160xbf16, #tpu.memory_space<vmem>>) attributes {dimension_semantics = [#tpu.dimension_semantics<parallel>], iteration_bounds = array<i64: 1>, scalar_prefetch = 0 : i64, scratch_operands = 0 : i64, tpu.core_type = #tpu.core_type<tc>, window_params = [{transform_indices = @transform_0, window_bounds = array<i64: 2, 128>}, {pipeline_mode = #tpu.pipeline_mode<synchronous>, transform_indices = @transform_1, window_bounds = array<i64: 128, 160>}, {pipeline_mode = #tpu.pipeline_mode<synchronous>, transform_indices = @transform_2, window_bounds = array<i64: 1, 160>}, {transform_indices = @transform_3, window_bounds = array<i64: 2, 160>}]} {
    %c0 = arith.constant 0 : index
    %c0_0 = arith.constant 0 : index
    %0 = vector.load %arg1[%c0, %c0_0] : memref<2x128xbf16, #tpu.memory_space<vmem>>, vector<2x128xbf16>
    %c0_1 = arith.constant 0 : index
    %c0_2 = arith.constant 0 : index
    %1 = vector.load %arg2[%c0_1, %c0_2] : memref<128x160xbf16, #tpu.memory_space<vmem>>, vector<128x160xbf16>
    %cst = arith.constant dense<0.000000e+00> : vector<2x160xf32>
    %2 = tpu.matmul %0, %1, %cst {dimension_numbers = #tpu.dot_dimension_numbers<[1], [0], [0], [1], [0, 0, 1, 1], [], []>} : vector<2x128xbf16>, vector<128x160xbf16>, vector<2x160xf32> -> vector<2x160xf32>
    %c0_3 = arith.constant 0 : index
    %c0_4 = arith.constant 0 : index
    %3 = vector.load %arg3[%c0_3, %c0_4] : memref<1x160xf32, #tpu.memory_space<vmem>>, vector<1x160xf32>
    %4 = vector.broadcast %3 : vector<1x160xf32> to vector<2x160xf32>
    %5 = arith.addf %2, %4 : vector<2x160xf32>
    %cst_5 = arith.constant 0.000000e+00 : f32
    %6 = vector.broadcast %cst_5 : f32 to vector<2x160xf32>
    %7 = arith.maximumf %5, %6 : vector<2x160xf32>
    %8 = arith.truncf %7 : vector<2x160xf32> to vector<2x160xbf16>
    %c0_6 = arith.constant 0 : index
    %c0_7 = arith.constant 0 : index
    %9 = vector.load %arg4[%c0_6, %c0_7] : memref<2x160xbf16, #tpu.memory_space<vmem>>, vector<2x160xbf16>
    tpu.vector_store %arg4[%c0_6, %c0_7], %8 {strides = array<i32>} : memref<2x160xbf16, #tpu.memory_space<vmem>>, vector<2x160xbf16>,
    return
  }
  func.func @transform_0(%arg0: i32) -> (i32, i32) {
    %c0_i32 = arith.constant 0 : i32
    %c0_i32_0 = arith.constant 0 : i32
    return %arg0, %c0_i32 : i32, i32
  }
  func.func @transform_1(%arg0: i32) -> (i32, i32) {
    %c0_i32 = arith.constant 0 : i32
    %c0_i32_0 = arith.constant 0 : i32
    %c0_i32_1 = arith.constant 0 : i32
    return %c0_i32, %c0_i32_0 : i32, i32
  }
  func.func @transform_2(%arg0: i32) -> (i32, i32) {
    %c0_i32 = arith.constant 0 : i32
    %c0_i32_0 = arith.constant 0 : i32
    %c0_i32_1 = arith.constant 0 : i32
    return %c0_i32, %c0_i32_0 : i32, i32
  }
  func.func @transform_3(%arg0: i32) -> (i32, i32) {
    %c0_i32 = arith.constant 0 : i32
    %c0_i32_0 = arith.constant 0 : i32
    return %arg0, %c0_i32 : i32, i32
  }
}

module attributes {stable_mosaic.version = 11 : i64} {
  func.func @_efatt_kernel(%arg0: i32, %arg1: memref<1x1x160xbf16, #tpu.memory_space<vmem>>, %arg2: memref<1x1x160xf32, #tpu.memory_space<vmem>>, %arg3: memref<1x1x160xf32, #tpu.memory_space<vmem>>, %arg4: memref<1x1x160xbf16, #tpu.memory_space<vmem>>) attributes {dimension_semantics = [#tpu.dimension_semantics<parallel>], iteration_bounds = array<i64: 2>, scalar_prefetch = 0 : i64, scratch_operands = 0 : i64, tpu.core_type = #tpu.core_type<tc>, window_params = [{transform_indices = @transform_0, window_bounds = array<i64: 1, 1, 160>}, {pipeline_mode = #tpu.pipeline_mode<synchronous>, transform_indices = @transform_1, window_bounds = array<i64: 1, 1, 160>}, {pipeline_mode = #tpu.pipeline_mode<synchronous>, transform_indices = @transform_2, window_bounds = array<i64: 1, 1, 160>}, {transform_indices = @transform_3, window_bounds = array<i64: 1, 1, 160>}]} {
    %c0 = arith.constant 0 : index
    %c0_0 = arith.constant 0 : index
    %c0_1 = arith.constant 0 : index
    %0 = vector.load %arg1[%c0, %c0_0, %c0_1] : memref<1x1x160xbf16, #tpu.memory_space<vmem>>, vector<1x1x160xbf16>
    %1 = arith.extf %0 : vector<1x1x160xbf16> to vector<1x1x160xf32>
    %cst = arith.constant dense<0.000000e+00> : vector<1x160xf32>
    %2 = vector.multi_reduction <add>, %1, %cst [1] : vector<1x1x160xf32> to vector<1x160xf32>
    %3 = vector.shape_cast %2 : vector<1x160xf32> to vector<1x1x160xf32>
    %cst_2 = arith.constant 1.000000e+00 : f32
    %4 = vector.broadcast %cst_2 : f32 to vector<1x1x160xf32>
    %5 = arith.divf %3, %4 : vector<1x1x160xf32>
    %c0_3 = arith.constant 0 : index
    %c0_4 = arith.constant 0 : index
    %c0_5 = arith.constant 0 : index
    %6 = vector.load %arg2[%c0_3, %c0_4, %c0_5] : memref<1x1x160xf32, #tpu.memory_space<vmem>>, vector<1x1x160xf32>
    %7 = arith.mulf %5, %6 : vector<1x1x160xf32>
    %c0_6 = arith.constant 0 : index
    %c0_7 = arith.constant 0 : index
    %c0_8 = arith.constant 0 : index
    %8 = vector.load %arg3[%c0_6, %c0_7, %c0_8] : memref<1x1x160xf32, #tpu.memory_space<vmem>>, vector<1x1x160xf32>
    %9 = arith.addf %7, %8 : vector<1x1x160xf32>
    %10 = arith.negf %9 : vector<1x1x160xf32>
    %11 = math.exp %10 : vector<1x1x160xf32>
    %cst_9 = arith.constant 1.000000e+00 : f32
    %12 = vector.broadcast %cst_9 : f32 to vector<1x1x160xf32>
    %13 = arith.addf %12, %11 : vector<1x1x160xf32>
    %14 = arith.divf %12, %13 : vector<1x1x160xf32>
    %15 = arith.mulf %1, %14 : vector<1x1x160xf32>
    %16 = arith.truncf %15 : vector<1x1x160xf32> to vector<1x1x160xbf16>
    %c0_10 = arith.constant 0 : index
    %c0_11 = arith.constant 0 : index
    %c0_12 = arith.constant 0 : index
    %17 = vector.load %arg4[%c0_10, %c0_11, %c0_12] : memref<1x1x160xbf16, #tpu.memory_space<vmem>>, vector<1x1x160xbf16>
    tpu.vector_store %arg4[%c0_10, %c0_11, %c0_12], %16 {strides = array<i32>} : memref<1x1x160xbf16, #tpu.memory_space<vmem>>, vector<1x1x160xbf16>,
    return
  }
  func.func @transform_0(%arg0: i32) -> (i32, i32, i32) {
    %c0_i32 = arith.constant 0 : i32
    %c0_i32_0 = arith.constant 0 : i32
    %c0_i32_1 = arith.constant 0 : i32
    return %arg0, %c0_i32, %c0_i32_0 : i32, i32, i32
  }
  func.func @transform_1(%arg0: i32) -> (i32, i32, i32) {
    %c0_i32 = arith.constant 0 : i32
    %c0_i32_0 = arith.constant 0 : i32
    %c0_i32_1 = arith.constant 0 : i32
    %c0_i32_2 = arith.constant 0 : i32
    return %c0_i32, %c0_i32_0, %c0_i32_1 : i32, i32, i32
  }
  func.func @transform_2(%arg0: i32) -> (i32, i32, i32) {
    %c0_i32 = arith.constant 0 : i32
    %c0_i32_0 = arith.constant 0 : i32
    %c0_i32_1 = arith.constant 0 : i32
    %c0_i32_2 = arith.constant 0 : i32
    return %c0_i32, %c0_i32_0, %c0_i32_1 : i32, i32, i32
  }
  func.func @transform_3(%arg0: i32) -> (i32, i32, i32) {
    %c0_i32 = arith.constant 0 : i32
    %c0_i32_0 = arith.constant 0 : i32
    %c0_i32_1 = arith.constant 0 : i32
    return %arg0, %c0_i32, %c0_i32_0 : i32, i32, i32
  }
}

module attributes {stable_mosaic.version = 11 : i64} {
  func.func @_dec_kernel(%arg0: i32, %arg1: memref<8x128xbf16, #tpu.memory_space<vmem>>, %arg2: memref<8x160xbf16, #tpu.memory_space<vmem>>, %arg3: memref<128x128xbf16, #tpu.memory_space<vmem>>, %arg4: memref<160x128xbf16, #tpu.memory_space<vmem>>, %arg5: memref<1x128xf32, #tpu.memory_space<vmem>>, %arg6: memref<8x128xbf16, #tpu.memory_space<vmem>>) attributes {dimension_semantics = [#tpu.dimension_semantics<parallel>], iteration_bounds = array<i64: 1>, scalar_prefetch = 0 : i64, scratch_operands = 0 : i64, tpu.core_type = #tpu.core_type<tc>, window_params = [{transform_indices = @transform_0, window_bounds = array<i64: 8, 128>}, {transform_indices = @transform_1, window_bounds = array<i64: 8, 160>}, {pipeline_mode = #tpu.pipeline_mode<synchronous>, transform_indices = @transform_2, window_bounds = array<i64: 128, 128>}, {pipeline_mode = #tpu.pipeline_mode<synchronous>, transform_indices = @transform_3, window_bounds = array<i64: 160, 128>}, {pipeline_mode = #tpu.pipeline_mode<synchronous>, transform_indices = @transform_4, window_bounds = array<i64: 1, 128>}, {transform_indices = @transform_5, window_bounds = array<i64: 8, 128>}]} {
    %c0 = arith.constant 0 : index
    %c0_0 = arith.constant 0 : index
    %0 = vector.load %arg1[%c0, %c0_0] : memref<8x128xbf16, #tpu.memory_space<vmem>>, vector<8x128xbf16>
    %c0_1 = arith.constant 0 : index
    %c0_2 = arith.constant 0 : index
    %1 = vector.load %arg3[%c0_1, %c0_2] : memref<128x128xbf16, #tpu.memory_space<vmem>>, vector<128x128xbf16>
    %cst = arith.constant dense<0.000000e+00> : vector<8x128xf32>
    %2 = tpu.matmul %0, %1, %cst {dimension_numbers = #tpu.dot_dimension_numbers<[1], [0], [0], [1], [0, 0, 1, 1], [], []>} : vector<8x128xbf16>, vector<128x128xbf16>, vector<8x128xf32> -> vector<8x128xf32>
    %c0_3 = arith.constant 0 : index
    %c0_4 = arith.constant 0 : index
    %3 = vector.load %arg2[%c0_3, %c0_4] : memref<8x160xbf16, #tpu.memory_space<vmem>>, vector<8x160xbf16>
    %c0_5 = arith.constant 0 : index
    %c0_6 = arith.constant 0 : index
    %4 = vector.load %arg4[%c0_5, %c0_6] : memref<160x128xbf16, #tpu.memory_space<vmem>>, vector<160x128xbf16>
    %cst_7 = arith.constant dense<0.000000e+00> : vector<8x128xf32>
    %5 = tpu.matmul %3, %4, %cst_7 {dimension_numbers = #tpu.dot_dimension_numbers<[1], [0], [0], [1], [0, 0, 1, 1], [], []>} : vector<8x160xbf16>, vector<160x128xbf16>, vector<8x128xf32> -> vector<8x128xf32>
    %6 = arith.addf %2, %5 : vector<8x128xf32>
    %c0_8 = arith.constant 0 : index
    %c0_9 = arith.constant 0 : index
    %7 = vector.load %arg5[%c0_8, %c0_9] : memref<1x128xf32, #tpu.memory_space<vmem>>, vector<1x128xf32>
    %8 = vector.broadcast %7 : vector<1x128xf32> to vector<8x128xf32>
    %9 = arith.addf %6, %8 : vector<8x128xf32>
    %cst_10 = arith.constant 0.000000e+00 : f32
    %10 = vector.broadcast %cst_10 : f32 to vector<8x128xf32>
    %11 = arith.maximumf %9, %10 : vector<8x128xf32>
    %12 = arith.truncf %11 : vector<8x128xf32> to vector<8x128xbf16>
    %c0_11 = arith.constant 0 : index
    %c0_12 = arith.constant 0 : index
    %13 = vector.load %arg6[%c0_11, %c0_12] : memref<8x128xbf16, #tpu.memory_space<vmem>>, vector<8x128xbf16>
    tpu.vector_store %arg6[%c0_11, %c0_12], %12 {strides = array<i32>} : memref<8x128xbf16, #tpu.memory_space<vmem>>, vector<8x128xbf16>,
    return
  }
  func.func @transform_0(%arg0: i32) -> (i32, i32) {
    %c0_i32 = arith.constant 0 : i32
    %c0_i32_0 = arith.constant 0 : i32
    return %arg0, %c0_i32 : i32, i32
  }
  func.func @transform_1(%arg0: i32) -> (i32, i32) {
    %c0_i32 = arith.constant 0 : i32
    %c0_i32_0 = arith.constant 0 : i32
    return %arg0, %c0_i32 : i32, i32
  }
  func.func @transform_2(%arg0: i32) -> (i32, i32) {
    %c0_i32 = arith.constant 0 : i32
    %c0_i32_0 = arith.constant 0 : i32
    %c0_i32_1 = arith.constant 0 : i32
    return %c0_i32, %c0_i32_0 : i32, i32
  }
  func.func @transform_3(%arg0: i32) -> (i32, i32) {
    %c0_i32 = arith.constant 0 : i32
    %c0_i32_0 = arith.constant 0 : i32
    %c0_i32_1 = arith.constant 0 : i32
    return %c0_i32, %c0_i32_0 : i32, i32
  }
  func.func @transform_4(%arg0: i32) -> (i32, i32) {
    %c0_i32 = arith.constant 0 : i32
    %c0_i32_0 = arith.constant 0 : i32
    %c0_i32_1 = arith.constant 0 : i32
    return %c0_i32, %c0_i32_0 : i32, i32
  }
  func.func @transform_5(%arg0: i32) -> (i32, i32) {
    %c0_i32 = arith.constant 0 : i32
    %c0_i32_0 = arith.constant 0 : i32
    return %arg0, %c0_i32 : i32, i32
  }
}

module attributes {stable_mosaic.version = 11 : i64} {
  func.func @_mm_bias_act_kernel(%arg0: i32, %arg1: memref<8x128xbf16, #tpu.memory_space<vmem>>, %arg2: memref<128x32xbf16, #tpu.memory_space<vmem>>, %arg3: memref<1x32xf32, #tpu.memory_space<vmem>>, %arg4: memref<8x32xbf16, #tpu.memory_space<vmem>>) attributes {dimension_semantics = [#tpu.dimension_semantics<parallel>], iteration_bounds = array<i64: 1>, scalar_prefetch = 0 : i64, scratch_operands = 0 : i64, tpu.core_type = #tpu.core_type<tc>, window_params = [{transform_indices = @transform_0, window_bounds = array<i64: 8, 128>}, {pipeline_mode = #tpu.pipeline_mode<synchronous>, transform_indices = @transform_1, window_bounds = array<i64: 128, 32>}, {pipeline_mode = #tpu.pipeline_mode<synchronous>, transform_indices = @transform_2, window_bounds = array<i64: 1, 32>}, {transform_indices = @transform_3, window_bounds = array<i64: 8, 32>}]} {
    %c0 = arith.constant 0 : index
    %c0_0 = arith.constant 0 : index
    %0 = vector.load %arg1[%c0, %c0_0] : memref<8x128xbf16, #tpu.memory_space<vmem>>, vector<8x128xbf16>
    %c0_1 = arith.constant 0 : index
    %c0_2 = arith.constant 0 : index
    %1 = vector.load %arg2[%c0_1, %c0_2] : memref<128x32xbf16, #tpu.memory_space<vmem>>, vector<128x32xbf16>
    %cst = arith.constant dense<0.000000e+00> : vector<8x32xf32>
    %2 = tpu.matmul %0, %1, %cst {dimension_numbers = #tpu.dot_dimension_numbers<[1], [0], [0], [1], [0, 0, 1, 1], [], []>} : vector<8x128xbf16>, vector<128x32xbf16>, vector<8x32xf32> -> vector<8x32xf32>
    %c0_3 = arith.constant 0 : index
    %c0_4 = arith.constant 0 : index
    %3 = vector.load %arg3[%c0_3, %c0_4] : memref<1x32xf32, #tpu.memory_space<vmem>>, vector<1x32xf32>
    %4 = vector.broadcast %3 : vector<1x32xf32> to vector<8x32xf32>
    %5 = arith.addf %2, %4 : vector<8x32xf32>
    %cst_5 = arith.constant 0.000000e+00 : f32
    %6 = vector.broadcast %cst_5 : f32 to vector<8x32xf32>
    %7 = arith.maximumf %5, %6 : vector<8x32xf32>
    %8 = arith.truncf %7 : vector<8x32xf32> to vector<8x32xbf16>
    %c0_6 = arith.constant 0 : index
    %c0_7 = arith.constant 0 : index
    %9 = vector.load %arg4[%c0_6, %c0_7] : memref<8x32xbf16, #tpu.memory_space<vmem>>, vector<8x32xbf16>
    tpu.vector_store %arg4[%c0_6, %c0_7], %8 {strides = array<i32>} : memref<8x32xbf16, #tpu.memory_space<vmem>>, vector<8x32xbf16>,
    return
  }
  func.func @transform_0(%arg0: i32) -> (i32, i32) {
    %c0_i32 = arith.constant 0 : i32
    %c0_i32_0 = arith.constant 0 : i32
    return %arg0, %c0_i32 : i32, i32
  }
  func.func @transform_1(%arg0: i32) -> (i32, i32) {
    %c0_i32 = arith.constant 0 : i32
    %c0_i32_0 = arith.constant 0 : i32
    %c0_i32_1 = arith.constant 0 : i32
    return %c0_i32, %c0_i32_0 : i32, i32
  }
  func.func @transform_2(%arg0: i32) -> (i32, i32) {
    %c0_i32 = arith.constant 0 : i32
    %c0_i32_0 = arith.constant 0 : i32
    %c0_i32_1 = arith.constant 0 : i32
    return %c0_i32, %c0_i32_0 : i32, i32
  }
  func.func @transform_3(%arg0: i32) -> (i32, i32) {
    %c0_i32 = arith.constant 0 : i32
    %c0_i32_0 = arith.constant 0 : i32
    return %arg0, %c0_i32 : i32, i32
  }
}

module attributes {stable_mosaic.version = 11 : i64} {
  func.func @_dec_kernel(%arg0: i32, %arg1: memref<32x96xbf16, #tpu.memory_space<vmem>>, %arg2: memref<32x128xbf16, #tpu.memory_space<vmem>>, %arg3: memref<96x96xbf16, #tpu.memory_space<vmem>>, %arg4: memref<128x96xbf16, #tpu.memory_space<vmem>>, %arg5: memref<1x96xf32, #tpu.memory_space<vmem>>, %arg6: memref<32x96xbf16, #tpu.memory_space<vmem>>) attributes {dimension_semantics = [#tpu.dimension_semantics<parallel>], iteration_bounds = array<i64: 1>, scalar_prefetch = 0 : i64, scratch_operands = 0 : i64, tpu.core_type = #tpu.core_type<tc>, window_params = [{transform_indices = @transform_0, window_bounds = array<i64: 32, 96>}, {transform_indices = @transform_1, window_bounds = array<i64: 32, 128>}, {pipeline_mode = #tpu.pipeline_mode<synchronous>, transform_indices = @transform_2, window_bounds = array<i64: 96, 96>}, {pipeline_mode = #tpu.pipeline_mode<synchronous>, transform_indices = @transform_3, window_bounds = array<i64: 128, 96>}, {pipeline_mode = #tpu.pipeline_mode<synchronous>, transform_indices = @transform_4, window_bounds = array<i64: 1, 96>}, {transform_indices = @transform_5, window_bounds = array<i64: 32, 96>}]} {
    %c0 = arith.constant 0 : index
    %c0_0 = arith.constant 0 : index
    %0 = vector.load %arg1[%c0, %c0_0] : memref<32x96xbf16, #tpu.memory_space<vmem>>, vector<32x96xbf16>
    %c0_1 = arith.constant 0 : index
    %c0_2 = arith.constant 0 : index
    %1 = vector.load %arg3[%c0_1, %c0_2] : memref<96x96xbf16, #tpu.memory_space<vmem>>, vector<96x96xbf16>
    %cst = arith.constant dense<0.000000e+00> : vector<32x96xf32>
    %2 = tpu.matmul %0, %1, %cst {dimension_numbers = #tpu.dot_dimension_numbers<[1], [0], [0], [1], [0, 0, 1, 1], [], []>} : vector<32x96xbf16>, vector<96x96xbf16>, vector<32x96xf32> -> vector<32x96xf32>
    %c0_3 = arith.constant 0 : index
    %c0_4 = arith.constant 0 : index
    %3 = vector.load %arg2[%c0_3, %c0_4] : memref<32x128xbf16, #tpu.memory_space<vmem>>, vector<32x128xbf16>
    %c0_5 = arith.constant 0 : index
    %c0_6 = arith.constant 0 : index
    %4 = vector.load %arg4[%c0_5, %c0_6] : memref<128x96xbf16, #tpu.memory_space<vmem>>, vector<128x96xbf16>
    %cst_7 = arith.constant dense<0.000000e+00> : vector<32x96xf32>
    %5 = tpu.matmul %3, %4, %cst_7 {dimension_numbers = #tpu.dot_dimension_numbers<[1], [0], [0], [1], [0, 0, 1, 1], [], []>} : vector<32x128xbf16>, vector<128x96xbf16>, vector<32x96xf32> -> vector<32x96xf32>
    %6 = arith.addf %2, %5 : vector<32x96xf32>
    %c0_8 = arith.constant 0 : index
    %c0_9 = arith.constant 0 : index
    %7 = vector.load %arg5[%c0_8, %c0_9] : memref<1x96xf32, #tpu.memory_space<vmem>>, vector<1x96xf32>
    %8 = vector.broadcast %7 : vector<1x96xf32> to vector<32x96xf32>
    %9 = arith.addf %6, %8 : vector<32x96xf32>
    %cst_10 = arith.constant 0.000000e+00 : f32
    %10 = vector.broadcast %cst_10 : f32 to vector<32x96xf32>
    %11 = arith.maximumf %9, %10 : vector<32x96xf32>
    %12 = arith.truncf %11 : vector<32x96xf32> to vector<32x96xbf16>
    %c0_11 = arith.constant 0 : index
    %c0_12 = arith.constant 0 : index
    %13 = vector.load %arg6[%c0_11, %c0_12] : memref<32x96xbf16, #tpu.memory_space<vmem>>, vector<32x96xbf16>
    tpu.vector_store %arg6[%c0_11, %c0_12], %12 {strides = array<i32>} : memref<32x96xbf16, #tpu.memory_space<vmem>>, vector<32x96xbf16>,
    return
  }
  func.func @transform_0(%arg0: i32) -> (i32, i32) {
    %c0_i32 = arith.constant 0 : i32
    %c0_i32_0 = arith.constant 0 : i32
    return %arg0, %c0_i32 : i32, i32
  }
  func.func @transform_1(%arg0: i32) -> (i32, i32) {
    %c0_i32 = arith.constant 0 : i32
    %c0_i32_0 = arith.constant 0 : i32
    return %arg0, %c0_i32 : i32, i32
  }
  func.func @transform_2(%arg0: i32) -> (i32, i32) {
    %c0_i32 = arith.constant 0 : i32
    %c0_i32_0 = arith.constant 0 : i32
    %c0_i32_1 = arith.constant 0 : i32
    return %c0_i32, %c0_i32_0 : i32, i32
  }
  func.func @transform_3(%arg0: i32) -> (i32, i32) {
    %c0_i32 = arith.constant 0 : i32
    %c0_i32_0 = arith.constant 0 : i32
    %c0_i32_1 = arith.constant 0 : i32
    return %c0_i32, %c0_i32_0 : i32, i32
  }
  func.func @transform_4(%arg0: i32) -> (i32, i32) {
    %c0_i32 = arith.constant 0 : i32
    %c0_i32_0 = arith.constant 0 : i32
    %c0_i32_1 = arith.constant 0 : i32
    return %c0_i32, %c0_i32_0 : i32, i32
  }
  func.func @transform_5(%arg0: i32) -> (i32, i32) {
    %c0_i32 = arith.constant 0 : i32
    %c0_i32_0 = arith.constant 0 : i32
    return %arg0, %c0_i32 : i32, i32
  }
}

module attributes {stable_mosaic.version = 11 : i64} {
  func.func @_mm_bias_relu_res_kernel(%arg0: i32, %arg1: memref<32x96xbf16, #tpu.memory_space<vmem>>, %arg2: memref<96x32xbf16, #tpu.memory_space<vmem>>, %arg3: memref<1x32xf32, #tpu.memory_space<vmem>>, %arg4: memref<32x32xbf16, #tpu.memory_space<vmem>>, %arg5: memref<32x32xbf16, #tpu.memory_space<vmem>>) attributes {dimension_semantics = [#tpu.dimension_semantics<parallel>], iteration_bounds = array<i64: 1>, scalar_prefetch = 0 : i64, scratch_operands = 0 : i64, tpu.core_type = #tpu.core_type<tc>, window_params = [{transform_indices = @transform_0, window_bounds = array<i64: 32, 96>}, {pipeline_mode = #tpu.pipeline_mode<synchronous>, transform_indices = @transform_1, window_bounds = array<i64: 96, 32>}, {pipeline_mode = #tpu.pipeline_mode<synchronous>, transform_indices = @transform_2, window_bounds = array<i64: 1, 32>}, {transform_indices = @transform_3, window_bounds = array<i64: 32, 32>}, {transform_indices = @transform_4, window_bounds = array<i64: 32, 32>}]} {
    %c0 = arith.constant 0 : index
    %c0_0 = arith.constant 0 : index
    %0 = vector.load %arg1[%c0, %c0_0] : memref<32x96xbf16, #tpu.memory_space<vmem>>, vector<32x96xbf16>
    %c0_1 = arith.constant 0 : index
    %c0_2 = arith.constant 0 : index
    %1 = vector.load %arg2[%c0_1, %c0_2] : memref<96x32xbf16, #tpu.memory_space<vmem>>, vector<96x32xbf16>
    %cst = arith.constant dense<0.000000e+00> : vector<32x32xf32>
    %2 = tpu.matmul %0, %1, %cst {dimension_numbers = #tpu.dot_dimension_numbers<[1], [0], [0], [1], [0, 0, 1, 1], [], []>} : vector<32x96xbf16>, vector<96x32xbf16>, vector<32x32xf32> -> vector<32x32xf32>
    %c0_3 = arith.constant 0 : index
    %c0_4 = arith.constant 0 : index
    %3 = vector.load %arg3[%c0_3, %c0_4] : memref<1x32xf32, #tpu.memory_space<vmem>>, vector<1x32xf32>
    %4 = vector.broadcast %3 : vector<1x32xf32> to vector<32x32xf32>
    %5 = arith.addf %2, %4 : vector<32x32xf32>
    %cst_5 = arith.constant 0.000000e+00 : f32
    %6 = vector.broadcast %cst_5 : f32 to vector<32x32xf32>
    %7 = arith.maximumf %5, %6 : vector<32x32xf32>
    %c0_6 = arith.constant 0 : index
    %c0_7 = arith.constant 0 : index
    %8 = vector.load %arg4[%c0_6, %c0_7] : memref<32x32xbf16, #tpu.memory_space<vmem>>, vector<32x32xbf16>
    %9 = arith.extf %8 : vector<32x32xbf16> to vector<32x32xf32>
    %10 = arith.addf %7, %9 : vector<32x32xf32>
    %11 = arith.truncf %10 : vector<32x32xf32> to vector<32x32xbf16>
    %c0_8 = arith.constant 0 : index
    %c0_9 = arith.constant 0 : index
    %12 = vector.load %arg5[%c0_8, %c0_9] : memref<32x32xbf16, #tpu.memory_space<vmem>>, vector<32x32xbf16>
    tpu.vector_store %arg5[%c0_8, %c0_9], %11 {strides = array<i32>} : memref<32x32xbf16, #tpu.memory_space<vmem>>, vector<32x32xbf16>,
    return
  }
  func.func @transform_0(%arg0: i32) -> (i32, i32) {
    %c0_i32 = arith.constant 0 : i32
    %c0_i32_0 = arith.constant 0 : i32
    return %arg0, %c0_i32 : i32, i32
  }
  func.func @transform_1(%arg0: i32) -> (i32, i32) {
    %c0_i32 = arith.constant 0 : i32
    %c0_i32_0 = arith.constant 0 : i32
    %c0_i32_1 = arith.constant 0 : i32
    return %c0_i32, %c0_i32_0 : i32, i32
  }
  func.func @transform_2(%arg0: i32) -> (i32, i32) {
    %c0_i32 = arith.constant 0 : i32
    %c0_i32_0 = arith.constant 0 : i32
    %c0_i32_1 = arith.constant 0 : i32
    return %c0_i32, %c0_i32_0 : i32, i32
  }
  func.func @transform_3(%arg0: i32) -> (i32, i32) {
    %c0_i32 = arith.constant 0 : i32
    %c0_i32_0 = arith.constant 0 : i32
    return %arg0, %c0_i32 : i32, i32
  }
  func.func @transform_4(%arg0: i32) -> (i32, i32) {
    %c0_i32 = arith.constant 0 : i32
    %c0_i32_0 = arith.constant 0 : i32
    return %arg0, %c0_i32 : i32, i32
  }
}

module attributes {stable_mosaic.version = 11 : i64} {
  func.func @_dec_kernel(%arg0: i32, %arg1: memref<128x64xbf16, #tpu.memory_space<vmem>>, %arg2: memref<128x96xbf16, #tpu.memory_space<vmem>>, %arg3: memref<64x64xbf16, #tpu.memory_space<vmem>>, %arg4: memref<96x64xbf16, #tpu.memory_space<vmem>>, %arg5: memref<1x64xf32, #tpu.memory_space<vmem>>, %arg6: memref<128x64xbf16, #tpu.memory_space<vmem>>) attributes {dimension_semantics = [#tpu.dimension_semantics<parallel>], iteration_bounds = array<i64: 1>, scalar_prefetch = 0 : i64, scratch_operands = 0 : i64, tpu.core_type = #tpu.core_type<tc>, window_params = [{transform_indices = @transform_0, window_bounds = array<i64: 128, 64>}, {transform_indices = @transform_1, window_bounds = array<i64: 128, 96>}, {pipeline_mode = #tpu.pipeline_mode<synchronous>, transform_indices = @transform_2, window_bounds = array<i64: 64, 64>}, {pipeline_mode = #tpu.pipeline_mode<synchronous>, transform_indices = @transform_3, window_bounds = array<i64: 96, 64>}, {pipeline_mode = #tpu.pipeline_mode<synchronous>, transform_indices = @transform_4, window_bounds = array<i64: 1, 64>}, {transform_indices = @transform_5, window_bounds = array<i64: 128, 64>}]} {
    %c0 = arith.constant 0 : index
    %c0_0 = arith.constant 0 : index
    %0 = vector.load %arg1[%c0, %c0_0] : memref<128x64xbf16, #tpu.memory_space<vmem>>, vector<128x64xbf16>
    %c0_1 = arith.constant 0 : index
    %c0_2 = arith.constant 0 : index
    %1 = vector.load %arg3[%c0_1, %c0_2] : memref<64x64xbf16, #tpu.memory_space<vmem>>, vector<64x64xbf16>
    %cst = arith.constant dense<0.000000e+00> : vector<128x64xf32>
    %2 = tpu.matmul %0, %1, %cst {dimension_numbers = #tpu.dot_dimension_numbers<[1], [0], [0], [1], [0, 0, 1, 1], [], []>} : vector<128x64xbf16>, vector<64x64xbf16>, vector<128x64xf32> -> vector<128x64xf32>
    %c0_3 = arith.constant 0 : index
    %c0_4 = arith.constant 0 : index
    %3 = vector.load %arg2[%c0_3, %c0_4] : memref<128x96xbf16, #tpu.memory_space<vmem>>, vector<128x96xbf16>
    %c0_5 = arith.constant 0 : index
    %c0_6 = arith.constant 0 : index
    %4 = vector.load %arg4[%c0_5, %c0_6] : memref<96x64xbf16, #tpu.memory_space<vmem>>, vector<96x64xbf16>
    %cst_7 = arith.constant dense<0.000000e+00> : vector<128x64xf32>
    %5 = tpu.matmul %3, %4, %cst_7 {dimension_numbers = #tpu.dot_dimension_numbers<[1], [0], [0], [1], [0, 0, 1, 1], [], []>} : vector<128x96xbf16>, vector<96x64xbf16>, vector<128x64xf32> -> vector<128x64xf32>
    %6 = arith.addf %2, %5 : vector<128x64xf32>
    %c0_8 = arith.constant 0 : index
    %c0_9 = arith.constant 0 : index
    %7 = vector.load %arg5[%c0_8, %c0_9] : memref<1x64xf32, #tpu.memory_space<vmem>>, vector<1x64xf32>
    %8 = vector.broadcast %7 : vector<1x64xf32> to vector<128x64xf32>
    %9 = arith.addf %6, %8 : vector<128x64xf32>
    %cst_10 = arith.constant 0.000000e+00 : f32
    %10 = vector.broadcast %cst_10 : f32 to vector<128x64xf32>
    %11 = arith.maximumf %9, %10 : vector<128x64xf32>
    %12 = arith.truncf %11 : vector<128x64xf32> to vector<128x64xbf16>
    %c0_11 = arith.constant 0 : index
    %c0_12 = arith.constant 0 : index
    %13 = vector.load %arg6[%c0_11, %c0_12] : memref<128x64xbf16, #tpu.memory_space<vmem>>, vector<128x64xbf16>
    tpu.vector_store %arg6[%c0_11, %c0_12], %12 {strides = array<i32>} : memref<128x64xbf16, #tpu.memory_space<vmem>>, vector<128x64xbf16>,
    return
  }
  func.func @transform_0(%arg0: i32) -> (i32, i32) {
    %c0_i32 = arith.constant 0 : i32
    %c0_i32_0 = arith.constant 0 : i32
    return %arg0, %c0_i32 : i32, i32
  }
  func.func @transform_1(%arg0: i32) -> (i32, i32) {
    %c0_i32 = arith.constant 0 : i32
    %c0_i32_0 = arith.constant 0 : i32
    return %arg0, %c0_i32 : i32, i32
  }
  func.func @transform_2(%arg0: i32) -> (i32, i32) {
    %c0_i32 = arith.constant 0 : i32
    %c0_i32_0 = arith.constant 0 : i32
    %c0_i32_1 = arith.constant 0 : i32
    return %c0_i32, %c0_i32_0 : i32, i32
  }
  func.func @transform_3(%arg0: i32) -> (i32, i32) {
    %c0_i32 = arith.constant 0 : i32
    %c0_i32_0 = arith.constant 0 : i32
    %c0_i32_1 = arith.constant 0 : i32
    return %c0_i32, %c0_i32_0 : i32, i32
  }
  func.func @transform_4(%arg0: i32) -> (i32, i32) {
    %c0_i32 = arith.constant 0 : i32
    %c0_i32_0 = arith.constant 0 : i32
    %c0_i32_1 = arith.constant 0 : i32
    return %c0_i32, %c0_i32_0 : i32, i32
  }
  func.func @transform_5(%arg0: i32) -> (i32, i32) {
    %c0_i32 = arith.constant 0 : i32
    %c0_i32_0 = arith.constant 0 : i32
    return %arg0, %c0_i32 : i32, i32
  }
}

module attributes {stable_mosaic.version = 11 : i64} {
  func.func @_mm_bias_relu_res_kernel(%arg0: i32, %arg1: memref<128x64xbf16, #tpu.memory_space<vmem>>, %arg2: memref<64x32xbf16, #tpu.memory_space<vmem>>, %arg3: memref<1x32xf32, #tpu.memory_space<vmem>>, %arg4: memref<128x32xbf16, #tpu.memory_space<vmem>>, %arg5: memref<128x32xbf16, #tpu.memory_space<vmem>>) attributes {dimension_semantics = [#tpu.dimension_semantics<parallel>], iteration_bounds = array<i64: 1>, scalar_prefetch = 0 : i64, scratch_operands = 0 : i64, tpu.core_type = #tpu.core_type<tc>, window_params = [{transform_indices = @transform_0, window_bounds = array<i64: 128, 64>}, {pipeline_mode = #tpu.pipeline_mode<synchronous>, transform_indices = @transform_1, window_bounds = array<i64: 64, 32>}, {pipeline_mode = #tpu.pipeline_mode<synchronous>, transform_indices = @transform_2, window_bounds = array<i64: 1, 32>}, {transform_indices = @transform_3, window_bounds = array<i64: 128, 32>}, {transform_indices = @transform_4, window_bounds = array<i64: 128, 32>}]} {
    %c0 = arith.constant 0 : index
    %c0_0 = arith.constant 0 : index
    %0 = vector.load %arg1[%c0, %c0_0] : memref<128x64xbf16, #tpu.memory_space<vmem>>, vector<128x64xbf16>
    %c0_1 = arith.constant 0 : index
    %c0_2 = arith.constant 0 : index
    %1 = vector.load %arg2[%c0_1, %c0_2] : memref<64x32xbf16, #tpu.memory_space<vmem>>, vector<64x32xbf16>
    %cst = arith.constant dense<0.000000e+00> : vector<128x32xf32>
    %2 = tpu.matmul %0, %1, %cst {dimension_numbers = #tpu.dot_dimension_numbers<[1], [0], [0], [1], [0, 0, 1, 1], [], []>} : vector<128x64xbf16>, vector<64x32xbf16>, vector<128x32xf32> -> vector<128x32xf32>
    %c0_3 = arith.constant 0 : index
    %c0_4 = arith.constant 0 : index
    %3 = vector.load %arg3[%c0_3, %c0_4] : memref<1x32xf32, #tpu.memory_space<vmem>>, vector<1x32xf32>
    %4 = vector.broadcast %3 : vector<1x32xf32> to vector<128x32xf32>
    %5 = arith.addf %2, %4 : vector<128x32xf32>
    %cst_5 = arith.constant 0.000000e+00 : f32
    %6 = vector.broadcast %cst_5 : f32 to vector<128x32xf32>
    %7 = arith.maximumf %5, %6 : vector<128x32xf32>
    %c0_6 = arith.constant 0 : index
    %c0_7 = arith.constant 0 : index
    %8 = vector.load %arg4[%c0_6, %c0_7] : memref<128x32xbf16, #tpu.memory_space<vmem>>, vector<128x32xbf16>
    %9 = arith.extf %8 : vector<128x32xbf16> to vector<128x32xf32>
    %10 = arith.addf %7, %9 : vector<128x32xf32>
    %11 = arith.truncf %10 : vector<128x32xf32> to vector<128x32xbf16>
    %c0_8 = arith.constant 0 : index
    %c0_9 = arith.constant 0 : index
    %12 = vector.load %arg5[%c0_8, %c0_9] : memref<128x32xbf16, #tpu.memory_space<vmem>>, vector<128x32xbf16>
    tpu.vector_store %arg5[%c0_8, %c0_9], %11 {strides = array<i32>} : memref<128x32xbf16, #tpu.memory_space<vmem>>, vector<128x32xbf16>,
    return
  }
  func.func @transform_0(%arg0: i32) -> (i32, i32) {
    %c0_i32 = arith.constant 0 : i32
    %c0_i32_0 = arith.constant 0 : i32
    return %arg0, %c0_i32 : i32, i32
  }
  func.func @transform_1(%arg0: i32) -> (i32, i32) {
    %c0_i32 = arith.constant 0 : i32
    %c0_i32_0 = arith.constant 0 : i32
    %c0_i32_1 = arith.constant 0 : i32
    return %c0_i32, %c0_i32_0 : i32, i32
  }
  func.func @transform_2(%arg0: i32) -> (i32, i32) {
    %c0_i32 = arith.constant 0 : i32
    %c0_i32_0 = arith.constant 0 : i32
    %c0_i32_1 = arith.constant 0 : i32
    return %c0_i32, %c0_i32_0 : i32, i32
  }
  func.func @transform_3(%arg0: i32) -> (i32, i32) {
    %c0_i32 = arith.constant 0 : i32
    %c0_i32_0 = arith.constant 0 : i32
    return %arg0, %c0_i32 : i32, i32
  }
  func.func @transform_4(%arg0: i32) -> (i32, i32) {
    %c0_i32 = arith.constant 0 : i32
    %c0_i32_0 = arith.constant 0 : i32
    return %arg0, %c0_i32 : i32, i32
  }
}

module attributes {stable_mosaic.version = 11 : i64} {
  func.func @_mm_bias_relu_res_kernel(%arg0: i32, %arg1: memref<256x32xbf16, #tpu.memory_space<vmem>>, %arg2: memref<32x32xbf16, #tpu.memory_space<vmem>>, %arg3: memref<1x32xf32, #tpu.memory_space<vmem>>, %arg4: memref<256x32xbf16, #tpu.memory_space<vmem>>, %arg5: memref<256x32xbf16, #tpu.memory_space<vmem>>) attributes {dimension_semantics = [#tpu.dimension_semantics<parallel>], iteration_bounds = array<i64: 2>, scalar_prefetch = 0 : i64, scratch_operands = 0 : i64, tpu.core_type = #tpu.core_type<tc>, window_params = [{transform_indices = @transform_0, window_bounds = array<i64: 256, 32>}, {pipeline_mode = #tpu.pipeline_mode<synchronous>, transform_indices = @transform_1, window_bounds = array<i64: 32, 32>}, {pipeline_mode = #tpu.pipeline_mode<synchronous>, transform_indices = @transform_2, window_bounds = array<i64: 1, 32>}, {transform_indices = @transform_3, window_bounds = array<i64: 256, 32>}, {transform_indices = @transform_4, window_bounds = array<i64: 256, 32>}]} {
    %c0 = arith.constant 0 : index
    %c0_0 = arith.constant 0 : index
    %0 = vector.load %arg1[%c0, %c0_0] : memref<256x32xbf16, #tpu.memory_space<vmem>>, vector<256x32xbf16>
    %c0_1 = arith.constant 0 : index
    %c0_2 = arith.constant 0 : index
    %1 = vector.load %arg2[%c0_1, %c0_2] : memref<32x32xbf16, #tpu.memory_space<vmem>>, vector<32x32xbf16>
    %cst = arith.constant dense<0.000000e+00> : vector<256x32xf32>
    %2 = tpu.matmul %0, %1, %cst {dimension_numbers = #tpu.dot_dimension_numbers<[1], [0], [0], [1], [0, 0, 1, 1], [], []>} : vector<256x32xbf16>, vector<32x32xbf16>, vector<256x32xf32> -> vector<256x32xf32>
    %c0_3 = arith.constant 0 : index
    %c0_4 = arith.constant 0 : index
    %3 = vector.load %arg3[%c0_3, %c0_4] : memref<1x32xf32, #tpu.memory_space<vmem>>, vector<1x32xf32>
    %4 = vector.broadcast %3 : vector<1x32xf32> to vector<256x32xf32>
    %5 = arith.addf %2, %4 : vector<256x32xf32>
    %cst_5 = arith.constant 0.000000e+00 : f32
    %6 = vector.broadcast %cst_5 : f32 to vector<256x32xf32>
    %7 = arith.maximumf %5, %6 : vector<256x32xf32>
    %c0_6 = arith.constant 0 : index
    %c0_7 = arith.constant 0 : index
    %8 = vector.load %arg4[%c0_6, %c0_7] : memref<256x32xbf16, #tpu.memory_space<vmem>>, vector<256x32xbf16>
    %9 = arith.extf %8 : vector<256x32xbf16> to vector<256x32xf32>
    %10 = arith.addf %7, %9 : vector<256x32xf32>
    %11 = arith.truncf %10 : vector<256x32xf32> to vector<256x32xbf16>
    %c0_8 = arith.constant 0 : index
    %c0_9 = arith.constant 0 : index
    %12 = vector.load %arg5[%c0_8, %c0_9] : memref<256x32xbf16, #tpu.memory_space<vmem>>, vector<256x32xbf16>
    tpu.vector_store %arg5[%c0_8, %c0_9], %11 {strides = array<i32>} : memref<256x32xbf16, #tpu.memory_space<vmem>>, vector<256x32xbf16>,
    return
  }
  func.func @transform_0(%arg0: i32) -> (i32, i32) {
    %c0_i32 = arith.constant 0 : i32
    %c0_i32_0 = arith.constant 0 : i32
    return %arg0, %c0_i32 : i32, i32
  }
  func.func @transform_1(%arg0: i32) -> (i32, i32) {
    %c0_i32 = arith.constant 0 : i32
    %c0_i32_0 = arith.constant 0 : i32
    %c0_i32_1 = arith.constant 0 : i32
    return %c0_i32, %c0_i32_0 : i32, i32
  }
  func.func @transform_2(%arg0: i32) -> (i32, i32) {
    %c0_i32 = arith.constant 0 : i32
    %c0_i32_0 = arith.constant 0 : i32
    %c0_i32_1 = arith.constant 0 : i32
    return %c0_i32, %c0_i32_0 : i32, i32
  }
  func.func @transform_3(%arg0: i32) -> (i32, i32) {
    %c0_i32 = arith.constant 0 : i32
    %c0_i32_0 = arith.constant 0 : i32
    return %arg0, %c0_i32 : i32, i32
  }
  func.func @transform_4(%arg0: i32) -> (i32, i32) {
    %c0_i32 = arith.constant 0 : i32
    %c0_i32_0 = arith.constant 0 : i32
    return %arg0, %c0_i32 : i32, i32
  }
}

module attributes {stable_mosaic.version = 11 : i64} {
  func.func @_dec_kernel(%arg0: i32, %arg1: memref<256x32xbf16, #tpu.memory_space<vmem>>, %arg2: memref<256x64xbf16, #tpu.memory_space<vmem>>, %arg3: memref<32x32xbf16, #tpu.memory_space<vmem>>, %arg4: memref<64x32xbf16, #tpu.memory_space<vmem>>, %arg5: memref<1x32xf32, #tpu.memory_space<vmem>>, %arg6: memref<256x32xbf16, #tpu.memory_space<vmem>>) attributes {dimension_semantics = [#tpu.dimension_semantics<parallel>], iteration_bounds = array<i64: 2>, scalar_prefetch = 0 : i64, scratch_operands = 0 : i64, tpu.core_type = #tpu.core_type<tc>, window_params = [{transform_indices = @transform_0, window_bounds = array<i64: 256, 32>}, {transform_indices = @transform_1, window_bounds = array<i64: 256, 64>}, {pipeline_mode = #tpu.pipeline_mode<synchronous>, transform_indices = @transform_2, window_bounds = array<i64: 32, 32>}, {pipeline_mode = #tpu.pipeline_mode<synchronous>, transform_indices = @transform_3, window_bounds = array<i64: 64, 32>}, {pipeline_mode = #tpu.pipeline_mode<synchronous>, transform_indices = @transform_4, window_bounds = array<i64: 1, 32>}, {transform_indices = @transform_5, window_bounds = array<i64: 256, 32>}]} {
    %c0 = arith.constant 0 : index
    %c0_0 = arith.constant 0 : index
    %0 = vector.load %arg1[%c0, %c0_0] : memref<256x32xbf16, #tpu.memory_space<vmem>>, vector<256x32xbf16>
    %c0_1 = arith.constant 0 : index
    %c0_2 = arith.constant 0 : index
    %1 = vector.load %arg3[%c0_1, %c0_2] : memref<32x32xbf16, #tpu.memory_space<vmem>>, vector<32x32xbf16>
    %cst = arith.constant dense<0.000000e+00> : vector<256x32xf32>
    %2 = tpu.matmul %0, %1, %cst {dimension_numbers = #tpu.dot_dimension_numbers<[1], [0], [0], [1], [0, 0, 1, 1], [], []>} : vector<256x32xbf16>, vector<32x32xbf16>, vector<256x32xf32> -> vector<256x32xf32>
    %c0_3 = arith.constant 0 : index
    %c0_4 = arith.constant 0 : index
    %3 = vector.load %arg2[%c0_3, %c0_4] : memref<256x64xbf16, #tpu.memory_space<vmem>>, vector<256x64xbf16>
    %c0_5 = arith.constant 0 : index
    %c0_6 = arith.constant 0 : index
    %4 = vector.load %arg4[%c0_5, %c0_6] : memref<64x32xbf16, #tpu.memory_space<vmem>>, vector<64x32xbf16>
    %cst_7 = arith.constant dense<0.000000e+00> : vector<256x32xf32>
    %5 = tpu.matmul %3, %4, %cst_7 {dimension_numbers = #tpu.dot_dimension_numbers<[1], [0], [0], [1], [0, 0, 1, 1], [], []>} : vector<256x64xbf16>, vector<64x32xbf16>, vector<256x32xf32> -> vector<256x32xf32>
    %6 = arith.addf %2, %5 : vector<256x32xf32>
    %c0_8 = arith.constant 0 : index
    %c0_9 = arith.constant 0 : index
    %7 = vector.load %arg5[%c0_8, %c0_9] : memref<1x32xf32, #tpu.memory_space<vmem>>, vector<1x32xf32>
    %8 = vector.broadcast %7 : vector<1x32xf32> to vector<256x32xf32>
    %9 = arith.addf %6, %8 : vector<256x32xf32>
    %cst_10 = arith.constant 0.000000e+00 : f32
    %10 = vector.broadcast %cst_10 : f32 to vector<256x32xf32>
    %11 = arith.maximumf %9, %10 : vector<256x32xf32>
    %12 = arith.truncf %11 : vector<256x32xf32> to vector<256x32xbf16>
    %c0_11 = arith.constant 0 : index
    %c0_12 = arith.constant 0 : index
    %13 = vector.load %arg6[%c0_11, %c0_12] : memref<256x32xbf16, #tpu.memory_space<vmem>>, vector<256x32xbf16>
    tpu.vector_store %arg6[%c0_11, %c0_12], %12 {strides = array<i32>} : memref<256x32xbf16, #tpu.memory_space<vmem>>, vector<256x32xbf16>,
    return
  }
  func.func @transform_0(%arg0: i32) -> (i32, i32) {
    %c0_i32 = arith.constant 0 : i32
    %c0_i32_0 = arith.constant 0 : i32
    return %arg0, %c0_i32 : i32, i32
  }
  func.func @transform_1(%arg0: i32) -> (i32, i32) {
    %c0_i32 = arith.constant 0 : i32
    %c0_i32_0 = arith.constant 0 : i32
    return %arg0, %c0_i32 : i32, i32
  }
  func.func @transform_2(%arg0: i32) -> (i32, i32) {
    %c0_i32 = arith.constant 0 : i32
    %c0_i32_0 = arith.constant 0 : i32
    %c0_i32_1 = arith.constant 0 : i32
    return %c0_i32, %c0_i32_0 : i32, i32
  }
  func.func @transform_3(%arg0: i32) -> (i32, i32) {
    %c0_i32 = arith.constant 0 : i32
    %c0_i32_0 = arith.constant 0 : i32
    %c0_i32_1 = arith.constant 0 : i32
    return %c0_i32, %c0_i32_0 : i32, i32
  }
  func.func @transform_4(%arg0: i32) -> (i32, i32) {
    %c0_i32 = arith.constant 0 : i32
    %c0_i32_0 = arith.constant 0 : i32
    %c0_i32_1 = arith.constant 0 : i32
    return %c0_i32, %c0_i32_0 : i32, i32
  }
  func.func @transform_5(%arg0: i32) -> (i32, i32) {
    %c0_i32 = arith.constant 0 : i32
    %c0_i32_0 = arith.constant 0 : i32
    return %arg0, %c0_i32 : i32, i32
  }
}

module attributes {stable_mosaic.version = 11 : i64} {
  func.func @_mm_bias_act_kernel(%arg0: i32, %arg1: memref<256x32xbf16, #tpu.memory_space<vmem>>, %arg2: memref<32x32xbf16, #tpu.memory_space<vmem>>, %arg3: memref<1x32xf32, #tpu.memory_space<vmem>>, %arg4: memref<256x32xbf16, #tpu.memory_space<vmem>>) attributes {dimension_semantics = [#tpu.dimension_semantics<parallel>], iteration_bounds = array<i64: 2>, scalar_prefetch = 0 : i64, scratch_operands = 0 : i64, tpu.core_type = #tpu.core_type<tc>, window_params = [{transform_indices = @transform_0, window_bounds = array<i64: 256, 32>}, {pipeline_mode = #tpu.pipeline_mode<synchronous>, transform_indices = @transform_1, window_bounds = array<i64: 32, 32>}, {pipeline_mode = #tpu.pipeline_mode<synchronous>, transform_indices = @transform_2, window_bounds = array<i64: 1, 32>}, {transform_indices = @transform_3, window_bounds = array<i64: 256, 32>}]} {
    %c0 = arith.constant 0 : index
    %c0_0 = arith.constant 0 : index
    %0 = vector.load %arg1[%c0, %c0_0] : memref<256x32xbf16, #tpu.memory_space<vmem>>, vector<256x32xbf16>
    %c0_1 = arith.constant 0 : index
    %c0_2 = arith.constant 0 : index
    %1 = vector.load %arg2[%c0_1, %c0_2] : memref<32x32xbf16, #tpu.memory_space<vmem>>, vector<32x32xbf16>
    %cst = arith.constant dense<0.000000e+00> : vector<256x32xf32>
    %2 = tpu.matmul %0, %1, %cst {dimension_numbers = #tpu.dot_dimension_numbers<[1], [0], [0], [1], [0, 0, 1, 1], [], []>} : vector<256x32xbf16>, vector<32x32xbf16>, vector<256x32xf32> -> vector<256x32xf32>
    %c0_3 = arith.constant 0 : index
    %c0_4 = arith.constant 0 : index
    %3 = vector.load %arg3[%c0_3, %c0_4] : memref<1x32xf32, #tpu.memory_space<vmem>>, vector<1x32xf32>
    %4 = vector.broadcast %3 : vector<1x32xf32> to vector<256x32xf32>
    %5 = arith.addf %2, %4 : vector<256x32xf32>
    %cst_5 = arith.constant 0.000000e+00 : f32
    %6 = vector.broadcast %cst_5 : f32 to vector<256x32xf32>
    %7 = arith.maximumf %5, %6 : vector<256x32xf32>
    %8 = arith.truncf %7 : vector<256x32xf32> to vector<256x32xbf16>
    %c0_6 = arith.constant 0 : index
    %c0_7 = arith.constant 0 : index
    %9 = vector.load %arg4[%c0_6, %c0_7] : memref<256x32xbf16, #tpu.memory_space<vmem>>, vector<256x32xbf16>
    tpu.vector_store %arg4[%c0_6, %c0_7], %8 {strides = array<i32>} : memref<256x32xbf16, #tpu.memory_space<vmem>>, vector<256x32xbf16>,
    return
  }
  func.func @transform_0(%arg0: i32) -> (i32, i32) {
    %c0_i32 = arith.constant 0 : i32
    %c0_i32_0 = arith.constant 0 : i32
    return %arg0, %c0_i32 : i32, i32
  }
  func.func @transform_1(%arg0: i32) -> (i32, i32) {
    %c0_i32 = arith.constant 0 : i32
    %c0_i32_0 = arith.constant 0 : i32
    %c0_i32_1 = arith.constant 0 : i32
    return %c0_i32, %c0_i32_0 : i32, i32
  }
  func.func @transform_2(%arg0: i32) -> (i32, i32) {
    %c0_i32 = arith.constant 0 : i32
    %c0_i32_0 = arith.constant 0 : i32
    %c0_i32_1 = arith.constant 0 : i32
    return %c0_i32, %c0_i32_0 : i32, i32
  }
  func.func @transform_3(%arg0: i32) -> (i32, i32) {
    %c0_i32 = arith.constant 0 : i32
    %c0_i32_0 = arith.constant 0 : i32
    return %arg0, %c0_i32 : i32, i32
  }
}

module attributes {stable_mosaic.version = 11 : i64} {
  func.func @_mm_bias_softmax2_kernel(%arg0: i32, %arg1: memref<256x32xbf16, #tpu.memory_space<vmem>>, %arg2: memref<32x2xbf16, #tpu.memory_space<vmem>>, %arg3: memref<1x2xf32, #tpu.memory_space<vmem>>, %arg4: memref<256x2xf32, #tpu.memory_space<vmem>>) attributes {dimension_semantics = [#tpu.dimension_semantics<parallel>], iteration_bounds = array<i64: 8>, scalar_prefetch = 0 : i64, scratch_operands = 0 : i64, tpu.core_type = #tpu.core_type<tc>, window_params = [{transform_indices = @transform_0, window_bounds = array<i64: 256, 32>}, {pipeline_mode = #tpu.pipeline_mode<synchronous>, transform_indices = @transform_1, window_bounds = array<i64: 32, 2>}, {pipeline_mode = #tpu.pipeline_mode<synchronous>, transform_indices = @transform_2, window_bounds = array<i64: 1, 2>}, {transform_indices = @transform_3, window_bounds = array<i64: 256, 2>}]} {
    %c0 = arith.constant 0 : index
    %c0_0 = arith.constant 0 : index
    %0 = vector.load %arg1[%c0, %c0_0] : memref<256x32xbf16, #tpu.memory_space<vmem>>, vector<256x32xbf16>
    %c0_1 = arith.constant 0 : index
    %c0_2 = arith.constant 0 : index
    %1 = vector.load %arg2[%c0_1, %c0_2] : memref<32x2xbf16, #tpu.memory_space<vmem>>, vector<32x2xbf16>
    %cst = arith.constant dense<0.000000e+00> : vector<256x2xf32>
    %2 = tpu.matmul %0, %1, %cst {dimension_numbers = #tpu.dot_dimension_numbers<[1], [0], [0], [1], [0, 0, 1, 1], [], []>} : vector<256x32xbf16>, vector<32x2xbf16>, vector<256x2xf32> -> vector<256x2xf32>
    %c0_3 = arith.constant 0 : index
    %c0_4 = arith.constant 0 : index
    %3 = vector.load %arg3[%c0_3, %c0_4] : memref<1x2xf32, #tpu.memory_space<vmem>>, vector<1x2xf32>
    %4 = vector.broadcast %3 : vector<1x2xf32> to vector<256x2xf32>
    %5 = arith.addf %2, %4 : vector<256x2xf32>
    %6 = vector.extract_strided_slice %5 {offsets = [0, 0], sizes = [256, 1], strides = [1, 1]} : vector<256x2xf32> to vector<256x1xf32>
    %7 = vector.extract_strided_slice %5 {offsets = [0, 1], sizes = [256, 1], strides = [1, 1]} : vector<256x2xf32> to vector<256x1xf32>
    %8 = arith.subf %6, %7 : vector<256x1xf32>
    %9 = arith.negf %8 : vector<256x1xf32>
    %10 = math.exp %9 : vector<256x1xf32>
    %cst_5 = arith.constant 1.000000e+00 : f32
    %11 = vector.broadcast %cst_5 : f32 to vector<256x1xf32>
    %12 = arith.addf %11, %10 : vector<256x1xf32>
    %13 = arith.divf %11, %12 : vector<256x1xf32>
    %14 = tpu.iota {dimensions = array<i32: 1>} : vector<256x2xi32>
    %c0_i32 = arith.constant 0 : i32
    %15 = vector.broadcast %c0_i32 : i32 to vector<256x2xi32>
    %16 = arith.cmpi eq, %14, %15 : vector<256x2xi32>
    %cst_6 = arith.constant 1.000000e+00 : f32
    %17 = vector.broadcast %cst_6 : f32 to vector<256x1xf32>
    %18 = arith.subf %17, %13 : vector<256x1xf32>
    %19 = vector.shape_cast %13 : vector<256x1xf32> to vector<256x1xf32>
    %20 = vector.broadcast %19 : vector<256x1xf32> to vector<256x2xf32>
    %21 = vector.shape_cast %18 : vector<256x1xf32> to vector<256x1xf32>
    %22 = vector.broadcast %21 : vector<256x1xf32> to vector<256x2xf32>
    %23 = arith.select %16, %20, %22 : vector<256x2xi1>, vector<256x2xf32>
    %c0_7 = arith.constant 0 : index
    %c0_8 = arith.constant 0 : index
    %24 = vector.load %arg4[%c0_7, %c0_8] : memref<256x2xf32, #tpu.memory_space<vmem>>, vector<256x2xf32>
    tpu.vector_store %arg4[%c0_7, %c0_8], %23 {strides = array<i32>} : memref<256x2xf32, #tpu.memory_space<vmem>>, vector<256x2xf32>,
    return
  }
  func.func @transform_0(%arg0: i32) -> (i32, i32) {
    %c0_i32 = arith.constant 0 : i32
    %c0_i32_0 = arith.constant 0 : i32
    return %arg0, %c0_i32 : i32, i32
  }
  func.func @transform_1(%arg0: i32) -> (i32, i32) {
    %c0_i32 = arith.constant 0 : i32
    %c0_i32_0 = arith.constant 0 : i32
    %c0_i32_1 = arith.constant 0 : i32
    return %c0_i32, %c0_i32_0 : i32, i32
  }
  func.func @transform_2(%arg0: i32) -> (i32, i32) {
    %c0_i32 = arith.constant 0 : i32
    %c0_i32_0 = arith.constant 0 : i32
    %c0_i32_1 = arith.constant 0 : i32
    return %c0_i32, %c0_i32_0 : i32, i32
  }
  func.func @transform_3(%arg0: i32) -> (i32, i32) {
    %c0_i32 = arith.constant 0 : i32
    %c0_i32_0 = arith.constant 0 : i32
    return %arg0, %c0_i32 : i32, i32
  }
}

</mosaic_0001>

<bundles_post_ra>
// kernel: lanet_forward.20
= control target key start
LH: loop header
LB: loop body
LE: loop exit
PB: predicated region body
PF: predicated region fallthrough
CT: control target
= control target key end

     0   :  { %s973_s12 = smov 0   ;;  %s1137_s0 = inlined_call_operand.vmem [shape: bf16[512,8], index: 0, kind: input, shape index: {}]   ;;  %s1138_s1 = inlined_call_operand.vmem [shape: bf16[8,32], index: 1, kind: input, shape index: {}]   ;;  %s1139_s2 = inlined_call_operand.vmem [shape: f32[1,32], index: 2, kind: input, shape index: {}]   ;;  %s1140_s3 = inlined_call_operand.vmem [shape: bf16[512,32], index: 3, kind: output, shape index: {}]  }
   0x1 LB: > { %s758_s13 = sadd.s32 4294967295, %s951_s12   ;;  %p762_p0 = scmp.ge.s32.totalorder %s951_s12, 1  ;;  %s951_s12 = sphi %s973_s12, %s13_s12  }
   0x2   : > { %p138_p1 = scmp.lt.s32.totalorder %s951_s12, 3 }
   0x4   : > { %p139_p2 = pnand %p762_p0, %p138_p1 }
   0x5   : > { %v207_v0 = vld [vmem:[%s1138_s1] sm:$0xf] (!%p139_p2)  ;;  %vm344_vm0 = vcmask (!%p139_p2), 1043456   ;;  %s763_s16 = sshll.u32 (!%p139_p2), %s758_s13, 5  ;;  %vm295_vm1 = vcmask (!%p139_p2), 64512   ;;  %vm669_vm2 = vcmask (!%p139_p2), 257024  }
   0x6   : > { %142 = sbr.rel (%p139_p2) target bundleno = 265 (0x109), region = 32  ;;  %919 = vmatprep.subr.msk.bf16.mxu0 (!%p139_p2), %vm344_vm0, %v207_v0  ;;  %920 = vmatprep.subr.msk.bf16.mxu1 (!%p139_p2), %vm344_vm0, %v207_v0  ;;  %v346_v1 = vsel (!%p139_p2), %vm344_vm0, %v207_v0, 0  ;;  %p163_p3 = scmp.lt.s32.totalorder (!%p139_p2), %s763_s16, 63  ;;  %v1029_v18 = vld [vmem:[%s1139_s2] ss:$0 sm:$0xff] (!%p139_p2) }
   0x7   : > { %884 = vmatpush3.bf16.msra.mxu0 (!%p139_p2), %v346_v1  ;;  %918 = vmatpush3.bf16.msra.mxu1 (!%p139_p2), %v346_v1 }
   0xd   : > { %s1142_s16 = smov (!%p163_p3, %s763_s16), 63 }
   0xe   : > { %s764_s17 = sshll.u32 %s1142_s16, 2 }
   0xf   : > { %s992_s20 = scalar_lea.vmem %s1137_s0, %s764_s17  ;;  %s1041_s25 = scalar_lea.vmem %s1140_s3, %s764_s17 }
  0x10   : > { %v929_v2 = vld [vmem:[%s992_s20] sm:$0xff]   ;;  %v931_v4 = vld [vmem:[%s992_s20 + $0x8] sm:$0xff]   ;;  %v933_v6 = vld [vmem:[%s992_s20 + $0x10] sm:$0xff]  }
  0x11   : > { %v930_v3 = vld [vmem:[%s992_s20 + $0x40] sm:$0xff]   ;;  %885 = vmatprep.mubr.msk.bf16.mxu0 %vm295_vm1, %v929_v2  ;;  %v932_v5 = vld [vmem:[%s992_s20 + $0x48] sm:$0xff]   ;;  %v934_v7 = vld [vmem:[%s992_s20 + $0x50] sm:$0xff]  }
  0x12   : > { %901 = vmatprep.mubr.msk.bf16.mxu1 %vm295_vm1, %v930_v3  ;;  %886 = vmatmul.mubr.msk.bf16.vlgmr.msra.gmra.mrb[0].mxu0 %vm295_vm1, %v931_v4  ;;  %v935_v8 = vld [vmem:[%s992_s20 + $0x18] sm:$0xff]   ;;  %v937_v10 = vld [vmem:[%s992_s20 + $0x20] sm:$0xff]   ;;  %v939_v12 = vld [vmem:[%s992_s20 + $0x28] sm:$0xff]  }
  0x13   : > { %902 = vmatmul.mubr.msk.bf16.vlgmr.msra.gmra.mrb[0].mxu1 %vm295_vm1, %v932_v5  ;;  %889 = vmatprep.mubr.msk.bf16.mxu0 %vm295_vm1, %v933_v6  ;;  %v936_v9 = vld [vmem:[%s992_s20 + $0x58] sm:$0xff]   ;;  %v938_v11 = vld [vmem:[%s992_s20 + $0x60] sm:$0xff]   ;;  %v940_v13 = vld [vmem:[%s992_s20 + $0x68] sm:$0xff]  }
  0x14   : > { %905 = vmatprep.mubr.msk.bf16.mxu1 %vm295_vm1, %v934_v7  ;;  %v941_v14 = vld [vmem:[%s992_s20 + $0x30] sm:$0xff]   ;;  %v943_v16 = vld [vmem:[%s992_s20 + $0x38] sm:$0xff]  }
  0x15   : > { %v942_v15 = vld [vmem:[%s992_s20 + $0x70] sm:$0xff]   ;;  %v944_v17 = vld [vmem:[%s992_s20 + $0x78] sm:$0xff]  }
  0x1a   : > { %890 = vmatmul.mubr.msk.bf16.gmra.mrb[4].mxu0 %vm295_vm1, %v935_v8 }
  0x1b   : > { %906 = vmatmul.mubr.msk.bf16.gmra.mrb[4].mxu1 %vm295_vm1, %v936_v9  ;;  %893 = vmatprep.mubr.msk.bf16.mxu0 %vm295_vm1, %v937_v10 }
  0x1c   : > { %909 = vmatprep.mubr.msk.bf16.mxu1 %vm295_vm1, %v938_v11 }
  0x22   : > { %894 = vmatmul.mubr.msk.bf16.gmra.mrb[8].mxu0 %vm295_vm1, %v939_v12 }
  0x23   : > { %910 = vmatmul.mubr.msk.bf16.gmra.mrb[8].mxu1 %vm295_vm1, %v940_v13  ;;  %897 = vmatprep.mubr.msk.bf16.mxu0 %vm295_vm1, %v941_v14 }
  0x24   : > { %913 = vmatprep.mubr.msk.bf16.mxu1 %vm295_vm1, %v942_v15 }
  0x2a   : > { %898 = vmatmul.mubr.msk.bf16.gmra.mrb[12].mxu0 %vm295_vm1, %v943_v16 }
  0x2b   : > { %914 = vmatmul.mubr.msk.bf16.gmra.mrb[12].mxu1 %vm295_vm1, %v944_v17 }
  0xe5   : > { %v887_v19 = vpop.f32.mrb[0].mxu0 }
  0xe6   : > { %v391_v20 = vadd.f32 %v887_v19, %v1029_v18  ;;  %v903_v21 = vpop.f32.mrb[0].mxu1  ;;  %v382_v22 = vpop.f32.mrb[1].mxu0 }
  0xe7   : > { %v455_v23 = vadd.f32 %v903_v21, %v1029_v18  ;;  %v383_v24 = vadd.f32 %v1029_v18, %v382_v22  ;;  %v446_v25 = vpop.f32.mrb[1].mxu1  ;;  %v888_v26 = vpop.f32.mrb[2].mxu0 }
  0xe8   : > { %v511_v27 = vmax.f32 %v391_v20, 0.0  ;;  %v447_v28 = vadd.f32 %v1029_v18, %v446_v25  ;;  %v394_v29 = vadd.f32 %v888_v26, %v1029_v18  ;;  %v904_v30 = vpop.f32.mrb[2].mxu1  ;;  %v385_v31 = vpop.f32.mrb[3].mxu0 }
  0xe9   : > { %v527_v32 = vmax.f32 %v455_v23, 0.0  ;;  %v509_v33 = vmax.f32 %v383_v24, 0.0  ;;  %v458_v34 = vadd.f32 %v904_v30, %v1029_v18  ;;  %v386_v35 = vadd.f32 %v1029_v18, %v385_v31  ;;  %v449_v36 = vpop.f32.mrb[3].mxu1 }
  0xea   : > { %v836_v37 = vpack.c.bf16 %v511_v27, %v511_v27  ;;  %v525_v38 = vmax.f32 %v447_v28, 0.0  ;;  %v512_v39 = vmax.f32 %v394_v29, 0.0  ;;  %v450_v40 = vadd.f32 %v1029_v18, %v449_v36 }
  0xeb   : > { %v852_v41 = vpack.c.bf16 %v527_v32, %v527_v32  ;;  %v834_v42 = vpack.c.bf16 %v509_v33, %v509_v33  ;;  %v528_v43 = vmax.f32 %v458_v34, 0.0  ;;  %v510_v44 = vmax.f32 %v386_v35, 0.0 }
  0xec   : > { %672 = vst.msk [vmem:[%s1041_s25 + $0x8] sm:$0xf] %vm669_vm2, %v836_v37  ;;  %v850_v45 = vpack.c.bf16 %v525_v38, %v525_v38  ;;  %v837_v46 = vpack.c.bf16 %v512_v39, %v512_v39  ;;  %v526_v47 = vmax.f32 %v450_v40, 0.0 }
  0xed   : > { %688 = vst.msk [vmem:[%s1041_s25 + $0x48] sm:$0xf] %vm669_vm2, %v852_v41  ;;  %670 = vst.msk [vmem:[%s1041_s25] sm:$0xf] %vm669_vm2, %v834_v42  ;;  %v853_v48 = vpack.c.bf16 %v528_v43, %v528_v43  ;;  %v835_v49 = vpack.c.bf16 %v510_v44, %v510_v44  ;;  %v891_v50 = vpop.f32.mrb[4].mxu0 }
  0xee   : > { %686 = vst.msk [vmem:[%s1041_s25 + $0x40] sm:$0xf] %vm669_vm2, %v850_v45  ;;  %673 = vst.msk [vmem:[%s1041_s25 + $0xc] sm:$0xf] %vm669_vm2, %v837_v46  ;;  %v851_v51 = vpack.c.bf16 %v526_v47, %v526_v47  ;;  %v407_v52 = vadd.f32 %v891_v50, %v1029_v18  ;;  %v907_v53 = vpop.f32.mrb[4].mxu1  ;;  %v398_v54 = vpop.f32.mrb[5].mxu0 }
  0xef   : > { %689 = vst.msk [vmem:[%s1041_s25 + $0x4c] sm:$0xf] %vm669_vm2, %v853_v48  ;;  %671 = vst.msk [vmem:[%s1041_s25 + $0x4] sm:$0xf] %vm669_vm2, %v835_v49  ;;  %v471_v55 = vadd.f32 %v907_v53, %v1029_v18  ;;  %v399_v56 = vadd.f32 %v1029_v18, %v398_v54  ;;  %v462_v57 = vpop.f32.mrb[5].mxu1  ;;  %v892_v58 = vpop.f32.mrb[6].mxu0 }
  0xf0   : > { %687 = vst.msk [vmem:[%s1041_s25 + $0x44] sm:$0xf] %vm669_vm2, %v851_v51  ;;  %v515_v59 = vmax.f32 %v407_v52, 0.0  ;;  %v463_v60 = vadd.f32 %v1029_v18, %v462_v57  ;;  %v410_v61 = vadd.f32 %v892_v58, %v1029_v18  ;;  %v908_v62 = vpop.f32.mrb[6].mxu1  ;;  %v401_v63 = vpop.f32.mrb[7].mxu0 }
  0xf1   : > { %v531_v0 = vmax.f32 %v471_v55, 0.0  ;;  %v513_v1 = vmax.f32 %v399_v56, 0.0  ;;  %v474_v2 = vadd.f32 %v908_v62, %v1029_v18  ;;  %v402_v3 = vadd.f32 %v1029_v18, %v401_v63  ;;  %v465_v4 = vpop.f32.mrb[7].mxu1 }
  0xf2   : > { %v840_v5 = vpack.c.bf16 %v515_v59, %v515_v59  ;;  %v529_v6 = vmax.f32 %v463_v60, 0.0  ;;  %v516_v7 = vmax.f32 %v410_v61, 0.0  ;;  %v466_v8 = vadd.f32 %v1029_v18, %v465_v4 }
  0xf3   : > { %v856_v9 = vpack.c.bf16 %v531_v0, %v531_v0  ;;  %v838_v10 = vpack.c.bf16 %v513_v1, %v513_v1  ;;  %v532_v11 = vmax.f32 %v474_v2, 0.0  ;;  %v514_v12 = vmax.f32 %v402_v3, 0.0 }
  0xf4   : > { %676 = vst.msk [vmem:[%s1041_s25 + $0x18] sm:$0xf] %vm669_vm2, %v840_v5  ;;  %v854_v13 = vpack.c.bf16 %v529_v6, %v529_v6  ;;  %v841_v14 = vpack.c.bf16 %v516_v7, %v516_v7  ;;  %v530_v15 = vmax.f32 %v466_v8, 0.0 }
  0xf5   : > { %692 = vst.msk [vmem:[%s1041_s25 + $0x58] sm:$0xf] %vm669_vm2, %v856_v9  ;;  %674 = vst.msk [vmem:[%s1041_s25 + $0x10] sm:$0xf] %vm669_vm2, %v838_v10  ;;  %v857_v16 = vpack.c.bf16 %v532_v11, %v532_v11  ;;  %v839_v17 = vpack.c.bf16 %v514_v12, %v514_v12  ;;  %v895_v19 = vpop.f32.mrb[8].mxu0 }
  0xf6   : > { %690 = vst.msk [vmem:[%s1041_s25 + $0x50] sm:$0xf] %vm669_vm2, %v854_v13  ;;  %677 = vst.msk [vmem:[%s1041_s25 + $0x1c] sm:$0xf] %vm669_vm2, %v841_v14  ;;  %v855_v20 = vpack.c.bf16 %v530_v15, %v530_v15  ;;  %v423_v21 = vadd.f32 %v895_v19, %v1029_v18  ;;  %v911_v22 = vpop.f32.mrb[8].mxu1  ;;  %v414_v23 = vpop.f32.mrb[9].mxu0 }
  0xf7   : > { %693 = vst.msk [vmem:[%s1041_s25 + $0x5c] sm:$0xf] %vm669_vm2, %v857_v16  ;;  %675 = vst.msk [vmem:[%s1041_s25 + $0x14] sm:$0xf] %vm669_vm2, %v839_v17  ;;  %v487_v24 = vadd.f32 %v911_v22, %v1029_v18  ;;  %v415_v25 = vadd.f32 %v1029_v18, %v414_v23  ;;  %v478_v26 = vpop.f32.mrb[9].mxu1  ;;  %v896_v27 = vpop.f32.mrb[10].mxu0 }
  0xf8   : > { %691 = vst.msk [vmem:[%s1041_s25 + $0x54] sm:$0xf] %vm669_vm2, %v855_v20  ;;  %v519_v28 = vmax.f32 %v423_v21, 0.0  ;;  %v479_v29 = vadd.f32 %v1029_v18, %v478_v26  ;;  %v426_v30 = vadd.f32 %v896_v27, %v1029_v18  ;;  %v912_v31 = vpop.f32.mrb[10].mxu1  ;;  %v417_v32 = vpop.f32.mrb[11].mxu0 }
  0xf9   : > { %v535_v33 = vmax.f32 %v487_v24, 0.0  ;;  %v517_v34 = vmax.f32 %v415_v25, 0.0  ;;  %v490_v35 = vadd.f32 %v912_v31, %v1029_v18  ;;  %v418_v36 = vadd.f32 %v1029_v18, %v417_v32  ;;  %v481_v37 = vpop.f32.mrb[11].mxu1 }
  0xfa   : > { %v844_v38 = vpack.c.bf16 %v519_v28, %v519_v28  ;;  %v533_v39 = vmax.f32 %v479_v29, 0.0  ;;  %v520_v40 = vmax.f32 %v426_v30, 0.0  ;;  %v482_v41 = vadd.f32 %v1029_v18, %v481_v37 }
  0xfb   : > { %v860_v42 = vpack.c.bf16 %v535_v33, %v535_v33  ;;  %v842_v43 = vpack.c.bf16 %v517_v34, %v517_v34  ;;  %v536_v44 = vmax.f32 %v490_v35, 0.0  ;;  %v518_v45 = vmax.f32 %v418_v36, 0.0 }
  0xfc   : > { %680 = vst.msk [vmem:[%s1041_s25 + $0x28] sm:$0xf] %vm669_vm2, %v844_v38  ;;  %v858_v46 = vpack.c.bf16 %v533_v39, %v533_v39  ;;  %v845_v47 = vpack.c.bf16 %v520_v40, %v520_v40  ;;  %v534_v48 = vmax.f32 %v482_v41, 0.0 }
  0xfd   : > { %696 = vst.msk [vmem:[%s1041_s25 + $0x68] sm:$0xf] %vm669_vm2, %v860_v42  ;;  %678 = vst.msk [vmem:[%s1041_s25 + $0x20] sm:$0xf] %vm669_vm2, %v842_v43  ;;  %v861_v49 = vpack.c.bf16 %v536_v44, %v536_v44  ;;  %v843_v50 = vpack.c.bf16 %v518_v45, %v518_v45  ;;  %v899_v51 = vpop.f32.mrb[12].mxu0 }
  0xfe   : > { %694 = vst.msk [vmem:[%s1041_s25 + $0x60] sm:$0xf] %vm669_vm2, %v858_v46  ;;  %681 = vst.msk [vmem:[%s1041_s25 + $0x2c] sm:$0xf] %vm669_vm2, %v845_v47  ;;  %v859_v52 = vpack.c.bf16 %v534_v48, %v534_v48  ;;  %v439_v53 = vadd.f32 %v899_v51, %v1029_v18  ;;  %v915_v54 = vpop.f32.mrb[12].mxu1  ;;  %v430_v55 = vpop.f32.mrb[13].mxu0 }
  0xff   : > { %697 = vst.msk [vmem:[%s1041_s25 + $0x6c] sm:$0xf] %vm669_vm2, %v861_v49  ;;  %679 = vst.msk [vmem:[%s1041_s25 + $0x24] sm:$0xf] %vm669_vm2, %v843_v50  ;;  %v503_v56 = vadd.f32 %v915_v54, %v1029_v18  ;;  %v431_v57 = vadd.f32 %v1029_v18, %v430_v55  ;;  %v494_v58 = vpop.f32.mrb[13].mxu1  ;;  %v900_v59 = vpop.f32.mrb[14].mxu0 }
 0x100   : > { %695 = vst.msk [vmem:[%s1041_s25 + $0x64] sm:$0xf] %vm669_vm2, %v859_v52  ;;  %v523_v60 = vmax.f32 %v439_v53, 0.0  ;;  %v495_v61 = vadd.f32 %v1029_v18, %v494_v58  ;;  %v442_v62 = vadd.f32 %v900_v59, %v1029_v18  ;;  %v916_v63 = vpop.f32.mrb[14].mxu1  ;;  %v433_v0 = vpop.f32.mrb[15].mxu0 }
 0x101   : > { %v539_v1 = vmax.f32 %v503_v56, 0.0  ;;  %v521_v2 = vmax.f32 %v431_v57, 0.0  ;;  %v506_v3 = vadd.f32 %v916_v63, %v1029_v18  ;;  %v434_v4 = vadd.f32 %v1029_v18, %v433_v0  ;;  %v497_v5 = vpop.f32.mrb[15].mxu1 }
 0x102   : > { %v848_v6 = vpack.c.bf16 %v523_v60, %v523_v60  ;;  %v537_v7 = vmax.f32 %v495_v61, 0.0  ;;  %v524_v8 = vmax.f32 %v442_v62, 0.0  ;;  %v498_v9 = vadd.f32 %v1029_v18, %v497_v5 }
 0x103   : > { %v864_v10 = vpack.c.bf16 %v539_v1, %v539_v1  ;;  %v846_v11 = vpack.c.bf16 %v521_v2, %v521_v2  ;;  %v540_v12 = vmax.f32 %v506_v3, 0.0  ;;  %v522_v13 = vmax.f32 %v434_v4, 0.0 }
 0x104   : > { %684 = vst.msk [vmem:[%s1041_s25 + $0x38] sm:$0xf] %vm669_vm2, %v848_v6  ;;  %v862_v14 = vpack.c.bf16 %v537_v7, %v537_v7  ;;  %v849_v15 = vpack.c.bf16 %v524_v8, %v524_v8  ;;  %v538_v16 = vmax.f32 %v498_v9, 0.0 }
 0x105   : > { %700 = vst.msk [vmem:[%s1041_s25 + $0x78] sm:$0xf] %vm669_vm2, %v864_v10  ;;  %682 = vst.msk [vmem:[%s1041_s25 + $0x30] sm:$0xf] %vm669_vm2, %v846_v11  ;;  %v865_v17 = vpack.c.bf16 %v540_v12, %v540_v12  ;;  %v847_v19 = vpack.c.bf16 %v522_v13, %v522_v13 }
 0x106   : > { %698 = vst.msk [vmem:[%s1041_s25 + $0x70] sm:$0xf] %vm669_vm2, %v862_v14  ;;  %685 = vst.msk [vmem:[%s1041_s25 + $0x3c] sm:$0xf] %vm669_vm2, %v849_v15  ;;  %v863_v18 = vpack.c.bf16 %v538_v16, %v538_v16 }
 0x107   : > { %701 = vst.msk [vmem:[%s1041_s25 + $0x7c] sm:$0xf] %vm669_vm2, %v865_v17  ;;  %683 = vst.msk [vmem:[%s1041_s25 + $0x34] sm:$0xf] %vm669_vm2, %v847_v19 }
 0x108   : > { %699 = vst.msk [vmem:[%s1041_s25 + $0x74] sm:$0xf] %vm669_vm2, %v863_v18 }
 0x109 PF: > { %s13_s12 = sadd.s32 1, %s951_s12  }
 0x10a   : > { %p10_p4 = scmp.ge.s32.totalorder %s13_s12, 4  }
 0x10c   :  { %12 = sbr.rel (!%p10_p4) target bundleno = 1 (0x1), region = 62 }

// kernel: lanet_forward.25
= control target key start
LH: loop header
LB: loop body
LE: loop exit
PB: predicated region body
PF: predicated region fallthrough
CT: control target
= control target key end

     0   :  { %s766_s12 = smov 0   ;;  %s1138_s0 = inlined_call_operand.vmem [shape: bf16[2,256,32], index: 0, kind: input, shape index: {}]   ;;  %s1139_s1 = inlined_call_operand.vmem [shape: f32[1,1,32], index: 1, kind: input, shape index: {}]   ;;  %s1140_s2 = inlined_call_operand.vmem [shape: f32[1,1,32], index: 2, kind: input, shape index: {}]   ;;  %s1141_s3 = inlined_call_operand.vmem [shape: bf16[2,256,32], index: 3, kind: output, shape index: {}]  }
   0x1 LB: > { %s569_s13 = sadd.s32 4294967295, %s744_s12   ;;  %p573_p0 = scmp.ge.s32.totalorder %s744_s12, 1  ;;  %s744_s12 = sphi %s766_s12, %s13_s12  }
   0x2   : > { %p137_p1 = scmp.lt.s32.totalorder %s744_s12, 3 }
   0x4   : > { %p138_p2 = pnand %p573_p0, %p137_p1 }
   0x5   : > { %p161_p3 = scmp.lt.s32.totalorder (!%p138_p2), %s569_s13, 1  ;;  %vm235_vm0 = vcmask (!%p138_p2), 261120   ;;  %vm481_vm1 = vcmask (!%p138_p2), 257024  }
   0x6   : > { %141 = sbr.rel (%p138_p2) target bundleno = 150 (0x96), region = 32 }
   0xd   : > { %s1143_s13 = smov (!%p161_p3, %s569_s13), 1 }
   0xe   : > { %s613_s14 = sshll.u32 %s1143_s13, 7 }
   0xf   : > { %s782_s17 = scalar_lea.vmem %s1138_s0, %s613_s14  ;;  %s985_s24 = scalar_lea.vmem %s1141_s3, %s613_s14 }
  0x10   : > { %v785_v0 = vld [vmem:[%s782_s17] sm:$0xff]   ;;  %v788_v1 = vld [vmem:[%s782_s17 + $0x8] sm:$0xff]   ;;  %v794_v5 = vld [vmem:[%s782_s17 + $0x10] sm:$0xff]  }
  0x11   : > { %v649_v2 = vunpack.c.l.bf16 %v785_v0  ;;  %v650_v3 = vunpack.c.h.bf16 %v785_v0  ;;  %v653_v4 = vunpack.c.l.bf16 %v788_v1  ;;  %v654_v6 = vunpack.c.h.bf16 %v788_v1  ;;  %v808_v11 = vld [vmem:[%s782_s17 + $0x18] sm:$0xff]   ;;  %v819_v18 = vld [vmem:[%s782_s17 + $0x20] sm:$0xff]   ;;  %v830_v25 = vld [vmem:[%s782_s17 + $0x28] sm:$0xff]  }
  0x12   : > { %v657_v7 = vunpack.c.l.bf16 %v794_v5  ;;  %v658_v13 = vunpack.c.h.bf16 %v794_v5  ;;  %v661_v16 = vunpack.c.l.bf16 %v808_v11  ;;  %v662_v20 = vunpack.c.h.bf16 %v808_v11  ;;  %v841_v32 = vld [vmem:[%s782_s17 + $0x30] sm:$0xff]   ;;  %v852_v39 = vld [vmem:[%s782_s17 + $0x38] sm:$0xff]   ;;  %v863_v46 = vld [vmem:[%s782_s17 + $0x40] sm:$0xff]  }
  0x13   : > { %v236_v8 = vsel %vm235_vm0, %v649_v2, 0.0  ;;  %v237_v9 = vsel %vm235_vm0, %v650_v3, 0.0  ;;  %v239_v10 = vsel %vm235_vm0, %v653_v4, 0.0  ;;  %v241_v14 = vsel %vm235_vm0, %v654_v6, 0.0  ;;  %v874_v53 = vld [vmem:[%s782_s17 + $0x48] sm:$0xff]   ;;  %v885_v60 = vld [vmem:[%s782_s17 + $0x50] sm:$0xff]  }
  0x14   : > { %v238_v12 = vadd.f32 %v237_v9, %v236_v8  ;;  %v243_v17 = vsel %vm235_vm0, %v657_v7, 0.0  ;;  %v245_v21 = vsel %vm235_vm0, %v658_v13, 0.0  ;;  %v665_v23 = vunpack.c.l.bf16 %v819_v18 }
  0x15   : > { %v247_v24 = vsel %vm235_vm0, %v661_v16, 0.0  ;;  %v666_v27 = vunpack.c.h.bf16 %v819_v18  ;;  %v249_v28 = vsel %vm235_vm0, %v662_v20, 0.0  ;;  %v669_v30 = vunpack.c.l.bf16 %v830_v25 }
  0x16   : > { %v240_v15 = vadd.f32 %v239_v10, %v238_v12  ;;  %v251_v31 = vsel %vm235_vm0, %v665_v23, 0.0  ;;  %v670_v34 = vunpack.c.h.bf16 %v830_v25  ;;  %v673_v37 = vunpack.c.l.bf16 %v841_v32  ;;  %v896_v12 = vld [vmem:[%s782_s17 + $0x58] sm:$0xff]  }
  0x17   : > { %v253_v35 = vsel %vm235_vm0, %v666_v27, 0.0  ;;  %v255_v38 = vsel %vm235_vm0, %v669_v30, 0.0  ;;  %v674_v41 = vunpack.c.h.bf16 %v841_v32  ;;  %v677_v44 = vunpack.c.l.bf16 %v852_v39 }
  0x18   : > { %v242_v19 = vadd.f32 %v241_v14, %v240_v15  ;;  %v257_v42 = vsel %vm235_vm0, %v670_v34, 0.0  ;;  %v259_v45 = vsel %vm235_vm0, %v673_v37, 0.0  ;;  %v678_v48 = vunpack.c.h.bf16 %v852_v39 }
  0x19   : > { %v261_v49 = vsel %vm235_vm0, %v674_v41, 0.0  ;;  %v681_v51 = vunpack.c.l.bf16 %v863_v46  ;;  %v263_v52 = vsel %vm235_vm0, %v677_v44, 0.0  ;;  %v682_v55 = vunpack.c.h.bf16 %v863_v46 }
  0x1a   : > { %v244_v22 = vadd.f32 %v243_v17, %v242_v19  ;;  %v265_v56 = vsel %vm235_vm0, %v678_v48, 0.0  ;;  %v685_v58 = vunpack.c.l.bf16 %v874_v53  ;;  %v686_v62 = vunpack.c.h.bf16 %v874_v53 }
  0x1b   : > { %v267_v59 = vsel %vm235_vm0, %v681_v51, 0.0  ;;  %v269_v63 = vsel %vm235_vm0, %v682_v55, 0.0  ;;  %v689_v9 = vunpack.c.l.bf16 %v885_v60  ;;  %v690_v15 = vunpack.c.h.bf16 %v885_v60 }
  0x1c   : > { %v246_v26 = vadd.f32 %v245_v21, %v244_v22  ;;  %v271_v10 = vsel %vm235_vm0, %v685_v58, 0.0  ;;  %v273_v17 = vsel %vm235_vm0, %v686_v62, 0.0  ;;  %v693_v21 = vunpack.c.l.bf16 %v896_v12 }
  0x1d   : > { %v275_v22 = vsel %vm235_vm0, %v689_v9, 0.0 }
  0x1e   : > { %v248_v29 = vadd.f32 %v247_v24, %v246_v26  ;;  %v907_v24 = vld [vmem:[%s782_s17 + $0x60] sm:$0xff]  }
  0x20   : > { %v250_v33 = vadd.f32 %v249_v28, %v248_v29  ;;  %v694_v28 = vunpack.c.h.bf16 %v896_v12  ;;  %v277_v29 = vsel %vm235_vm0, %v690_v15, 0.0 }
  0x22   : > { %v252_v36 = vadd.f32 %v251_v31, %v250_v33  ;;  %v697_v33 = vunpack.c.l.bf16 %v907_v24 }
  0x24   : > { %v254_v40 = vadd.f32 %v253_v35, %v252_v36  ;;  %v279_v35 = vsel %vm235_vm0, %v693_v21, 0.0  ;;  %v918_v36 = vld [vmem:[%s782_s17 + $0x68] sm:$0xff]  }
  0x26   : > { %v256_v43 = vadd.f32 %v255_v38, %v254_v40  ;;  %v698_v40 = vunpack.c.h.bf16 %v907_v24 }
  0x28   : > { %v258_v47 = vadd.f32 %v257_v42, %v256_v43  ;;  %v281_v42 = vsel %vm235_vm0, %v694_v28, 0.0 }
  0x2a   : > { %v260_v50 = vadd.f32 %v259_v45, %v258_v47  ;;  %v701_v45 = vunpack.c.l.bf16 %v918_v36  ;;  %v283_v47 = vsel %vm235_vm0, %v697_v33, 0.0 }
  0x2c   : > { %v262_v54 = vadd.f32 %v261_v49, %v260_v50  ;;  %v929_v49 = vld [vmem:[%s782_s17 + $0x70] sm:$0xff]  }
  0x2e   : > { %v264_v57 = vadd.f32 %v263_v52, %v262_v54  ;;  %v702_v52 = vunpack.c.h.bf16 %v918_v36  ;;  %v285_v54 = vsel %vm235_vm0, %v698_v40, 0.0 }
  0x30   : > { %v266_v61 = vadd.f32 %v265_v56, %v264_v57  ;;  %v705_v57 = vunpack.c.l.bf16 %v929_v49 }
  0x32   : > { %v268_v8 = vadd.f32 %v267_v59, %v266_v61  ;;  %v287_v59 = vsel %vm235_vm0, %v701_v45, 0.0  ;;  %v940_v61 = vld [vmem:[%s782_s17 + $0x78] sm:$0xff]  }
  0x34   : > { %v270_v14 = vadd.f32 %v269_v63, %v268_v8  ;;  %v706_v8 = vunpack.c.h.bf16 %v929_v49 }
  0x36   : > { %v272_v19 = vadd.f32 %v271_v10, %v270_v14  ;;  %v289_v10 = vsel %vm235_vm0, %v702_v52, 0.0 }
  0x38   : > { %v274_v26 = vadd.f32 %v273_v17, %v272_v19  ;;  %v709_v17 = vunpack.c.l.bf16 %v940_v61  ;;  %v291_v19 = vsel %vm235_vm0, %v705_v57, 0.0 }
  0x3a   : > { %v276_v31 = vadd.f32 %v275_v22, %v274_v26  ;;  %v710_v26 = vunpack.c.h.bf16 %v940_v61 }
  0x3c   : > { %v278_v38 = vadd.f32 %v277_v29, %v276_v31  ;;  %v293_v29 = vsel %vm235_vm0, %v706_v8, 0.0 }
  0x3e   : > { %v280_v43 = vadd.f32 %v279_v35, %v278_v38  ;;  %v295_v35 = vsel %vm235_vm0, %v709_v17, 0.0 }
  0x40   : > { %v282_v50 = vadd.f32 %v281_v42, %v280_v43  ;;  %v297_v42 = vsel %vm235_vm0, %v710_v26, 0.0 }
  0x42   : > { %v284_v56 = vadd.f32 %v283_v47, %v282_v50 }
  0x44   : > { %v286_v63 = vadd.f32 %v285_v54, %v284_v56 }
  0x46   : > { %v288_v14 = vadd.f32 %v287_v59, %v286_v63 }
  0x48   : > { %v290_v22 = vadd.f32 %v289_v10, %v288_v14  ;;  %v307_v14 = vld [vmem:[%s1139_s1] sm:$0x1] }
  0x4a   : > { %v292_v31 = vadd.f32 %v291_v19, %v290_v22  ;;  %v309_v22 = vld [vmem:[%s1140_s2] sm:$0x1] }
  0x4c   : > { %v294_v38 = vadd.f32 %v293_v29, %v292_v31 }
  0x4e   : > { %v296_v43 = vadd.f32 %v295_v35, %v294_v38 }
  0x50   : > { %v298_v47 = vadd.f32 %v297_v42, %v296_v43  ;;  %v317_v43 = vlaneseq }
  0x52   : > { %v299_v50 = vrot.slane %v298_v47, 4 }
  0x54   : > { %v300_v54 = vadd.f32 %v299_v50, %v298_v47  ;;  %v318_v47 = vshrl.u32 %v317_v43, 7 }
  0x56   : > { %v301_v56 = vrot.slane %v300_v54, 2  ;;  %v319_v50 = vsub.s32 0, %v318_v47 }
  0x58   : > { %v302_v59 = vadd.f32 %v301_v56, %v300_v54 }
  0x5a   : > { %v303_v63 = vrot.slane %v302_v59, 1 }
  0x5c   : > { %v304_v10 = vadd.f32 %v303_v63, %v302_v59 }
  0x5e   : > { %v306_v19 = vmul.f32 0.00390625, %v304_v10 }
  0x60   : > { %v308_v29 = vmul.f32 %v307_v14, %v306_v19 }
  0x62   : > { %v310_v31 = vadd.f32 %v309_v22, %v308_v29 }
  0x64   : > { %v578_v35 = vmul.f32 -1.442695, %v310_v31 }
  0x66   : > { %734 = vpow2.f32 %v578_v35 }
  0x70   : > { %v735_v38 = vpop.eup %734 }
  0x71   : > { %v314_v42 = vadd.f32 1.0, %v735_v38 }
  0x73   : > { %736 = vrcp.f32 %v314_v42 }
  0x7d   : > { %v737_v54 = vpop.eup %736 }
  0x7e   : > { %v966_v56 = vrot.slane %v737_v54, %v319_v50 }
  0x80   : > { %v321_v59 = vmul.f32 %v649_v2, %v966_v56  ;;  %v322_v63 = vmul.f32 %v650_v3, %v966_v56  ;;  %v323_v10 = vmul.f32 %v653_v4, %v966_v56  ;;  %v324_v14 = vmul.f32 %v654_v6, %v966_v56 }
  0x81   : > { %v325_v0 = vmul.f32 %v657_v7, %v966_v56  ;;  %v326_v2 = vmul.f32 %v658_v13, %v966_v56  ;;  %v327_v1 = vmul.f32 %v661_v16, %v966_v56  ;;  %v328_v3 = vmul.f32 %v662_v20, %v966_v56 }
  0x82   : > { %v615_v4 = vpack.c.bf16 %v321_v59, %v321_v59  ;;  %v616_v6 = vpack.c.bf16 %v322_v63, %v322_v63  ;;  %v617_v19 = vpack.c.bf16 %v323_v10, %v323_v10  ;;  %v618_v22 = vpack.c.bf16 %v324_v14, %v324_v14 }
  0x83   : > { %v619_v7 = vpack.c.bf16 %v325_v0, %v325_v0  ;;  %v620_v29 = vpack.c.bf16 %v326_v2, %v326_v2  ;;  %v621_v5 = vpack.c.bf16 %v327_v1, %v327_v1  ;;  %v622_v13 = vpack.c.bf16 %v328_v3, %v328_v3 }
  0x84   : > { %482 = vst.msk [vmem:[%s985_s24] sm:$0xf] %vm481_vm1, %v615_v4  ;;  %483 = vst.msk [vmem:[%s985_s24 + $0x4] sm:$0xf] %vm481_vm1, %v616_v6  ;;  %v329_v11 = vmul.f32 %v665_v23, %v966_v56  ;;  %v330_v16 = vmul.f32 %v666_v27, %v966_v56  ;;  %v331_v20 = vmul.f32 %v669_v30, %v966_v56 }
  0x85   : > { %484 = vst.msk [vmem:[%s985_s24 + $0x8] sm:$0xf] %vm481_vm1, %v617_v19  ;;  %485 = vst.msk [vmem:[%s985_s24 + $0xc] sm:$0xf] %vm481_vm1, %v618_v22  ;;  %v332_v31 = vmul.f32 %v670_v34, %v966_v56  ;;  %v333_v18 = vmul.f32 %v673_v37, %v966_v56  ;;  %v334_v23 = vmul.f32 %v674_v41, %v966_v56 }
  0x86   : > { %486 = vst.msk [vmem:[%s985_s24 + $0x10] sm:$0xf] %vm481_vm1, %v619_v7  ;;  %487 = vst.msk [vmem:[%s985_s24 + $0x14] sm:$0xf] %vm481_vm1, %v620_v29  ;;  %v335_v25 = vmul.f32 %v677_v44, %v966_v56  ;;  %v336_v27 = vmul.f32 %v678_v48, %v966_v56  ;;  %v623_v30 = vpack.c.bf16 %v329_v11, %v329_v11 }
  0x87   : > { %488 = vst.msk [vmem:[%s985_s24 + $0x18] sm:$0xf] %vm481_vm1, %v621_v5  ;;  %489 = vst.msk [vmem:[%s985_s24 + $0x1c] sm:$0xf] %vm481_vm1, %v622_v13  ;;  %v624_v34 = vpack.c.bf16 %v330_v16, %v330_v16  ;;  %v625_v35 = vpack.c.bf16 %v331_v20, %v331_v20  ;;  %v626_v38 = vpack.c.bf16 %v332_v31, %v332_v31 }
  0x88   : > { %v627_v37 = vpack.c.bf16 %v333_v18, %v333_v18  ;;  %v628_v42 = vpack.c.bf16 %v334_v23, %v334_v23  ;;  %v629_v32 = vpack.c.bf16 %v335_v25, %v335_v25  ;;  %v630_v41 = vpack.c.bf16 %v336_v27, %v336_v27  ;;  %490 = vst.msk [vmem:[%s985_s24 + $0x20] sm:$0xf] %vm481_vm1, %v623_v30 }
  0x89   : > { %491 = vst.msk [vmem:[%s985_s24 + $0x24] sm:$0xf] %vm481_vm1, %v624_v34  ;;  %492 = vst.msk [vmem:[%s985_s24 + $0x28] sm:$0xf] %vm481_vm1, %v625_v35  ;;  %v337_v39 = vmul.f32 %v681_v51, %v966_v56  ;;  %v338_v44 = vmul.f32 %v682_v55, %v966_v56  ;;  %v339_v48 = vmul.f32 %v685_v58, %v966_v56 }
  0x8a   : > { %493 = vst.msk [vmem:[%s985_s24 + $0x2c] sm:$0xf] %vm481_vm1, %v626_v38  ;;  %v340_v43 = vmul.f32 %v686_v62, %v966_v56  ;;  %494 = vst.msk [vmem:[%s985_s24 + $0x30] sm:$0xf] %vm481_vm1, %v627_v37  ;;  %v341_v46 = vmul.f32 %v689_v9, %v966_v56  ;;  %v342_v51 = vmul.f32 %v690_v15, %v966_v56 }
  0x8b   : > { %495 = vst.msk [vmem:[%s985_s24 + $0x34] sm:$0xf] %vm481_vm1, %v628_v42  ;;  %496 = vst.msk [vmem:[%s985_s24 + $0x38] sm:$0xf] %vm481_vm1, %v629_v32  ;;  %v343_v53 = vmul.f32 %v693_v21, %v966_v56  ;;  %v344_v55 = vmul.f32 %v694_v28, %v966_v56  ;;  %v631_v58 = vpack.c.bf16 %v337_v39, %v337_v39 }
  0x8c   : > { %497 = vst.msk [vmem:[%s985_s24 + $0x3c] sm:$0xf] %vm481_vm1, %v630_v41  ;;  %v632_v62 = vpack.c.bf16 %v338_v44, %v338_v44  ;;  %v633_v47 = vpack.c.bf16 %v339_v48, %v339_v48  ;;  %v634_v50 = vpack.c.bf16 %v340_v43, %v340_v43  ;;  %v635_v9 = vpack.c.bf16 %v341_v46, %v341_v46 }
  0x8d   : > { %v636_v54 = vpack.c.bf16 %v342_v51, %v342_v51  ;;  %v637_v60 = vpack.c.bf16 %v343_v53, %v343_v53  ;;  %v638_v15 = vpack.c.bf16 %v344_v55, %v344_v55  ;;  %498 = vst.msk [vmem:[%s985_s24 + $0x40] sm:$0xf] %vm481_vm1, %v631_v58  ;;  %v345_v12 = vmul.f32 %v697_v33, %v966_v56 }
  0x8e   : > { %499 = vst.msk [vmem:[%s985_s24 + $0x44] sm:$0xf] %vm481_vm1, %v632_v62  ;;  %500 = vst.msk [vmem:[%s985_s24 + $0x48] sm:$0xf] %vm481_vm1, %v633_v47  ;;  %v346_v21 = vmul.f32 %v698_v40, %v966_v56  ;;  %v347_v28 = vmul.f32 %v701_v45, %v966_v56  ;;  %v348_v59 = vmul.f32 %v702_v52, %v966_v56 }
  0x8f   : > { %501 = vst.msk [vmem:[%s985_s24 + $0x4c] sm:$0xf] %vm481_vm1, %v634_v50  ;;  %502 = vst.msk [vmem:[%s985_s24 + $0x50] sm:$0xf] %vm481_vm1, %v635_v9  ;;  %v349_v24 = vmul.f32 %v705_v57, %v966_v56  ;;  %v350_v33 = vmul.f32 %v706_v8, %v966_v56  ;;  %v351_v36 = vmul.f32 %v709_v17, %v966_v56 }
  0x90   : > { %503 = vst.msk [vmem:[%s985_s24 + $0x54] sm:$0xf] %vm481_vm1, %v636_v54  ;;  %504 = vst.msk [vmem:[%s985_s24 + $0x58] sm:$0xf] %vm481_vm1, %v637_v60  ;;  %v352_v40 = vmul.f32 %v710_v26, %v966_v56  ;;  %v639_v45 = vpack.c.bf16 %v345_v12, %v345_v12  ;;  %v640_v52 = vpack.c.bf16 %v346_v21, %v346_v21 }
  0x91   : > { %505 = vst.msk [vmem:[%s985_s24 + $0x5c] sm:$0xf] %vm481_vm1, %v638_v15  ;;  %v641_v63 = vpack.c.bf16 %v347_v28, %v347_v28  ;;  %v642_v57 = vpack.c.bf16 %v348_v59, %v348_v59  ;;  %v643_v10 = vpack.c.bf16 %v349_v24, %v349_v24  ;;  %v644_v14 = vpack.c.bf16 %v350_v33, %v350_v33 }
  0x92   : > { %v645_v49 = vpack.c.bf16 %v351_v36, %v351_v36  ;;  %v646_v0 = vpack.c.bf16 %v352_v40, %v352_v40  ;;  %506 = vst.msk [vmem:[%s985_s24 + $0x60] sm:$0xf] %vm481_vm1, %v639_v45  ;;  %507 = vst.msk [vmem:[%s985_s24 + $0x64] sm:$0xf] %vm481_vm1, %v640_v52 }
  0x93   : > { %508 = vst.msk [vmem:[%s985_s24 + $0x68] sm:$0xf] %vm481_vm1, %v641_v63  ;;  %509 = vst.msk [vmem:[%s985_s24 + $0x6c] sm:$0xf] %vm481_vm1, %v642_v57 }
  0x94   : > { %510 = vst.msk [vmem:[%s985_s24 + $0x70] sm:$0xf] %vm481_vm1, %v643_v10  ;;  %511 = vst.msk [vmem:[%s985_s24 + $0x74] sm:$0xf] %vm481_vm1, %v644_v14 }
  0x95   : > { %512 = vst.msk [vmem:[%s985_s24 + $0x78] sm:$0xf] %vm481_vm1, %v645_v49  ;;  %513 = vst.msk [vmem:[%s985_s24 + $0x7c] sm:$0xf] %vm481_vm1, %v646_v0 }
  0x96 PF: > { %s13_s12 = sadd.s32 1, %s744_s12  }
  0x97   : > { %p10_p4 = scmp.ge.s32.totalorder %s13_s12, 4  }
  0x99   :  { %12 = sbr.rel (!%p10_p4) target bundleno = 1 (0x1), region = 62 }

// kernel: lanet_forward.21
= control target key start
LH: loop header
LB: loop body
LE: loop exit
PB: predicated region body
PF: predicated region fallthrough
CT: control target
= control target key end

     0   :  { %vm94_vm0 = vcmask 261120   ;;  %vm296_vm1 = vcmask 519168   ;;  %s537_s1 = inlined_call_operand.vmem [shape: bf16[32,64], index: 1, kind: input, shape index: {}]   ;;  %s538_s0 = inlined_call_operand.vmem [shape: bf16[128,32], index: 0, kind: input, shape index: {}]   ;;  %s539_s2 = inlined_call_operand.vmem [shape: f32[1,64], index: 2, kind: input, shape index: {}]   ;;  %s540_s3 = inlined_call_operand.vmem [shape: bf16[128,64], index: 3, kind: output, shape index: {}]  }
   0x1   :  { %v402_v0 = vld [vmem:[%s537_s1] sm:$0xff]   ;;  %v403_v1 = vld [vmem:[%s537_s1 + $0x8] sm:$0xff]   ;;  %v408_v6 = vld [vmem:[%s538_s0 + $0x10] sm:$0xff]  }
   0x2   :  { %378 = vmatprep.subr.bf16.mxu0 %v402_v0  ;;  %398 = vmatprep.subr.bf16.mxu1 %v402_v0  ;;  %v404_v2 = vld [vmem:[%s538_s0] sm:$0xff]   ;;  %v406_v4 = vld [vmem:[%s538_s0 + $0x8] sm:$0xff]   ;;  %v409_v7 = vld [vmem:[%s538_s0 + $0x30] sm:$0xff]  }
   0x3   :  { %379 = vmatpush3.bf16.msra.mxu0 %v402_v0  ;;  %400 = vmatpush3.bf16.msra.mxu1 %v402_v0  ;;  %v405_v3 = vld [vmem:[%s538_s0 + $0x20] sm:$0xff]   ;;  %v407_v5 = vld [vmem:[%s538_s0 + $0x28] sm:$0xff]   ;;  %v410_v8 = vld [vmem:[%s538_s0 + $0x18] sm:$0xff]  }
   0x4   :  { %380 = vmatprep.subr.bf16.mxu0 %v403_v1  ;;  %399 = vmatprep.subr.bf16.mxu1 %v403_v1  ;;  %v411_v9 = vld [vmem:[%s538_s0 + $0x38] sm:$0xff]   ;;  %v317_v10 = vld [vmem:[%s539_s2] ss:$0 sm:$0xff] }
   0x5   :  { %382 = vmatprep.mubr.msk.bf16.mxu0 %vm94_vm0, %v404_v2  ;;  %390 = vmatprep.mubr.msk.bf16.mxu1 %vm94_vm0, %v405_v3 }
   0x7   :  { %381 = vmatpush3.bf16.msra.mxu0 %v403_v1  ;;  %401 = vmatpush3.bf16.msra.mxu1 %v403_v1 }
   0xa   :  { %383 = vmatmul.mubr.msk.bf16.vlgmr.msra.gmra.mrb[0].mxu0 %vm94_vm0, %v406_v4  ;;  %391 = vmatmul.mubr.msk.bf16.vlgmr.msra.gmra.mrb[0].mxu1 %vm94_vm0, %v407_v5 }
   0xb   :  { %386 = vmatprep.mubr.msk.bf16.mxu0 %vm94_vm0, %v408_v6  ;;  %394 = vmatprep.mubr.msk.bf16.mxu1 %vm94_vm0, %v409_v7 }
  0x12   :  { %387 = vmatmul.mubr.msk.bf16.gmra.mrb[4].mxu0 %vm94_vm0, %v410_v8  ;;  %395 = vmatmul.mubr.msk.bf16.gmra.mrb[4].mxu1 %vm94_vm0, %v411_v9 }
  0xdd   :  { %v384_v11 = vpop.f32.mrb[0].mxu0  ;;  %v392_v12 = vpop.f32.mrb[0].mxu1 }
  0xde   :  { %v162_v13 = vadd.f32 %v384_v11, %v317_v10  ;;  %v194_v14 = vadd.f32 %v392_v12, %v317_v10  ;;  %v153_v15 = vpop.f32.mrb[1].mxu0  ;;  %v185_v16 = vpop.f32.mrb[1].mxu1 }
  0xdf   :  { %v154_v17 = vadd.f32 %v317_v10, %v153_v15  ;;  %v186_v18 = vadd.f32 %v317_v10, %v185_v16  ;;  %v385_v19 = vpop.f32.mrb[2].mxu0  ;;  %v393_v20 = vpop.f32.mrb[2].mxu1 }
  0xe0   :  { %v218_v21 = vmax.f32 %v162_v13, 0.0  ;;  %v226_v22 = vmax.f32 %v194_v14, 0.0  ;;  %v165_v23 = vadd.f32 %v385_v19, %v317_v10  ;;  %v197_v24 = vadd.f32 %v393_v20, %v317_v10  ;;  %v156_v25 = vpop.f32.mrb[3].mxu0  ;;  %v188_v26 = vpop.f32.mrb[3].mxu1 }
  0xe1   :  { %v216_v27 = vmax.f32 %v154_v17, 0.0  ;;  %v224_v28 = vmax.f32 %v186_v18, 0.0  ;;  %v157_v29 = vadd.f32 %v317_v10, %v156_v25  ;;  %v189_v30 = vadd.f32 %v317_v10, %v188_v26 }
  0xe2   :  { %v354_v31 = vpack.c.bf16 %v218_v21, %v218_v21  ;;  %v362_v32 = vpack.c.bf16 %v226_v22, %v226_v22  ;;  %v219_v33 = vmax.f32 %v165_v23, 0.0  ;;  %v227_v34 = vmax.f32 %v197_v24, 0.0 }
  0xe3   :  { %v352_v35 = vpack.c.bf16 %v216_v27, %v216_v27  ;;  %v360_v36 = vpack.c.bf16 %v224_v28, %v224_v28  ;;  %v217_v37 = vmax.f32 %v157_v29, 0.0  ;;  %v225_v38 = vmax.f32 %v189_v30, 0.0 }
  0xe4   :  { %299 = vst.msk [vmem:[%s540_s3 + $0x8] sm:$0xf] %vm296_vm1, %v354_v31  ;;  %307 = vst.msk [vmem:[%s540_s3 + $0x28] sm:$0xf] %vm296_vm1, %v362_v32  ;;  %v355_v39 = vpack.c.bf16 %v219_v33, %v219_v33  ;;  %v363_v40 = vpack.c.bf16 %v227_v34, %v227_v34 }
  0xe5   :  { %297 = vst.msk [vmem:[%s540_s3] sm:$0xf] %vm296_vm1, %v352_v35  ;;  %305 = vst.msk [vmem:[%s540_s3 + $0x20] sm:$0xf] %vm296_vm1, %v360_v36  ;;  %v353_v41 = vpack.c.bf16 %v217_v37, %v217_v37  ;;  %v361_v42 = vpack.c.bf16 %v225_v38, %v225_v38  ;;  %v388_v43 = vpop.f32.mrb[4].mxu0  ;;  %v396_v44 = vpop.f32.mrb[4].mxu1 }
  0xe6   :  { %300 = vst.msk [vmem:[%s540_s3 + $0xc] sm:$0xf] %vm296_vm1, %v355_v39  ;;  %308 = vst.msk [vmem:[%s540_s3 + $0x2c] sm:$0xf] %vm296_vm1, %v363_v40  ;;  %v178_v45 = vadd.f32 %v388_v43, %v317_v10  ;;  %v210_v46 = vadd.f32 %v396_v44, %v317_v10  ;;  %v169_v47 = vpop.f32.mrb[5].mxu0  ;;  %v201_v48 = vpop.f32.mrb[5].mxu1 }
  0xe7   :  { %298 = vst.msk [vmem:[%s540_s3 + $0x4] sm:$0xf] %vm296_vm1, %v353_v41  ;;  %306 = vst.msk [vmem:[%s540_s3 + $0x24] sm:$0xf] %vm296_vm1, %v361_v42  ;;  %v170_v49 = vadd.f32 %v317_v10, %v169_v47  ;;  %v202_v50 = vadd.f32 %v317_v10, %v201_v48  ;;  %v389_v51 = vpop.f32.mrb[6].mxu0  ;;  %v397_v52 = vpop.f32.mrb[6].mxu1 }
  0xe8   :  { %v222_v53 = vmax.f32 %v178_v45, 0.0  ;;  %v230_v54 = vmax.f32 %v210_v46, 0.0  ;;  %v181_v55 = vadd.f32 %v389_v51, %v317_v10  ;;  %v213_v56 = vadd.f32 %v397_v52, %v317_v10  ;;  %v172_v57 = vpop.f32.mrb[7].mxu0  ;;  %v204_v58 = vpop.f32.mrb[7].mxu1 }
  0xe9   :  { %v220_v59 = vmax.f32 %v170_v49, 0.0  ;;  %v228_v60 = vmax.f32 %v202_v50, 0.0  ;;  %v173_v61 = vadd.f32 %v317_v10, %v172_v57  ;;  %v205_v62 = vadd.f32 %v317_v10, %v204_v58 }
  0xea   :  { %v358_v63 = vpack.c.bf16 %v222_v53, %v222_v53  ;;  %v366_v0 = vpack.c.bf16 %v230_v54, %v230_v54  ;;  %v223_v1 = vmax.f32 %v181_v55, 0.0  ;;  %v231_v2 = vmax.f32 %v213_v56, 0.0 }
  0xeb   :  { %v356_v3 = vpack.c.bf16 %v220_v59, %v220_v59  ;;  %v364_v4 = vpack.c.bf16 %v228_v60, %v228_v60  ;;  %v221_v5 = vmax.f32 %v173_v61, 0.0  ;;  %v229_v6 = vmax.f32 %v205_v62, 0.0 }
  0xec   :  { %303 = vst.msk [vmem:[%s540_s3 + $0x18] sm:$0xf] %vm296_vm1, %v358_v63  ;;  %311 = vst.msk [vmem:[%s540_s3 + $0x38] sm:$0xf] %vm296_vm1, %v366_v0  ;;  %v359_v7 = vpack.c.bf16 %v223_v1, %v223_v1  ;;  %v367_v8 = vpack.c.bf16 %v231_v2, %v231_v2 }
  0xed   :  { %301 = vst.msk [vmem:[%s540_s3 + $0x10] sm:$0xf] %vm296_vm1, %v356_v3  ;;  %309 = vst.msk [vmem:[%s540_s3 + $0x30] sm:$0xf] %vm296_vm1, %v364_v4  ;;  %v357_v9 = vpack.c.bf16 %v221_v5, %v221_v5  ;;  %v365_v10 = vpack.c.bf16 %v229_v6, %v229_v6 }
  0xee   :  { %304 = vst.msk [vmem:[%s540_s3 + $0x1c] sm:$0xf] %vm296_vm1, %v359_v7  ;;  %312 = vst.msk [vmem:[%s540_s3 + $0x3c] sm:$0xf] %vm296_vm1, %v367_v8 }
  0xef   :  { %302 = vst.msk [vmem:[%s540_s3 + $0x14] sm:$0xf] %vm296_vm1, %v357_v9  ;;  %310 = vst.msk [vmem:[%s540_s3 + $0x34] sm:$0xf] %vm296_vm1, %v365_v10 }

// kernel: lanet_forward.26
= control target key start
LH: loop header
LB: loop body
LE: loop exit
PB: predicated region body
PF: predicated region fallthrough
CT: control target
= control target key end

     0   :  { %s418_s12 = smov 0   ;;  %s464_s0 = inlined_call_operand.vmem [shape: bf16[2,64,64], index: 0, kind: input, shape index: {}]   ;;  %s465_s1 = inlined_call_operand.vmem [shape: f32[1,1,64], index: 1, kind: input, shape index: {}]   ;;  %s466_s2 = inlined_call_operand.vmem [shape: f32[1,1,64], index: 2, kind: input, shape index: {}]   ;;  %s467_s3 = inlined_call_operand.vmem [shape: bf16[2,64,64], index: 3, kind: output, shape index: {}]  }
   0x1 LB: > { %s329_s13 = sadd.s32 4294967295, %s396_s12   ;;  %p333_p0 = scmp.ge.s32.totalorder %s396_s12, 1  ;;  %s396_s12 = sphi %s418_s12, %s13_s12  }
   0x2   : > { %p137_p1 = scmp.lt.s32.totalorder %s396_s12, 3 }
   0x4   : > { %p138_p2 = pnand %p333_p0, %p137_p1 }
   0x5   : > { %p161_p3 = scmp.lt.s32.totalorder (!%p138_p2), %s329_s13, 1  ;;  %vm187_vm0 = vcmask (!%p138_p2), 523264   ;;  %v211_v33 = vld [vmem:[%s465_s1] sm:$0x1] (!%p138_p2)  ;;  %v221_v41 = vlaneseq (!%p138_p2)  ;;  %vm265_vm1 = vcmask (!%p138_p2), 519168  }
   0x6   : > { %141 = sbr.rel (%p138_p2) target bundleno = 88 (0x58), region = 32  ;;  %v213_v35 = vld [vmem:[%s466_s2] sm:$0x1] (!%p138_p2) }
   0x7   : > { %v222_v42 = vshrl.u32 (!%p138_p2), %v221_v41, 7 }
   0x9   : > { %v223_v43 = vsub.s32 (!%p138_p2), 0, %v222_v42 }
   0xd   : > { %s469_s13 = smov (!%p161_p3, %s329_s13), 1 }
   0xe   : > { %s349_s14 = sshll.u32 %s469_s13, 5 }
   0xf   : > { %s165_s17 = scalar_lea.vmem %s464_s0, %s349_s14  ;;  %s170_s24 = scalar_lea.vmem %s467_s3, %s349_s14 }
  0x10   : > { %v360_v0 = vld [vmem:[%s165_s17] sm:$0xff]   ;;  %v375_v1 = vld [vmem:[%s165_s17 + $0x8] sm:$0xff]   ;;  %v376_v2 = vld [vmem:[%s165_s17 + $0x10] sm:$0xff]  }
  0x11   : > { %v361_v3 = vunpack.c.l.bf16 %v360_v0  ;;  %v362_v4 = vunpack.c.h.bf16 %v360_v0  ;;  %v365_v5 = vunpack.c.l.bf16 %v375_v1  ;;  %v366_v6 = vunpack.c.h.bf16 %v375_v1  ;;  %v377_v11 = vld [vmem:[%s165_s17 + $0x18] sm:$0xff]  }
  0x12   : > { %v369_v7 = vunpack.c.l.bf16 %v376_v2  ;;  %v370_v13 = vunpack.c.h.bf16 %v376_v2  ;;  %v373_v16 = vunpack.c.l.bf16 %v377_v11  ;;  %v374_v19 = vunpack.c.h.bf16 %v377_v11 }
  0x13   : > { %v188_v8 = vsel %vm187_vm0, %v361_v3, 0.0  ;;  %v189_v9 = vsel %vm187_vm0, %v362_v4, 0.0  ;;  %v191_v10 = vsel %vm187_vm0, %v365_v5, 0.0  ;;  %v193_v14 = vsel %vm187_vm0, %v366_v6, 0.0 }
  0x14   : > { %v190_v12 = vadd.f32 %v189_v9, %v188_v8  ;;  %v195_v17 = vsel %vm187_vm0, %v369_v7, 0.0  ;;  %v197_v20 = vsel %vm187_vm0, %v370_v13, 0.0  ;;  %v199_v22 = vsel %vm187_vm0, %v373_v16, 0.0 }
  0x15   : > { %v201_v24 = vsel %vm187_vm0, %v374_v19, 0.0 }
  0x16   : > { %v192_v15 = vadd.f32 %v191_v10, %v190_v12 }
  0x18   : > { %v194_v18 = vadd.f32 %v193_v14, %v192_v15 }
  0x1a   : > { %v196_v21 = vadd.f32 %v195_v17, %v194_v18 }
  0x1c   : > { %v198_v23 = vadd.f32 %v197_v20, %v196_v21 }
  0x1e   : > { %v200_v25 = vadd.f32 %v199_v22, %v198_v23 }
  0x20   : > { %v202_v26 = vadd.f32 %v201_v24, %v200_v25 }
  0x22   : > { %v203_v27 = vrot.slane %v202_v26, 4 }
  0x24   : > { %v204_v28 = vadd.f32 %v203_v27, %v202_v26 }
  0x26   : > { %v205_v29 = vrot.slane %v204_v28, 2 }
  0x28   : > { %v206_v30 = vadd.f32 %v205_v29, %v204_v28 }
  0x2a   : > { %v207_v31 = vrot.slane %v206_v30, 1 }
  0x2c   : > { %v208_v32 = vadd.f32 %v207_v31, %v206_v30 }
  0x2e   : > { %v210_v34 = vmul.f32 0.015625, %v208_v32 }
  0x30   : > { %v212_v36 = vmul.f32 %v211_v33, %v210_v34 }
  0x32   : > { %v214_v37 = vadd.f32 %v213_v35, %v212_v36 }
  0x34   : > { %v338_v38 = vmul.f32 -1.442695, %v214_v37 }
  0x36   : > { %386 = vpow2.f32 %v338_v38 }
  0x40   : > { %v387_v39 = vpop.eup %386 }
  0x41   : > { %v218_v40 = vadd.f32 1.0, %v387_v39 }
  0x43   : > { %388 = vrcp.f32 %v218_v40 }
  0x4d   : > { %v389_v44 = vpop.eup %388 }
  0x4e   : > { %v224_v45 = vrot.slane %v389_v44, %v223_v43 }
  0x50   : > { %v225_v46 = vmul.f32 %v361_v3, %v224_v45  ;;  %v226_v47 = vmul.f32 %v362_v4, %v224_v45  ;;  %v227_v48 = vmul.f32 %v365_v5, %v224_v45  ;;  %v228_v49 = vmul.f32 %v366_v6, %v224_v45 }
  0x51   : > { %v229_v50 = vmul.f32 %v369_v7, %v224_v45  ;;  %v230_v51 = vmul.f32 %v370_v13, %v224_v45  ;;  %v231_v52 = vmul.f32 %v373_v16, %v224_v45  ;;  %v232_v53 = vmul.f32 %v374_v19, %v224_v45 }
  0x52   : > { %v351_v54 = vpack.c.bf16 %v225_v46, %v225_v46  ;;  %v352_v55 = vpack.c.bf16 %v226_v47, %v226_v47  ;;  %v353_v56 = vpack.c.bf16 %v227_v48, %v227_v48  ;;  %v354_v57 = vpack.c.bf16 %v228_v49, %v228_v49 }
  0x53   : > { %v355_v58 = vpack.c.bf16 %v229_v50, %v229_v50  ;;  %v356_v59 = vpack.c.bf16 %v230_v51, %v230_v51  ;;  %v357_v60 = vpack.c.bf16 %v231_v52, %v231_v52  ;;  %v358_v61 = vpack.c.bf16 %v232_v53, %v232_v53 }
  0x54   : > { %266 = vst.msk [vmem:[%s170_s24] sm:$0xf] %vm265_vm1, %v351_v54  ;;  %267 = vst.msk [vmem:[%s170_s24 + $0x4] sm:$0xf] %vm265_vm1, %v352_v55 }
  0x55   : > { %268 = vst.msk [vmem:[%s170_s24 + $0x8] sm:$0xf] %vm265_vm1, %v353_v56  ;;  %269 = vst.msk [vmem:[%s170_s24 + $0xc] sm:$0xf] %vm265_vm1, %v354_v57 }
  0x56   : > { %270 = vst.msk [vmem:[%s170_s24 + $0x10] sm:$0xf] %vm265_vm1, %v355_v58  ;;  %271 = vst.msk [vmem:[%s170_s24 + $0x14] sm:$0xf] %vm265_vm1, %v356_v59 }
  0x57   : > { %272 = vst.msk [vmem:[%s170_s24 + $0x18] sm:$0xf] %vm265_vm1, %v357_v60  ;;  %273 = vst.msk [vmem:[%s170_s24 + $0x1c] sm:$0xf] %vm265_vm1, %v358_v61 }
  0x58 PF: > { %s13_s12 = sadd.s32 1, %s396_s12  }
  0x59   : > { %p10_p4 = scmp.ge.s32.totalorder %s13_s12, 4  }
  0x5b   :  { %12 = sbr.rel (!%p10_p4) target bundleno = 1 (0x1), region = 62 }

// kernel: lanet_forward.22
= control target key start
LH: loop header
LB: loop body
LE: loop exit
PB: predicated region body
PF: predicated region fallthrough
CT: control target
= control target key end

     0   :  { %vm68_vm0 = vcmask 523264   ;;  %vm144_vm1 = vcmask 781312   ;;  %s247_s1 = inlined_call_operand.vmem [shape: bf16[64,96], index: 1, kind: input, shape index: {}]   ;;  %s248_s0 = inlined_call_operand.vmem [shape: bf16[32,64], index: 0, kind: input, shape index: {}]   ;;  %s249_s2 = inlined_call_operand.vmem [shape: f32[1,96], index: 2, kind: input, shape index: {}]   ;;  %s250_s3 = inlined_call_operand.vmem [shape: bf16[32,96], index: 3, kind: output, shape index: {}]  }
   0x1   :  { %v188_v0 = vld [vmem:[%s247_s1] sm:$0xff]   ;;  %v189_v1 = vld [vmem:[%s247_s1 + $0x8] sm:$0xff]   ;;  %v190_v2 = vld [vmem:[%s247_s1 + $0x10] sm:$0xff]  }
   0x2   :  { %176 = vmatprep.subr.bf16.mxu0 %v188_v0  ;;  %v192_v3 = vld [vmem:[%s248_s0] sm:$0xff]   ;;  %v191_v4 = vld [vmem:[%s247_s1 + $0x18] sm:$0xff]   ;;  %v193_v5 = vld [vmem:[%s248_s0 + $0x8] sm:$0xff]  }
   0x3   :  { %177 = vmatpush3.bf16.msra.mxu0 %v188_v0  ;;  %184 = vmatprep.mubr.msk.bf16.mxu0 %vm68_vm0, %v192_v3  ;;  %v153_v6 = vld [vmem:[%s249_s2] ss:$0 sm:$0xff] }
   0x4   :  { %178 = vmatprep.subr.bf16.mxu0 %v189_v1 }
   0x7   :  { %179 = vmatpush3.bf16.msra.mxu0 %v189_v1 }
   0x8   :  { %180 = vmatprep.subr.bf16.mxu0 %v190_v2 }
   0xb   :  { %181 = vmatpush3.bf16.msra.mxu0 %v190_v2 }
   0xc   :  { %182 = vmatprep.subr.bf16.mxu0 %v191_v4 }
   0xf   :  { %183 = vmatpush3.bf16.msra.mxu0 %v191_v4 }
  0x12   :  { %185 = vmatmul.mubr.msk.bf16.vlgmr.msra.gmra.mrb[0].mxu0 %vm68_vm0, %v193_v5 }
  0xe5   :  { %v186_v7 = vpop.f32.mrb[0].mxu0 }
  0xe6   :  { %v118_v8 = vadd.f32 %v186_v7, %v153_v6  ;;  %v109_v9 = vpop.f32.mrb[1].mxu0 }
  0xe7   :  { %v110_v10 = vadd.f32 %v153_v6, %v109_v9  ;;  %v187_v11 = vpop.f32.mrb[2].mxu0 }
  0xe8   :  { %v126_v12 = vmax.f32 %v118_v8, 0.0  ;;  %v121_v13 = vadd.f32 %v187_v11, %v153_v6  ;;  %v112_v14 = vpop.f32.mrb[3].mxu0 }
  0xe9   :  { %v124_v15 = vmax.f32 %v110_v10, 0.0  ;;  %v113_v16 = vadd.f32 %v153_v6, %v112_v14 }
  0xea   :  { %v168_v17 = vpack.c.bf16 %v126_v12, %v126_v12  ;;  %v127_v18 = vmax.f32 %v121_v13, 0.0 }
  0xeb   :  { %v166_v19 = vpack.c.bf16 %v124_v15, %v124_v15  ;;  %v125_v20 = vmax.f32 %v113_v16, 0.0 }
  0xec   :  { %147 = vst.msk [vmem:[%s250_s3 + $0x8] sm:$0xf] %vm144_vm1, %v168_v17  ;;  %v169_v21 = vpack.c.bf16 %v127_v18, %v127_v18 }
  0xed   :  { %145 = vst.msk [vmem:[%s250_s3] sm:$0xf] %vm144_vm1, %v166_v19  ;;  %v167_v22 = vpack.c.bf16 %v125_v20, %v125_v20 }
  0xee   :  { %148 = vst.msk [vmem:[%s250_s3 + $0xc] sm:$0xf] %vm144_vm1, %v169_v21 }
  0xef   :  { %146 = vst.msk [vmem:[%s250_s3 + $0x4] sm:$0xf] %vm144_vm1, %v167_v22 }

// kernel: lanet_forward.27
= control target key start
LH: loop header
LB: loop body
LE: loop exit
PB: predicated region body
PF: predicated region fallthrough
CT: control target
= control target key end

     0   :  { %s331_s12 = smov 0   ;;  %s361_s0 = inlined_call_operand.vmem [shape: bf16[2,16,96], index: 0, kind: input, shape index: {}]   ;;  %s362_s1 = inlined_call_operand.vmem [shape: f32[1,1,96], index: 1, kind: input, shape index: {}]   ;;  %s363_s2 = inlined_call_operand.vmem [shape: f32[1,1,96], index: 2, kind: input, shape index: {}]   ;;  %s364_s3 = inlined_call_operand.vmem [shape: bf16[2,16,96], index: 3, kind: output, shape index: {}]  }
   0x1 LB: > { %s269_s13 = sadd.s32 4294967295, %s309_s12   ;;  %p273_p0 = scmp.ge.s32.totalorder %s309_s12, 1  ;;  %s309_s12 = sphi %s331_s12, %s13_s12  }
   0x2   : > { %p137_p1 = scmp.lt.s32.totalorder %s309_s12, 3 }
   0x4   : > { %p138_p2 = pnand %p273_p0, %p137_p1 }
   0x5   : > { %p161_p3 = scmp.lt.s32.totalorder (!%p138_p2), %s269_s13, 1  ;;  %vm175_vm0 = vcmask (!%p138_p2), 785408   ;;  %v187_v12 = vld [vmem:[%s362_s1] sm:$0x1] (!%p138_p2)  ;;  %v197_v20 = vlaneseq (!%p138_p2)  ;;  %vm211_vm1 = vcmask (!%p138_p2), 781312  }
   0x6   : > { %141 = sbr.rel (%p138_p2) target bundleno = 73 (0x49), region = 32  ;;  %v189_v14 = vld [vmem:[%s363_s2] sm:$0x1] (!%p138_p2) }
   0x7   : > { %v198_v21 = vshrl.u32 (!%p138_p2), %v197_v20, 7 }
   0x9   : > { %v199_v22 = vsub.s32 (!%p138_p2), 0, %v198_v21 }
   0xd   : > { %s366_s13 = smov (!%p161_p3, %s269_s13), 1 }
   0xe   : > { %s283_s14 = sshll.u32 %s366_s13, 3 }
   0xf   : > { %s165_s17 = scalar_lea.vmem %s361_s0, %s283_s14  ;;  %s170_s24 = scalar_lea.vmem %s364_s3, %s283_s14 }
  0x10   : > { %v288_v0 = vld [vmem:[%s165_s17] sm:$0xff]  }
  0x11   : > { %v289_v1 = vunpack.c.l.bf16 %v288_v0  ;;  %v290_v2 = vunpack.c.h.bf16 %v288_v0 }
  0x13   : > { %v176_v3 = vsel %vm175_vm0, %v289_v1, 0.0  ;;  %v177_v4 = vsel %vm175_vm0, %v290_v2, 0.0 }
  0x14   : > { %v178_v5 = vadd.f32 %v177_v4, %v176_v3 }
  0x16   : > { %v179_v6 = vrot.slane %v178_v5, 4 }
  0x18   : > { %v180_v7 = vadd.f32 %v179_v6, %v178_v5 }
  0x1a   : > { %v181_v8 = vrot.slane %v180_v7, 2 }
  0x1c   : > { %v182_v9 = vadd.f32 %v181_v8, %v180_v7 }
  0x1e   : > { %v183_v10 = vrot.slane %v182_v9, 1 }
  0x20   : > { %v184_v11 = vadd.f32 %v183_v10, %v182_v9 }
  0x22   : > { %v186_v13 = vmul.f32 0.0625, %v184_v11 }
  0x24   : > { %v188_v15 = vmul.f32 %v187_v12, %v186_v13 }
  0x26   : > { %v190_v16 = vadd.f32 %v189_v14, %v188_v15 }
  0x28   : > { %v278_v17 = vmul.f32 -1.442695, %v190_v16 }
  0x2a   : > { %299 = vpow2.f32 %v278_v17 }
  0x34   : > { %v300_v18 = vpop.eup %299 }
  0x35   : > { %v194_v19 = vadd.f32 1.0, %v300_v18 }
  0x37   : > { %301 = vrcp.f32 %v194_v19 }
  0x41   : > { %v302_v23 = vpop.eup %301 }
  0x42   : > { %v200_v24 = vrot.slane %v302_v23, %v199_v22 }
  0x44   : > { %v201_v25 = vmul.f32 %v289_v1, %v200_v24  ;;  %v202_v26 = vmul.f32 %v290_v2, %v200_v24 }
  0x46   : > { %v285_v27 = vpack.c.bf16 %v201_v25, %v201_v25  ;;  %v286_v28 = vpack.c.bf16 %v202_v26, %v202_v26 }
  0x48   : > { %212 = vst.msk [vmem:[%s170_s24] sm:$0xf] %vm211_vm1, %v285_v27  ;;  %213 = vst.msk [vmem:[%s170_s24 + $0x4] sm:$0xf] %vm211_vm1, %v286_v28 }
  0x49 PF: > { %s13_s12 = sadd.s32 1, %s309_s12  }
  0x4a   : > { %p10_p4 = scmp.ge.s32.totalorder %s13_s12, 4  }
  0x4c   :  { %12 = sbr.rel (!%p10_p4) target bundleno = 1 (0x1), region = 62 }

// kernel: lanet_forward.28
= control target key start
LH: loop header
LB: loop body
LE: loop exit
PB: predicated region body
PF: predicated region fallthrough
CT: control target
= control target key end

     0   :  { %s298_s12 = smov 0   ;;  %s324_s0 = inlined_call_operand.vmem [shape: bf16[2,4,128], index: 0, kind: input, shape index: {}]   ;;  %s325_s1 = inlined_call_operand.vmem [shape: f32[1,1,128], index: 1, kind: input, shape index: {}]   ;;  %s326_s2 = inlined_call_operand.vmem [shape: f32[1,1,128], index: 2, kind: input, shape index: {}]   ;;  %s327_s3 = inlined_call_operand.vmem [shape: bf16[2,4,128], index: 3, kind: output, shape index: {}]  }
   0x1 LB: > { %s248_s13 = sadd.s32 4294967295, %s276_s12   ;;  %p252_p0 = scmp.ge.s32.totalorder %s276_s12, 1  ;;  %s276_s12 = sphi %s298_s12, %s13_s12  }
   0x2   : > { %p136_p1 = scmp.lt.s32.totalorder %s276_s12, 3 }
   0x4   : > { %p137_p2 = pnand %p252_p0, %p136_p1 }
   0x5   : > { %p158_p3 = scmp.lt.s32.totalorder (!%p137_p2), %s248_s13, 1  ;;  %vm168_vm0 = vcmask (!%p137_p2), 1043456   ;;  %v178_v9 = vld [vmem:[%s325_s1] sm:$0x1] (!%p137_p2)  ;;  %v188_v17 = vlaneseq (!%p137_p2) }
   0x6   : > { %140 = sbr.rel (%p137_p2) target bundleno = 71 (0x47), region = 32  ;;  %v180_v11 = vld [vmem:[%s326_s2] sm:$0x1] (!%p137_p2) }
   0x7   : > { %v189_v18 = vshrl.u32 (!%p137_p2), %v188_v17, 7 }
   0x9   : > { %v190_v19 = vsub.s32 (!%p137_p2), 0, %v189_v18 }
   0xd   : > { %s329_s13 = smov (!%p158_p3, %s248_s13), 1 }
   0xe   : > { %s253_s14 = sshll.u32 %s329_s13, 1 }
   0xf   : > { %s161_s17 = scalar_lea.vmem %s324_s0, %s253_s14  ;;  %s165_s24 = scalar_lea.vmem %s327_s3, %s253_s14 }
  0x10   : > { %v166_v0 = vld [vmem:[%s161_s17] sm:$0x3] }
  0x11   : > { %v167_v1 = vunpack.c.l.bf16 %v166_v0 }
  0x13   : > { %v169_v2 = vsel %vm168_vm0, %v167_v1, 0.0 }
  0x14   : > { %v170_v3 = vrot.slane %v169_v2, 4 }
  0x16   : > { %v171_v4 = vadd.f32 %v170_v3, %v169_v2 }
  0x18   : > { %v172_v5 = vrot.slane %v171_v4, 2 }
  0x1a   : > { %v173_v6 = vadd.f32 %v172_v5, %v171_v4 }
  0x1c   : > { %v174_v7 = vrot.slane %v173_v6, 1 }
  0x1e   : > { %v175_v8 = vadd.f32 %v174_v7, %v173_v6 }
  0x20   : > { %v177_v10 = vmul.f32 0.25, %v175_v8 }
  0x22   : > { %v179_v12 = vmul.f32 %v178_v9, %v177_v10 }
  0x24   : > { %v181_v13 = vadd.f32 %v180_v11, %v179_v12 }
  0x26   : > { %v255_v14 = vmul.f32 -1.442695, %v181_v13 }
  0x28   : > { %266 = vpow2.f32 %v255_v14 }
  0x32   : > { %v267_v15 = vpop.eup %266 }
  0x33   : > { %v185_v16 = vadd.f32 1.0, %v267_v15 }
  0x35   : > { %268 = vrcp.f32 %v185_v16 }
  0x3f   : > { %v269_v20 = vpop.eup %268 }
  0x40   : > { %v191_v21 = vrot.slane %v269_v20, %v190_v19 }
  0x42   : > { %v192_v22 = vmul.f32 %v191_v21, %v167_v1 }
  0x44   : > { %v193_v23 = vpack.c.bf16 %v192_v22, %v192_v22 }
  0x46   : > { %194 = vst [vmem:[%s165_s24] sm:$0x3] %v193_v23 }
  0x47 PF: > { %s13_s12 = sadd.s32 1, %s276_s12  }
  0x48   : > { %p10_p4 = scmp.ge.s32.totalorder %s13_s12, 4  }
  0x4a   :  { %12 = sbr.rel (!%p10_p4) target bundleno = 1 (0x1), region = 62 }

// kernel: lanet_forward.23
= control target key start
LH: loop header
LB: loop body
LE: loop exit
PB: predicated region body
PF: predicated region fallthrough
CT: control target
= control target key end

     0   :  { %v161_v0 = vmov 0.0   ;;  %vm162_vm0 = vmmov 0   ;;  %vm71_vm1 = vcmask 785408   ;;  %s210_s1 = inlined_call_operand.vmem [shape: bf16[96,128], index: 1, kind: input, shape index: {}]   ;;  %s211_s0 = inlined_call_operand.vmem [shape: bf16[8,96], index: 0, kind: input, shape index: {}]   ;;  %s212_s2 = inlined_call_operand.vmem [shape: f32[1,128], index: 2, kind: input, shape index: {}]   ;;  %s213_s3 = inlined_call_operand.vmem [shape: bf16[8,128], index: 3, kind: output, shape index: {}]  }
   0x1   :  { %137 = vmatprep.subr.bf16.mxu0 %v161_v0  ;;  %v155_v1 = vld [vmem:[%s210_s1] sm:$0xff]   ;;  %149 = vmatprep.mubr.msk.bf16.mxu0 %vm162_vm0, %v161_v0  ;;  %v156_v2 = vld [vmem:[%s210_s1 + $0x8] sm:$0xff]   ;;  %v157_v3 = vld [vmem:[%s210_s1 + $0x10] sm:$0xff]  }
   0x2   :  { %138 = vmatpush3.bf16.msra.mxu0 %v155_v1  ;;  %v158_v4 = vld [vmem:[%s210_s1 + $0x18] sm:$0xff]   ;;  %v159_v5 = vld [vmem:[%s210_s1 + $0x20] sm:$0xff]   ;;  %v160_v6 = vld [vmem:[%s210_s1 + $0x28] sm:$0xff]  }
   0x3   :  { %139 = vmatprep.subr.bf16.mxu0 %v161_v0  ;;  %v15_v7 = vld [vmem:[%s211_s0] sm:$0xf] }
   0x4   :  { %v122_v8 = vld [vmem:[%s212_s2] ss:$0 sm:$0xff] }
   0x6   :  { %140 = vmatpush3.bf16.msra.mxu0 %v156_v2 }
   0x7   :  { %141 = vmatprep.subr.bf16.mxu0 %v161_v0 }
   0xa   :  { %142 = vmatpush3.bf16.msra.mxu0 %v157_v3 }
   0xb   :  { %143 = vmatprep.subr.bf16.mxu0 %v161_v0 }
   0xe   :  { %144 = vmatpush3.bf16.msra.mxu0 %v158_v4 }
   0xf   :  { %145 = vmatprep.subr.bf16.mxu0 %v161_v0 }
  0x12   :  { %146 = vmatpush3.bf16.msra.mxu0 %v159_v5 }
  0x13   :  { %147 = vmatprep.subr.bf16.mxu0 %v161_v0 }
  0x16   :  { %148 = vmatpush3.bf16.msra.mxu0 %v160_v6 }
  0x19   :  { %150 = vmatmul.mubr.msk.bf16.vlgmr.msra.gmra.mrb[0].mxu0 %vm71_vm1, %v15_v7 }
  0xec   :  { %v109_v9 = vpop.f32.mrb[0].mxu0 }
  0xed   :  { %v110_v10 = vadd.f32 %v122_v8, %v109_v9  ;;  %v151_v11 = vpop.f32.mrb[1].mxu0 }
  0xee   :  { %v112_v12 = vpop.f32.mrb[2].mxu0 }
  0xef   :  { %v115_v13 = vmax.f32 %v110_v10, 0.0  ;;  %v152_v14 = vpop.f32.mrb[3].mxu0 }
  0xf1   :  { %v116_v15 = vpack.c.bf16 %v115_v13, %v115_v13 }
  0xf3   :  { %117 = vst [vmem:[%s213_s3] sm:$0xf] %v116_v15 }

// kernel: lanet_forward.24
= control target key start
LH: loop header
LB: loop body
LE: loop exit
PB: predicated region body
PF: predicated region fallthrough
CT: control target
= control target key end

     0   :  { %v238_v1 = vmov 0   ;;  %v34_v18 = vlaneseq  ;;  %v239_v23 = vmov 1966171168   ;;  %vm187_vm0 = vcmask 1040384   ;;  %s317_s1 = inlined_call_operand.vmem [shape: bf16[128,160], index: 1, kind: input, shape index: {}]   ;;  %s318_s0 = inlined_call_operand.vmem [shape: bf16[2,128], index: 0, kind: input, shape index: {}]   ;;  %s319_s2 = inlined_call_operand.vmem [shape: f32[1,160], index: 2, kind: input, shape index: {}]   ;;  %s320_s3 = inlined_call_operand.vmem [shape: bf16[2,160], index: 3, kind: output, shape index: {}]  }
   0x1   :  { %v214_v0 = vld [vmem:[%s317_s1 + $0x4] ss:$8 sps:$4 sm:$0xff]   ;;  %156 = vmatprep.mubr.bf16.mxu0 %v238_v1  ;;  %v216_v2 = vld [vmem:[%s317_s1] ss:$8 sps:$4 sm:$0xff]   ;;  %v217_v3 = vld [vmem:[%s317_s1 + $0x14] ss:$8 sps:$4 sm:$0xff]   ;;  %v173_v24 = vunpack.c.l.s4 %v239_v23 }
   0x2   :  { %124 = vmatprep.subr.bf16.mxu0 %v214_v0  ;;  %v219_v4 = vld [vmem:[%s317_s1 + $0x10] ss:$8 sps:$4 sm:$0xff]   ;;  %v220_v5 = vld [vmem:[%s317_s1 + $0x24] ss:$8 sps:$4 sm:$0xff]   ;;  %v222_v6 = vld [vmem:[%s317_s1 + $0x20] ss:$8 sps:$4 sm:$0xff]  }
   0x3   :  { %125 = vmatpush1.bf16.msra.mxu0 %v216_v2  ;;  %v223_v7 = vld [vmem:[%s317_s1 + $0x34] ss:$8 sps:$4 sm:$0xff]   ;;  %v225_v8 = vld [vmem:[%s317_s1 + $0x30] ss:$8 sps:$4 sm:$0xff]   ;;  %v226_v9 = vld [vmem:[%s317_s1 + $0x44] ss:$8 sps:$4 sm:$0xff]   ;;  %v174_v28 = vunpack.c.0.s8 %v173_v24 }
   0x4   :  { %126 = vmatprep.subr.bf16.mxu0 %v217_v3  ;;  %v228_v10 = vld [vmem:[%s317_s1 + $0x40] ss:$8 sps:$4 sm:$0xff]   ;;  %v229_v11 = vld [vmem:[%s317_s1 + $0x54] ss:$8 sps:$4 sm:$0xff]   ;;  %v231_v12 = vld [vmem:[%s317_s1 + $0x50] ss:$8 sps:$4 sm:$0xff]  }
   0x5   :  { %v232_v13 = vld [vmem:[%s317_s1 + $0x64] ss:$8 sps:$4 sm:$0xff]   ;;  %v234_v14 = vld [vmem:[%s317_s1 + $0x60] ss:$8 sps:$4 sm:$0xff]   ;;  %v235_v15 = vld [vmem:[%s317_s1 + $0x74] ss:$8 sps:$4 sm:$0xff]  }
   0x6   :  { %v237_v16 = vld [vmem:[%s317_s1 + $0x70] ss:$8 sps:$4 sm:$0xff]   ;;  %v15_v17 = vld [vmem:[%s318_s0] sm:$0x1]  ;;  %v35_v19 = vshrl.u32 %v34_v18, 7  ;;  %vm188_vm1 = vcmask 254977  }
   0x7   :  { %127 = vmatpush1.bf16.msra.mxu0 %v219_v4  ;;  %v32_v21 = vld [vmem:[%s319_s2] sm:$0x3]  ;;  %vm189_vm2 = vmor %vm188_vm1, %vm187_vm0 }
   0x8   :  { %128 = vmatprep.subr.bf16.mxu0 %v220_v5  ;;  %v36_v20 = vsub.s32 0, %v35_v19  ;;  %v40_v22 = vsub.s32 1, %v35_v19  ;;  %v177_v36 = vsub.s32 %v174_v28, %v35_v19 }
   0xa   :  { %v37_v25 = vrot.slane %v32_v21, %v36_v20  ;;  %v41_v26 = vrot.slane %v32_v21, %v40_v22 }
   0xb   :  { %129 = vmatpush1.bf16.msra.mxu0 %v222_v6 }
   0xc   :  { %130 = vmatprep.subr.bf16.mxu0 %v223_v7 }
   0xf   :  { %131 = vmatpush1.bf16.msra.mxu0 %v225_v8 }
  0x10   :  { %132 = vmatprep.subr.bf16.mxu0 %v226_v9 }
  0x13   :  { %133 = vmatpush1.bf16.msra.mxu0 %v228_v10 }
  0x14   :  { %134 = vmatprep.subr.bf16.mxu0 %v229_v11 }
  0x17   :  { %135 = vmatpush1.bf16.msra.mxu0 %v231_v12 }
  0x18   :  { %136 = vmatprep.subr.bf16.mxu0 %v232_v13 }
  0x1b   :  { %137 = vmatpush1.bf16.msra.mxu0 %v234_v14 }
  0x1c   :  { %138 = vmatprep.subr.bf16.mxu0 %v235_v15 }
  0x1f   :  { %139 = vmatpush1.bf16.msra.mxu0 %v237_v16 }
  0x22   :  { %157 = vmatmul.mubr.bf16.vlgmr.msra.gmra.mrb[0].mxu0 %v15_v17 }
  0xf5   :  { %v158_v27 = vpop.f32.mrb[0].mxu0 }
  0xf6   :  { %v159_v29 = vadd.f32 %v158_v27, %v37_v25  ;;  %v160_v30 = vpop.f32.mrb[1].mxu0 }
  0xf7   :  { %v161_v31 = vadd.f32 %v160_v30, %v41_v26  ;;  %v162_v32 = vpop.f32.mrb[2].mxu0 }
  0xf8   :  { %v165_v33 = vmax.f32 %v159_v29, 0.0  ;;  %v163_v34 = vpop.f32.mrb[3].mxu0 }
  0xf9   :  { %v166_v35 = vmax.f32 %v161_v31, 0.0 }
  0xfb   :  { %v211_v37 = vpack.c.bf16 %v166_v35, %v165_v33 }
  0xfd   :  { %v178_v38 = vrot.slane %v211_v37, %v177_v36 }
  0xff   :  { %v185_v39 = vrot.slane %v178_v38, %v177_v36 }
 0x101   :  { %190 = vst.msk [vmem:[%s320_s3] sm:$0x3] %vm189_vm2, %v185_v39 }

// kernel: lanet_forward.29
= control target key start
LH: loop header
LB: loop body
LE: loop exit
PB: predicated region body
PF: predicated region fallthrough
CT: control target
= control target key end

     0   :  { %s347_s12 = smov 0   ;;  %s377_s0 = inlined_call_operand.vmem [shape: bf16[2,1,160], index: 0, kind: input, shape index: {}]   ;;  %s378_s1 = inlined_call_operand.vmem [shape: f32[1,1,160], index: 1, kind: input, shape index: {}]   ;;  %s379_s2 = inlined_call_operand.vmem [shape: f32[1,1,160], index: 2, kind: input, shape index: {}]   ;;  %s380_s3 = inlined_call_operand.vmem [shape: bf16[2,1,160], index: 3, kind: output, shape index: {}]  }
   0x1 LB: > { %s292_s13 = sadd.s32 4294967295, %s323_s12   ;;  %p296_p0 = scmp.ge.s32.totalorder %s323_s12, 1  ;;  %s323_s12 = sphi %s347_s12, %s13_s12  }
   0x2   : > { %p136_p1 = scmp.lt.s32.totalorder %s323_s12, 3 }
   0x4   : > { %p137_p2 = pnand %p296_p0, %p136_p1 }
   0x5   : > { %p158_p3 = scmp.lt.s32.totalorder (!%p137_p2), %s292_s13, 1  ;;  %v174_v0 = vlaneseq (!%p137_p2)  ;;  %v325_v1 = vmov (!%p137_p2), 857870592   ;;  %v169_v5 = vld [vmem:[%s378_s1] sm:$0x3] (!%p137_p2)  ;;  %vm229_vm0 = vcmask (!%p137_p2), 1040384  }
   0x6   : > { %140 = sbr.rel (%p137_p2) target bundleno = 61 (0x3d), region = 32  ;;  %v172_v2 = vunpack.c.l.s4 (!%p137_p2), %v325_v1  ;;  %v180_v6 = vld [vmem:[%s379_s2] sm:$0x3] (!%p137_p2)  ;;  %v326_v17 = vmov (!%p137_p2), 1966171168   ;;  %vm232_vm2 = vcmask (!%p137_p2), 254977  }
   0x7   : > { %v175_v3 = vshrl.u32 (!%p137_p2), %v174_v0, 7  ;;  %v215_v18 = vunpack.c.l.s4 (!%p137_p2), %v326_v17  ;;  %vm230_vm1 = vsmask.f32 (!%p137_p2), 256  ;;  %vm233_vm3 = vsmask.f32 (!%p137_p2), 1280 }
   0x8   : > { %v173_v4 = vunpack.c.0.s8 (!%p137_p2), %v172_v2  ;;  %vm231_vm4 = vmand (!%p137_p2), %vm229_vm0, %vm230_vm1 }
   0x9   : > { %v201_v19 = vsub.s32 (!%p137_p2), 0, %v175_v3  ;;  %v205_v20 = vsub.s32 (!%p137_p2), 2, %v175_v3  ;;  %v216_v21 = vunpack.c.0.s8 (!%p137_p2), %v215_v18  ;;  %vm234_vm5 = vmand (!%p137_p2), %vm232_vm2, %vm233_vm3 }
   0xa   : > { %v176_v7 = vsub.s32 (!%p137_p2), %v173_v4, %v175_v3  ;;  %vm235_vm6 = vmor (!%p137_p2), %vm234_vm5, %vm231_vm4 }
   0xb   : > { %v219_v26 = vsub.s32 (!%p137_p2), %v216_v21, %v175_v3 }
   0xc   : > { %v177_v10 = vrot.slane (!%p137_p2), %v169_v5, %v176_v7  ;;  %v188_v11 = vrot.slane (!%p137_p2), %v180_v6, %v176_v7 }
   0xd   : > { %s382_s13 = smov (!%p158_p3, %s292_s13), 1 }
   0xe   : > { %s297_s14 = sshll.u32 %s382_s13, 1 }
   0xf   : > { %s161_s21 = scalar_lea.vmem %s377_s0, %s297_s14  ;;  %s165_s24 = scalar_lea.vmem %s380_s3, %s297_s14 }
  0x10   : > { %v166_v8 = vld [vmem:[%s161_s21] sm:$0x3] }
  0x11   : > { %v167_v9 = vunpack.c.l.bf16 %v166_v8  ;;  %v236_v29 = vld [vmem:[%s165_s24] sm:$0x3] }
  0x13   : > { %v179_v12 = vmul.f32 %v177_v10, %v167_v9 }
  0x15   : > { %v190_v13 = vadd.f32 %v188_v11, %v179_v12 }
  0x17   : > { %v299_v14 = vmul.f32 -1.442695, %v190_v13 }
  0x19   : > { %313 = vpow2.f32 %v299_v14 }
  0x23   : > { %v314_v15 = vpop.eup %313 }
  0x24   : > { %v194_v16 = vadd.f32 1.0, %v314_v15 }
  0x26   : > { %315 = vrcp.f32 %v194_v16 }
  0x30   : > { %v316_v22 = vpop.eup %315 }
  0x31   : > { %v197_v23 = vmul.f32 %v316_v22, %v167_v9 }
  0x33   : > { %v202_v24 = vrot.slane %v197_v23, %v201_v19  ;;  %v206_v25 = vrot.slane %v197_v23, %v205_v20 }
  0x35   : > { %v300_v27 = vpack.c.bf16 %v206_v25, %v202_v24 }
  0x37   : > { %v220_v28 = vrot.slane %v300_v27, %v219_v26 }
  0x39   : > { %v227_v30 = vrot.slane %v220_v28, %v219_v26 }
  0x3b   : > { %v237_v31 = vsel %vm235_vm6, %v227_v30, %v236_v29 }
  0x3c   : > { %238 = vst [vmem:[%s165_s24] sm:$0x3] %v237_v31 }
  0x3d PF: > { %s13_s12 = sadd.s32 1, %s323_s12  }
  0x3e   : > { %p10_p4 = scmp.ge.s32.totalorder %s13_s12, 4  }
  0x40   :  { %12 = sbr.rel (!%p10_p4) target bundleno = 1 (0x1), region = 62 }

// kernel: lanet_forward.34
= control target key start
LH: loop header
LB: loop body
LE: loop exit
PB: predicated region body
PF: predicated region fallthrough
CT: control target
= control target key end

     0   :  { %v183_v0 = vmov 0.0   ;;  %vm184_vm0 = vmmov 0   ;;  %vm129_vm1 = vcmask 257024   ;;  %s238_s1 = inlined_call_operand.vmem [shape: bf16[128,32], index: 1, kind: input, shape index: {}]   ;;  %s239_s0 = inlined_call_operand.vmem [shape: bf16[8,128], index: 0, kind: input, shape index: {}]   ;;  %s240_s2 = inlined_call_operand.vmem [shape: f32[1,32], index: 2, kind: input, shape index: {}]   ;;  %s241_s3 = inlined_call_operand.vmem [shape: bf16[8,32], index: 3, kind: output, shape index: {}]  }
   0x1   :  { %153 = vmatprep.subr.bf16.mxu0 %v183_v0  ;;  %v175_v1 = vld [vmem:[%s238_s1] sm:$0xff]   ;;  %169 = vmatprep.mubr.msk.bf16.mxu0 %vm184_vm0, %v183_v0  ;;  %v176_v2 = vld [vmem:[%s238_s1 + $0x8] sm:$0xff]   ;;  %v177_v3 = vld [vmem:[%s238_s1 + $0x10] sm:$0xff]  }
   0x2   :  { %154 = vmatpush3.bf16.msra.mxu0 %v175_v1  ;;  %v178_v4 = vld [vmem:[%s238_s1 + $0x18] sm:$0xff]   ;;  %v179_v5 = vld [vmem:[%s238_s1 + $0x20] sm:$0xff]   ;;  %v180_v6 = vld [vmem:[%s238_s1 + $0x28] sm:$0xff]  }
   0x3   :  { %155 = vmatprep.subr.bf16.mxu0 %v183_v0  ;;  %v181_v7 = vld [vmem:[%s238_s1 + $0x30] sm:$0xff]   ;;  %v182_v8 = vld [vmem:[%s238_s1 + $0x38] sm:$0xff]   ;;  %v15_v9 = vld [vmem:[%s239_s0] sm:$0xf] }
   0x4   :  { %v135_v10 = vld [vmem:[%s240_s2] ss:$0 sm:$0xff] }
   0x6   :  { %156 = vmatpush3.bf16.msra.mxu0 %v176_v2 }
   0x7   :  { %157 = vmatprep.subr.bf16.mxu0 %v183_v0 }
   0xa   :  { %158 = vmatpush3.bf16.msra.mxu0 %v177_v3 }
   0xb   :  { %159 = vmatprep.subr.bf16.mxu0 %v183_v0 }
   0xe   :  { %160 = vmatpush3.bf16.msra.mxu0 %v178_v4 }
   0xf   :  { %161 = vmatprep.subr.bf16.mxu0 %v183_v0 }
  0x12   :  { %162 = vmatpush3.bf16.msra.mxu0 %v179_v5 }
  0x13   :  { %163 = vmatprep.subr.bf16.mxu0 %v183_v0 }
  0x16   :  { %164 = vmatpush3.bf16.msra.mxu0 %v180_v6 }
  0x17   :  { %165 = vmatprep.subr.bf16.mxu0 %v183_v0 }
  0x1a   :  { %166 = vmatpush3.bf16.msra.mxu0 %v181_v7 }
  0x1b   :  { %167 = vmatprep.subr.bf16.mxu0 %v183_v0 }
  0x1e   :  { %168 = vmatpush3.bf16.msra.mxu0 %v182_v8 }
  0x21   :  { %170 = vmatmul.mubr.bf16.vlgmr.msra.gmra.mrb[0].mxu0 %v15_v9 }
  0xf4   :  { %v121_v11 = vpop.f32.mrb[0].mxu0 }
  0xf5   :  { %v122_v12 = vadd.f32 %v135_v10, %v121_v11  ;;  %v171_v13 = vpop.f32.mrb[1].mxu0 }
  0xf6   :  { %v124_v14 = vpop.f32.mrb[2].mxu0 }
  0xf7   :  { %v127_v15 = vmax.f32 %v122_v12, 0.0  ;;  %v172_v16 = vpop.f32.mrb[3].mxu0 }
  0xf9   :  { %v128_v17 = vpack.c.bf16 %v127_v15, %v127_v15 }
  0xfb   :  { %130 = vst.msk [vmem:[%s241_s3] sm:$0xf] %vm129_vm1, %v128_v17 }

// kernel: lanet_forward.30
= control target key start
LH: loop header
LB: loop body
LE: loop exit
PB: predicated region body
PF: predicated region fallthrough
CT: control target
= control target key end

     0   :  { %v346_v0 = vmov 0   ;;  %v347_v2 = vmov 0.0   ;;  %vm348_vm0 = vmmov 0   ;;  %vm125_vm1 = vcmask 261120   ;;  %s445_s3 = inlined_call_operand.vmem [shape: bf16[160,128], index: 3, kind: input, shape index: {}]   ;;  %s446_s2 = inlined_call_operand.vmem [shape: bf16[128,128], index: 2, kind: input, shape index: {}]   ;;  %s447_s1 = inlined_call_operand.vmem [shape: bf16[8,160], index: 1, kind: input, shape index: {}]   ;;  %s448_s0 = inlined_call_operand.vmem [shape: bf16[8,128], index: 0, kind: input, shape index: {}]   ;;  %s449_s4 = inlined_call_operand.vmem [shape: f32[1,128], index: 4, kind: input, shape index: {}]   ;;  %s450_s5 = inlined_call_operand.vmem [shape: bf16[8,128], index: 5, kind: output, shape index: {}]  }
   0x1   :  { %129 = vmatprep.subr.bf16.mxu0 %v346_v0  ;;  %v326_v1 = vld [vmem:[%s445_s3] sm:$0xff]   ;;  %303 = vmatprep.subr.bf16.mxu1 %v347_v2  ;;  %v327_v3 = vld [vmem:[%s445_s3 + $0x8] sm:$0xff]   ;;  %v329_v6 = vld [vmem:[%s445_s3 + $0x10] sm:$0xff]  }
   0x2   :  { %319 = vmatprep.mubr.msk.bf16.mxu1 %vm348_vm0, %v347_v2  ;;  %130 = vmatpush1.bf16.msra.mxu0 %v326_v1  ;;  %v328_v4 = vld [vmem:[%s446_s2] sm:$0xff]   ;;  %v330_v5 = vld [vmem:[%s446_s2 + $0x8] sm:$0xff]   ;;  %v332_v7 = vld [vmem:[%s446_s2 + $0x10] sm:$0xff]  }
   0x3   :  { %131 = vmatprep.subr.bf16.mxu0 %v346_v0  ;;  %304 = vmatpush3.bf16.msra.mxu1 %v328_v4  ;;  %v331_v8 = vld [vmem:[%s445_s3 + $0x18] sm:$0xff]   ;;  %v333_v10 = vld [vmem:[%s445_s3 + $0x20] sm:$0xff]   ;;  %v335_v12 = vld [vmem:[%s445_s3 + $0x28] sm:$0xff]  }
   0x4   :  { %305 = vmatprep.subr.bf16.mxu1 %v347_v2  ;;  %v334_v9 = vld [vmem:[%s446_s2 + $0x18] sm:$0xff]   ;;  %v336_v11 = vld [vmem:[%s446_s2 + $0x20] sm:$0xff]   ;;  %v338_v15 = vld [vmem:[%s446_s2 + $0x28] sm:$0xff]  }
   0x5   :  { %v38_v13 = vld [vmem:[%s447_s1] sm:$0xff]  ;;  %v337_v16 = vld [vmem:[%s445_s3 + $0x30] sm:$0xff]   ;;  %v339_v18 = vld [vmem:[%s445_s3 + $0x38] sm:$0xff]  }
   0x6   :  { %132 = vmatpush1.bf16.msra.mxu0 %v327_v3  ;;  %v273_v14 = vcombine.high %v38_v13, %v38_v13  ;;  %v340_v17 = vld [vmem:[%s446_s2 + $0x30] sm:$0xff]   ;;  %v342_v19 = vld [vmem:[%s446_s2 + $0x38] sm:$0xff]   ;;  %v341_v20 = vld [vmem:[%s445_s3 + $0x40] sm:$0xff]   ;;  %v272_v23 = vcombine.low %v38_v13, %v38_v13 }
   0x7   :  { %133 = vmatprep.subr.bf16.mxu0 %v346_v0  ;;  %306 = vmatpush3.bf16.msra.mxu1 %v330_v5  ;;  %v21_v21 = vld [vmem:[%s448_s0] sm:$0xf]  ;;  %v343_v22 = vld [vmem:[%s445_s3 + $0x48] sm:$0xff]  }
   0x8   :  { %307 = vmatprep.subr.bf16.mxu1 %v347_v2  ;;  %284 = vmatprep.mubr.msk.bf16.mxu0 %vm125_vm1, %v273_v14  ;;  %v293_v29 = vld [vmem:[%s449_s4] ss:$0 sm:$0xff] }
   0xa   :  { %134 = vmatpush1.bf16.msra.mxu0 %v329_v6 }
   0xb   :  { %135 = vmatprep.subr.bf16.mxu0 %v346_v0  ;;  %308 = vmatpush3.bf16.msra.mxu1 %v332_v7 }
   0xc   :  { %309 = vmatprep.subr.bf16.mxu1 %v347_v2 }
   0xe   :  { %136 = vmatpush1.bf16.msra.mxu0 %v331_v8 }
   0xf   :  { %137 = vmatprep.subr.bf16.mxu0 %v346_v0  ;;  %310 = vmatpush3.bf16.msra.mxu1 %v334_v9 }
  0x10   :  { %311 = vmatprep.subr.bf16.mxu1 %v347_v2 }
  0x12   :  { %138 = vmatpush1.bf16.msra.mxu0 %v333_v10 }
  0x13   :  { %139 = vmatprep.subr.bf16.mxu0 %v346_v0  ;;  %312 = vmatpush3.bf16.msra.mxu1 %v336_v11 }
  0x14   :  { %313 = vmatprep.subr.bf16.mxu1 %v347_v2 }
  0x16   :  { %140 = vmatpush1.bf16.msra.mxu0 %v335_v12 }
  0x17   :  { %141 = vmatprep.subr.bf16.mxu0 %v346_v0  ;;  %314 = vmatpush3.bf16.msra.mxu1 %v338_v15 }
  0x18   :  { %315 = vmatprep.subr.bf16.mxu1 %v347_v2 }
  0x1a   :  { %142 = vmatpush1.bf16.msra.mxu0 %v337_v16 }
  0x1b   :  { %143 = vmatprep.subr.bf16.mxu0 %v346_v0  ;;  %316 = vmatpush3.bf16.msra.mxu1 %v340_v17 }
  0x1c   :  { %317 = vmatprep.subr.bf16.mxu1 %v347_v2 }
  0x1e   :  { %144 = vmatpush1.bf16.msra.mxu0 %v339_v18 }
  0x1f   :  { %145 = vmatprep.subr.bf16.mxu0 %v346_v0  ;;  %318 = vmatpush3.bf16.msra.mxu1 %v342_v19 }
  0x22   :  { %146 = vmatpush1.bf16.msra.mxu0 %v341_v20  ;;  %320 = vmatmul.mubr.bf16.vlgmr.msra.gmra.mrb[0].mxu1 %v21_v21 }
  0x23   :  { %147 = vmatprep.subr.bf16.mxu0 %v346_v0 }
  0x26   :  { %148 = vmatpush1.bf16.msra.mxu0 %v343_v22 }
  0x29   :  { %162 = vmatmul.mubr.bf16.vlgmr.msra.gmra.mrb[0].mxu0 %v272_v23 }
  0xf5   :  { %v251_v24 = vpop.f32.mrb[0].mxu1 }
  0xf6   :  { %v321_v25 = vpop.f32.mrb[1].mxu1 }
  0xf7   :  { %v254_v26 = vpop.f32.mrb[2].mxu1 }
  0xf8   :  { %v322_v27 = vpop.f32.mrb[3].mxu1 }
  0xfc   :  { %v163_v28 = vpop.f32.mrb[0].mxu0 }
  0xfd   :  { %v252_v30 = vadd.f32 %v251_v24, %v163_v28  ;;  %v165_v31 = vpop.f32.mrb[1].mxu0 }
  0xfe   :  { %v166_v32 = vpop.f32.mrb[2].mxu0 }
  0xff   :  { %v264_v33 = vadd.f32 %v293_v29, %v252_v30  ;;  %v167_v34 = vpop.f32.mrb[3].mxu0 }
 0x101   :  { %v265_v35 = vmax.f32 %v264_v33, 0.0 }
 0x103   :  { %v266_v36 = vpack.c.bf16 %v265_v35, %v265_v35 }
 0x105   :  { %267 = vst [vmem:[%s450_s5] sm:$0xf] %v266_v36 }

// kernel: lanet_forward.31
= control target key start
LH: loop header
LB: loop body
LE: loop exit
PB: predicated region body
PF: predicated region fallthrough
CT: control target
= control target key end

     0   :  { %vm212_vm0 = vcmask 785408   ;;  %vm299_vm1 = vcmask 781312   ;;  %s514_s3 = inlined_call_operand.vmem [shape: bf16[128,96], index: 3, kind: input, shape index: {}]   ;;  %s515_s2 = inlined_call_operand.vmem [shape: bf16[96,96], index: 2, kind: input, shape index: {}]   ;;  %s516_s0 = inlined_call_operand.vmem [shape: bf16[32,96], index: 0, kind: input, shape index: {}]   ;;  %s517_s1 = inlined_call_operand.vmem [shape: bf16[32,128], index: 1, kind: input, shape index: {}]   ;;  %s518_s4 = inlined_call_operand.vmem [shape: f32[1,96], index: 4, kind: input, shape index: {}]   ;;  %s519_s5 = inlined_call_operand.vmem [shape: bf16[32,96], index: 5, kind: output, shape index: {}]  }
   0x1   :  { %v395_v0 = vld [vmem:[%s514_s3] sm:$0xff]   ;;  %v396_v1 = vld [vmem:[%s514_s3 + $0x8] sm:$0xff]   ;;  %v398_v3 = vld [vmem:[%s514_s3 + $0x10] sm:$0xff]  }
   0x2   :  { %355 = vmatprep.subr.bf16.mxu1 %v395_v0  ;;  %v397_v2 = vld [vmem:[%s515_s2] sm:$0xff]   ;;  %v399_v4 = vld [vmem:[%s515_s2 + $0x8] sm:$0xff]   ;;  %v401_v5 = vld [vmem:[%s515_s2 + $0x10] sm:$0xff]  }
   0x3   :  { %356 = vmatpush3.bf16.msra.mxu1 %v395_v0  ;;  %375 = vmatprep.subr.bf16.mxu0 %v397_v2  ;;  %v400_v6 = vld [vmem:[%s514_s3 + $0x18] sm:$0xff]   ;;  %v402_v8 = vld [vmem:[%s514_s3 + $0x20] sm:$0xff]   ;;  %v404_v11 = vld [vmem:[%s514_s3 + $0x28] sm:$0xff]  }
   0x4   :  { %357 = vmatprep.subr.bf16.mxu1 %v396_v1  ;;  %376 = vmatpush3.bf16.msra.mxu0 %v397_v2  ;;  %v403_v7 = vld [vmem:[%s515_s2 + $0x18] sm:$0xff]   ;;  %v405_v9 = vld [vmem:[%s515_s2 + $0x20] sm:$0xff]   ;;  %v407_v13 = vld [vmem:[%s515_s2 + $0x28] sm:$0xff]  }
   0x5   :  { %377 = vmatprep.subr.bf16.mxu0 %v399_v4  ;;  %v409_v10 = vld [vmem:[%s516_s0] sm:$0xff]   ;;  %v406_v14 = vld [vmem:[%s514_s3 + $0x30] sm:$0xff]   ;;  %v408_v15 = vld [vmem:[%s514_s3 + $0x38] sm:$0xff]  }
   0x6   :  { %387 = vmatprep.mubr.msk.bf16.mxu0 %vm212_vm0, %v409_v10  ;;  %v411_v12 = vld [vmem:[%s517_s1] sm:$0xff]   ;;  %v410_v16 = vld [vmem:[%s516_s0 + $0x8] sm:$0xff]  }
   0x7   :  { %358 = vmatpush3.bf16.msra.mxu1 %v396_v1  ;;  %371 = vmatprep.mubr.bf16.mxu1 %v411_v12  ;;  %v412_v17 = vld [vmem:[%s517_s1 + $0x8] sm:$0xff]   ;;  %v328_v23 = vld [vmem:[%s518_s4] ss:$0 sm:$0xff] }
   0x8   :  { %359 = vmatprep.subr.bf16.mxu1 %v398_v3  ;;  %378 = vmatpush3.bf16.msra.mxu0 %v399_v4 }
   0x9   :  { %379 = vmatprep.subr.bf16.mxu0 %v401_v5 }
   0xb   :  { %360 = vmatpush3.bf16.msra.mxu1 %v398_v3 }
   0xc   :  { %361 = vmatprep.subr.bf16.mxu1 %v400_v6  ;;  %380 = vmatpush3.bf16.msra.mxu0 %v401_v5 }
   0xd   :  { %381 = vmatprep.subr.bf16.mxu0 %v403_v7 }
   0xf   :  { %362 = vmatpush3.bf16.msra.mxu1 %v400_v6 }
  0x10   :  { %363 = vmatprep.subr.bf16.mxu1 %v402_v8  ;;  %382 = vmatpush3.bf16.msra.mxu0 %v403_v7 }
  0x11   :  { %383 = vmatprep.subr.bf16.mxu0 %v405_v9 }
  0x13   :  { %364 = vmatpush3.bf16.msra.mxu1 %v402_v8 }
  0x14   :  { %365 = vmatprep.subr.bf16.mxu1 %v404_v11  ;;  %384 = vmatpush3.bf16.msra.mxu0 %v405_v9 }
  0x15   :  { %385 = vmatprep.subr.bf16.mxu0 %v407_v13 }
  0x17   :  { %366 = vmatpush3.bf16.msra.mxu1 %v404_v11 }
  0x18   :  { %367 = vmatprep.subr.bf16.mxu1 %v406_v14  ;;  %386 = vmatpush3.bf16.msra.mxu0 %v407_v13 }
  0x1b   :  { %368 = vmatpush3.bf16.msra.mxu1 %v406_v14  ;;  %388 = vmatmul.mubr.msk.bf16.vlgmr.msra.gmra.mrb[0].mxu0 %vm212_vm0, %v410_v16 }
  0x1c   :  { %369 = vmatprep.subr.bf16.mxu1 %v408_v15 }
  0x1f   :  { %370 = vmatpush3.bf16.msra.mxu1 %v408_v15 }
  0x22   :  { %372 = vmatmul.mubr.bf16.vlgmr.msra.gmra.mrb[0].mxu1 %v412_v17 }
  0xee   :  { %v389_v18 = vpop.f32.mrb[0].mxu0 }
  0xef   :  { %v253_v19 = vpop.f32.mrb[1].mxu0 }
  0xf0   :  { %v390_v20 = vpop.f32.mrb[2].mxu0 }
  0xf1   :  { %v256_v21 = vpop.f32.mrb[3].mxu0 }
  0xf5   :  { %v373_v22 = vpop.f32.mrb[0].mxu1 }
  0xf6   :  { %v262_v24 = vadd.f32 %v389_v18, %v373_v22  ;;  %v151_v25 = vpop.f32.mrb[1].mxu1 }
  0xf7   :  { %v254_v26 = vadd.f32 %v253_v19, %v151_v25  ;;  %v374_v27 = vpop.f32.mrb[2].mxu1 }
  0xf8   :  { %v277_v28 = vadd.f32 %v328_v23, %v262_v24  ;;  %v265_v29 = vadd.f32 %v390_v20, %v374_v27  ;;  %v154_v30 = vpop.f32.mrb[3].mxu1 }
  0xf9   :  { %v275_v31 = vadd.f32 %v328_v23, %v254_v26  ;;  %v257_v32 = vadd.f32 %v256_v21, %v154_v30 }
  0xfa   :  { %v281_v33 = vmax.f32 %v277_v28, 0.0  ;;  %v278_v34 = vadd.f32 %v328_v23, %v265_v29 }
  0xfb   :  { %v279_v35 = vmax.f32 %v275_v31, 0.0  ;;  %v276_v36 = vadd.f32 %v328_v23, %v257_v32 }
  0xfc   :  { %v335_v37 = vpack.c.bf16 %v281_v33, %v281_v33  ;;  %v282_v38 = vmax.f32 %v278_v34, 0.0 }
  0xfd   :  { %v333_v39 = vpack.c.bf16 %v279_v35, %v279_v35  ;;  %v280_v40 = vmax.f32 %v276_v36, 0.0 }
  0xfe   :  { %302 = vst.msk [vmem:[%s519_s5 + $0x8] sm:$0xf] %vm299_vm1, %v335_v37  ;;  %v336_v41 = vpack.c.bf16 %v282_v38, %v282_v38 }
  0xff   :  { %300 = vst.msk [vmem:[%s519_s5] sm:$0xf] %vm299_vm1, %v333_v39  ;;  %v334_v42 = vpack.c.bf16 %v280_v40, %v280_v40 }
 0x100   :  { %303 = vst.msk [vmem:[%s519_s5 + $0xc] sm:$0xf] %vm299_vm1, %v336_v41 }
 0x101   :  { %301 = vst.msk [vmem:[%s519_s5 + $0x4] sm:$0xf] %vm299_vm1, %v334_v42 }

// kernel: lanet_forward.35
= control target key start
LH: loop header
LB: loop body
LE: loop exit
PB: predicated region body
PF: predicated region fallthrough
CT: control target
= control target key end

     0   :  { %vm87_vm0 = vcmask 785408   ;;  %vm175_vm1 = vcmask 257024   ;;  %s316_s1 = inlined_call_operand.vmem [shape: bf16[96,32], index: 1, kind: input, shape index: {}]   ;;  %s317_s0 = inlined_call_operand.vmem [shape: bf16[32,96], index: 0, kind: input, shape index: {}]   ;;  %s318_s2 = inlined_call_operand.vmem [shape: f32[1,32], index: 2, kind: input, shape index: {}]   ;;  %s319_s3 = inlined_call_operand.vmem [shape: bf16[32,32], index: 3, kind: input, shape index: {}]   ;;  %s320_s4 = inlined_call_operand.vmem [shape: bf16[32,32], index: 4, kind: output, shape index: {}]  }
   0x1   :  { %v236_v0 = vld [vmem:[%s316_s1] sm:$0xff]   ;;  %v237_v1 = vld [vmem:[%s316_s1 + $0x8] sm:$0xff]   ;;  %v238_v2 = vld [vmem:[%s316_s1 + $0x10] sm:$0xff]  }
   0x2   :  { %220 = vmatprep.subr.bf16.mxu0 %v236_v0  ;;  %v242_v3 = vld [vmem:[%s317_s0] sm:$0xff]   ;;  %v239_v4 = vld [vmem:[%s316_s1 + $0x18] sm:$0xff]   ;;  %v241_v6 = vld [vmem:[%s316_s1 + $0x28] sm:$0xff]  }
   0x3   :  { %221 = vmatpush3.bf16.msra.mxu0 %v236_v0  ;;  %232 = vmatprep.mubr.msk.bf16.mxu0 %vm87_vm0, %v242_v3  ;;  %v240_v5 = vld [vmem:[%s316_s1 + $0x20] sm:$0xff]   ;;  %v243_v7 = vld [vmem:[%s317_s0 + $0x8] sm:$0xff]  }
   0x4   :  { %222 = vmatprep.subr.bf16.mxu0 %v237_v1  ;;  %v184_v8 = vld [vmem:[%s318_s2] ss:$0 sm:$0xff]  ;;  %v211_v9 = vld [vmem:[%s319_s3 + $0x8] sm:$0xff]  }
   0x5   :  { %v204_v10 = vld [vmem:[%s319_s3] sm:$0xff]   ;;  %v209_v13 = vunpack.c.l.bf16 %v211_v9  ;;  %v210_v20 = vunpack.c.h.bf16 %v211_v9 }
   0x6   :  { %v205_v16 = vunpack.c.l.bf16 %v204_v10  ;;  %v206_v24 = vunpack.c.h.bf16 %v204_v10 }
   0x7   :  { %223 = vmatpush3.bf16.msra.mxu0 %v237_v1 }
   0x8   :  { %224 = vmatprep.subr.bf16.mxu0 %v238_v2 }
   0xb   :  { %225 = vmatpush3.bf16.msra.mxu0 %v238_v2 }
   0xc   :  { %226 = vmatprep.subr.bf16.mxu0 %v239_v4 }
   0xf   :  { %227 = vmatpush3.bf16.msra.mxu0 %v239_v4 }
  0x10   :  { %228 = vmatprep.subr.bf16.mxu0 %v240_v5 }
  0x13   :  { %229 = vmatpush3.bf16.msra.mxu0 %v240_v5 }
  0x14   :  { %230 = vmatprep.subr.bf16.mxu0 %v241_v6 }
  0x17   :  { %231 = vmatpush3.bf16.msra.mxu0 %v241_v6 }
  0x1a   :  { %233 = vmatmul.mubr.msk.bf16.vlgmr.msra.gmra.mrb[0].mxu0 %vm87_vm0, %v243_v7 }
  0xed   :  { %v234_v11 = vpop.f32.mrb[0].mxu0 }
  0xee   :  { %v137_v12 = vadd.f32 %v234_v11, %v184_v8  ;;  %v128_v14 = vpop.f32.mrb[1].mxu0 }
  0xef   :  { %v129_v15 = vadd.f32 %v184_v8, %v128_v14  ;;  %v235_v17 = vpop.f32.mrb[2].mxu0 }
  0xf0   :  { %v145_v18 = vmax.f32 %v137_v12, 0.0  ;;  %v140_v19 = vadd.f32 %v235_v17, %v184_v8  ;;  %v131_v21 = vpop.f32.mrb[3].mxu0 }
  0xf1   :  { %v143_v22 = vmax.f32 %v129_v15, 0.0  ;;  %v132_v23 = vadd.f32 %v184_v8, %v131_v21 }
  0xf2   :  { %v157_v25 = vadd.f32 %v209_v13, %v145_v18  ;;  %v146_v26 = vmax.f32 %v140_v19, 0.0 }
  0xf3   :  { %v155_v27 = vadd.f32 %v205_v16, %v143_v22  ;;  %v144_v28 = vmax.f32 %v132_v23, 0.0 }
  0xf4   :  { %v201_v29 = vpack.c.bf16 %v157_v25, %v157_v25  ;;  %v158_v30 = vadd.f32 %v210_v20, %v146_v26 }
  0xf5   :  { %v199_v31 = vpack.c.bf16 %v155_v27, %v155_v27  ;;  %v156_v32 = vadd.f32 %v206_v24, %v144_v28 }
  0xf6   :  { %178 = vst.msk [vmem:[%s320_s4 + $0x8] sm:$0xf] %vm175_vm1, %v201_v29  ;;  %v202_v33 = vpack.c.bf16 %v158_v30, %v158_v30 }
  0xf7   :  { %176 = vst.msk [vmem:[%s320_s4] sm:$0xf] %vm175_vm1, %v199_v31  ;;  %v200_v34 = vpack.c.bf16 %v156_v32, %v156_v32 }
  0xf8   :  { %179 = vst.msk [vmem:[%s320_s4 + $0xc] sm:$0xf] %vm175_vm1, %v202_v33 }
  0xf9   :  { %177 = vst.msk [vmem:[%s320_s4 + $0x4] sm:$0xf] %vm175_vm1, %v200_v34 }

// kernel: lanet_forward.36
= control target key start
LH: loop header
LB: loop body
LE: loop exit
PB: predicated region body
PF: predicated region fallthrough
CT: control target
= control target key end

     0   :  { %vm113_vm0 = vcmask 523264   ;;  %vm363_vm1 = vcmask 257024   ;;  %s742_s1 = inlined_call_operand.vmem [shape: bf16[64,32], index: 1, kind: input, shape index: {}]   ;;  %s743_s0 = inlined_call_operand.vmem [shape: bf16[128,64], index: 0, kind: input, shape index: {}]   ;;  %s744_s3 = inlined_call_operand.vmem [shape: bf16[128,32], index: 3, kind: input, shape index: {}]   ;;  %s745_s2 = inlined_call_operand.vmem [shape: f32[1,32], index: 2, kind: input, shape index: {}]   ;;  %s746_s4 = inlined_call_operand.vmem [shape: bf16[128,32], index: 4, kind: output, shape index: {}]  }
   0x1   :  { %v520_v0 = vld [vmem:[%s742_s1] sm:$0xff]   ;;  %v521_v1 = vld [vmem:[%s742_s1 + $0x8] sm:$0xff]   ;;  %v522_v2 = vld [vmem:[%s742_s1 + $0x10] sm:$0xff]  }
   0x2   :  { %488 = vmatprep.subr.bf16.mxu0 %v520_v0  ;;  %512 = vmatprep.subr.bf16.mxu1 %v520_v0  ;;  %v524_v3 = vld [vmem:[%s743_s0] sm:$0xff]   ;;  %v523_v5 = vld [vmem:[%s742_s1 + $0x18] sm:$0xff]   ;;  %v526_v6 = vld [vmem:[%s743_s0 + $0x8] sm:$0xff]  }
   0x3   :  { %489 = vmatpush3.bf16.msra.mxu0 %v520_v0  ;;  %516 = vmatpush3.bf16.msra.mxu1 %v520_v0  ;;  %v525_v4 = vld [vmem:[%s743_s0 + $0x20] sm:$0xff]   ;;  %v527_v7 = vld [vmem:[%s743_s0 + $0x28] sm:$0xff]   ;;  %v528_v8 = vld [vmem:[%s743_s0 + $0x10] sm:$0xff]  }
   0x4   :  { %490 = vmatprep.subr.bf16.mxu0 %v521_v1  ;;  %513 = vmatprep.subr.bf16.mxu1 %v521_v1  ;;  %v529_v9 = vld [vmem:[%s743_s0 + $0x30] sm:$0xff]   ;;  %v530_v10 = vld [vmem:[%s743_s0 + $0x18] sm:$0xff]   ;;  %v469_v12 = vld [vmem:[%s744_s3 + $0x8] sm:$0xff]  }
   0x5   :  { %496 = vmatprep.mubr.msk.bf16.mxu0 %vm113_vm0, %v524_v3  ;;  %504 = vmatprep.mubr.msk.bf16.mxu1 %vm113_vm0, %v525_v4  ;;  %v531_v11 = vld [vmem:[%s743_s0 + $0x38] sm:$0xff]   ;;  %v473_v13 = vld [vmem:[%s744_s3 + $0x28] sm:$0xff]   ;;  %v438_v14 = vld [vmem:[%s744_s3] sm:$0xff]   ;;  %v443_v17 = vunpack.c.l.bf16 %v469_v12  ;;  %v444_v25 = vunpack.c.h.bf16 %v469_v12 }
   0x6   :  { %v472_v15 = vld [vmem:[%s744_s3 + $0x20] sm:$0xff]   ;;  %v616_v16 = vld [vmem:[%s744_s3 + $0x18] sm:$0xff]   ;;  %v626_v19 = vld [vmem:[%s744_s3 + $0x10] sm:$0xff]   ;;  %v459_v22 = vunpack.c.l.bf16 %v473_v13  ;;  %v439_v23 = vunpack.c.l.bf16 %v438_v14  ;;  %v460_v26 = vunpack.c.h.bf16 %v473_v13  ;;  %v440_v27 = vunpack.c.h.bf16 %v438_v14 }
   0x7   :  { %491 = vmatpush3.bf16.msra.mxu0 %v521_v1  ;;  %517 = vmatpush3.bf16.msra.mxu1 %v521_v1  ;;  %v621_v18 = vld [vmem:[%s744_s3 + $0x38] sm:$0xff]   ;;  %v631_v20 = vld [vmem:[%s744_s3 + $0x30] sm:$0xff]   ;;  %v636_v21 = vld [vmem:[%s745_s2] ss:$0 sm:$0xff]  ;;  %v455_v24 = vunpack.c.l.bf16 %v472_v15  ;;  %v456_v28 = vunpack.c.h.bf16 %v472_v15  ;;  %v451_v31 = vunpack.c.l.bf16 %v616_v16  ;;  %v447_v33 = vunpack.c.l.bf16 %v626_v19 }
   0x8   :  { %492 = vmatprep.subr.bf16.mxu0 %v522_v2  ;;  %514 = vmatprep.subr.bf16.mxu1 %v522_v2  ;;  %v467_v32 = vunpack.c.l.bf16 %v621_v18  ;;  %v463_v34 = vunpack.c.l.bf16 %v631_v20  ;;  %v452_v39 = vunpack.c.h.bf16 %v616_v16  ;;  %v468_v40 = vunpack.c.h.bf16 %v621_v18 }
   0x9   :  { %v448_v45 = vunpack.c.h.bf16 %v626_v19  ;;  %v464_v46 = vunpack.c.h.bf16 %v631_v20 }
   0xb   :  { %493 = vmatpush3.bf16.msra.mxu0 %v522_v2  ;;  %518 = vmatpush3.bf16.msra.mxu1 %v522_v2 }
   0xc   :  { %494 = vmatprep.subr.bf16.mxu0 %v523_v5  ;;  %515 = vmatprep.subr.bf16.mxu1 %v523_v5 }
   0xf   :  { %495 = vmatpush3.bf16.msra.mxu0 %v523_v5  ;;  %519 = vmatpush3.bf16.msra.mxu1 %v523_v5 }
  0x12   :  { %497 = vmatmul.mubr.msk.bf16.vlgmr.msra.gmra.mrb[0].mxu0 %vm113_vm0, %v526_v6  ;;  %505 = vmatmul.mubr.msk.bf16.vlgmr.msra.gmra.mrb[0].mxu1 %vm113_vm0, %v527_v7 }
  0x13   :  { %500 = vmatprep.mubr.msk.bf16.mxu0 %vm113_vm0, %v528_v8  ;;  %508 = vmatprep.mubr.msk.bf16.mxu1 %vm113_vm0, %v529_v9 }
  0x1a   :  { %501 = vmatmul.mubr.msk.bf16.gmra.mrb[4].mxu0 %vm113_vm0, %v530_v10  ;;  %509 = vmatmul.mubr.msk.bf16.gmra.mrb[4].mxu1 %vm113_vm0, %v531_v11 }
  0xe5   :  { %v498_v29 = vpop.f32.mrb[0].mxu0  ;;  %v506_v30 = vpop.f32.mrb[0].mxu1 }
  0xe6   :  { %v181_v35 = vadd.f32 %v498_v29, %v636_v21  ;;  %v213_v36 = vadd.f32 %v506_v30, %v636_v21  ;;  %v172_v37 = vpop.f32.mrb[1].mxu0  ;;  %v204_v38 = vpop.f32.mrb[1].mxu1 }
  0xe7   :  { %v173_v41 = vadd.f32 %v636_v21, %v172_v37  ;;  %v205_v42 = vadd.f32 %v636_v21, %v204_v38  ;;  %v499_v43 = vpop.f32.mrb[2].mxu0  ;;  %v507_v44 = vpop.f32.mrb[2].mxu1 }
  0xe8   :  { %v237_v47 = vmax.f32 %v181_v35, 0.0  ;;  %v245_v48 = vmax.f32 %v213_v36, 0.0  ;;  %v184_v49 = vadd.f32 %v499_v43, %v636_v21  ;;  %v216_v50 = vadd.f32 %v507_v44, %v636_v21  ;;  %v175_v51 = vpop.f32.mrb[3].mxu0  ;;  %v207_v52 = vpop.f32.mrb[3].mxu1 }
  0xe9   :  { %v235_v53 = vmax.f32 %v173_v41, 0.0  ;;  %v243_v54 = vmax.f32 %v205_v42, 0.0  ;;  %v176_v55 = vadd.f32 %v636_v21, %v175_v51  ;;  %v208_v56 = vadd.f32 %v636_v21, %v207_v52 }
  0xea   :  { %v285_v57 = vadd.f32 %v443_v17, %v237_v47  ;;  %v293_v58 = vadd.f32 %v459_v22, %v245_v48  ;;  %v238_v59 = vmax.f32 %v184_v49, 0.0  ;;  %v246_v60 = vmax.f32 %v216_v50, 0.0 }
  0xeb   :  { %v283_v61 = vadd.f32 %v439_v23, %v235_v53  ;;  %v291_v62 = vadd.f32 %v455_v24, %v243_v54  ;;  %v236_v63 = vmax.f32 %v176_v55, 0.0  ;;  %v244_v0 = vmax.f32 %v208_v56, 0.0 }
  0xec   :  { %v423_v1 = vpack.c.bf16 %v285_v57, %v285_v57  ;;  %v431_v2 = vpack.c.bf16 %v293_v58, %v293_v58  ;;  %v286_v3 = vadd.f32 %v444_v25, %v238_v59  ;;  %v294_v4 = vadd.f32 %v460_v26, %v246_v60 }
  0xed   :  { %v421_v5 = vpack.c.bf16 %v283_v61, %v283_v61  ;;  %v429_v6 = vpack.c.bf16 %v291_v62, %v291_v62  ;;  %v284_v7 = vadd.f32 %v440_v27, %v236_v63  ;;  %v292_v8 = vadd.f32 %v456_v28, %v244_v0  ;;  %v502_v9 = vpop.f32.mrb[4].mxu0  ;;  %v510_v10 = vpop.f32.mrb[4].mxu1 }
  0xee   :  { %366 = vst.msk [vmem:[%s746_s4 + $0x8] sm:$0xf] %vm363_vm1, %v423_v1  ;;  %374 = vst.msk [vmem:[%s746_s4 + $0x28] sm:$0xf] %vm363_vm1, %v431_v2  ;;  %v424_v11 = vpack.c.bf16 %v286_v3, %v286_v3  ;;  %v432_v12 = vpack.c.bf16 %v294_v4, %v294_v4  ;;  %v197_v13 = vadd.f32 %v502_v9, %v636_v21  ;;  %v188_v15 = vpop.f32.mrb[5].mxu0  ;;  %v220_v17 = vpop.f32.mrb[5].mxu1 }
  0xef   :  { %v229_v14 = vadd.f32 %v510_v10, %v636_v21  ;;  %364 = vst.msk [vmem:[%s746_s4] sm:$0xf] %vm363_vm1, %v421_v5  ;;  %372 = vst.msk [vmem:[%s746_s4 + $0x20] sm:$0xf] %vm363_vm1, %v429_v6  ;;  %v422_v22 = vpack.c.bf16 %v284_v7, %v284_v7  ;;  %v430_v23 = vpack.c.bf16 %v292_v8, %v292_v8  ;;  %v503_v26 = vpop.f32.mrb[6].mxu0  ;;  %v511_v27 = vpop.f32.mrb[6].mxu1 }
  0xf0   :  { %v189_v24 = vadd.f32 %v636_v21, %v188_v15  ;;  %v221_v25 = vadd.f32 %v636_v21, %v220_v17  ;;  %367 = vst.msk [vmem:[%s746_s4 + $0xc] sm:$0xf] %vm363_vm1, %v424_v11  ;;  %375 = vst.msk [vmem:[%s746_s4 + $0x2c] sm:$0xf] %vm363_vm1, %v432_v12  ;;  %v241_v28 = vmax.f32 %v197_v13, 0.0  ;;  %v200_v30 = vadd.f32 %v503_v26, %v636_v21  ;;  %v191_v36 = vpop.f32.mrb[7].mxu0 }
  0xf1   :  { %v249_v29 = vmax.f32 %v229_v14, 0.0  ;;  %v232_v35 = vadd.f32 %v511_v27, %v636_v21  ;;  %v223_v37 = vpop.f32.mrb[7].mxu1  ;;  %365 = vst.msk [vmem:[%s746_s4 + $0x4] sm:$0xf] %vm363_vm1, %v422_v22  ;;  %373 = vst.msk [vmem:[%s746_s4 + $0x24] sm:$0xf] %vm363_vm1, %v430_v23  ;;  %v192_v42 = vadd.f32 %v636_v21, %v191_v36 }
  0xf2   :  { %v239_v38 = vmax.f32 %v189_v24, 0.0  ;;  %v247_v41 = vmax.f32 %v221_v25, 0.0  ;;  %v224_v43 = vadd.f32 %v636_v21, %v223_v37  ;;  %v289_v44 = vadd.f32 %v451_v31, %v241_v28 }
  0xf3   :  { %v297_v47 = vadd.f32 %v467_v32, %v249_v29  ;;  %v242_v48 = vmax.f32 %v200_v30, 0.0  ;;  %v250_v49 = vmax.f32 %v232_v35, 0.0  ;;  %v240_v52 = vmax.f32 %v192_v42, 0.0 }
  0xf4   :  { %v287_v50 = vadd.f32 %v447_v33, %v239_v38  ;;  %v295_v51 = vadd.f32 %v463_v34, %v247_v41  ;;  %v248_v53 = vmax.f32 %v224_v43, 0.0  ;;  %v427_v54 = vpack.c.bf16 %v289_v44, %v289_v44 }
  0xf5   :  { %v435_v55 = vpack.c.bf16 %v297_v47, %v297_v47  ;;  %v290_v21 = vadd.f32 %v452_v39, %v242_v48  ;;  %v298_v31 = vadd.f32 %v468_v40, %v250_v49  ;;  %v288_v57 = vadd.f32 %v448_v45, %v240_v52 }
  0xf6   :  { %v425_v56 = vpack.c.bf16 %v287_v50, %v287_v50  ;;  %v433_v32 = vpack.c.bf16 %v295_v51, %v295_v51  ;;  %v296_v33 = vadd.f32 %v464_v46, %v248_v53  ;;  %370 = vst.msk [vmem:[%s746_s4 + $0x18] sm:$0xf] %vm363_vm1, %v427_v54 }
  0xf7   :  { %378 = vst.msk [vmem:[%s746_s4 + $0x38] sm:$0xf] %vm363_vm1, %v435_v55  ;;  %v428_v16 = vpack.c.bf16 %v290_v21, %v290_v21  ;;  %v436_v18 = vpack.c.bf16 %v298_v31, %v298_v31  ;;  %v426_v19 = vpack.c.bf16 %v288_v57, %v288_v57 }
  0xf8   :  { %368 = vst.msk [vmem:[%s746_s4 + $0x10] sm:$0xf] %vm363_vm1, %v425_v56  ;;  %376 = vst.msk [vmem:[%s746_s4 + $0x30] sm:$0xf] %vm363_vm1, %v433_v32  ;;  %v434_v20 = vpack.c.bf16 %v296_v33, %v296_v33 }
  0xf9   :  { %371 = vst.msk [vmem:[%s746_s4 + $0x1c] sm:$0xf] %vm363_vm1, %v428_v16  ;;  %379 = vst.msk [vmem:[%s746_s4 + $0x3c] sm:$0xf] %vm363_vm1, %v436_v18 }
  0xfa   :  { %369 = vst.msk [vmem:[%s746_s4 + $0x14] sm:$0xf] %vm363_vm1, %v426_v19  ;;  %377 = vst.msk [vmem:[%s746_s4 + $0x34] sm:$0xf] %vm363_vm1, %v434_v20 }

// kernel: lanet_forward.32
= control target key start
LH: loop header
LB: loop body
LE: loop exit
PB: predicated region body
PF: predicated region fallthrough
CT: control target
= control target key end

     0   :  { %vm335_vm0 = vcmask 523264   ;;  %vm149_vm1 = vcmask 785408   ;;  %vm560_vm2 = vcmask 519168   ;;  %s985_s3 = inlined_call_operand.vmem [shape: bf16[96,64], index: 3, kind: input, shape index: {}]   ;;  %s986_s2 = inlined_call_operand.vmem [shape: bf16[64,64], index: 2, kind: input, shape index: {}]   ;;  %s987_s0 = inlined_call_operand.vmem [shape: bf16[128,64], index: 0, kind: input, shape index: {}]   ;;  %s988_s1 = inlined_call_operand.vmem [shape: bf16[128,96], index: 1, kind: input, shape index: {}]   ;;  %s989_s4 = inlined_call_operand.vmem [shape: f32[1,64], index: 4, kind: input, shape index: {}]   ;;  %s990_s5 = inlined_call_operand.vmem [shape: bf16[128,64], index: 5, kind: output, shape index: {}]  }
   0x1   :  { %v750_v0 = vld [vmem:[%s985_s3] sm:$0xff]   ;;  %v751_v1 = vld [vmem:[%s985_s3 + $0x8] sm:$0xff]   ;;  %v753_v3 = vld [vmem:[%s985_s3 + $0x10] sm:$0xff]  }
   0x2   :  { %682 = vmatprep.subr.bf16.mxu1 %v750_v0  ;;  %v752_v2 = vld [vmem:[%s986_s2] sm:$0xff]   ;;  %v754_v4 = vld [vmem:[%s986_s2 + $0x8] sm:$0xff]   ;;  %v756_v5 = vld [vmem:[%s986_s2 + $0x10] sm:$0xff]  }
   0x3   :  { %683 = vmatpush3.bf16.msra.mxu1 %v750_v0  ;;  %710 = vmatprep.subr.bf16.mxu0 %v752_v2  ;;  %v755_v6 = vld [vmem:[%s985_s3 + $0x18] sm:$0xff]   ;;  %v760_v8 = vld [vmem:[%s987_s0] sm:$0xff]   ;;  %v759_v11 = vld [vmem:[%s985_s3 + $0x28] sm:$0xff]  }
   0x4   :  { %684 = vmatprep.subr.bf16.mxu1 %v751_v1  ;;  %711 = vmatpush3.bf16.msra.mxu0 %v752_v2  ;;  %v758_v7 = vld [vmem:[%s986_s2 + $0x18] sm:$0xff]   ;;  %v757_v9 = vld [vmem:[%s985_s3 + $0x20] sm:$0xff]   ;;  %v761_v12 = vld [vmem:[%s987_s0 + $0x8] sm:$0xff]  }
   0x5   :  { %712 = vmatprep.subr.bf16.mxu0 %v754_v4  ;;  %718 = vmatprep.mubr.msk.bf16.mxu0 %vm335_vm0, %v760_v8  ;;  %v762_v10 = vld [vmem:[%s988_s1] sm:$0xff]   ;;  %v764_v13 = vld [vmem:[%s987_s0 + $0x10] sm:$0xff]   ;;  %v763_v14 = vld [vmem:[%s988_s1 + $0x8] sm:$0xff]  }
   0x6   :  { %694 = vmatprep.mubr.msk.bf16.mxu1 %vm149_vm1, %v762_v10  ;;  %v766_v15 = vld [vmem:[%s988_s1 + $0x10] sm:$0xff]   ;;  %v765_v16 = vld [vmem:[%s987_s0 + $0x18] sm:$0xff]   ;;  %v768_v17 = vld [vmem:[%s987_s0 + $0x20] sm:$0xff]  }
   0x7   :  { %685 = vmatpush3.bf16.msra.mxu1 %v751_v1  ;;  %v767_v18 = vld [vmem:[%s988_s1 + $0x18] sm:$0xff]   ;;  %v770_v19 = vld [vmem:[%s988_s1 + $0x20] sm:$0xff]   ;;  %v769_v20 = vld [vmem:[%s987_s0 + $0x28] sm:$0xff]  }
   0x8   :  { %686 = vmatprep.subr.bf16.mxu1 %v753_v3  ;;  %713 = vmatpush3.bf16.msra.mxu0 %v754_v4  ;;  %v772_v21 = vld [vmem:[%s987_s0 + $0x30] sm:$0xff]   ;;  %v771_v22 = vld [vmem:[%s988_s1 + $0x28] sm:$0xff]   ;;  %v773_v24 = vld [vmem:[%s987_s0 + $0x38] sm:$0xff]  }
   0x9   :  { %714 = vmatprep.subr.bf16.mxu0 %v756_v5  ;;  %v774_v23 = vld [vmem:[%s988_s1 + $0x30] sm:$0xff]   ;;  %v775_v25 = vld [vmem:[%s988_s1 + $0x38] sm:$0xff]   ;;  %v903_v31 = vld [vmem:[%s989_s4] ss:$0 sm:$0xff] }
   0xb   :  { %687 = vmatpush3.bf16.msra.mxu1 %v753_v3 }
   0xc   :  { %688 = vmatprep.subr.bf16.mxu1 %v755_v6  ;;  %715 = vmatpush3.bf16.msra.mxu0 %v756_v5 }
   0xd   :  { %716 = vmatprep.subr.bf16.mxu0 %v758_v7 }
   0xf   :  { %689 = vmatpush3.bf16.msra.mxu1 %v755_v6 }
  0x10   :  { %690 = vmatprep.subr.bf16.mxu1 %v757_v9  ;;  %717 = vmatpush3.bf16.msra.mxu0 %v758_v7 }
  0x13   :  { %691 = vmatpush3.bf16.msra.mxu1 %v757_v9  ;;  %719 = vmatmul.mubr.msk.bf16.vlgmr.msra.gmra.mrb[0].mxu0 %vm335_vm0, %v761_v12 }
  0x14   :  { %692 = vmatprep.subr.bf16.mxu1 %v759_v11  ;;  %722 = vmatprep.mubr.msk.bf16.mxu0 %vm335_vm0, %v764_v13 }
  0x17   :  { %693 = vmatpush3.bf16.msra.mxu1 %v759_v11 }
  0x1a   :  { %695 = vmatmul.mubr.msk.bf16.vlgmr.msra.gmra.mrb[0].mxu1 %vm149_vm1, %v763_v14 }
  0x1b   :  { %698 = vmatprep.mubr.msk.bf16.mxu1 %vm149_vm1, %v766_v15  ;;  %723 = vmatmul.mubr.msk.bf16.gmra.mrb[4].mxu0 %vm335_vm0, %v765_v16 }
  0x1c   :  { %726 = vmatprep.mubr.msk.bf16.mxu0 %vm335_vm0, %v768_v17 }
  0x22   :  { %699 = vmatmul.mubr.msk.bf16.gmra.mrb[4].mxu1 %vm149_vm1, %v767_v18 }
  0x23   :  { %702 = vmatprep.mubr.msk.bf16.mxu1 %vm149_vm1, %v770_v19  ;;  %727 = vmatmul.mubr.msk.bf16.gmra.mrb[8].mxu0 %vm335_vm0, %v769_v20 }
  0x24   :  { %730 = vmatprep.mubr.msk.bf16.mxu0 %vm335_vm0, %v772_v21 }
  0x2a   :  { %703 = vmatmul.mubr.msk.bf16.gmra.mrb[8].mxu1 %vm149_vm1, %v771_v22 }
  0x2b   :  { %706 = vmatprep.mubr.msk.bf16.mxu1 %vm149_vm1, %v774_v23  ;;  %731 = vmatmul.mubr.msk.bf16.gmra.mrb[12].mxu0 %vm335_vm0, %v773_v24 }
  0x32   :  { %707 = vmatmul.mubr.msk.bf16.gmra.mrb[12].mxu1 %vm149_vm1, %v775_v25 }
  0xe6   :  { %v720_v26 = vpop.f32.mrb[0].mxu0 }
  0xe7   :  { %v394_v27 = vpop.f32.mrb[1].mxu0 }
  0xe8   :  { %v721_v28 = vpop.f32.mrb[2].mxu0 }
  0xe9   :  { %v397_v29 = vpop.f32.mrb[3].mxu0 }
  0xed   :  { %v696_v30 = vpop.f32.mrb[0].mxu1 }
  0xee   :  { %v403_v32 = vadd.f32 %v720_v26, %v696_v30  ;;  %v208_v33 = vpop.f32.mrb[1].mxu1  ;;  %v724_v36 = vpop.f32.mrb[4].mxu0 }
  0xef   :  { %v395_v34 = vadd.f32 %v394_v27, %v208_v33  ;;  %v697_v35 = vpop.f32.mrb[2].mxu1  ;;  %v410_v40 = vpop.f32.mrb[5].mxu0 }
  0xf0   :  { %v466_v37 = vadd.f32 %v903_v31, %v403_v32  ;;  %v406_v38 = vadd.f32 %v721_v28, %v697_v35  ;;  %v211_v39 = vpop.f32.mrb[3].mxu1  ;;  %v725_v43 = vpop.f32.mrb[6].mxu0 }
  0xf1   :  { %v464_v41 = vadd.f32 %v903_v31, %v395_v34  ;;  %v398_v42 = vadd.f32 %v397_v29, %v211_v39  ;;  %v413_v46 = vpop.f32.mrb[7].mxu0 }
  0xf2   :  { %v482_v44 = vmax.f32 %v466_v37, 0.0  ;;  %v467_v45 = vadd.f32 %v903_v31, %v406_v38 }
  0xf3   :  { %v480_v47 = vmax.f32 %v464_v41, 0.0  ;;  %v465_v48 = vadd.f32 %v903_v31, %v398_v42 }
  0xf4   :  { %v642_v49 = vpack.c.bf16 %v482_v44, %v482_v44  ;;  %v483_v50 = vmax.f32 %v467_v45, 0.0 }
  0xf5   :  { %v640_v51 = vpack.c.bf16 %v480_v47, %v480_v47  ;;  %v481_v52 = vmax.f32 %v465_v48, 0.0  ;;  %v700_v53 = vpop.f32.mrb[4].mxu1 }
  0xf6   :  { %563 = vst.msk [vmem:[%s990_s5 + $0x8] sm:$0xf] %vm560_vm2, %v642_v49  ;;  %v643_v54 = vpack.c.bf16 %v483_v50, %v483_v50  ;;  %v419_v55 = vadd.f32 %v724_v36, %v700_v53  ;;  %v224_v56 = vpop.f32.mrb[5].mxu1  ;;  %v728_v60 = vpop.f32.mrb[8].mxu0 }
  0xf7   :  { %561 = vst.msk [vmem:[%s990_s5] sm:$0xf] %vm560_vm2, %v640_v51  ;;  %v641_v57 = vpack.c.bf16 %v481_v52, %v481_v52  ;;  %v411_v58 = vadd.f32 %v410_v40, %v224_v56  ;;  %v701_v59 = vpop.f32.mrb[6].mxu1  ;;  %v426_v0 = vpop.f32.mrb[9].mxu0 }
  0xf8   :  { %564 = vst.msk [vmem:[%s990_s5 + $0xc] sm:$0xf] %vm560_vm2, %v643_v54  ;;  %v470_v61 = vadd.f32 %v903_v31, %v419_v55  ;;  %v422_v62 = vadd.f32 %v725_v43, %v701_v59  ;;  %v227_v63 = vpop.f32.mrb[7].mxu1  ;;  %v729_v3 = vpop.f32.mrb[10].mxu0 }
  0xf9   :  { %562 = vst.msk [vmem:[%s990_s5 + $0x4] sm:$0xf] %vm560_vm2, %v641_v57  ;;  %v468_v1 = vadd.f32 %v903_v31, %v411_v58  ;;  %v414_v2 = vadd.f32 %v413_v46, %v227_v63  ;;  %v429_v6 = vpop.f32.mrb[11].mxu0 }
  0xfa   :  { %v486_v4 = vmax.f32 %v470_v61, 0.0  ;;  %v471_v5 = vadd.f32 %v903_v31, %v422_v62 }
  0xfb   :  { %v484_v7 = vmax.f32 %v468_v1, 0.0  ;;  %v469_v8 = vadd.f32 %v903_v31, %v414_v2 }
  0xfc   :  { %v646_v9 = vpack.c.bf16 %v486_v4, %v486_v4  ;;  %v487_v10 = vmax.f32 %v471_v5, 0.0 }
  0xfd   :  { %v644_v11 = vpack.c.bf16 %v484_v7, %v484_v7  ;;  %v485_v12 = vmax.f32 %v469_v8, 0.0  ;;  %v704_v13 = vpop.f32.mrb[8].mxu1 }
  0xfe   :  { %567 = vst.msk [vmem:[%s990_s5 + $0x18] sm:$0xf] %vm560_vm2, %v646_v9  ;;  %v647_v14 = vpack.c.bf16 %v487_v10, %v487_v10  ;;  %v435_v15 = vadd.f32 %v728_v60, %v704_v13  ;;  %v240_v16 = vpop.f32.mrb[9].mxu1  ;;  %v732_v20 = vpop.f32.mrb[12].mxu0 }
  0xff   :  { %565 = vst.msk [vmem:[%s990_s5 + $0x10] sm:$0xf] %vm560_vm2, %v644_v11  ;;  %v645_v17 = vpack.c.bf16 %v485_v12, %v485_v12  ;;  %v427_v18 = vadd.f32 %v426_v0, %v240_v16  ;;  %v705_v19 = vpop.f32.mrb[10].mxu1  ;;  %v442_v24 = vpop.f32.mrb[13].mxu0 }
 0x100   :  { %568 = vst.msk [vmem:[%s990_s5 + $0x1c] sm:$0xf] %vm560_vm2, %v647_v14  ;;  %v474_v21 = vadd.f32 %v903_v31, %v435_v15  ;;  %v438_v22 = vadd.f32 %v729_v3, %v705_v19  ;;  %v243_v23 = vpop.f32.mrb[11].mxu1  ;;  %v733_v27 = vpop.f32.mrb[14].mxu0 }
 0x101   :  { %566 = vst.msk [vmem:[%s990_s5 + $0x14] sm:$0xf] %vm560_vm2, %v645_v17  ;;  %v472_v25 = vadd.f32 %v903_v31, %v427_v18  ;;  %v430_v26 = vadd.f32 %v429_v6, %v243_v23  ;;  %v445_v30 = vpop.f32.mrb[15].mxu0 }
 0x102   :  { %v490_v28 = vmax.f32 %v474_v21, 0.0  ;;  %v475_v29 = vadd.f32 %v903_v31, %v438_v22 }
 0x103   :  { %v488_v32 = vmax.f32 %v472_v25, 0.0  ;;  %v473_v33 = vadd.f32 %v903_v31, %v430_v26 }
 0x104   :  { %v650_v34 = vpack.c.bf16 %v490_v28, %v490_v28  ;;  %v491_v35 = vmax.f32 %v475_v29, 0.0 }
 0x105   :  { %v648_v36 = vpack.c.bf16 %v488_v32, %v488_v32  ;;  %v489_v37 = vmax.f32 %v473_v33, 0.0  ;;  %v708_v38 = vpop.f32.mrb[12].mxu1 }
 0x106   :  { %571 = vst.msk [vmem:[%s990_s5 + $0x28] sm:$0xf] %vm560_vm2, %v650_v34  ;;  %v651_v39 = vpack.c.bf16 %v491_v35, %v491_v35  ;;  %v451_v40 = vadd.f32 %v732_v20, %v708_v38  ;;  %v256_v41 = vpop.f32.mrb[13].mxu1 }
 0x107   :  { %569 = vst.msk [vmem:[%s990_s5 + $0x20] sm:$0xf] %vm560_vm2, %v648_v36  ;;  %v649_v42 = vpack.c.bf16 %v489_v37, %v489_v37  ;;  %v443_v43 = vadd.f32 %v442_v24, %v256_v41  ;;  %v709_v44 = vpop.f32.mrb[14].mxu1 }
 0x108   :  { %572 = vst.msk [vmem:[%s990_s5 + $0x2c] sm:$0xf] %vm560_vm2, %v651_v39  ;;  %v478_v45 = vadd.f32 %v903_v31, %v451_v40  ;;  %v454_v46 = vadd.f32 %v733_v27, %v709_v44  ;;  %v259_v47 = vpop.f32.mrb[15].mxu1 }
 0x109   :  { %570 = vst.msk [vmem:[%s990_s5 + $0x24] sm:$0xf] %vm560_vm2, %v649_v42  ;;  %v476_v48 = vadd.f32 %v903_v31, %v443_v43  ;;  %v446_v49 = vadd.f32 %v445_v30, %v259_v47 }
 0x10a   :  { %v494_v50 = vmax.f32 %v478_v45, 0.0  ;;  %v479_v51 = vadd.f32 %v903_v31, %v454_v46 }
 0x10b   :  { %v492_v52 = vmax.f32 %v476_v48, 0.0  ;;  %v477_v53 = vadd.f32 %v903_v31, %v446_v49 }
 0x10c   :  { %v654_v54 = vpack.c.bf16 %v494_v50, %v494_v50  ;;  %v495_v55 = vmax.f32 %v479_v51, 0.0 }
 0x10d   :  { %v652_v56 = vpack.c.bf16 %v492_v52, %v492_v52  ;;  %v493_v57 = vmax.f32 %v477_v53, 0.0 }
 0x10e   :  { %575 = vst.msk [vmem:[%s990_s5 + $0x38] sm:$0xf] %vm560_vm2, %v654_v54  ;;  %v655_v58 = vpack.c.bf16 %v495_v55, %v495_v55 }
 0x10f   :  { %573 = vst.msk [vmem:[%s990_s5 + $0x30] sm:$0xf] %vm560_vm2, %v652_v56  ;;  %v653_v59 = vpack.c.bf16 %v493_v57, %v493_v57 }
 0x110   :  { %576 = vst.msk [vmem:[%s990_s5 + $0x3c] sm:$0xf] %vm560_vm2, %v655_v58 }
 0x111   :  { %574 = vst.msk [vmem:[%s990_s5 + $0x34] sm:$0xf] %vm560_vm2, %v653_v59 }

// kernel: lanet_forward.37
= control target key start
LH: loop header
LB: loop body
LE: loop exit
PB: predicated region body
PF: predicated region fallthrough
CT: control target
= control target key end

     0   :  { %s1234_s15 = smov 0   ;;  %s1546_s0 = inlined_call_operand.vmem [shape: bf16[512,32], index: 0, kind: input, shape index: {}]   ;;  %s1547_s1 = inlined_call_operand.vmem [shape: bf16[32,32], index: 1, kind: input, shape index: {}]   ;;  %s1548_s2 = inlined_call_operand.vmem [shape: f32[1,32], index: 2, kind: input, shape index: {}]   ;;  %s1549_s3 = inlined_call_operand.vmem [shape: bf16[512,32], index: 3, kind: input, shape index: {}]   ;;  %s1550_s4 = inlined_call_operand.vmem [shape: bf16[512,32], index: 4, kind: output, shape index: {}]  }
   0x1 LB: > { %s926_s16 = sadd.s32 4294967295, %s1207_s15   ;;  %p930_p0 = scmp.ge.s32.totalorder %s1207_s15, 1  ;;  %s1207_s15 = sphi %s1234_s15, %s14_s15  }
   0x2   : > { %p174_p1 = scmp.lt.s32.totalorder %s1207_s15, 3 }
   0x4   : > { %p175_p2 = pnand %p930_p0, %p174_p1 }
   0x5   : > { %v1183_v0 = vld [vmem:[%s1547_s1] sm:$0xff] (!%p175_p2)   ;;  %s931_s19 = sshll.u32 (!%p175_p2), %s926_s16, 5  ;;  %v1184_v1 = vld [vmem:[%s1547_s1 + $0x8] sm:$0xff] (!%p175_p2)   ;;  %vm359_vm0 = vcmask (!%p175_p2), 261120   ;;  %vm825_vm1 = vcmask (!%p175_p2), 257024  }
   0x6   : > { %178 = sbr.rel (%p175_p2) target bundleno = 269 (0x10d), region = 36  ;;  %p206_p3 = scmp.lt.s32.totalorder (!%p175_p2), %s931_s19, 63  ;;  %1135 = vmatprep.subr.bf16.mxu0 (!%p175_p2), %v1183_v0  ;;  %1171 = vmatprep.subr.bf16.mxu1 (!%p175_p2), %v1183_v0  ;;  %v1353_v46 = vld [vmem:[%s1548_s2] ss:$0 sm:$0xff] (!%p175_p2) }
   0x7   : > { %1136 = vmatpush3.bf16.msra.mxu0 (!%p175_p2), %v1183_v0  ;;  %1173 = vmatpush3.bf16.msra.mxu1 (!%p175_p2), %v1183_v0 }
   0x8   : > { %1137 = vmatprep.subr.bf16.mxu0 (!%p175_p2), %v1184_v1  ;;  %1172 = vmatprep.subr.bf16.mxu1 (!%p175_p2), %v1184_v1 }
   0xb   : > { %1138 = vmatpush3.bf16.msra.mxu0 (!%p175_p2), %v1184_v1  ;;  %1174 = vmatpush3.bf16.msra.mxu1 (!%p175_p2), %v1184_v1 }
   0xd   : > { %s1555_s19 = smov (!%p206_p3, %s931_s19), 63 }
   0xe   : > { %s1248_s22 = sshll.u32 %s1555_s19, 2 }
   0xf   : > { %s1254_s25 = scalar_lea.vmem %s1546_s0, %s1248_s22  ;;  %s1292_s28 = scalar_lea.vmem %s1549_s3, %s1248_s22 }
  0x10   : > { %v1185_v2 = vld [vmem:[%s1254_s25] sm:$0xff]   ;;  %v1187_v4 = vld [vmem:[%s1254_s25 + $0x8] sm:$0xff]   ;;  %v1189_v6 = vld [vmem:[%s1254_s25 + $0x10] sm:$0xff]   ;;  %s1391_s7 = scalar_lea.vmem %s1550_s4, %s1248_s22 }
  0x11   : > { %v1186_v3 = vld [vmem:[%s1254_s25 + $0x40] sm:$0xff]   ;;  %1139 = vmatprep.mubr.msk.bf16.mxu0 %vm359_vm0, %v1185_v2  ;;  %v1188_v5 = vld [vmem:[%s1254_s25 + $0x48] sm:$0xff]   ;;  %v1190_v7 = vld [vmem:[%s1254_s25 + $0x50] sm:$0xff]  }
  0x12   : > { %1155 = vmatprep.mubr.msk.bf16.mxu1 %vm359_vm0, %v1186_v3  ;;  %1140 = vmatmul.mubr.msk.bf16.vlgmr.msra.gmra.mrb[0].mxu0 %vm359_vm0, %v1187_v4  ;;  %v1191_v8 = vld [vmem:[%s1254_s25 + $0x18] sm:$0xff]   ;;  %v1193_v10 = vld [vmem:[%s1254_s25 + $0x20] sm:$0xff]   ;;  %v1195_v12 = vld [vmem:[%s1254_s25 + $0x28] sm:$0xff]  }
  0x13   : > { %1156 = vmatmul.mubr.msk.bf16.vlgmr.msra.gmra.mrb[0].mxu1 %vm359_vm0, %v1188_v5  ;;  %1143 = vmatprep.mubr.msk.bf16.mxu0 %vm359_vm0, %v1189_v6  ;;  %v1192_v9 = vld [vmem:[%s1254_s25 + $0x58] sm:$0xff]   ;;  %v1194_v11 = vld [vmem:[%s1254_s25 + $0x60] sm:$0xff]   ;;  %v1196_v13 = vld [vmem:[%s1254_s25 + $0x68] sm:$0xff]  }
  0x14   : > { %1159 = vmatprep.mubr.msk.bf16.mxu1 %vm359_vm0, %v1190_v7  ;;  %v1197_v14 = vld [vmem:[%s1254_s25 + $0x30] sm:$0xff]   ;;  %v1199_v16 = vld [vmem:[%s1254_s25 + $0x38] sm:$0xff]   ;;  %v1295_v18 = vld [vmem:[%s1292_s28 + $0x8] sm:$0xff]  }
  0x15   : > { %v1198_v15 = vld [vmem:[%s1254_s25 + $0x70] sm:$0xff]   ;;  %v1200_v17 = vld [vmem:[%s1254_s25 + $0x78] sm:$0xff]   ;;  %v1298_v19 = vld [vmem:[%s1292_s28 + $0x48] sm:$0xff]   ;;  %v1044_v24 = vunpack.c.l.bf16 %v1295_v18  ;;  %v1045_v30 = vunpack.c.h.bf16 %v1295_v18 }
  0x16   : > { %v1301_v20 = vld [vmem:[%s1292_s28] sm:$0xff]   ;;  %v1307_v22 = vld [vmem:[%s1292_s28 + $0x18] sm:$0xff]   ;;  %v1076_v25 = vunpack.c.l.bf16 %v1298_v19  ;;  %v1315_v26 = vld [vmem:[%s1292_s28 + $0x10] sm:$0xff]   ;;  %v1077_v31 = vunpack.c.h.bf16 %v1298_v19 }
  0x17   : > { %v1304_v21 = vld [vmem:[%s1292_s28 + $0x40] sm:$0xff]   ;;  %v1310_v23 = vld [vmem:[%s1292_s28 + $0x58] sm:$0xff]   ;;  %v1318_v27 = vld [vmem:[%s1292_s28 + $0x50] sm:$0xff]   ;;  %v1040_v28 = vunpack.c.l.bf16 %v1301_v20  ;;  %v1041_v34 = vunpack.c.h.bf16 %v1301_v20  ;;  %v1052_v36 = vunpack.c.l.bf16 %v1307_v22  ;;  %v1048_v40 = vunpack.c.l.bf16 %v1315_v26 }
  0x18   : > { %v1072_v29 = vunpack.c.l.bf16 %v1304_v21  ;;  %v1325_v32 = vld [vmem:[%s1292_s28 + $0x28] sm:$0xff]   ;;  %v1073_v35 = vunpack.c.h.bf16 %v1304_v21  ;;  %v1084_v37 = vunpack.c.l.bf16 %v1310_v23  ;;  %v1335_v38 = vld [vmem:[%s1292_s28 + $0x20] sm:$0xff]   ;;  %v1080_v41 = vunpack.c.l.bf16 %v1318_v27  ;;  %v1345_v44 = vld [vmem:[%s1292_s28 + $0x38] sm:$0xff]  }
  0x19   : > { %v1328_v33 = vld [vmem:[%s1292_s28 + $0x68] sm:$0xff]   ;;  %v1338_v39 = vld [vmem:[%s1292_s28 + $0x60] sm:$0xff]   ;;  %v1053_v42 = vunpack.c.h.bf16 %v1307_v22  ;;  %v1085_v43 = vunpack.c.h.bf16 %v1310_v23  ;;  %v1348_v45 = vld [vmem:[%s1292_s28 + $0x78] sm:$0xff]   ;;  %v1049_v47 = vunpack.c.h.bf16 %v1315_v26  ;;  %v1081_v48 = vunpack.c.h.bf16 %v1318_v27 }
  0x1a   : > { %1144 = vmatmul.mubr.msk.bf16.gmra.mrb[4].mxu0 %vm359_vm0, %v1191_v8  ;;  %v1060_v49 = vunpack.c.l.bf16 %v1325_v32  ;;  %v1092_v50 = vunpack.c.l.bf16 %v1328_v33  ;;  %v1360_v51 = vld [vmem:[%s1292_s28 + $0x30] sm:$0xff]   ;;  %v1056_v53 = vunpack.c.l.bf16 %v1335_v38  ;;  %v1088_v54 = vunpack.c.l.bf16 %v1338_v39 }
  0x1b   : > { %1160 = vmatmul.mubr.msk.bf16.gmra.mrb[4].mxu1 %vm359_vm0, %v1192_v9  ;;  %1147 = vmatprep.mubr.msk.bf16.mxu0 %vm359_vm0, %v1193_v10  ;;  %v1363_v52 = vld [vmem:[%s1292_s28 + $0x70] sm:$0xff]   ;;  %v1061_v55 = vunpack.c.h.bf16 %v1325_v32  ;;  %v1093_v56 = vunpack.c.h.bf16 %v1328_v33  ;;  %v1057_v58 = vunpack.c.h.bf16 %v1335_v38  ;;  %v1089_v59 = vunpack.c.h.bf16 %v1338_v39 }
  0x1c   : > { %1163 = vmatprep.mubr.msk.bf16.mxu1 %vm359_vm0, %v1194_v11  ;;  %v1068_v60 = vunpack.c.l.bf16 %v1345_v44  ;;  %v1100_v61 = vunpack.c.l.bf16 %v1348_v45  ;;  %v1064_v1 = vunpack.c.l.bf16 %v1360_v51  ;;  %v1096_v2 = vunpack.c.l.bf16 %v1363_v52 }
  0x22   : > { %1148 = vmatmul.mubr.msk.bf16.gmra.mrb[8].mxu0 %vm359_vm0, %v1195_v12 }
  0x23   : > { %1164 = vmatmul.mubr.msk.bf16.gmra.mrb[8].mxu1 %vm359_vm0, %v1196_v13  ;;  %1151 = vmatprep.mubr.msk.bf16.mxu0 %vm359_vm0, %v1197_v14 }
  0x24   : > { %1167 = vmatprep.mubr.msk.bf16.mxu1 %vm359_vm0, %v1198_v15  ;;  %v1097_v15 = vunpack.c.h.bf16 %v1363_v52 }
  0x2a   : > { %1152 = vmatmul.mubr.msk.bf16.gmra.mrb[12].mxu0 %vm359_vm0, %v1199_v16 }
  0x2b   : > { %1168 = vmatmul.mubr.msk.bf16.gmra.mrb[12].mxu1 %vm359_vm0, %v1200_v17 }
  0xe5   : > { %v1141_v57 = vpop.f32.mrb[0].mxu0 }
  0xe6   : > { %v451_v62 = vadd.f32 %v1141_v57, %v1353_v46  ;;  %v1157_v63 = vpop.f32.mrb[0].mxu1  ;;  %v442_v0 = vpop.f32.mrb[1].mxu0 }
  0xe7   : > { %v515_v4 = vadd.f32 %v1157_v63, %v1353_v46  ;;  %v443_v5 = vadd.f32 %v1353_v46, %v442_v0  ;;  %v506_v6 = vpop.f32.mrb[1].mxu1  ;;  %v1142_v7 = vpop.f32.mrb[2].mxu0 }
  0xe8   : > { %v571_v10 = vmax.f32 %v451_v62, 0.0  ;;  %v507_v11 = vadd.f32 %v1353_v46, %v506_v6  ;;  %v454_v12 = vadd.f32 %v1142_v7, %v1353_v46  ;;  %v1158_v13 = vpop.f32.mrb[2].mxu1  ;;  %v445_v14 = vpop.f32.mrb[3].mxu0 }
  0xe9   : > { %v587_v16 = vmax.f32 %v515_v4, 0.0  ;;  %v569_v17 = vmax.f32 %v443_v5, 0.0  ;;  %v518_v57 = vadd.f32 %v1158_v13, %v1353_v46  ;;  %v446_v63 = vadd.f32 %v1353_v46, %v445_v14  ;;  %v509_v0 = vpop.f32.mrb[3].mxu1 }
  0xea   : > { %v667_v8 = vadd.f32 %v1044_v24, %v571_v10  ;;  %v585_v3 = vmax.f32 %v507_v11, 0.0  ;;  %v572_v9 = vmax.f32 %v454_v12, 0.0  ;;  %v510_v62 = vadd.f32 %v1353_v46, %v509_v0 }
  0xeb   : > { %v683_v4 = vadd.f32 %v1076_v25, %v587_v16  ;;  %v665_v5 = vadd.f32 %v1040_v28, %v569_v17  ;;  %v588_v6 = vmax.f32 %v518_v57, 0.0  ;;  %v570_v7 = vmax.f32 %v446_v63, 0.0 }
  0xec   : > { %v1008_v13 = vpack.c.bf16 %v667_v8, %v667_v8  ;;  %v681_v24 = vadd.f32 %v1072_v29, %v585_v3  ;;  %v668_v10 = vadd.f32 %v1045_v30, %v572_v9  ;;  %v586_v11 = vmax.f32 %v510_v62, 0.0 }
  0xed   : > { %v1024_v12 = vpack.c.bf16 %v683_v4, %v683_v4  ;;  %v1006_v14 = vpack.c.bf16 %v665_v5, %v665_v5  ;;  %v684_v25 = vadd.f32 %v1077_v31, %v588_v6  ;;  %v666_v28 = vadd.f32 %v1041_v34, %v570_v7  ;;  %v1145_v16 = vpop.f32.mrb[4].mxu0 }
  0xee   : > { %828 = vst.msk [vmem:[%s1391_s7 + $0x8] sm:$0xf] %vm825_vm1, %v1008_v13  ;;  %v1022_v8 = vpack.c.bf16 %v681_v24, %v681_v24  ;;  %v1009_v29 = vpack.c.bf16 %v668_v10, %v668_v10  ;;  %v682_v18 = vadd.f32 %v1073_v35, %v586_v11  ;;  %v467_v30 = vadd.f32 %v1145_v16, %v1353_v46  ;;  %v1161_v3 = vpop.f32.mrb[4].mxu1  ;;  %v458_v9 = vpop.f32.mrb[5].mxu0 }
  0xef   : > { %844 = vst.msk [vmem:[%s1391_s7 + $0x48] sm:$0xf] %vm825_vm1, %v1024_v12  ;;  %826 = vst.msk [vmem:[%s1391_s7] sm:$0xf] %vm825_vm1, %v1006_v14  ;;  %v1025_v19 = vpack.c.bf16 %v684_v25, %v684_v25  ;;  %v1007_v20 = vpack.c.bf16 %v666_v28, %v666_v28  ;;  %v531_v31 = vadd.f32 %v1161_v3, %v1353_v46  ;;  %v522_v17 = vpop.f32.mrb[5].mxu1  ;;  %v1146_v57 = vpop.f32.mrb[6].mxu0 }
  0xf0   : > { %v459_v34 = vadd.f32 %v1353_v46, %v458_v9  ;;  %842 = vst.msk [vmem:[%s1391_s7 + $0x40] sm:$0xf] %vm825_vm1, %v1022_v8  ;;  %829 = vst.msk [vmem:[%s1391_s7 + $0xc] sm:$0xf] %vm825_vm1, %v1009_v29  ;;  %v1023_v21 = vpack.c.bf16 %v682_v18, %v682_v18  ;;  %v575_v35 = vmax.f32 %v467_v30, 0.0  ;;  %v523_v63 = vadd.f32 %v1353_v46, %v522_v17  ;;  %v1162_v62 = vpop.f32.mrb[6].mxu1 }
  0xf1   : > { %v470_v0 = vadd.f32 %v1146_v57, %v1353_v46  ;;  %v461_v4 = vpop.f32.mrb[7].mxu0  ;;  %845 = vst.msk [vmem:[%s1391_s7 + $0x4c] sm:$0xf] %vm825_vm1, %v1025_v19  ;;  %827 = vst.msk [vmem:[%s1391_s7 + $0x4] sm:$0xf] %vm825_vm1, %v1007_v20  ;;  %v591_v5 = vmax.f32 %v531_v31, 0.0  ;;  %v534_v7 = vadd.f32 %v1162_v62, %v1353_v46 }
  0xf2   : > { %v573_v6 = vmax.f32 %v459_v34, 0.0  ;;  %v462_v13 = vadd.f32 %v1353_v46, %v461_v4  ;;  %v525_v24 = vpop.f32.mrb[7].mxu1  ;;  %843 = vst.msk [vmem:[%s1391_s7 + $0x44] sm:$0xf] %vm825_vm1, %v1023_v21  ;;  %v671_v10 = vadd.f32 %v1052_v36, %v575_v35  ;;  %v589_v11 = vmax.f32 %v523_v63, 0.0 }
  0xf3   : > { %v576_v12 = vmax.f32 %v470_v0, 0.0  ;;  %v526_v14 = vadd.f32 %v1353_v46, %v525_v24  ;;  %v687_v25 = vadd.f32 %v1084_v37, %v591_v5  ;;  %v592_v16 = vmax.f32 %v534_v7, 0.0 }
  0xf4   : > { %v669_v28 = vadd.f32 %v1048_v40, %v573_v6  ;;  %v574_v8 = vmax.f32 %v462_v13, 0.0  ;;  %v1012_v29 = vpack.c.bf16 %v671_v10, %v671_v10  ;;  %v685_v18 = vadd.f32 %v1080_v41, %v589_v11 }
  0xf5   : > { %v672_v36 = vadd.f32 %v1053_v42, %v576_v12  ;;  %v590_v30 = vmax.f32 %v526_v14, 0.0  ;;  %v1028_v3 = vpack.c.bf16 %v687_v25, %v687_v25  ;;  %v688_v37 = vadd.f32 %v1085_v43, %v592_v16  ;;  %v1149_v19 = vpop.f32.mrb[8].mxu0 }
  0xf6   : > { %v1010_v9 = vpack.c.bf16 %v669_v28, %v669_v28  ;;  %v670_v40 = vadd.f32 %v1049_v47, %v574_v8  ;;  %832 = vst.msk [vmem:[%s1391_s7 + $0x18] sm:$0xf] %vm825_vm1, %v1012_v29  ;;  %v1026_v20 = vpack.c.bf16 %v685_v18, %v685_v18  ;;  %v483_v42 = vadd.f32 %v1149_v19, %v1353_v46  ;;  %v1165_v31 = vpop.f32.mrb[8].mxu1  ;;  %v474_v34 = vpop.f32.mrb[9].mxu0 }
  0xf7   : > { %v1013_v41 = vpack.c.bf16 %v672_v36, %v672_v36  ;;  %v686_v22 = vadd.f32 %v1081_v48, %v590_v30  ;;  %848 = vst.msk [vmem:[%s1391_s7 + $0x58] sm:$0xf] %vm825_vm1, %v1028_v3  ;;  %v1029_v23 = vpack.c.bf16 %v688_v37, %v688_v37  ;;  %v547_v43 = vadd.f32 %v1165_v31, %v1353_v46  ;;  %v538_v17 = vpop.f32.mrb[9].mxu1  ;;  %v1150_v57 = vpop.f32.mrb[10].mxu0 }
  0xf8   : > { %830 = vst.msk [vmem:[%s1391_s7 + $0x10] sm:$0xf] %vm825_vm1, %v1010_v9  ;;  %v1011_v26 = vpack.c.bf16 %v670_v40, %v670_v40  ;;  %v475_v47 = vadd.f32 %v1353_v46, %v474_v34  ;;  %846 = vst.msk [vmem:[%s1391_s7 + $0x50] sm:$0xf] %vm825_vm1, %v1026_v20  ;;  %v579_v48 = vmax.f32 %v483_v42, 0.0  ;;  %v539_v21 = vadd.f32 %v1353_v46, %v538_v17  ;;  %v1166_v63 = vpop.f32.mrb[10].mxu1 }
  0xf9   : > { %833 = vst.msk [vmem:[%s1391_s7 + $0x1c] sm:$0xf] %vm825_vm1, %v1013_v41  ;;  %v1027_v27 = vpack.c.bf16 %v686_v22, %v686_v22  ;;  %v486_v35 = vadd.f32 %v1150_v57, %v1353_v46  ;;  %v477_v0 = vpop.f32.mrb[11].mxu0  ;;  %849 = vst.msk [vmem:[%s1391_s7 + $0x5c] sm:$0xf] %vm825_vm1, %v1029_v23  ;;  %v595_v62 = vmax.f32 %v547_v43, 0.0  ;;  %v550_v5 = vadd.f32 %v1166_v63, %v1353_v46 }
  0xfa   : > { %831 = vst.msk [vmem:[%s1391_s7 + $0x14] sm:$0xf] %vm825_vm1, %v1011_v26  ;;  %v577_v4 = vmax.f32 %v475_v47, 0.0  ;;  %v478_v6 = vadd.f32 %v1353_v46, %v477_v0  ;;  %v541_v7 = vpop.f32.mrb[11].mxu1  ;;  %v675_v13 = vadd.f32 %v1060_v49, %v579_v48  ;;  %v593_v24 = vmax.f32 %v539_v21, 0.0 }
  0xfb   : > { %847 = vst.msk [vmem:[%s1391_s7 + $0x54] sm:$0xf] %vm825_vm1, %v1027_v27  ;;  %v580_v10 = vmax.f32 %v486_v35, 0.0  ;;  %v542_v11 = vadd.f32 %v1353_v46, %v541_v7  ;;  %v691_v12 = vadd.f32 %v1092_v50, %v595_v62  ;;  %v596_v25 = vmax.f32 %v550_v5, 0.0 }
  0xfc   : > { %v673_v14 = vadd.f32 %v1056_v53, %v577_v4  ;;  %v578_v28 = vmax.f32 %v478_v6, 0.0  ;;  %v1016_v16 = vpack.c.bf16 %v675_v13, %v675_v13  ;;  %v689_v8 = vadd.f32 %v1088_v54, %v593_v24 }
  0xfd   : > { %v676_v49 = vadd.f32 %v1061_v55, %v580_v10  ;;  %v594_v29 = vmax.f32 %v542_v11, 0.0  ;;  %v1032_v18 = vpack.c.bf16 %v691_v12, %v691_v12  ;;  %v692_v50 = vadd.f32 %v1093_v56, %v596_v25  ;;  %v1153_v30 = vpop.f32.mrb[12].mxu0 }
  0xfe   : > { %v1014_v36 = vpack.c.bf16 %v673_v14, %v673_v14  ;;  %v674_v53 = vadd.f32 %v1057_v58, %v578_v28  ;;  %836 = vst.msk [vmem:[%s1391_s7 + $0x28] sm:$0xf] %vm825_vm1, %v1016_v16  ;;  %v1030_v3 = vpack.c.bf16 %v689_v8, %v689_v8  ;;  %v499_v55 = vadd.f32 %v1153_v30, %v1353_v46  ;;  %v1169_v9 = vpop.f32.mrb[12].mxu1  ;;  %v490_v37 = vpop.f32.mrb[13].mxu0 }
  0xff   : > { %v1017_v54 = vpack.c.bf16 %v676_v49, %v676_v49  ;;  %v690_v32 = vadd.f32 %v1089_v59, %v594_v29  ;;  %852 = vst.msk [vmem:[%s1391_s7 + $0x68] sm:$0xf] %vm825_vm1, %v1032_v18  ;;  %v1033_v33 = vpack.c.bf16 %v692_v50, %v692_v50  ;;  %v563_v56 = vadd.f32 %v1169_v9, %v1353_v46  ;;  %v554_v40 = vpop.f32.mrb[13].mxu1  ;;  %v1154_v19 = vpop.f32.mrb[14].mxu0 }
 0x100   : > { %834 = vst.msk [vmem:[%s1391_s7 + $0x20] sm:$0xf] %vm825_vm1, %v1014_v36  ;;  %v1015_v38 = vpack.c.bf16 %v674_v53, %v674_v53  ;;  %v491_v58 = vadd.f32 %v1353_v46, %v490_v37  ;;  %850 = vst.msk [vmem:[%s1391_s7 + $0x60] sm:$0xf] %vm825_vm1, %v1030_v3  ;;  %v583_v59 = vmax.f32 %v499_v55, 0.0  ;;  %v555_v20 = vadd.f32 %v1353_v46, %v554_v40  ;;  %v1170_v22 = vpop.f32.mrb[14].mxu1 }
 0x101   : > { %837 = vst.msk [vmem:[%s1391_s7 + $0x2c] sm:$0xf] %vm825_vm1, %v1017_v54  ;;  %v1031_v39 = vpack.c.bf16 %v690_v32, %v690_v32  ;;  %v502_v41 = vadd.f32 %v1154_v19, %v1353_v46  ;;  %v493_v42 = vpop.f32.mrb[15].mxu0  ;;  %853 = vst.msk [vmem:[%s1391_s7 + $0x6c] sm:$0xf] %vm825_vm1, %v1033_v33  ;;  %v599_v31 = vmax.f32 %v563_v56, 0.0  ;;  %v566_v23 = vadd.f32 %v1170_v22, %v1353_v46 }
 0x102   : > { %835 = vst.msk [vmem:[%s1391_s7 + $0x24] sm:$0xf] %vm825_vm1, %v1015_v38  ;;  %v581_v34 = vmax.f32 %v491_v58, 0.0  ;;  %v494_v26 = vadd.f32 %v1353_v46, %v493_v42  ;;  %v557_v43 = vpop.f32.mrb[15].mxu1  ;;  %v679_v47 = vadd.f32 %v1068_v60, %v583_v59  ;;  %v597_v17 = vmax.f32 %v555_v20, 0.0 }
 0x103   : > { %851 = vst.msk [vmem:[%s1391_s7 + $0x64] sm:$0xf] %vm825_vm1, %v1031_v39  ;;  %v584_v57 = vmax.f32 %v502_v41, 0.0  ;;  %v558_v27 = vadd.f32 %v1353_v46, %v557_v43  ;;  %v695_v48 = vadd.f32 %v1100_v61, %v599_v31  ;;  %v600_v35 = vmax.f32 %v566_v23, 0.0 }
 0x104   : > { %v677_v21 = vadd.f32 %v1064_v1, %v581_v34  ;;  %v582_v63 = vmax.f32 %v494_v26, 0.0  ;;  %v1020_v0 = vpack.c.bf16 %v679_v47, %v679_v47  ;;  %v693_v60 = vadd.f32 %v1096_v2, %v597_v17 }
 0x105   : > { %v1551_v62 = vunpack.c.h.bf16 %v1345_v44  ;;  %v598_v46 = vmax.f32 %v558_v27, 0.0  ;;  %v1036_v5 = vpack.c.bf16 %v695_v48, %v695_v48  ;;  %v1552_v6 = vunpack.c.h.bf16 %v1348_v45 }
 0x106   : > { %v1018_v61 = vpack.c.bf16 %v677_v21, %v677_v21  ;;  %v1553_v7 = vunpack.c.h.bf16 %v1360_v51  ;;  %840 = vst.msk [vmem:[%s1391_s7 + $0x38] sm:$0xf] %vm825_vm1, %v1020_v0  ;;  %v1034_v24 = vpack.c.bf16 %v693_v60, %v693_v60 }
 0x107   : > { %v680_v4 = vadd.f32 %v1551_v62, %v584_v57  ;;  %v696_v1 = vadd.f32 %v1552_v6, %v600_v35  ;;  %v694_v44 = vadd.f32 %v1097_v15, %v598_v46  ;;  %856 = vst.msk [vmem:[%s1391_s7 + $0x78] sm:$0xf] %vm825_vm1, %v1036_v5 }
 0x108   : > { %v678_v13 = vadd.f32 %v1553_v7, %v582_v63  ;;  %838 = vst.msk [vmem:[%s1391_s7 + $0x30] sm:$0xf] %vm825_vm1, %v1018_v61  ;;  %854 = vst.msk [vmem:[%s1391_s7 + $0x70] sm:$0xf] %vm825_vm1, %v1034_v24 }
 0x109   : > { %v1021_v2 = vpack.c.bf16 %v680_v4, %v680_v4  ;;  %v1037_v10 = vpack.c.bf16 %v696_v1, %v696_v1  ;;  %v1035_v45 = vpack.c.bf16 %v694_v44, %v694_v44 }
 0x10a   : > { %v1019_v11 = vpack.c.bf16 %v678_v13, %v678_v13 }
 0x10b   : > { %841 = vst.msk [vmem:[%s1391_s7 + $0x3c] sm:$0xf] %vm825_vm1, %v1021_v2  ;;  %857 = vst.msk [vmem:[%s1391_s7 + $0x7c] sm:$0xf] %vm825_vm1, %v1037_v10 }
 0x10c   : > { %839 = vst.msk [vmem:[%s1391_s7 + $0x34] sm:$0xf] %vm825_vm1, %v1019_v11  ;;  %855 = vst.msk [vmem:[%s1391_s7 + $0x74] sm:$0xf] %vm825_vm1, %v1035_v45 }
 0x10d PF: > { %s14_s15 = sadd.s32 1, %s1207_s15  }
 0x10e   : > { %p11_p4 = scmp.ge.s32.totalorder %s14_s15, 4  }
 0x110   :  { %13 = sbr.rel (!%p11_p4) target bundleno = 1 (0x1), region = 69 }

// kernel: lanet_forward.33
= control target key start
LH: loop header
LB: loop body
LE: loop exit
PB: predicated region body
PF: predicated region fallthrough
CT: control target
= control target key end

     0   :  { %s1621_s18 = smov 0   ;;  %s1835_s0 = inlined_call_operand.vmem [shape: bf16[512,32], index: 0, kind: input, shape index: {}]   ;;  %s1836_s1 = inlined_call_operand.vmem [shape: bf16[512,64], index: 1, kind: input, shape index: {}]   ;;  %s1837_s2 = inlined_call_operand.vmem [shape: bf16[32,32], index: 2, kind: input, shape index: {}]   ;;  %s1838_s3 = inlined_call_operand.vmem [shape: bf16[64,32], index: 3, kind: input, shape index: {}]   ;;  %s1839_s4 = inlined_call_operand.vmem [shape: f32[1,32], index: 4, kind: input, shape index: {}]   ;;  %s1840_s5 = inlined_call_operand.vmem [shape: bf16[512,32], index: 5, kind: output, shape index: {}]  }
   0x1 LB: > { %s1243_s19 = sadd.s32 4294967295, %s1589_s18   ;;  %p1247_p0 = scmp.ge.s32.totalorder %s1589_s18, 1  ;;  %s1589_s18 = sphi %s1621_s18, %s15_s18  }
   0x2   : > { %p199_p1 = scmp.lt.s32.totalorder %s1589_s18, 3 }
   0x4   : > { %p200_p2 = pnand %p1247_p0, %p199_p1 }
   0x5   : > { %v1545_v0 = vld [vmem:[%s1838_s3] sm:$0xff] (!%p200_p2)   ;;  %s1248_s22 = sshll.u32 (!%p200_p2), %s1243_s19, 5  ;;  %v1546_v1 = vld [vmem:[%s1838_s3 + $0x8] sm:$0xff] (!%p200_p2)   ;;  %v1548_v3 = vld [vmem:[%s1838_s3 + $0x10] sm:$0xff] (!%p200_p2)   ;;  %vm733_vm0 = vcmask (!%p200_p2), 261120   ;;  %vm431_vm1 = vcmask (!%p200_p2), 523264  }
   0x6   : > { %203 = sbr.rel (%p200_p2) target bundleno = 302 (0x12e), region = 40  ;;  %p233_p3 = scmp.lt.s32.totalorder (!%p200_p2), %s1248_s22, 63  ;;  %1429 = vmatprep.subr.bf16.mxu1 (!%p200_p2), %v1545_v0  ;;  %v1547_v2 = vld [vmem:[%s1837_s2] sm:$0xff] (!%p200_p2)   ;;  %v1549_v4 = vld [vmem:[%s1837_s2 + $0x8] sm:$0xff] (!%p200_p2)   ;;  %v1550_v5 = vld [vmem:[%s1838_s3 + $0x18] sm:$0xff] (!%p200_p2)   ;;  %vm1142_vm2 = vcmask (!%p200_p2), 257024  }
   0x7   : > { %1430 = vmatpush3.bf16.msra.mxu1 (!%p200_p2), %v1545_v0  ;;  %1469 = vmatprep.subr.bf16.mxu0 (!%p200_p2), %v1547_v2  ;;  %v1728_v43 = vld [vmem:[%s1839_s4] ss:$0 sm:$0xff] (!%p200_p2) }
   0x8   : > { %1431 = vmatprep.subr.bf16.mxu1 (!%p200_p2), %v1546_v1  ;;  %1470 = vmatpush3.bf16.msra.mxu0 (!%p200_p2), %v1547_v2 }
   0x9   : > { %1471 = vmatprep.subr.bf16.mxu0 (!%p200_p2), %v1549_v4 }
   0xb   : > { %1432 = vmatpush3.bf16.msra.mxu1 (!%p200_p2), %v1546_v1 }
   0xc   : > { %1433 = vmatprep.subr.bf16.mxu1 (!%p200_p2), %v1548_v3  ;;  %1472 = vmatpush3.bf16.msra.mxu0 (!%p200_p2), %v1549_v4 }
   0xd   : > { %s1842_s22 = smov (!%p233_p3, %s1248_s22), 63 }
   0xe   : > { %s1644_s6 = sshll.u32 %s1842_s22, 2 }
   0xf   : > { %s1653_s11 = scalar_lea.vmem %s1835_s0, %s1644_s6  ;;  %s1660_s14 = scalar_lea.vmem %s1836_s1, %s1644_s6  ;;  %1434 = vmatpush3.bf16.msra.mxu1 %v1548_v3 }
  0x10   : > { %v1551_v6 = vld [vmem:[%s1653_s11] sm:$0xff]   ;;  %v1552_v7 = vld [vmem:[%s1653_s11 + $0x8] sm:$0xff]   ;;  %v1555_v9 = vld [vmem:[%s1653_s11 + $0x10] sm:$0xff]   ;;  %1435 = vmatprep.subr.bf16.mxu1 %v1550_v5  ;;  %s1737_s20 = scalar_lea.vmem %s1840_s5, %s1644_s6 }
  0x11   : > { %1473 = vmatprep.mubr.msk.bf16.mxu0 %vm733_vm0, %v1551_v6  ;;  %v1553_v8 = vld [vmem:[%s1660_s14] sm:$0xff]   ;;  %v1554_v10 = vld [vmem:[%s1660_s14 + $0x8] sm:$0xff]   ;;  %v1557_v11 = vld [vmem:[%s1660_s14 + $0x10] sm:$0xff]  }
  0x12   : > { %1437 = vmatprep.mubr.msk.bf16.mxu1 %vm431_vm1, %v1553_v8  ;;  %1474 = vmatmul.mubr.msk.bf16.vlgmr.msra.gmra.mrb[0].mxu0 %vm733_vm0, %v1552_v7  ;;  %v1556_v12 = vld [vmem:[%s1653_s11 + $0x18] sm:$0xff]   ;;  %v1559_v13 = vld [vmem:[%s1653_s11 + $0x20] sm:$0xff]   ;;  %v1560_v16 = vld [vmem:[%s1653_s11 + $0x28] sm:$0xff]  }
  0x13   : > { %1477 = vmatprep.mubr.msk.bf16.mxu0 %vm733_vm0, %v1555_v9  ;;  %1436 = vmatpush3.bf16.msra.mxu1 %v1550_v5  ;;  %v1558_v14 = vld [vmem:[%s1660_s14 + $0x18] sm:$0xff]   ;;  %v1561_v15 = vld [vmem:[%s1660_s14 + $0x20] sm:$0xff]   ;;  %v1563_v17 = vld [vmem:[%s1653_s11 + $0x30] sm:$0xff]  }
  0x14   : > { %v1562_v18 = vld [vmem:[%s1660_s14 + $0x28] sm:$0xff]   ;;  %v1565_v19 = vld [vmem:[%s1660_s14 + $0x30] sm:$0xff]   ;;  %v1564_v20 = vld [vmem:[%s1653_s11 + $0x38] sm:$0xff]  }
  0x15   : > { %v1567_v21 = vld [vmem:[%s1653_s11 + $0x40] sm:$0xff]   ;;  %v1566_v22 = vld [vmem:[%s1660_s14 + $0x38] sm:$0xff]   ;;  %v1568_v24 = vld [vmem:[%s1653_s11 + $0x48] sm:$0xff]  }
  0x16   : > { %1438 = vmatmul.mubr.msk.bf16.vlgmr.msra.gmra.mrb[0].mxu1 %vm431_vm1, %v1554_v10  ;;  %v1569_v23 = vld [vmem:[%s1660_s14 + $0x40] sm:$0xff]   ;;  %v1571_v25 = vld [vmem:[%s1653_s11 + $0x50] sm:$0xff]   ;;  %v1570_v26 = vld [vmem:[%s1660_s14 + $0x48] sm:$0xff]  }
  0x17   : > { %1441 = vmatprep.mubr.msk.bf16.mxu1 %vm431_vm1, %v1557_v11  ;;  %v1573_v27 = vld [vmem:[%s1660_s14 + $0x50] sm:$0xff]   ;;  %v1572_v28 = vld [vmem:[%s1653_s11 + $0x58] sm:$0xff]   ;;  %v1575_v29 = vld [vmem:[%s1653_s11 + $0x60] sm:$0xff]  }
  0x18   : > { %v1574_v30 = vld [vmem:[%s1660_s14 + $0x58] sm:$0xff]   ;;  %v1577_v31 = vld [vmem:[%s1660_s14 + $0x60] sm:$0xff]   ;;  %v1576_v32 = vld [vmem:[%s1653_s11 + $0x68] sm:$0xff]  }
  0x19   : > { %v1579_v33 = vld [vmem:[%s1653_s11 + $0x70] sm:$0xff]   ;;  %v1578_v34 = vld [vmem:[%s1660_s14 + $0x68] sm:$0xff]   ;;  %v1580_v36 = vld [vmem:[%s1653_s11 + $0x78] sm:$0xff]  }
  0x1a   : > { %1478 = vmatmul.mubr.msk.bf16.gmra.mrb[4].mxu0 %vm733_vm0, %v1556_v12  ;;  %v1581_v35 = vld [vmem:[%s1660_s14 + $0x70] sm:$0xff]   ;;  %v1582_v37 = vld [vmem:[%s1660_s14 + $0x78] sm:$0xff]  }
  0x1b   : > { %1481 = vmatprep.mubr.msk.bf16.mxu0 %vm733_vm0, %v1559_v13 }
  0x1e   : > { %1442 = vmatmul.mubr.msk.bf16.gmra.mrb[4].mxu1 %vm431_vm1, %v1558_v14 }
  0x1f   : > { %1445 = vmatprep.mubr.msk.bf16.mxu1 %vm431_vm1, %v1561_v15 }
  0x22   : > { %1482 = vmatmul.mubr.msk.bf16.gmra.mrb[8].mxu0 %vm733_vm0, %v1560_v16 }
  0x23   : > { %1485 = vmatprep.mubr.msk.bf16.mxu0 %vm733_vm0, %v1563_v17 }
  0x26   : > { %1446 = vmatmul.mubr.msk.bf16.gmra.mrb[8].mxu1 %vm431_vm1, %v1562_v18 }
  0x27   : > { %1449 = vmatprep.mubr.msk.bf16.mxu1 %vm431_vm1, %v1565_v19 }
  0x2a   : > { %1486 = vmatmul.mubr.msk.bf16.gmra.mrb[12].mxu0 %vm733_vm0, %v1564_v20 }
  0x2b   : > { %1489 = vmatprep.mubr.msk.bf16.mxu0 %vm733_vm0, %v1567_v21 }
  0x2e   : > { %1450 = vmatmul.mubr.msk.bf16.gmra.mrb[12].mxu1 %vm431_vm1, %v1566_v22 }
  0x2f   : > { %1453 = vmatprep.mubr.msk.bf16.mxu1 %vm431_vm1, %v1569_v23 }
  0x32   : > { %1490 = vmatmul.mubr.msk.bf16.gmra.mrb[16].mxu0 %vm733_vm0, %v1568_v24 }
  0x33   : > { %1493 = vmatprep.mubr.msk.bf16.mxu0 %vm733_vm0, %v1571_v25 }
  0x36   : > { %1454 = vmatmul.mubr.msk.bf16.gmra.mrb[16].mxu1 %vm431_vm1, %v1570_v26 }
  0x37   : > { %1457 = vmatprep.mubr.msk.bf16.mxu1 %vm431_vm1, %v1573_v27 }
  0x3a   : > { %1494 = vmatmul.mubr.msk.bf16.gmra.mrb[20].mxu0 %vm733_vm0, %v1572_v28 }
  0x3b   : > { %1497 = vmatprep.mubr.msk.bf16.mxu0 %vm733_vm0, %v1575_v29 }
  0x3e   : > { %1458 = vmatmul.mubr.msk.bf16.gmra.mrb[20].mxu1 %vm431_vm1, %v1574_v30 }
  0x3f   : > { %1461 = vmatprep.mubr.msk.bf16.mxu1 %vm431_vm1, %v1577_v31 }
  0x42   : > { %1498 = vmatmul.mubr.msk.bf16.gmra.mrb[24].mxu0 %vm733_vm0, %v1576_v32 }
  0x43   : > { %1501 = vmatprep.mubr.msk.bf16.mxu0 %vm733_vm0, %v1579_v33 }
  0x46   : > { %1462 = vmatmul.mubr.msk.bf16.gmra.mrb[24].mxu1 %vm431_vm1, %v1578_v34 }
  0x47   : > { %1465 = vmatprep.mubr.msk.bf16.mxu1 %vm431_vm1, %v1581_v35 }
  0x4a   : > { %1502 = vmatmul.mubr.msk.bf16.gmra.mrb[28].mxu0 %vm733_vm0, %v1580_v36 }
  0x4e   : > { %1466 = vmatmul.mubr.msk.bf16.gmra.mrb[28].mxu1 %vm431_vm1, %v1582_v37 }
  0xe5   : > { %v1475_v38 = vpop.f32.mrb[0].mxu0 }
  0xe6   : > { %v816_v39 = vpop.f32.mrb[1].mxu0 }
  0xe7   : > { %v1476_v40 = vpop.f32.mrb[2].mxu0 }
  0xe8   : > { %v819_v41 = vpop.f32.mrb[3].mxu0 }
  0xe9   : > { %v1439_v42 = vpop.f32.mrb[0].mxu1 }
  0xea   : > { %v825_v44 = vadd.f32 %v1475_v38, %v1439_v42  ;;  %v514_v45 = vpop.f32.mrb[1].mxu1 }
  0xeb   : > { %v817_v46 = vadd.f32 %v816_v39, %v514_v45  ;;  %v1440_v47 = vpop.f32.mrb[2].mxu1 }
  0xec   : > { %v952_v49 = vadd.f32 %v1728_v43, %v825_v44  ;;  %v828_v50 = vadd.f32 %v1476_v40, %v1440_v47  ;;  %v517_v51 = vpop.f32.mrb[3].mxu1 }
  0xed   : > { %v1479_v48 = vpop.f32.mrb[4].mxu0  ;;  %v950_v53 = vadd.f32 %v1728_v43, %v817_v46  ;;  %v820_v54 = vadd.f32 %v819_v41, %v517_v51 }
  0xee   : > { %v832_v52 = vpop.f32.mrb[5].mxu0  ;;  %v984_v56 = vmax.f32 %v952_v49, 0.0  ;;  %v953_v57 = vadd.f32 %v1728_v43, %v828_v50 }
  0xef   : > { %v1480_v55 = vpop.f32.mrb[6].mxu0  ;;  %v982_v59 = vmax.f32 %v950_v53, 0.0  ;;  %v951_v60 = vadd.f32 %v1728_v43, %v820_v54 }
  0xf0   : > { %v835_v58 = vpop.f32.mrb[7].mxu0  ;;  %v1361_v61 = vpack.c.bf16 %v984_v56, %v984_v56  ;;  %v985_v62 = vmax.f32 %v953_v57, 0.0 }
  0xf1   : > { %v1359_v63 = vpack.c.bf16 %v982_v59, %v982_v59  ;;  %v983_v0 = vmax.f32 %v951_v60, 0.0  ;;  %v1443_v1 = vpop.f32.mrb[4].mxu1 }
  0xf2   : > { %1145 = vst.msk [vmem:[%s1737_s20 + $0x8] sm:$0xf] %vm1142_vm2, %v1361_v61  ;;  %v1362_v2 = vpack.c.bf16 %v985_v62, %v985_v62  ;;  %v841_v3 = vadd.f32 %v1479_v48, %v1443_v1  ;;  %v530_v4 = vpop.f32.mrb[5].mxu1 }
  0xf3   : > { %1143 = vst.msk [vmem:[%s1737_s20] sm:$0xf] %vm1142_vm2, %v1359_v63  ;;  %v1360_v5 = vpack.c.bf16 %v983_v0, %v983_v0  ;;  %v833_v6 = vadd.f32 %v832_v52, %v530_v4  ;;  %v1444_v7 = vpop.f32.mrb[6].mxu1 }
  0xf4   : > { %1146 = vst.msk [vmem:[%s1737_s20 + $0xc] sm:$0xf] %vm1142_vm2, %v1362_v2  ;;  %v956_v9 = vadd.f32 %v1728_v43, %v841_v3  ;;  %v844_v10 = vadd.f32 %v1480_v55, %v1444_v7  ;;  %v533_v11 = vpop.f32.mrb[7].mxu1 }
  0xf5   : > { %v1483_v8 = vpop.f32.mrb[8].mxu0  ;;  %1144 = vst.msk [vmem:[%s1737_s20 + $0x4] sm:$0xf] %vm1142_vm2, %v1360_v5  ;;  %v954_v13 = vadd.f32 %v1728_v43, %v833_v6  ;;  %v836_v14 = vadd.f32 %v835_v58, %v533_v11 }
  0xf6   : > { %v848_v12 = vpop.f32.mrb[9].mxu0  ;;  %v988_v16 = vmax.f32 %v956_v9, 0.0  ;;  %v957_v17 = vadd.f32 %v1728_v43, %v844_v10 }
  0xf7   : > { %v1484_v15 = vpop.f32.mrb[10].mxu0  ;;  %v986_v19 = vmax.f32 %v954_v13, 0.0  ;;  %v955_v20 = vadd.f32 %v1728_v43, %v836_v14 }
  0xf8   : > { %v851_v18 = vpop.f32.mrb[11].mxu0  ;;  %v1365_v21 = vpack.c.bf16 %v988_v16, %v988_v16  ;;  %v989_v22 = vmax.f32 %v957_v17, 0.0 }
  0xf9   : > { %v1363_v23 = vpack.c.bf16 %v986_v19, %v986_v19  ;;  %v987_v24 = vmax.f32 %v955_v20, 0.0  ;;  %v1447_v25 = vpop.f32.mrb[8].mxu1 }
  0xfa   : > { %1149 = vst.msk [vmem:[%s1737_s20 + $0x18] sm:$0xf] %vm1142_vm2, %v1365_v21  ;;  %v1366_v26 = vpack.c.bf16 %v989_v22, %v989_v22  ;;  %v857_v27 = vadd.f32 %v1483_v8, %v1447_v25  ;;  %v546_v28 = vpop.f32.mrb[9].mxu1 }
  0xfb   : > { %1147 = vst.msk [vmem:[%s1737_s20 + $0x10] sm:$0xf] %vm1142_vm2, %v1363_v23  ;;  %v1364_v29 = vpack.c.bf16 %v987_v24, %v987_v24  ;;  %v849_v30 = vadd.f32 %v848_v12, %v546_v28  ;;  %v1448_v31 = vpop.f32.mrb[10].mxu1 }
  0xfc   : > { %1150 = vst.msk [vmem:[%s1737_s20 + $0x1c] sm:$0xf] %vm1142_vm2, %v1366_v26  ;;  %v960_v33 = vadd.f32 %v1728_v43, %v857_v27  ;;  %v860_v34 = vadd.f32 %v1484_v15, %v1448_v31  ;;  %v549_v35 = vpop.f32.mrb[11].mxu1 }
  0xfd   : > { %v1487_v32 = vpop.f32.mrb[12].mxu0  ;;  %1148 = vst.msk [vmem:[%s1737_s20 + $0x14] sm:$0xf] %vm1142_vm2, %v1364_v29  ;;  %v958_v37 = vadd.f32 %v1728_v43, %v849_v30  ;;  %v852_v38 = vadd.f32 %v851_v18, %v549_v35 }
  0xfe   : > { %v864_v36 = vpop.f32.mrb[13].mxu0  ;;  %v992_v40 = vmax.f32 %v960_v33, 0.0  ;;  %v961_v41 = vadd.f32 %v1728_v43, %v860_v34 }
  0xff   : > { %v1488_v39 = vpop.f32.mrb[14].mxu0  ;;  %v990_v44 = vmax.f32 %v958_v37, 0.0  ;;  %v959_v45 = vadd.f32 %v1728_v43, %v852_v38 }
 0x100   : > { %v867_v42 = vpop.f32.mrb[15].mxu0  ;;  %v1369_v46 = vpack.c.bf16 %v992_v40, %v992_v40  ;;  %v993_v47 = vmax.f32 %v961_v41, 0.0 }
 0x101   : > { %v1367_v48 = vpack.c.bf16 %v990_v44, %v990_v44  ;;  %v991_v49 = vmax.f32 %v959_v45, 0.0  ;;  %v1451_v50 = vpop.f32.mrb[12].mxu1 }
 0x102   : > { %1153 = vst.msk [vmem:[%s1737_s20 + $0x28] sm:$0xf] %vm1142_vm2, %v1369_v46  ;;  %v1370_v51 = vpack.c.bf16 %v993_v47, %v993_v47  ;;  %v873_v52 = vadd.f32 %v1487_v32, %v1451_v50  ;;  %v562_v53 = vpop.f32.mrb[13].mxu1 }
 0x103   : > { %1151 = vst.msk [vmem:[%s1737_s20 + $0x20] sm:$0xf] %vm1142_vm2, %v1367_v48  ;;  %v1368_v54 = vpack.c.bf16 %v991_v49, %v991_v49  ;;  %v865_v55 = vadd.f32 %v864_v36, %v562_v53  ;;  %v1452_v56 = vpop.f32.mrb[14].mxu1 }
 0x104   : > { %1154 = vst.msk [vmem:[%s1737_s20 + $0x2c] sm:$0xf] %vm1142_vm2, %v1370_v51  ;;  %v964_v58 = vadd.f32 %v1728_v43, %v873_v52  ;;  %v876_v59 = vadd.f32 %v1488_v39, %v1452_v56  ;;  %v565_v60 = vpop.f32.mrb[15].mxu1 }
 0x105   : > { %v1491_v57 = vpop.f32.mrb[16].mxu0  ;;  %1152 = vst.msk [vmem:[%s1737_s20 + $0x24] sm:$0xf] %vm1142_vm2, %v1368_v54  ;;  %v962_v62 = vadd.f32 %v1728_v43, %v865_v55  ;;  %v868_v63 = vadd.f32 %v867_v42, %v565_v60 }
 0x106   : > { %v880_v61 = vpop.f32.mrb[17].mxu0  ;;  %v996_v1 = vmax.f32 %v964_v58, 0.0  ;;  %v965_v2 = vadd.f32 %v1728_v43, %v876_v59 }
 0x107   : > { %v1492_v0 = vpop.f32.mrb[18].mxu0  ;;  %v994_v4 = vmax.f32 %v962_v62, 0.0  ;;  %v963_v5 = vadd.f32 %v1728_v43, %v868_v63 }
 0x108   : > { %v883_v3 = vpop.f32.mrb[19].mxu0  ;;  %v1373_v6 = vpack.c.bf16 %v996_v1, %v996_v1  ;;  %v997_v7 = vmax.f32 %v965_v2, 0.0 }
 0x109   : > { %v1371_v8 = vpack.c.bf16 %v994_v4, %v994_v4  ;;  %v995_v9 = vmax.f32 %v963_v5, 0.0  ;;  %v1455_v10 = vpop.f32.mrb[16].mxu1 }
 0x10a   : > { %1157 = vst.msk [vmem:[%s1737_s20 + $0x38] sm:$0xf] %vm1142_vm2, %v1373_v6  ;;  %v1374_v11 = vpack.c.bf16 %v997_v7, %v997_v7  ;;  %v889_v12 = vadd.f32 %v1491_v57, %v1455_v10  ;;  %v578_v13 = vpop.f32.mrb[17].mxu1 }
 0x10b   : > { %1155 = vst.msk [vmem:[%s1737_s20 + $0x30] sm:$0xf] %vm1142_vm2, %v1371_v8  ;;  %v1372_v14 = vpack.c.bf16 %v995_v9, %v995_v9  ;;  %v881_v15 = vadd.f32 %v880_v61, %v578_v13  ;;  %v1456_v16 = vpop.f32.mrb[18].mxu1 }
 0x10c   : > { %1158 = vst.msk [vmem:[%s1737_s20 + $0x3c] sm:$0xf] %vm1142_vm2, %v1374_v11  ;;  %v968_v18 = vadd.f32 %v1728_v43, %v889_v12  ;;  %v892_v19 = vadd.f32 %v1492_v0, %v1456_v16  ;;  %v581_v20 = vpop.f32.mrb[19].mxu1 }
 0x10d   : > { %v1495_v17 = vpop.f32.mrb[20].mxu0  ;;  %1156 = vst.msk [vmem:[%s1737_s20 + $0x34] sm:$0xf] %vm1142_vm2, %v1372_v14  ;;  %v966_v22 = vadd.f32 %v1728_v43, %v881_v15  ;;  %v884_v23 = vadd.f32 %v883_v3, %v581_v20 }
 0x10e   : > { %v896_v21 = vpop.f32.mrb[21].mxu0  ;;  %v1000_v25 = vmax.f32 %v968_v18, 0.0  ;;  %v969_v26 = vadd.f32 %v1728_v43, %v892_v19 }
 0x10f   : > { %v1496_v24 = vpop.f32.mrb[22].mxu0  ;;  %v998_v28 = vmax.f32 %v966_v22, 0.0  ;;  %v967_v29 = vadd.f32 %v1728_v43, %v884_v23 }
 0x110   : > { %v899_v27 = vpop.f32.mrb[23].mxu0  ;;  %v1377_v30 = vpack.c.bf16 %v1000_v25, %v1000_v25  ;;  %v1001_v31 = vmax.f32 %v969_v26, 0.0 }
 0x111   : > { %v1375_v32 = vpack.c.bf16 %v998_v28, %v998_v28  ;;  %v999_v33 = vmax.f32 %v967_v29, 0.0  ;;  %v1459_v34 = vpop.f32.mrb[20].mxu1 }
 0x112   : > { %1161 = vst.msk [vmem:[%s1737_s20 + $0x48] sm:$0xf] %vm1142_vm2, %v1377_v30  ;;  %v1378_v35 = vpack.c.bf16 %v1001_v31, %v1001_v31  ;;  %v905_v36 = vadd.f32 %v1495_v17, %v1459_v34  ;;  %v594_v37 = vpop.f32.mrb[21].mxu1 }
 0x113   : > { %1159 = vst.msk [vmem:[%s1737_s20 + $0x40] sm:$0xf] %vm1142_vm2, %v1375_v32  ;;  %v1376_v38 = vpack.c.bf16 %v999_v33, %v999_v33  ;;  %v897_v39 = vadd.f32 %v896_v21, %v594_v37  ;;  %v1460_v40 = vpop.f32.mrb[22].mxu1 }
 0x114   : > { %1162 = vst.msk [vmem:[%s1737_s20 + $0x4c] sm:$0xf] %vm1142_vm2, %v1378_v35  ;;  %v972_v42 = vadd.f32 %v1728_v43, %v905_v36  ;;  %v908_v44 = vadd.f32 %v1496_v24, %v1460_v40  ;;  %v597_v45 = vpop.f32.mrb[23].mxu1 }
 0x115   : > { %v1499_v41 = vpop.f32.mrb[24].mxu0  ;;  %1160 = vst.msk [vmem:[%s1737_s20 + $0x44] sm:$0xf] %vm1142_vm2, %v1376_v38  ;;  %v970_v47 = vadd.f32 %v1728_v43, %v897_v39  ;;  %v900_v48 = vadd.f32 %v899_v27, %v597_v45 }
 0x116   : > { %v912_v46 = vpop.f32.mrb[25].mxu0  ;;  %v1004_v50 = vmax.f32 %v972_v42, 0.0  ;;  %v973_v51 = vadd.f32 %v1728_v43, %v908_v44 }
 0x117   : > { %v1500_v49 = vpop.f32.mrb[26].mxu0  ;;  %v1002_v53 = vmax.f32 %v970_v47, 0.0  ;;  %v971_v54 = vadd.f32 %v1728_v43, %v900_v48 }
 0x118   : > { %v915_v52 = vpop.f32.mrb[27].mxu0  ;;  %v1381_v55 = vpack.c.bf16 %v1004_v50, %v1004_v50  ;;  %v1005_v56 = vmax.f32 %v973_v51, 0.0 }
 0x119   : > { %v1379_v57 = vpack.c.bf16 %v1002_v53, %v1002_v53  ;;  %v1003_v58 = vmax.f32 %v971_v54, 0.0  ;;  %v1463_v59 = vpop.f32.mrb[24].mxu1 }
 0x11a   : > { %1165 = vst.msk [vmem:[%s1737_s20 + $0x58] sm:$0xf] %vm1142_vm2, %v1381_v55  ;;  %v1382_v60 = vpack.c.bf16 %v1005_v56, %v1005_v56  ;;  %v921_v61 = vadd.f32 %v1499_v41, %v1463_v59  ;;  %v610_v62 = vpop.f32.mrb[25].mxu1 }
 0x11b   : > { %1163 = vst.msk [vmem:[%s1737_s20 + $0x50] sm:$0xf] %vm1142_vm2, %v1379_v57  ;;  %v1380_v63 = vpack.c.bf16 %v1003_v58, %v1003_v58  ;;  %v913_v0 = vadd.f32 %v912_v46, %v610_v62  ;;  %v1464_v1 = vpop.f32.mrb[26].mxu1 }
 0x11c   : > { %1166 = vst.msk [vmem:[%s1737_s20 + $0x5c] sm:$0xf] %vm1142_vm2, %v1382_v60  ;;  %v976_v3 = vadd.f32 %v1728_v43, %v921_v61  ;;  %v924_v4 = vadd.f32 %v1500_v49, %v1464_v1  ;;  %v613_v5 = vpop.f32.mrb[27].mxu1 }
 0x11d   : > { %v1503_v2 = vpop.f32.mrb[28].mxu0  ;;  %1164 = vst.msk [vmem:[%s1737_s20 + $0x54] sm:$0xf] %vm1142_vm2, %v1380_v63  ;;  %v974_v7 = vadd.f32 %v1728_v43, %v913_v0  ;;  %v916_v8 = vadd.f32 %v915_v52, %v613_v5 }
 0x11e   : > { %v928_v6 = vpop.f32.mrb[29].mxu0  ;;  %v1008_v10 = vmax.f32 %v976_v3, 0.0  ;;  %v977_v11 = vadd.f32 %v1728_v43, %v924_v4 }
 0x11f   : > { %v1504_v9 = vpop.f32.mrb[30].mxu0  ;;  %v1006_v13 = vmax.f32 %v974_v7, 0.0  ;;  %v975_v14 = vadd.f32 %v1728_v43, %v916_v8 }
 0x120   : > { %v931_v12 = vpop.f32.mrb[31].mxu0  ;;  %v1385_v15 = vpack.c.bf16 %v1008_v10, %v1008_v10  ;;  %v1009_v16 = vmax.f32 %v977_v11, 0.0 }
 0x121   : > { %v1383_v17 = vpack.c.bf16 %v1006_v13, %v1006_v13  ;;  %v1007_v18 = vmax.f32 %v975_v14, 0.0  ;;  %v1467_v19 = vpop.f32.mrb[28].mxu1 }
 0x122   : > { %1169 = vst.msk [vmem:[%s1737_s20 + $0x68] sm:$0xf] %vm1142_vm2, %v1385_v15  ;;  %v1386_v20 = vpack.c.bf16 %v1009_v16, %v1009_v16  ;;  %v937_v21 = vadd.f32 %v1503_v2, %v1467_v19  ;;  %v626_v22 = vpop.f32.mrb[29].mxu1 }
 0x123   : > { %1167 = vst.msk [vmem:[%s1737_s20 + $0x60] sm:$0xf] %vm1142_vm2, %v1383_v17  ;;  %v1384_v23 = vpack.c.bf16 %v1007_v18, %v1007_v18  ;;  %v929_v24 = vadd.f32 %v928_v6, %v626_v22  ;;  %v1468_v25 = vpop.f32.mrb[30].mxu1 }
 0x124   : > { %1170 = vst.msk [vmem:[%s1737_s20 + $0x6c] sm:$0xf] %vm1142_vm2, %v1386_v20  ;;  %v980_v26 = vadd.f32 %v1728_v43, %v937_v21  ;;  %v940_v27 = vadd.f32 %v1504_v9, %v1468_v25  ;;  %v629_v28 = vpop.f32.mrb[31].mxu1 }
 0x125   : > { %1168 = vst.msk [vmem:[%s1737_s20 + $0x64] sm:$0xf] %vm1142_vm2, %v1384_v23  ;;  %v978_v29 = vadd.f32 %v1728_v43, %v929_v24  ;;  %v932_v30 = vadd.f32 %v931_v12, %v629_v28 }
 0x126   : > { %v1012_v31 = vmax.f32 %v980_v26, 0.0  ;;  %v981_v32 = vadd.f32 %v1728_v43, %v940_v27 }
 0x127   : > { %v1010_v33 = vmax.f32 %v978_v29, 0.0  ;;  %v979_v34 = vadd.f32 %v1728_v43, %v932_v30 }
 0x128   : > { %v1389_v35 = vpack.c.bf16 %v1012_v31, %v1012_v31  ;;  %v1013_v36 = vmax.f32 %v981_v32, 0.0 }
 0x129   : > { %v1387_v37 = vpack.c.bf16 %v1010_v33, %v1010_v33  ;;  %v1011_v38 = vmax.f32 %v979_v34, 0.0 }
 0x12a   : > { %1173 = vst.msk [vmem:[%s1737_s20 + $0x78] sm:$0xf] %vm1142_vm2, %v1389_v35  ;;  %v1390_v39 = vpack.c.bf16 %v1013_v36, %v1013_v36 }
 0x12b   : > { %1171 = vst.msk [vmem:[%s1737_s20 + $0x70] sm:$0xf] %vm1142_vm2, %v1387_v37  ;;  %v1388_v40 = vpack.c.bf16 %v1011_v38, %v1011_v38 }
 0x12c   : > { %1174 = vst.msk [vmem:[%s1737_s20 + $0x7c] sm:$0xf] %vm1142_vm2, %v1390_v39 }
 0x12d   : > { %1172 = vst.msk [vmem:[%s1737_s20 + $0x74] sm:$0xf] %vm1142_vm2, %v1388_v40 }
 0x12e PF: > { %s15_s18 = sadd.s32 1, %s1589_s18  }
 0x12f   : > { %p12_p4 = scmp.ge.s32.totalorder %s15_s18, 4  }
 0x131   :  { %14 = sbr.rel (!%p12_p4) target bundleno = 1 (0x1), region = 73 }

// kernel: lanet_forward.38
= control target key start
LH: loop header
LB: loop body
LE: loop exit
PB: predicated region body
PF: predicated region fallthrough
CT: control target
= control target key end

     0   :  { %s991_s12 = smov 0   ;;  %s1158_s0 = inlined_call_operand.vmem [shape: bf16[512,32], index: 0, kind: input, shape index: {}]   ;;  %s1159_s1 = inlined_call_operand.vmem [shape: bf16[32,32], index: 1, kind: input, shape index: {}]   ;;  %s1160_s2 = inlined_call_operand.vmem [shape: f32[1,32], index: 2, kind: input, shape index: {}]   ;;  %s1161_s3 = inlined_call_operand.vmem [shape: bf16[512,32], index: 3, kind: output, shape index: {}]  }
   0x1 LB: > { %s769_s13 = sadd.s32 4294967295, %s969_s12   ;;  %p773_p0 = scmp.ge.s32.totalorder %s969_s12, 1  ;;  %s969_s12 = sphi %s991_s12, %s13_s12  }
   0x2   : > { %p138_p1 = scmp.lt.s32.totalorder %s969_s12, 3 }
   0x4   : > { %p139_p2 = pnand %p773_p0, %p138_p1 }
   0x5   : > { %v945_v0 = vld [vmem:[%s1159_s1] sm:$0xff] (!%p139_p2)   ;;  %s774_s16 = sshll.u32 (!%p139_p2), %s769_s13, 5  ;;  %v946_v1 = vld [vmem:[%s1159_s1 + $0x8] sm:$0xff] (!%p139_p2)   ;;  %vm310_vm0 = vcmask (!%p139_p2), 261120   ;;  %vm680_vm1 = vcmask (!%p139_p2), 257024  }
   0x6   : > { %142 = sbr.rel (%p139_p2) target bundleno = 265 (0x109), region = 32  ;;  %p163_p3 = scmp.lt.s32.totalorder (!%p139_p2), %s774_s16, 63  ;;  %897 = vmatprep.subr.bf16.mxu0 (!%p139_p2), %v945_v0  ;;  %933 = vmatprep.subr.bf16.mxu1 (!%p139_p2), %v945_v0  ;;  %v1050_v18 = vld [vmem:[%s1160_s2] ss:$0 sm:$0xff] (!%p139_p2) }
   0x7   : > { %898 = vmatpush3.bf16.msra.mxu0 (!%p139_p2), %v945_v0  ;;  %935 = vmatpush3.bf16.msra.mxu1 (!%p139_p2), %v945_v0 }
   0x8   : > { %899 = vmatprep.subr.bf16.mxu0 (!%p139_p2), %v946_v1  ;;  %934 = vmatprep.subr.bf16.mxu1 (!%p139_p2), %v946_v1 }
   0xb   : > { %900 = vmatpush3.bf16.msra.mxu0 (!%p139_p2), %v946_v1  ;;  %936 = vmatpush3.bf16.msra.mxu1 (!%p139_p2), %v946_v1 }
   0xd   : > { %s1163_s16 = smov (!%p163_p3, %s774_s16), 63 }
   0xe   : > { %s775_s19 = sshll.u32 %s1163_s16, 2 }
   0xf   : > { %s1013_s22 = scalar_lea.vmem %s1158_s0, %s775_s19  ;;  %s1062_s27 = scalar_lea.vmem %s1161_s3, %s775_s19 }
  0x10   : > { %v947_v2 = vld [vmem:[%s1013_s22] sm:$0xff]   ;;  %v949_v4 = vld [vmem:[%s1013_s22 + $0x8] sm:$0xff]   ;;  %v951_v6 = vld [vmem:[%s1013_s22 + $0x10] sm:$0xff]  }
  0x11   : > { %v948_v3 = vld [vmem:[%s1013_s22 + $0x40] sm:$0xff]   ;;  %901 = vmatprep.mubr.msk.bf16.mxu0 %vm310_vm0, %v947_v2  ;;  %v950_v5 = vld [vmem:[%s1013_s22 + $0x48] sm:$0xff]   ;;  %v952_v7 = vld [vmem:[%s1013_s22 + $0x50] sm:$0xff]  }
  0x12   : > { %917 = vmatprep.mubr.msk.bf16.mxu1 %vm310_vm0, %v948_v3  ;;  %902 = vmatmul.mubr.msk.bf16.vlgmr.msra.gmra.mrb[0].mxu0 %vm310_vm0, %v949_v4  ;;  %v953_v8 = vld [vmem:[%s1013_s22 + $0x18] sm:$0xff]   ;;  %v955_v10 = vld [vmem:[%s1013_s22 + $0x20] sm:$0xff]   ;;  %v957_v12 = vld [vmem:[%s1013_s22 + $0x28] sm:$0xff]  }
  0x13   : > { %918 = vmatmul.mubr.msk.bf16.vlgmr.msra.gmra.mrb[0].mxu1 %vm310_vm0, %v950_v5  ;;  %905 = vmatprep.mubr.msk.bf16.mxu0 %vm310_vm0, %v951_v6  ;;  %v954_v9 = vld [vmem:[%s1013_s22 + $0x58] sm:$0xff]   ;;  %v956_v11 = vld [vmem:[%s1013_s22 + $0x60] sm:$0xff]   ;;  %v958_v13 = vld [vmem:[%s1013_s22 + $0x68] sm:$0xff]  }
  0x14   : > { %921 = vmatprep.mubr.msk.bf16.mxu1 %vm310_vm0, %v952_v7  ;;  %v959_v14 = vld [vmem:[%s1013_s22 + $0x30] sm:$0xff]   ;;  %v961_v16 = vld [vmem:[%s1013_s22 + $0x38] sm:$0xff]  }
  0x15   : > { %v960_v15 = vld [vmem:[%s1013_s22 + $0x70] sm:$0xff]   ;;  %v962_v17 = vld [vmem:[%s1013_s22 + $0x78] sm:$0xff]  }
  0x1a   : > { %906 = vmatmul.mubr.msk.bf16.gmra.mrb[4].mxu0 %vm310_vm0, %v953_v8 }
  0x1b   : > { %922 = vmatmul.mubr.msk.bf16.gmra.mrb[4].mxu1 %vm310_vm0, %v954_v9  ;;  %909 = vmatprep.mubr.msk.bf16.mxu0 %vm310_vm0, %v955_v10 }
  0x1c   : > { %925 = vmatprep.mubr.msk.bf16.mxu1 %vm310_vm0, %v956_v11 }
  0x22   : > { %910 = vmatmul.mubr.msk.bf16.gmra.mrb[8].mxu0 %vm310_vm0, %v957_v12 }
  0x23   : > { %926 = vmatmul.mubr.msk.bf16.gmra.mrb[8].mxu1 %vm310_vm0, %v958_v13  ;;  %913 = vmatprep.mubr.msk.bf16.mxu0 %vm310_vm0, %v959_v14 }
  0x24   : > { %929 = vmatprep.mubr.msk.bf16.mxu1 %vm310_vm0, %v960_v15 }
  0x2a   : > { %914 = vmatmul.mubr.msk.bf16.gmra.mrb[12].mxu0 %vm310_vm0, %v961_v16 }
  0x2b   : > { %930 = vmatmul.mubr.msk.bf16.gmra.mrb[12].mxu1 %vm310_vm0, %v962_v17 }
  0xe5   : > { %v903_v19 = vpop.f32.mrb[0].mxu0 }
  0xe6   : > { %v402_v20 = vadd.f32 %v903_v19, %v1050_v18  ;;  %v919_v21 = vpop.f32.mrb[0].mxu1  ;;  %v393_v22 = vpop.f32.mrb[1].mxu0 }
  0xe7   : > { %v466_v23 = vadd.f32 %v919_v21, %v1050_v18  ;;  %v394_v24 = vadd.f32 %v1050_v18, %v393_v22  ;;  %v457_v25 = vpop.f32.mrb[1].mxu1  ;;  %v904_v26 = vpop.f32.mrb[2].mxu0 }
  0xe8   : > { %v522_v27 = vmax.f32 %v402_v20, 0.0  ;;  %v458_v28 = vadd.f32 %v1050_v18, %v457_v25  ;;  %v405_v29 = vadd.f32 %v904_v26, %v1050_v18  ;;  %v920_v30 = vpop.f32.mrb[2].mxu1  ;;  %v396_v31 = vpop.f32.mrb[3].mxu0 }
  0xe9   : > { %v538_v32 = vmax.f32 %v466_v23, 0.0  ;;  %v520_v33 = vmax.f32 %v394_v24, 0.0  ;;  %v469_v34 = vadd.f32 %v920_v30, %v1050_v18  ;;  %v397_v35 = vadd.f32 %v1050_v18, %v396_v31  ;;  %v460_v36 = vpop.f32.mrb[3].mxu1 }
  0xea   : > { %v849_v37 = vpack.c.bf16 %v522_v27, %v522_v27  ;;  %v536_v38 = vmax.f32 %v458_v28, 0.0  ;;  %v523_v39 = vmax.f32 %v405_v29, 0.0  ;;  %v461_v40 = vadd.f32 %v1050_v18, %v460_v36 }
  0xeb   : > { %v865_v41 = vpack.c.bf16 %v538_v32, %v538_v32  ;;  %v847_v42 = vpack.c.bf16 %v520_v33, %v520_v33  ;;  %v539_v43 = vmax.f32 %v469_v34, 0.0  ;;  %v521_v44 = vmax.f32 %v397_v35, 0.0 }
  0xec   : > { %683 = vst.msk [vmem:[%s1062_s27 + $0x8] sm:$0xf] %vm680_vm1, %v849_v37  ;;  %v863_v45 = vpack.c.bf16 %v536_v38, %v536_v38  ;;  %v850_v46 = vpack.c.bf16 %v523_v39, %v523_v39  ;;  %v537_v47 = vmax.f32 %v461_v40, 0.0 }
  0xed   : > { %699 = vst.msk [vmem:[%s1062_s27 + $0x48] sm:$0xf] %vm680_vm1, %v865_v41  ;;  %681 = vst.msk [vmem:[%s1062_s27] sm:$0xf] %vm680_vm1, %v847_v42  ;;  %v866_v48 = vpack.c.bf16 %v539_v43, %v539_v43  ;;  %v848_v49 = vpack.c.bf16 %v521_v44, %v521_v44  ;;  %v907_v50 = vpop.f32.mrb[4].mxu0 }
  0xee   : > { %697 = vst.msk [vmem:[%s1062_s27 + $0x40] sm:$0xf] %vm680_vm1, %v863_v45  ;;  %684 = vst.msk [vmem:[%s1062_s27 + $0xc] sm:$0xf] %vm680_vm1, %v850_v46  ;;  %v864_v51 = vpack.c.bf16 %v537_v47, %v537_v47  ;;  %v418_v52 = vadd.f32 %v907_v50, %v1050_v18  ;;  %v923_v53 = vpop.f32.mrb[4].mxu1  ;;  %v409_v54 = vpop.f32.mrb[5].mxu0 }
  0xef   : > { %700 = vst.msk [vmem:[%s1062_s27 + $0x4c] sm:$0xf] %vm680_vm1, %v866_v48  ;;  %682 = vst.msk [vmem:[%s1062_s27 + $0x4] sm:$0xf] %vm680_vm1, %v848_v49  ;;  %v482_v55 = vadd.f32 %v923_v53, %v1050_v18  ;;  %v410_v56 = vadd.f32 %v1050_v18, %v409_v54  ;;  %v473_v57 = vpop.f32.mrb[5].mxu1  ;;  %v908_v58 = vpop.f32.mrb[6].mxu0 }
  0xf0   : > { %698 = vst.msk [vmem:[%s1062_s27 + $0x44] sm:$0xf] %vm680_vm1, %v864_v51  ;;  %v526_v59 = vmax.f32 %v418_v52, 0.0  ;;  %v474_v60 = vadd.f32 %v1050_v18, %v473_v57  ;;  %v421_v61 = vadd.f32 %v908_v58, %v1050_v18  ;;  %v924_v62 = vpop.f32.mrb[6].mxu1  ;;  %v412_v63 = vpop.f32.mrb[7].mxu0 }
  0xf1   : > { %v542_v0 = vmax.f32 %v482_v55, 0.0  ;;  %v524_v1 = vmax.f32 %v410_v56, 0.0  ;;  %v485_v2 = vadd.f32 %v924_v62, %v1050_v18  ;;  %v413_v3 = vadd.f32 %v1050_v18, %v412_v63  ;;  %v476_v4 = vpop.f32.mrb[7].mxu1 }
  0xf2   : > { %v853_v5 = vpack.c.bf16 %v526_v59, %v526_v59  ;;  %v540_v6 = vmax.f32 %v474_v60, 0.0  ;;  %v527_v7 = vmax.f32 %v421_v61, 0.0  ;;  %v477_v8 = vadd.f32 %v1050_v18, %v476_v4 }
  0xf3   : > { %v869_v9 = vpack.c.bf16 %v542_v0, %v542_v0  ;;  %v851_v10 = vpack.c.bf16 %v524_v1, %v524_v1  ;;  %v543_v11 = vmax.f32 %v485_v2, 0.0  ;;  %v525_v12 = vmax.f32 %v413_v3, 0.0 }
  0xf4   : > { %687 = vst.msk [vmem:[%s1062_s27 + $0x18] sm:$0xf] %vm680_vm1, %v853_v5  ;;  %v867_v13 = vpack.c.bf16 %v540_v6, %v540_v6  ;;  %v854_v14 = vpack.c.bf16 %v527_v7, %v527_v7  ;;  %v541_v15 = vmax.f32 %v477_v8, 0.0 }
  0xf5   : > { %703 = vst.msk [vmem:[%s1062_s27 + $0x58] sm:$0xf] %vm680_vm1, %v869_v9  ;;  %685 = vst.msk [vmem:[%s1062_s27 + $0x10] sm:$0xf] %vm680_vm1, %v851_v10  ;;  %v870_v16 = vpack.c.bf16 %v543_v11, %v543_v11  ;;  %v852_v17 = vpack.c.bf16 %v525_v12, %v525_v12  ;;  %v911_v19 = vpop.f32.mrb[8].mxu0 }
  0xf6   : > { %701 = vst.msk [vmem:[%s1062_s27 + $0x50] sm:$0xf] %vm680_vm1, %v867_v13  ;;  %688 = vst.msk [vmem:[%s1062_s27 + $0x1c] sm:$0xf] %vm680_vm1, %v854_v14  ;;  %v868_v20 = vpack.c.bf16 %v541_v15, %v541_v15  ;;  %v434_v21 = vadd.f32 %v911_v19, %v1050_v18  ;;  %v927_v22 = vpop.f32.mrb[8].mxu1  ;;  %v425_v23 = vpop.f32.mrb[9].mxu0 }
  0xf7   : > { %704 = vst.msk [vmem:[%s1062_s27 + $0x5c] sm:$0xf] %vm680_vm1, %v870_v16  ;;  %686 = vst.msk [vmem:[%s1062_s27 + $0x14] sm:$0xf] %vm680_vm1, %v852_v17  ;;  %v498_v24 = vadd.f32 %v927_v22, %v1050_v18  ;;  %v426_v25 = vadd.f32 %v1050_v18, %v425_v23  ;;  %v489_v26 = vpop.f32.mrb[9].mxu1  ;;  %v912_v27 = vpop.f32.mrb[10].mxu0 }
  0xf8   : > { %702 = vst.msk [vmem:[%s1062_s27 + $0x54] sm:$0xf] %vm680_vm1, %v868_v20  ;;  %v530_v28 = vmax.f32 %v434_v21, 0.0  ;;  %v490_v29 = vadd.f32 %v1050_v18, %v489_v26  ;;  %v437_v30 = vadd.f32 %v912_v27, %v1050_v18  ;;  %v928_v31 = vpop.f32.mrb[10].mxu1  ;;  %v428_v32 = vpop.f32.mrb[11].mxu0 }
  0xf9   : > { %v546_v33 = vmax.f32 %v498_v24, 0.0  ;;  %v528_v34 = vmax.f32 %v426_v25, 0.0  ;;  %v501_v35 = vadd.f32 %v928_v31, %v1050_v18  ;;  %v429_v36 = vadd.f32 %v1050_v18, %v428_v32  ;;  %v492_v37 = vpop.f32.mrb[11].mxu1 }
  0xfa   : > { %v857_v38 = vpack.c.bf16 %v530_v28, %v530_v28  ;;  %v544_v39 = vmax.f32 %v490_v29, 0.0  ;;  %v531_v40 = vmax.f32 %v437_v30, 0.0  ;;  %v493_v41 = vadd.f32 %v1050_v18, %v492_v37 }
  0xfb   : > { %v873_v42 = vpack.c.bf16 %v546_v33, %v546_v33  ;;  %v855_v43 = vpack.c.bf16 %v528_v34, %v528_v34  ;;  %v547_v44 = vmax.f32 %v501_v35, 0.0  ;;  %v529_v45 = vmax.f32 %v429_v36, 0.0 }
  0xfc   : > { %691 = vst.msk [vmem:[%s1062_s27 + $0x28] sm:$0xf] %vm680_vm1, %v857_v38  ;;  %v871_v46 = vpack.c.bf16 %v544_v39, %v544_v39  ;;  %v858_v47 = vpack.c.bf16 %v531_v40, %v531_v40  ;;  %v545_v48 = vmax.f32 %v493_v41, 0.0 }
  0xfd   : > { %707 = vst.msk [vmem:[%s1062_s27 + $0x68] sm:$0xf] %vm680_vm1, %v873_v42  ;;  %689 = vst.msk [vmem:[%s1062_s27 + $0x20] sm:$0xf] %vm680_vm1, %v855_v43  ;;  %v874_v49 = vpack.c.bf16 %v547_v44, %v547_v44  ;;  %v856_v50 = vpack.c.bf16 %v529_v45, %v529_v45  ;;  %v915_v51 = vpop.f32.mrb[12].mxu0 }
  0xfe   : > { %705 = vst.msk [vmem:[%s1062_s27 + $0x60] sm:$0xf] %vm680_vm1, %v871_v46  ;;  %692 = vst.msk [vmem:[%s1062_s27 + $0x2c] sm:$0xf] %vm680_vm1, %v858_v47  ;;  %v872_v52 = vpack.c.bf16 %v545_v48, %v545_v48  ;;  %v450_v53 = vadd.f32 %v915_v51, %v1050_v18  ;;  %v931_v54 = vpop.f32.mrb[12].mxu1  ;;  %v441_v55 = vpop.f32.mrb[13].mxu0 }
  0xff   : > { %708 = vst.msk [vmem:[%s1062_s27 + $0x6c] sm:$0xf] %vm680_vm1, %v874_v49  ;;  %690 = vst.msk [vmem:[%s1062_s27 + $0x24] sm:$0xf] %vm680_vm1, %v856_v50  ;;  %v514_v56 = vadd.f32 %v931_v54, %v1050_v18  ;;  %v442_v57 = vadd.f32 %v1050_v18, %v441_v55  ;;  %v505_v58 = vpop.f32.mrb[13].mxu1  ;;  %v916_v59 = vpop.f32.mrb[14].mxu0 }
 0x100   : > { %706 = vst.msk [vmem:[%s1062_s27 + $0x64] sm:$0xf] %vm680_vm1, %v872_v52  ;;  %v534_v60 = vmax.f32 %v450_v53, 0.0  ;;  %v506_v61 = vadd.f32 %v1050_v18, %v505_v58  ;;  %v453_v62 = vadd.f32 %v916_v59, %v1050_v18  ;;  %v932_v63 = vpop.f32.mrb[14].mxu1  ;;  %v444_v0 = vpop.f32.mrb[15].mxu0 }
 0x101   : > { %v550_v1 = vmax.f32 %v514_v56, 0.0  ;;  %v532_v2 = vmax.f32 %v442_v57, 0.0  ;;  %v517_v3 = vadd.f32 %v932_v63, %v1050_v18  ;;  %v445_v4 = vadd.f32 %v1050_v18, %v444_v0  ;;  %v508_v5 = vpop.f32.mrb[15].mxu1 }
 0x102   : > { %v861_v6 = vpack.c.bf16 %v534_v60, %v534_v60  ;;  %v548_v7 = vmax.f32 %v506_v61, 0.0  ;;  %v535_v8 = vmax.f32 %v453_v62, 0.0  ;;  %v509_v9 = vadd.f32 %v1050_v18, %v508_v5 }
 0x103   : > { %v877_v10 = vpack.c.bf16 %v550_v1, %v550_v1  ;;  %v859_v11 = vpack.c.bf16 %v532_v2, %v532_v2  ;;  %v551_v12 = vmax.f32 %v517_v3, 0.0  ;;  %v533_v13 = vmax.f32 %v445_v4, 0.0 }
 0x104   : > { %695 = vst.msk [vmem:[%s1062_s27 + $0x38] sm:$0xf] %vm680_vm1, %v861_v6  ;;  %v875_v14 = vpack.c.bf16 %v548_v7, %v548_v7  ;;  %v862_v15 = vpack.c.bf16 %v535_v8, %v535_v8  ;;  %v549_v16 = vmax.f32 %v509_v9, 0.0 }
 0x105   : > { %711 = vst.msk [vmem:[%s1062_s27 + $0x78] sm:$0xf] %vm680_vm1, %v877_v10  ;;  %693 = vst.msk [vmem:[%s1062_s27 + $0x30] sm:$0xf] %vm680_vm1, %v859_v11  ;;  %v878_v17 = vpack.c.bf16 %v551_v12, %v551_v12  ;;  %v860_v19 = vpack.c.bf16 %v533_v13, %v533_v13 }
 0x106   : > { %709 = vst.msk [vmem:[%s1062_s27 + $0x70] sm:$0xf] %vm680_vm1, %v875_v14  ;;  %696 = vst.msk [vmem:[%s1062_s27 + $0x3c] sm:$0xf] %vm680_vm1, %v862_v15  ;;  %v876_v18 = vpack.c.bf16 %v549_v16, %v549_v16 }
 0x107   : > { %712 = vst.msk [vmem:[%s1062_s27 + $0x7c] sm:$0xf] %vm680_vm1, %v878_v17  ;;  %694 = vst.msk [vmem:[%s1062_s27 + $0x34] sm:$0xf] %vm680_vm1, %v860_v19 }
 0x108   : > { %710 = vst.msk [vmem:[%s1062_s27 + $0x74] sm:$0xf] %vm680_vm1, %v876_v18 }
 0x109 PF: > { %s13_s12 = sadd.s32 1, %s969_s12  }
 0x10a   : > { %p10_p4 = scmp.ge.s32.totalorder %s13_s12, 4  }
 0x10c   :  { %12 = sbr.rel (!%p10_p4) target bundleno = 1 (0x1), region = 62 }

// kernel: lanet_forward.39
= control target key start
LH: loop header
LB: loop body
LE: loop exit
PB: predicated region body
PF: predicated region fallthrough
CT: control target
= control target key end

     0   :  { %s1672_s12 = smov 0   ;;  %s2063_s0 = inlined_call_operand.vmem [shape: bf16[2048,32], index: 0, kind: input, shape index: {}]   ;;  %s2064_s1 = inlined_call_operand.vmem [shape: bf16[32,2], index: 1, kind: input, shape index: {}]   ;;  %s2065_s2 = inlined_call_operand.vmem [shape: f32[1,2], index: 2, kind: input, shape index: {}]   ;;  %s2066_s3 = inlined_call_operand.vmem [shape: f32[2048,2], index: 3, kind: output, shape index: {}]  }
   0x1 LB: > { %s1348_s13 = sadd.s32 4294967295, %s1648_s12   ;;  %p1352_p0 = scmp.ge.s32.totalorder %s1648_s12, 1  ;;  %s1648_s12 = sphi %s1672_s12, %s13_s12  }
   0x2   : > { %p138_p1 = scmp.lt.s32.totalorder %s1648_s12, 9 }
   0x4   : > { %p139_p2 = pnand %p1352_p0, %p138_p1 }
   0x5   : > { %v1496_v0 = vld [vmem:[%s2064_s1] sm:$0xff] (!%p139_p2)   ;;  %s1353_s16 = sshll.u32 (!%p139_p2), %s1348_s13, 5  ;;  %v1497_v1 = vld [vmem:[%s2064_s1 + $0x8] sm:$0xff] (!%p139_p2)   ;;  %vm310_vm0 = vcmask (!%p139_p2), 261120   ;;  %s1650_s25 = smov (!%p139_p2), 127   ;;  %v1651_v55 = vmov (!%p139_p2), 0  }
   0x6   : > { %142 = sbr.rel (%p139_p2) target bundleno = 634 (0x27a), region = 32  ;;  %p163_p3 = scmp.lt.s32.totalorder (!%p139_p2), %s1353_s16, 255  ;;  %1444 = vmatprep.subr.bf16.mxu0 (!%p139_p2), %v1496_v0  ;;  %1480 = vmatprep.subr.bf16.mxu1 (!%p139_p2), %v1496_v0  ;;  %v1729_v18 = vld [vmem:[%s2065_s2] ss:$0 sm:$0xff] (!%p139_p2)  ;;  %vm1259_vm2 = vcmask (!%p139_p2), 15360  }
   0x7   : > { %1445 = vmatpush3.bf16.msra.mxu0 (!%p139_p2), %v1496_v0  ;;  %1482 = vmatpush3.bf16.msra.mxu1 (!%p139_p2), %v1496_v0 }
   0x8   : > { %1446 = vmatprep.subr.bf16.mxu0 (!%p139_p2), %v1497_v1  ;;  %1481 = vmatprep.subr.bf16.mxu1 (!%p139_p2), %v1497_v1 }
   0x9   : > { %1494 = vset.pattern.permute.xlu1 (!%p139_p2), %v1651_v55  ;;  %1495 = vset.pattern.permute.xlu0 (!%p139_p2), %v1651_v55 }
   0xb   : > { %1447 = vmatpush3.bf16.msra.mxu0 (!%p139_p2), %v1497_v1  ;;  %1483 = vmatpush3.bf16.msra.mxu1 (!%p139_p2), %v1497_v1 }
   0xd   : > { %s2068_s16 = smov (!%p163_p3, %s1353_s16), 255 }
   0xe   : > { %s1354_s19 = sshll.u32 %s2068_s16, 2  ;;  %s1356_s26 = sshll.u32 %s2068_s16, 3 }
   0xf   : > { %s1692_s22 = scalar_lea.vmem %s2063_s0, %s1354_s19  ;;  %s1930_s29 = scalar_lea.vmem %s2066_s3, %s1356_s26 }
  0x10   : > { %v1498_v2 = vld [vmem:[%s1692_s22] sm:$0xff]   ;;  %v1500_v4 = vld [vmem:[%s1692_s22 + $0x8] sm:$0xff]   ;;  %v1502_v6 = vld [vmem:[%s1692_s22 + $0x10] sm:$0xff]  }
  0x11   : > { %v1499_v3 = vld [vmem:[%s1692_s22 + $0x40] sm:$0xff]   ;;  %1448 = vmatprep.mubr.msk.bf16.mxu0 %vm310_vm0, %v1498_v2  ;;  %v1501_v5 = vld [vmem:[%s1692_s22 + $0x48] sm:$0xff]   ;;  %v1504_v7 = vld [vmem:[%s1692_s22 + $0x50] sm:$0xff]  }
  0x12   : > { %1464 = vmatprep.mubr.msk.bf16.mxu1 %vm310_vm0, %v1499_v3  ;;  %1449 = vmatmul.mubr.msk.bf16.vlgmr.msra.gmra.mrb[0].mxu0 %vm310_vm0, %v1500_v4  ;;  %v1503_v8 = vld [vmem:[%s1692_s22 + $0x18] sm:$0xff]   ;;  %v1506_v10 = vld [vmem:[%s1692_s22 + $0x20] sm:$0xff]   ;;  %v1507_v12 = vld [vmem:[%s1692_s22 + $0x28] sm:$0xff]  }
  0x13   : > { %1465 = vmatmul.mubr.msk.bf16.vlgmr.msra.gmra.mrb[0].mxu1 %vm310_vm0, %v1501_v5  ;;  %1452 = vmatprep.mubr.msk.bf16.mxu0 %vm310_vm0, %v1502_v6  ;;  %v1505_v9 = vld [vmem:[%s1692_s22 + $0x58] sm:$0xff]   ;;  %v1508_v11 = vld [vmem:[%s1692_s22 + $0x60] sm:$0xff]   ;;  %v1509_v13 = vld [vmem:[%s1692_s22 + $0x68] sm:$0xff]  }
  0x14   : > { %1468 = vmatprep.mubr.msk.bf16.mxu1 %vm310_vm0, %v1504_v7  ;;  %v1510_v14 = vld [vmem:[%s1692_s22 + $0x30] sm:$0xff]   ;;  %v1511_v16 = vld [vmem:[%s1692_s22 + $0x38] sm:$0xff]  }
  0x15   : > { %v1512_v15 = vld [vmem:[%s1692_s22 + $0x70] sm:$0xff]   ;;  %v1513_v17 = vld [vmem:[%s1692_s22 + $0x78] sm:$0xff]  }
  0x1a   : > { %1453 = vmatmul.mubr.msk.bf16.gmra.mrb[4].mxu0 %vm310_vm0, %v1503_v8 }
  0x1b   : > { %1469 = vmatmul.mubr.msk.bf16.gmra.mrb[4].mxu1 %vm310_vm0, %v1505_v9  ;;  %1456 = vmatprep.mubr.msk.bf16.mxu0 %vm310_vm0, %v1506_v10 }
  0x1c   : > { %1472 = vmatprep.mubr.msk.bf16.mxu1 %vm310_vm0, %v1508_v11 }
  0x22   : > { %1457 = vmatmul.mubr.msk.bf16.gmra.mrb[8].mxu0 %vm310_vm0, %v1507_v12 }
  0x23   : > { %1473 = vmatmul.mubr.msk.bf16.gmra.mrb[8].mxu1 %vm310_vm0, %v1509_v13  ;;  %1460 = vmatprep.mubr.msk.bf16.mxu0 %vm310_vm0, %v1510_v14 }
  0x24   : > { %1476 = vmatprep.mubr.msk.bf16.mxu1 %vm310_vm0, %v1512_v15 }
  0x2a   : > { %1461 = vmatmul.mubr.msk.bf16.gmra.mrb[12].mxu0 %vm310_vm0, %v1511_v16 }
  0x2b   : > { %1477 = vmatmul.mubr.msk.bf16.gmra.mrb[12].mxu1 %vm310_vm0, %v1513_v17 }
  0xe5   : > { %v1450_v19 = vpop.f32.mrb[0].mxu0 }
  0xe6   : > { %v1732_v20 = vadd.f32 %v1450_v19, %v1729_v18  ;;  %v1466_v21 = vpop.f32.mrb[0].mxu1  ;;  %v393_v22 = vpop.f32.mrb[1].mxu0 }
  0xe7   : > { %v1735_v23 = vadd.f32 %v1466_v21, %v1729_v18  ;;  %v457_v24 = vpop.f32.mrb[1].mxu1  ;;  %v1451_v25 = vpop.f32.mrb[2].mxu0  ;;  %v1743_v29 = vadd.f32 %v1729_v18, %v393_v22 }
  0xe8   : > { %v1738_v26 = vadd.f32 %v1451_v25, %v1729_v18  ;;  %v1467_v27 = vpop.f32.mrb[2].mxu1  ;;  %556 = vrot.lane.b32.xlu1 %v1732_v20, %s1650_s25  ;;  %v396_v28 = vpop.f32.mrb[3].mxu0  ;;  %v1755_v35 = vadd.f32 %v1729_v18, %v457_v24 }
  0xe9   : > { %588 = vrot.lane.b32.xlu0 %v1735_v23, %s1650_s25  ;;  %v460_v30 = vpop.f32.mrb[3].mxu1  ;;  %v1752_v32 = vadd.f32 %v1467_v27, %v1729_v18  ;;  %v1765_v42 = vadd.f32 %v1729_v18, %v396_v28 }
  0xea   : > { %v1762_v41 = vadd.f32 %v1729_v18, %v460_v30 }
  0xec   : > { %558 = vrot.lane.b32.xlu1 %v1738_v26, %s1650_s25 }
  0xed   : > { %552 = vrot.lane.b32.xlu0 %v1743_v29, %s1650_s25  ;;  %v1454_v31 = vpop.f32.mrb[4].mxu0 }
  0xee   : > { %v409_v33 = vpop.f32.mrb[5].mxu0  ;;  %v1470_v34 = vpop.f32.mrb[4].mxu1  ;;  %v1773_v44 = vadd.f32 %v1454_v31, %v1729_v18 }
  0xef   : > { %v1455_v36 = vpop.f32.mrb[6].mxu0  ;;  %v473_v37 = vpop.f32.mrb[5].mxu1  ;;  %v1783_v53 = vadd.f32 %v1470_v34, %v1729_v18  ;;  %v1793_v57 = vadd.f32 %v1729_v18, %v409_v33 }
  0xf0   : > { %590 = vrot.lane.b32.xlu1 %v1752_v32, %s1650_s25  ;;  %v1471_v38 = vpop.f32.mrb[6].mxu1  ;;  %v412_v39 = vpop.f32.mrb[7].mxu0  ;;  %v1770_v43 = vadd.f32 %v1455_v36, %v1729_v18  ;;  %v1803_v2 = vadd.f32 %v1729_v18, %v473_v37 }
  0xf1   : > { %584 = vrot.lane.b32.xlu0 %v1755_v35, %s1650_s25  ;;  %v476_v40 = vpop.f32.mrb[7].mxu1  ;;  %v1780_v50 = vadd.f32 %v1471_v38, %v1729_v18  ;;  %v1790_v56 = vadd.f32 %v1729_v18, %v412_v39 }
  0xf2   : > { %v1800_v63 = vadd.f32 %v1729_v18, %v476_v40 }
  0xf4   : > { %586 = vrot.lane.b32.xlu1 %v1762_v41, %s1650_s25 }
  0xf5   : > { %554 = vrot.lane.b32.xlu0 %v1765_v42, %s1650_s25  ;;  %v1458_v45 = vpop.f32.mrb[8].mxu0 }
  0xf6   : > { %v425_v46 = vpop.f32.mrb[9].mxu0  ;;  %v1474_v47 = vpop.f32.mrb[8].mxu1  ;;  %v1813_v5 = vadd.f32 %v1458_v45, %v1729_v18 }
  0xf7   : > { %v1459_v48 = vpop.f32.mrb[10].mxu0  ;;  %v489_v49 = vpop.f32.mrb[9].mxu1  ;;  %v1823_v7 = vadd.f32 %v1474_v47, %v1729_v18  ;;  %v1833_v9 = vadd.f32 %v1729_v18, %v425_v46 }
  0xf8   : > { %566 = vrot.lane.b32.xlu1 %v1770_v43, %s1650_s25  ;;  %v1475_v51 = vpop.f32.mrb[10].mxu1  ;;  %v428_v52 = vpop.f32.mrb[11].mxu0  ;;  %v1810_v4 = vadd.f32 %v1459_v48, %v1729_v18  ;;  %v1843_v11 = vadd.f32 %v1729_v18, %v489_v49 }
  0xf9   : > { %564 = vrot.lane.b32.xlu0 %v1773_v44, %s1650_s25  ;;  %v492_v54 = vpop.f32.mrb[11].mxu1  ;;  %v1820_v6 = vadd.f32 %v1475_v51, %v1729_v18  ;;  %v1830_v8 = vadd.f32 %v1729_v18, %v428_v52 }
  0xfa   : > { %v1840_v10 = vadd.f32 %v1729_v18, %v492_v54 }
  0xfc   : > { %598 = vrot.lane.b32.xlu1 %v1780_v50, %s1650_s25 }
  0xfd   : > { %596 = vrot.lane.b32.xlu0 %v1783_v53, %s1650_s25  ;;  %v1462_v58 = vpop.f32.mrb[12].mxu0 }
  0xfe   : > { %v441_v59 = vpop.f32.mrb[13].mxu0  ;;  %v1478_v60 = vpop.f32.mrb[12].mxu1  ;;  %v1853_v13 = vadd.f32 %v1462_v58, %v1729_v18 }
  0xff   : > { %v1463_v61 = vpop.f32.mrb[14].mxu0  ;;  %v505_v62 = vpop.f32.mrb[13].mxu1  ;;  %v1863_v15 = vadd.f32 %v1478_v60, %v1729_v18  ;;  %v1873_v17 = vadd.f32 %v1729_v18, %v441_v59 }
 0x100   : > { %562 = vrot.lane.b32.xlu1 %v1790_v56, %s1650_s25  ;;  %v1479_v0 = vpop.f32.mrb[14].mxu1  ;;  %v444_v1 = vpop.f32.mrb[15].mxu0  ;;  %v1850_v12 = vadd.f32 %v1463_v61, %v1729_v18  ;;  %v1883_v21 = vadd.f32 %v1729_v18, %v505_v62 }
 0x101   : > { %560 = vrot.lane.b32.xlu0 %v1793_v57, %s1650_s25  ;;  %v508_v3 = vpop.f32.mrb[15].mxu1  ;;  %v1860_v14 = vadd.f32 %v1479_v0, %v1729_v18  ;;  %v1870_v16 = vadd.f32 %v1729_v18, %v444_v1 }
 0x102   : > { %v1880_v19 = vadd.f32 %v1729_v18, %v508_v3 }
 0x104   : > { %594 = vrot.lane.b32.xlu1 %v1800_v63, %s1650_s25 }
 0x105   : > { %592 = vrot.lane.b32.xlu0 %v1803_v2, %s1650_s25 }
 0x108   : > { %574 = vrot.lane.b32.xlu1 %v1810_v4, %s1650_s25 }
 0x109   : > { %572 = vrot.lane.b32.xlu0 %v1813_v5, %s1650_s25 }
 0x10c   : > { %606 = vrot.lane.b32.xlu1 %v1820_v6, %s1650_s25 }
 0x10d   : > { %604 = vrot.lane.b32.xlu0 %v1823_v7, %s1650_s25 }
 0x110   : > { %570 = vrot.lane.b32.xlu1 %v1830_v8, %s1650_s25 }
 0x111   : > { %568 = vrot.lane.b32.xlu0 %v1833_v9, %s1650_s25 }
 0x114   : > { %602 = vrot.lane.b32.xlu1 %v1840_v10, %s1650_s25 }
 0x115   : > { %600 = vrot.lane.b32.xlu0 %v1843_v11, %s1650_s25 }
 0x118   : > { %582 = vrot.lane.b32.xlu1 %v1850_v12, %s1650_s25 }
 0x119   : > { %580 = vrot.lane.b32.xlu0 %v1853_v13, %s1650_s25 }
 0x11c   : > { %614 = vrot.lane.b32.xlu1 %v1860_v14, %s1650_s25 }
 0x11d   : > { %612 = vrot.lane.b32.xlu0 %v1863_v15, %s1650_s25 }
 0x120   : > { %578 = vrot.lane.b32.xlu1 %v1870_v16, %s1650_s25 }
 0x121   : > { %576 = vrot.lane.b32.xlu0 %v1873_v17, %s1650_s25 }
 0x124   : > { %610 = vrot.lane.b32.xlu1 %v1880_v19, %s1650_s25 }
 0x125   : > { %608 = vrot.lane.b32.xlu0 %v1883_v21, %s1650_s25 }
 0x15a   : > { %v557_v22 = vpop.permute.xlu1 %556 }
 0x15b   : > { %v589_v24 = vpop.permute.xlu0 %588  ;;  %v650_v25 = vsub.f32 %v1732_v20, %v557_v22 }
 0x15c   : > { %v666_v27 = vsub.f32 %v1735_v23, %v589_v24 }
 0x15d   : > { %v1394_v28 = vmul.f32 -1.442695, %v650_v25 }
 0x15e   : > { %v1410_v30 = vmul.f32 -1.442695, %v666_v27  ;;  %v559_v31 = vpop.permute.xlu1 %558 }
 0x15f   : > { %1514 = vpow2.f32 %v1394_v28  ;;  %v651_v18 = vsub.f32 %v1738_v26, %v559_v31  ;;  %v553_v33 = vpop.permute.xlu0 %552 }
 0x160   : > { %1516 = vpow2.f32 %v1410_v30  ;;  %v648_v34 = vsub.f32 %v1743_v29, %v553_v33 }
 0x161   : > { %v1395_v36 = vmul.f32 -1.442695, %v651_v18 }
 0x162   : > { %v1392_v37 = vmul.f32 -1.442695, %v648_v34  ;;  %v591_v38 = vpop.permute.xlu1 %590 }
 0x163   : > { %1518 = vpow2.f32 %v1395_v36  ;;  %v667_v39 = vsub.f32 %v1752_v32, %v591_v38  ;;  %v585_v40 = vpop.permute.xlu0 %584 }
 0x164   : > { %1520 = vpow2.f32 %v1392_v37  ;;  %v664_v20 = vsub.f32 %v1755_v35, %v585_v40 }
 0x165   : > { %v1411_v23 = vmul.f32 -1.442695, %v667_v39 }
 0x166   : > { %v1408_v45 = vmul.f32 -1.442695, %v664_v20  ;;  %v587_v46 = vpop.permute.xlu1 %586 }
 0x167   : > { %1522 = vpow2.f32 %v1411_v23  ;;  %v665_v26 = vsub.f32 %v1762_v41, %v587_v46  ;;  %v555_v47 = vpop.permute.xlu0 %554 }
 0x168   : > { %1524 = vpow2.f32 %v1408_v45  ;;  %v649_v29 = vsub.f32 %v1765_v42, %v555_v47 }
 0x169   : > { %v1515_v48 = vpop.eup %1514  ;;  %v1409_v49 = vmul.f32 -1.442695, %v665_v26 }
 0x16a   : > { %v1517_v51 = vpop.eup %1516  ;;  %v778_v52 = vadd.f32 1.0, %v1515_v48  ;;  %v1393_v55 = vmul.f32 -1.442695, %v649_v29  ;;  %v567_v60 = vpop.permute.xlu1 %566 }
 0x16b   : > { %v794_v54 = vadd.f32 1.0, %v1517_v51  ;;  %1526 = vpow2.f32 %v1409_v49  ;;  %v565_v32 = vpop.permute.xlu0 %564  ;;  %v655_v27 = vsub.f32 %v1770_v43, %v567_v60 }
 0x16c   : > { %1528 = vrcp.f32 %v778_v52  ;;  %v654_v1 = vsub.f32 %v1773_v44, %v565_v32 }
 0x16d   : > { %v1519_v35 = vpop.eup %1518  ;;  %1530 = vrcp.f32 %v794_v54  ;;  %v1399_v37 = vmul.f32 -1.442695, %v655_v27 }
 0x16e   : > { %v1521_v58 = vpop.eup %1520  ;;  %v779_v61 = vadd.f32 1.0, %v1519_v35  ;;  %1532 = vpow2.f32 %v1393_v55  ;;  %v599_v24 = vpop.permute.xlu1 %598  ;;  %v1398_v30 = vmul.f32 -1.442695, %v654_v1 }
 0x16f   : > { %v776_v59 = vadd.f32 1.0, %v1521_v58  ;;  %v597_v62 = vpop.permute.xlu0 %596  ;;  %v671_v44 = vsub.f32 %v1780_v50, %v599_v24 }
 0x170   : > { %v670_v31 = vsub.f32 %v1783_v53, %v597_v62 }
 0x171   : > { %v1523_v41 = vpop.eup %1522  ;;  %1534 = vrcp.f32 %v776_v59  ;;  %v1415_v45 = vmul.f32 -1.442695, %v671_v44 }
 0x172   : > { %v1525_v42 = vpop.eup %1524  ;;  %1536 = vrcp.f32 %v779_v61  ;;  %v795_v22 = vadd.f32 1.0, %v1523_v41  ;;  %v563_v38 = vpop.permute.xlu1 %562  ;;  %v1414_v39 = vmul.f32 -1.442695, %v670_v31 }
 0x173   : > { %v792_v0 = vadd.f32 1.0, %v1525_v42  ;;  %v561_v28 = vpop.permute.xlu0 %560  ;;  %v653_v46 = vsub.f32 %v1790_v56, %v563_v38 }
 0x174   : > { %v652_v40 = vsub.f32 %v1793_v57, %v561_v28 }
 0x175   : > { %v1527_v3 = vpop.eup %1526  ;;  %1538 = vrcp.f32 %v792_v0  ;;  %v1397_v48 = vmul.f32 -1.442695, %v653_v46 }
 0x176   : > { %v1529_v25 = vpop.eup %1528  ;;  %1540 = vrcp.f32 %v795_v22  ;;  %v793_v33 = vadd.f32 1.0, %v1527_v3  ;;  %v1396_v26 = vmul.f32 -1.442695, %v652_v40  ;;  %v595_v47 = vpop.permute.xlu1 %594 }
 0x177   : > { %919 = vperm.xlu1 %1494, %v1529_v25   ;;  %v1531_v18 = vpop.eup %1530  ;;  %1542 = vpow2.f32 %v1398_v30  ;;  %v593_v20 = vpop.permute.xlu0 %592  ;;  %v877_v29 = vsub.f32 1.0, %v1529_v25  ;;  %v669_v49 = vsub.f32 %v1800_v63, %v595_v47 }
 0x178   : > { %v1533_v34 = vpop.eup %1532  ;;  %1544 = vrcp.f32 %v793_v33  ;;  %v668_v50 = vsub.f32 %v1803_v2, %v593_v20  ;;  %v893_v56 = vsub.f32 1.0, %v1531_v18 }
 0x179   : > { %v777_v43 = vadd.f32 1.0, %v1533_v34  ;;  %1546 = vpow2.f32 %v1399_v37  ;;  %v1413_v32 = vmul.f32 -1.442695, %v669_v49 }
 0x17a   : > { %1548 = vpow2.f32 %v1414_v39  ;;  %v1412_v51 = vmul.f32 -1.442695, %v668_v50  ;;  %v575_v1 = vpop.permute.xlu1 %574 }
 0x17b   : > { %v1535_v36 = vpop.eup %1534  ;;  %999 = vperm.xlu1 %1494, %v1531_v18   ;;  %1550 = vrcp.f32 %v777_v43  ;;  %v573_v60 = vpop.permute.xlu0 %572  ;;  %v659_v38 = vsub.f32 %v1810_v4, %v575_v1 }
 0x17c   : > { %909 = vperm.xlu0 %1495, %v1535_v36   ;;  %v1537_v23 = vpop.eup %1536  ;;  %1552 = vpow2.f32 %v1415_v45  ;;  %v875_v0 = vsub.f32 1.0, %v1535_v36  ;;  %v658_v18 = vsub.f32 %v1813_v5, %v573_v60 }
 0x17d   : > { %1554 = vpow2.f32 %v1396_v26  ;;  %v878_v58 = vsub.f32 1.0, %v1537_v23 }
 0x17e   : > { %1556 = vpow2.f32 %v1397_v48  ;;  %v607_v34 = vpop.permute.xlu1 %606  ;;  %v1402_v40 = vmul.f32 -1.442695, %v658_v18 }
 0x17f   : > { %v1539_v53 = vpop.eup %1538  ;;  %1558 = vpow2.f32 %v1412_v51  ;;  %v605_v25 = vpop.permute.xlu0 %604  ;;  %v675_v45 = vsub.f32 %v1820_v6, %v607_v34 }
 0x180   : > { %924 = vperm.xlu0 %1495, %v1537_v23   ;;  %989 = vperm.xlu1 %1494, %v1539_v53   ;;  %v1541_v57 = vpop.eup %1540  ;;  %1560 = vpow2.f32 %v1413_v32  ;;  %v891_v28 = vsub.f32 1.0, %v1539_v53  ;;  %v674_v43 = vsub.f32 %v1823_v7, %v605_v25  ;;  %v1403_v53 = vmul.f32 -1.442695, %v659_v38 }
 0x181   : > { %v1543_v52 = vpop.eup %1542  ;;  %v894_v42 = vsub.f32 1.0, %v1541_v57 }
 0x182   : > { %v1545_v54 = vpop.eup %1544  ;;  %v782_v55 = vadd.f32 1.0, %v1543_v52  ;;  %v571_v46 = vpop.permute.xlu1 %570  ;;  %v1418_v26 = vmul.f32 -1.442695, %v674_v43 }
 0x183   : > { %v1547_v2 = vpop.eup %1546  ;;  %v892_v37 = vsub.f32 1.0, %v1545_v54  ;;  %v569_v39 = vpop.permute.xlu0 %568 }
 0x184   : > { %1004 = vperm.xlu0 %1495, %v1541_v57   ;;  %1079 = vperm.xlu1 %1494, %v877_v29   ;;  %v1549_v35 = vpop.eup %1548  ;;  %v783_v61 = vadd.f32 1.0, %v1547_v2  ;;  %1562 = vrcp.f32 %v782_v55  ;;  %v656_v50 = vsub.f32 %v1833_v9, %v569_v39  ;;  %v1419_v29 = vmul.f32 -1.442695, %v675_v45 }
 0x185   : > { %v1551_v59 = vpop.eup %1550  ;;  %v798_v41 = vadd.f32 1.0, %v1549_v35  ;;  %v657_v57 = vsub.f32 %v1830_v8, %v571_v46 }
 0x186   : > { %v1553_v63 = vpop.eup %1552  ;;  %1564 = vrcp.f32 %v783_v61  ;;  %v876_v30 = vsub.f32 1.0, %v1551_v59  ;;  %v1400_v48 = vmul.f32 -1.442695, %v656_v50  ;;  %v603_v6 = vpop.permute.xlu1 %602 }
 0x187   : > { %v1555_v62 = vpop.eup %1554  ;;  %v799_v3 = vadd.f32 1.0, %v1553_v63  ;;  %1566 = vrcp.f32 %v798_v41  ;;  %v601_v4 = vpop.permute.xlu0 %600  ;;  %v1401_v9 = vmul.f32 -1.442695, %v657_v57 }
 0x188   : > { %994 = vperm.xlu0 %1495, %v1545_v54   ;;  %1159 = vperm.xlu1 %1494, %v893_v56   ;;  %v1557_v22 = vpop.eup %1556  ;;  %v780_v24 = vadd.f32 1.0, %v1555_v62  ;;  %v672_v49 = vsub.f32 %v1843_v11, %v601_v4  ;;  %v673_v56 = vsub.f32 %v1840_v10, %v603_v6 }
 0x189   : > { %v1559_v27 = vpop.eup %1558  ;;  %1568 = vrcp.f32 %v799_v3  ;;  %v781_v31 = vadd.f32 1.0, %v1557_v22 }
 0x18a   : > { %1570 = vrcp.f32 %v780_v24  ;;  %v796_v33 = vadd.f32 1.0, %v1559_v27  ;;  %v1561_v36 = vpop.eup %1560  ;;  %v1416_v54 = vmul.f32 -1.442695, %v672_v49  ;;  %v1417_v55 = vmul.f32 -1.442695, %v673_v56  ;;  %v583_v1 = vpop.permute.xlu1 %582 }
 0x18b   : > { %1572 = vrcp.f32 %v781_v31  ;;  %v797_v20 = vadd.f32 1.0, %v1561_v36  ;;  %v581_v61 = vpop.permute.xlu0 %580  ;;  %v663_v38 = vsub.f32 %v1850_v12, %v583_v1 }
 0x18c   : > { %1084 = vperm.xlu0 %1495, %v878_v58   ;;  %914 = vperm.xlu1 %1494, %v1551_v59   ;;  %1574 = vrcp.f32 %v796_v33  ;;  %v662_v18 = vsub.f32 %v1853_v13, %v581_v61 }
 0x18d   : > { %1576 = vpow2.f32 %v1402_v40 }
 0x18e   : > { %v1563_v44 = vpop.eup %1562  ;;  %1578 = vrcp.f32 %v797_v20  ;;  %v615_v34 = vpop.permute.xlu1 %614  ;;  %v1406_v40 = vmul.f32 -1.442695, %v662_v18 }
 0x18f   : > { %1580 = vpow2.f32 %v1403_v53  ;;  %v881_v2 = vsub.f32 1.0, %v1563_v44  ;;  %v613_v25 = vpop.permute.xlu0 %612  ;;  %v679_v53 = vsub.f32 %v1860_v14, %v615_v34 }
 0x190   : > { %1164 = vperm.xlu0 %1495, %v894_v42   ;;  %1069 = vperm.xlu1 %1494, %v875_v0   ;;  %v1565_v5 = vpop.eup %1564  ;;  %1582 = vpow2.f32 %v1418_v26  ;;  %v678_v43 = vsub.f32 %v1863_v15, %v613_v25 }
 0x191   : > { %v1567_v23 = vpop.eup %1566  ;;  %1584 = vpow2.f32 %v1419_v29  ;;  %v882_v59 = vsub.f32 1.0, %v1565_v5  ;;  %v1423_v4 = vmul.f32 -1.442695, %v679_v53 }
 0x192   : > { %1586 = vpow2.f32 %v1400_v48  ;;  %v897_v60 = vsub.f32 1.0, %v1567_v23  ;;  %v579_v45 = vpop.permute.xlu1 %578  ;;  %v1422_v46 = vmul.f32 -1.442695, %v678_v43 }
 0x193   : > { %v1569_v47 = vpop.eup %1568  ;;  %1588 = vpow2.f32 %v1401_v9  ;;  %v577_v39 = vpop.permute.xlu0 %576 }
 0x194   : > { %1149 = vperm.xlu1 %1494, %v891_v28   ;;  %1074 = vperm.xlu0 %1495, %v876_v30   ;;  %v1571_v7 = vpop.eup %1570  ;;  %1590 = vpow2.f32 %v1416_v54  ;;  %v898_v42 = vsub.f32 1.0, %v1569_v47  ;;  %v660_v26 = vsub.f32 %v1873_v17, %v577_v39 }
 0x195   : > { %v1573_v51 = vpop.eup %1572  ;;  %1592 = vpow2.f32 %v1417_v55  ;;  %v879_v0 = vsub.f32 1.0, %v1571_v7 }
 0x196   : > { %v1575_v52 = vpop.eup %1574  ;;  %v880_v28 = vsub.f32 1.0, %v1573_v51  ;;  %v611_v14 = vpop.permute.xlu1 %610 }
 0x197   : > { %v1577_v32 = vpop.eup %1576  ;;  %v895_v30 = vsub.f32 1.0, %v1575_v52  ;;  %v609_v12 = vpop.permute.xlu0 %608  ;;  %v677_v49 = vsub.f32 %v1880_v19, %v611_v14 }
 0x198   : > { %1154 = vperm.xlu0 %1495, %v892_v37   ;;  %939 = vperm.xlu1 %1494, %v1563_v44   ;;  %v1579_v8 = vpop.eup %1578  ;;  %v786_v35 = vadd.f32 1.0, %v1577_v32  ;;  %v676_v29 = vsub.f32 %v1883_v21, %v609_v12 }
 0x199   : > { %v1581_v11 = vpop.eup %1580  ;;  %v896_v37 = vsub.f32 1.0, %v1579_v8  ;;  %v1421_v9 = vmul.f32 -1.442695, %v677_v49 }
 0x19a   : > { %v1583_v58 = vpop.eup %1582  ;;  %v787_v63 = vadd.f32 1.0, %v1581_v11  ;;  %1594 = vrcp.f32 %v786_v35  ;;  %v1420_v6 = vmul.f32 -1.442695, %v676_v29 }
 0x19b   : > { %v1585_v10 = vpop.eup %1584  ;;  %v802_v41 = vadd.f32 1.0, %v1583_v58 }
 0x19c   : > { %944 = vperm.xlu0 %1495, %v1565_v5   ;;  %1019 = vperm.xlu1 %1494, %v1567_v23   ;;  %v1587_v62 = vpop.eup %1586  ;;  %1596 = vrcp.f32 %v787_v63  ;;  %v803_v3 = vadd.f32 1.0, %v1585_v10  ;;  %v1407_v23 = vmul.f32 -1.442695, %v663_v38 }
 0x19d   : > { %v1589_v22 = vpop.eup %1588  ;;  %1598 = vrcp.f32 %v802_v41  ;;  %v784_v24 = vadd.f32 1.0, %v1587_v62 }
 0x19e   : > { %v1591_v27 = vpop.eup %1590  ;;  %1600 = vrcp.f32 %v803_v3  ;;  %v785_v31 = vadd.f32 1.0, %v1589_v22 }
 0x19f   : > { %1602 = vrcp.f32 %v784_v24  ;;  %v800_v33 = vadd.f32 1.0, %v1591_v27  ;;  %v1593_v36 = vpop.eup %1592 }
 0x1a0   : > { %1024 = vperm.xlu0 %1495, %v1569_v47   ;;  %929 = vperm.xlu1 %1494, %v1571_v7   ;;  %1604 = vrcp.f32 %v785_v31  ;;  %v801_v20 = vadd.f32 1.0, %v1593_v36  ;;  %v661_v47 = vsub.f32 %v1870_v16, %v579_v45  ;;  %v1404_v7 = vmul.f32 -1.442695, %v660_v26 }
 0x1a1   : > { %1606 = vrcp.f32 %v800_v33 }
 0x1a2   : > { %1608 = vpow2.f32 %v1406_v40  ;;  %v1405_v17 = vmul.f32 -1.442695, %v661_v47 }
 0x1a3   : > { %1610 = vrcp.f32 %v801_v20  ;;  %v872_v20 = vlaneseq }
 0x1a4   : > { %934 = vperm.xlu0 %1495, %v1573_v51   ;;  %1009 = vperm.xlu1 %1494, %v1575_v52   ;;  %v1595_v44 = vpop.eup %1594  ;;  %1612 = vpow2.f32 %v1407_v23 }
 0x1a5   : > { %1614 = vpow2.f32 %v1422_v46  ;;  %v885_v52 = vsub.f32 1.0, %v1595_v44  ;;  %v1923_v23 = vand.u32 127, %v872_v20 }
 0x1a6   : > { %v1597_v13 = vpop.eup %1596  ;;  %1616 = vpow2.f32 %v1423_v4 }
 0x1a7   : > { %v1599_v5 = vpop.eup %1598  ;;  %1618 = vpow2.f32 %v1404_v7  ;;  %v886_v32 = vsub.f32 1.0, %v1597_v13  ;;  %vm874_vm1 = vcmp.eq.s32.totalorder %v1923_v23, 0 }
 0x1a8   : > { %1014 = vperm.xlu0 %1495, %v1579_v8   ;;  %1099 = vperm.xlu1 %1494, %v881_v2   ;;  %v1601_v50 = vpop.eup %1600  ;;  %1620 = vpow2.f32 %v1405_v17  ;;  %v901_v2 = vsub.f32 1.0, %v1599_v5 }
 0x1a9   : > { %v1603_v15 = vpop.eup %1602  ;;  %1622 = vpow2.f32 %v1420_v6  ;;  %v902_v35 = vsub.f32 1.0, %v1601_v50 }
 0x1aa   : > { %v1605_v57 = vpop.eup %1604  ;;  %1624 = vpow2.f32 %v1421_v9  ;;  %v883_v58 = vsub.f32 1.0, %v1603_v15 }
 0x1ab   : > { %v1607_v48 = vpop.eup %1606  ;;  %v884_v10 = vsub.f32 1.0, %v1605_v57 }
 0x1ac   : > { %1104 = vperm.xlu0 %1495, %v882_v59   ;;  %1179 = vperm.xlu1 %1494, %v897_v60   ;;  %v1609_v51 = vpop.eup %1608  ;;  %v899_v41 = vsub.f32 1.0, %v1607_v48 }
 0x1ad   : > { %v1611_v16 = vpop.eup %1610  ;;  %v790_v56 = vadd.f32 1.0, %v1609_v51 }
 0x1ae   : > { %v1613_v21 = vpop.eup %1612  ;;  %v900_v1 = vsub.f32 1.0, %v1611_v16 }
 0x1af   : > { %v1615_v54 = vpop.eup %1614  ;;  %v791_v8 = vadd.f32 1.0, %v1613_v21  ;;  %1626 = vrcp.f32 %v790_v56 }
 0x1b0   : > { %1184 = vperm.xlu0 %1495, %v898_v42   ;;  %1089 = vperm.xlu1 %1494, %v879_v0   ;;  %v1617_v19 = vpop.eup %1616  ;;  %v806_v55 = vadd.f32 1.0, %v1615_v54 }
 0x1b1   : > { %v1619_v11 = vpop.eup %1618  ;;  %1628 = vrcp.f32 %v791_v8  ;;  %v807_v59 = vadd.f32 1.0, %v1617_v19 }
 0x1b2   : > { %v1621_v60 = vpop.eup %1620  ;;  %1630 = vrcp.f32 %v806_v55  ;;  %v788_v61 = vadd.f32 1.0, %v1619_v11 }
 0x1b3   : > { %v1623_v63 = vpop.eup %1622  ;;  %1632 = vrcp.f32 %v807_v59  ;;  %v789_v62 = vadd.f32 1.0, %v1621_v60 }
 0x1b4   : > { %1094 = vperm.xlu0 %1495, %v880_v28   ;;  %1169 = vperm.xlu1 %1494, %v895_v30   ;;  %1634 = vrcp.f32 %v788_v61  ;;  %v804_v42 = vadd.f32 1.0, %v1623_v63  ;;  %v1625_v0 = vpop.eup %1624 }
 0x1b5   : > { %1636 = vrcp.f32 %v789_v62  ;;  %v805_v22 = vadd.f32 1.0, %v1625_v0 }
 0x1b6   : > { %1638 = vrcp.f32 %v804_v42 }
 0x1b7   : > { %1640 = vrcp.f32 %v805_v22 }
 0x1b8   : > { %1174 = vperm.xlu0 %1495, %v896_v37   ;;  %959 = vperm.xlu1 %1494, %v1595_v44  }
 0x1b9   : > { %v1627_v3 = vpop.eup %1626 }
 0x1ba   : > { %v889_v18 = vsub.f32 1.0, %v1627_v3 }
 0x1bb   : > { %v1629_v24 = vpop.eup %1628 }
 0x1bc   : > { %964 = vperm.xlu0 %1495, %v1597_v13   ;;  %1039 = vperm.xlu1 %1494, %v1599_v5   ;;  %v1631_v25 = vpop.eup %1630  ;;  %v890_v34 = vsub.f32 1.0, %v1629_v24 }
 0x1bd   : > { %v1633_v27 = vpop.eup %1632  ;;  %v905_v39 = vsub.f32 1.0, %v1631_v25 }
 0x1be   : > { %v1635_v28 = vpop.eup %1634  ;;  %v906_v43 = vsub.f32 1.0, %v1633_v27 }
 0x1bf   : > { %v1637_v30 = vpop.eup %1636  ;;  %v887_v36 = vsub.f32 1.0, %v1635_v28 }
 0x1c0   : > { %1044 = vperm.xlu0 %1495, %v1601_v50   ;;  %949 = vperm.xlu1 %1494, %v1603_v15   ;;  %v1639_v31 = vpop.eup %1638  ;;  %v888_v37 = vsub.f32 1.0, %v1637_v30 }
 0x1c1   : > { %v1641_v33 = vpop.eup %1640  ;;  %v903_v44 = vsub.f32 1.0, %v1639_v31 }
 0x1c2   : > { %v904_v38 = vsub.f32 1.0, %v1641_v33 }
 0x1c4   : > { %954 = vperm.xlu0 %1495, %v1605_v57   ;;  %1029 = vperm.xlu1 %1494, %v1607_v48  }
 0x1c8   : > { %1034 = vperm.xlu0 %1495, %v1611_v16   ;;  %1119 = vperm.xlu1 %1494, %v885_v52  }
 0x1cc   : > { %1124 = vperm.xlu0 %1495, %v886_v32   ;;  %1199 = vperm.xlu1 %1494, %v901_v2  }
 0x1d0   : > { %1204 = vperm.xlu0 %1495, %v902_v35   ;;  %1109 = vperm.xlu1 %1494, %v883_v58  }
 0x1d4   : > { %1114 = vperm.xlu0 %1495, %v884_v10   ;;  %1189 = vperm.xlu1 %1494, %v899_v41  }
 0x1d8   : > { %1194 = vperm.xlu0 %1495, %v900_v1   ;;  %979 = vperm.xlu1 %1494, %v1627_v3  }
 0x1dc   : > { %984 = vperm.xlu0 %1495, %v1629_v24   ;;  %1059 = vperm.xlu1 %1494, %v1631_v25  }
 0x1e0   : > { %1064 = vperm.xlu0 %1495, %v1633_v27   ;;  %969 = vperm.xlu1 %1494, %v1635_v28  }
 0x1e4   : > { %974 = vperm.xlu0 %1495, %v1637_v30   ;;  %1049 = vperm.xlu1 %1494, %v1639_v31  }
 0x1e8   : > { %1054 = vperm.xlu0 %1495, %v1641_v33   ;;  %1139 = vperm.xlu1 %1494, %v889_v18  }
 0x1ec   : > { %1144 = vperm.xlu0 %1495, %v890_v34   ;;  %1129 = vperm.xlu1 %1494, %v887_v36  }
 0x1f0   : > { %1134 = vperm.xlu0 %1495, %v888_v37   ;;  %1209 = vperm.xlu1 %1494, %v903_v44  }
 0x1f4   : > { %1214 = vperm.xlu0 %1495, %v904_v38   ;;  %1219 = vperm.xlu1 %1494, %v905_v39  }
 0x1f6   : > { %v920_v40 = vpop.permute.xlu1 %919 }
 0x1f8   : > { %1224 = vperm.xlu0 %1495, %v906_v43  }
 0x1fa   : > { %v1000_v13 = vpop.permute.xlu1 %999 }
 0x1fb   : > { %v910_v5 = vpop.permute.xlu0 %909 }
 0x1ff   : > { %v990_v53 = vpop.permute.xlu1 %989  ;;  %v925_v45 = vpop.permute.xlu0 %924 }
 0x203   : > { %v1080_v46 = vpop.permute.xlu1 %1079  ;;  %v1005_v26 = vpop.permute.xlu0 %1004 }
 0x204   : > { %v1229_v12 = vsel %vm874_vm1, %v920_v40, %v1080_v46 }
 0x205   : > { %1262 = vst.msk [vmem:[%s1930_s29 + $0x10] sm:$0xff] %vm1259_vm2, %v1229_v12 }
 0x207   : > { %v1160_v50 = vpop.permute.xlu1 %1159  ;;  %v995_v15 = vpop.permute.xlu0 %994 }
 0x208   : > { %v1245_v4 = vsel %vm874_vm1, %v1000_v13, %v1160_v50 }
 0x209   : > { %1278 = vst.msk [vmem:[%s1930_s29 + $0x90] sm:$0xff] %vm1259_vm2, %v1245_v4 }
 0x20b   : > { %v915_v47 = vpop.permute.xlu1 %914  ;;  %v1085_v7 = vpop.permute.xlu0 %1084 }
 0x20c   : > { %v1230_v29 = vsel %vm874_vm1, %v925_v45, %v1085_v7 }
 0x20d   : > { %1263 = vst.msk [vmem:[%s1930_s29 + $0x18] sm:$0xff] %vm1259_vm2, %v1230_v29 }
 0x20f   : > { %v1070_v14 = vpop.permute.xlu1 %1069  ;;  %v1165_v57 = vpop.permute.xlu0 %1164 }
 0x210   : > { %v1227_v48 = vsel %vm874_vm1, %v910_v5, %v1070_v14  ;;  %v1246_v17 = vsel %vm874_vm1, %v1005_v26, %v1165_v57 }
 0x211   : > { %1260 = vst.msk [vmem:[%s1930_s29] sm:$0xff] %vm1259_vm2, %v1227_v48  ;;  %1279 = vst.msk [vmem:[%s1930_s29 + $0x98] sm:$0xff] %vm1259_vm2, %v1246_v17 }
 0x213   : > { %v1150_v49 = vpop.permute.xlu1 %1149  ;;  %v1075_v6 = vpop.permute.xlu0 %1074 }
 0x214   : > { %v1243_v51 = vsel %vm874_vm1, %v990_v53, %v1150_v49  ;;  %v1228_v52 = vsel %vm874_vm1, %v915_v47, %v1075_v6 }
 0x215   : > { %1276 = vst.msk [vmem:[%s1930_s29 + $0x80] sm:$0xff] %vm1259_vm2, %v1243_v51  ;;  %1261 = vst.msk [vmem:[%s1930_s29 + $0x8] sm:$0xff] %vm1259_vm2, %v1228_v52 }
 0x217   : > { %v940_v16 = vpop.permute.xlu1 %939  ;;  %v1155_v9 = vpop.permute.xlu0 %1154 }
 0x218   : > { %v1244_v21 = vsel %vm874_vm1, %v995_v15, %v1155_v9 }
 0x219   : > { %1277 = vst.msk [vmem:[%s1930_s29 + $0x88] sm:$0xff] %vm1259_vm2, %v1244_v21 }
 0x21b   : > { %v1020_v56 = vpop.permute.xlu1 %1019  ;;  %v945_v54 = vpop.permute.xlu0 %944 }
 0x21f   : > { %v930_v32 = vpop.permute.xlu1 %929  ;;  %v1025_v2 = vpop.permute.xlu0 %1024 }
 0x223   : > { %v1010_v8 = vpop.permute.xlu1 %1009  ;;  %v935_v19 = vpop.permute.xlu0 %934 }
 0x227   : > { %v1100_v55 = vpop.permute.xlu1 %1099  ;;  %v1015_v11 = vpop.permute.xlu0 %1014 }
 0x228   : > { %v1233_v35 = vsel %vm874_vm1, %v940_v16, %v1100_v55 }
 0x229   : > { %1266 = vst.msk [vmem:[%s1930_s29 + $0x30] sm:$0xff] %vm1259_vm2, %v1233_v35 }
 0x22b   : > { %v1180_v58 = vpop.permute.xlu1 %1179  ;;  %v1105_v59 = vpop.permute.xlu0 %1104 }
 0x22c   : > { %v1249_v60 = vsel %vm874_vm1, %v1020_v56, %v1180_v58  ;;  %v1234_v61 = vsel %vm874_vm1, %v945_v54, %v1105_v59 }
 0x22d   : > { %1282 = vst.msk [vmem:[%s1930_s29 + $0xb0] sm:$0xff] %vm1259_vm2, %v1249_v60  ;;  %1267 = vst.msk [vmem:[%s1930_s29 + $0x38] sm:$0xff] %vm1259_vm2, %v1234_v61 }
 0x22f   : > { %v1090_v63 = vpop.permute.xlu1 %1089  ;;  %v1185_v10 = vpop.permute.xlu0 %1184 }
 0x230   : > { %v1231_v41 = vsel %vm874_vm1, %v930_v32, %v1090_v63  ;;  %v1250_v62 = vsel %vm874_vm1, %v1025_v2, %v1185_v10 }
 0x231   : > { %1264 = vst.msk [vmem:[%s1930_s29 + $0x20] sm:$0xff] %vm1259_vm2, %v1231_v41  ;;  %1283 = vst.msk [vmem:[%s1930_s29 + $0xb8] sm:$0xff] %vm1259_vm2, %v1250_v62 }
 0x233   : > { %v1170_v42 = vpop.permute.xlu1 %1169  ;;  %v1095_v0 = vpop.permute.xlu0 %1094 }
 0x234   : > { %v1247_v1 = vsel %vm874_vm1, %v1010_v8, %v1170_v42  ;;  %v1232_v3 = vsel %vm874_vm1, %v935_v19, %v1095_v0 }
 0x235   : > { %1280 = vst.msk [vmem:[%s1930_s29 + $0xa0] sm:$0xff] %vm1259_vm2, %v1247_v1  ;;  %1265 = vst.msk [vmem:[%s1930_s29 + $0x28] sm:$0xff] %vm1259_vm2, %v1232_v3 }
 0x237   : > { %v960_v22 = vpop.permute.xlu1 %959  ;;  %v1175_v24 = vpop.permute.xlu0 %1174 }
 0x238   : > { %v1248_v25 = vsel %vm874_vm1, %v1015_v11, %v1175_v24 }
 0x239   : > { %1281 = vst.msk [vmem:[%s1930_s29 + $0xa8] sm:$0xff] %vm1259_vm2, %v1248_v25 }
 0x23b   : > { %v1040_v27 = vpop.permute.xlu1 %1039  ;;  %v965_v28 = vpop.permute.xlu0 %964 }
 0x23f   : > { %v950_v30 = vpop.permute.xlu1 %949  ;;  %v1045_v31 = vpop.permute.xlu0 %1044 }
 0x243   : > { %v1030_v18 = vpop.permute.xlu1 %1029  ;;  %v955_v33 = vpop.permute.xlu0 %954 }
 0x247   : > { %v1120_v34 = vpop.permute.xlu1 %1119  ;;  %v1035_v36 = vpop.permute.xlu0 %1034 }
 0x248   : > { %v1237_v37 = vsel %vm874_vm1, %v960_v22, %v1120_v34 }
 0x249   : > { %1270 = vst.msk [vmem:[%s1930_s29 + $0x50] sm:$0xff] %vm1259_vm2, %v1237_v37 }
 0x24b   : > { %v1200_v44 = vpop.permute.xlu1 %1199  ;;  %v1125_v38 = vpop.permute.xlu0 %1124 }
 0x24c   : > { %v1253_v39 = vsel %vm874_vm1, %v1040_v27, %v1200_v44  ;;  %v1238_v40 = vsel %vm874_vm1, %v965_v28, %v1125_v38 }
 0x24d   : > { %1286 = vst.msk [vmem:[%s1930_s29 + $0xd0] sm:$0xff] %vm1259_vm2, %v1253_v39  ;;  %1271 = vst.msk [vmem:[%s1930_s29 + $0x58] sm:$0xff] %vm1259_vm2, %v1238_v40 }
 0x24f   : > { %v1110_v43 = vpop.permute.xlu1 %1109  ;;  %v1205_v20 = vpop.permute.xlu0 %1204 }
 0x250   : > { %v1235_v13 = vsel %vm874_vm1, %v950_v30, %v1110_v43  ;;  %v1254_v5 = vsel %vm874_vm1, %v1045_v31, %v1205_v20 }
 0x251   : > { %1268 = vst.msk [vmem:[%s1930_s29 + $0x40] sm:$0xff] %vm1259_vm2, %v1235_v13  ;;  %1287 = vst.msk [vmem:[%s1930_s29 + $0xd8] sm:$0xff] %vm1259_vm2, %v1254_v5 }
 0x253   : > { %v1190_v53 = vpop.permute.xlu1 %1189  ;;  %v1115_v45 = vpop.permute.xlu0 %1114 }
 0x254   : > { %v1251_v46 = vsel %vm874_vm1, %v1030_v18, %v1190_v53  ;;  %v1236_v26 = vsel %vm874_vm1, %v955_v33, %v1115_v45 }
 0x255   : > { %1284 = vst.msk [vmem:[%s1930_s29 + $0xc0] sm:$0xff] %vm1259_vm2, %v1251_v46  ;;  %1269 = vst.msk [vmem:[%s1930_s29 + $0x48] sm:$0xff] %vm1259_vm2, %v1236_v26 }
 0x257   : > { %v980_v12 = vpop.permute.xlu1 %979  ;;  %v1195_v50 = vpop.permute.xlu0 %1194 }
 0x258   : > { %v1252_v15 = vsel %vm874_vm1, %v1035_v36, %v1195_v50 }
 0x259   : > { %1285 = vst.msk [vmem:[%s1930_s29 + $0xc8] sm:$0xff] %vm1259_vm2, %v1252_v15 }
 0x25b   : > { %v1060_v4 = vpop.permute.xlu1 %1059  ;;  %v985_v47 = vpop.permute.xlu0 %984 }
 0x25f   : > { %v970_v7 = vpop.permute.xlu1 %969  ;;  %v1065_v29 = vpop.permute.xlu0 %1064 }
 0x263   : > { %v1050_v14 = vpop.permute.xlu1 %1049  ;;  %v975_v57 = vpop.permute.xlu0 %974 }
 0x267   : > { %v1140_v48 = vpop.permute.xlu1 %1139  ;;  %v1055_v17 = vpop.permute.xlu0 %1054 }
 0x268   : > { %v1241_v49 = vsel %vm874_vm1, %v980_v12, %v1140_v48 }
 0x269   : > { %1274 = vst.msk [vmem:[%s1930_s29 + $0x70] sm:$0xff] %vm1259_vm2, %v1241_v49 }
 0x26b   : > { %v1130_v6 = vpop.permute.xlu1 %1129  ;;  %v1145_v51 = vpop.permute.xlu0 %1144 }
 0x26c   : > { %v1239_v52 = vsel %vm874_vm1, %v970_v7, %v1130_v6  ;;  %v1242_v16 = vsel %vm874_vm1, %v985_v47, %v1145_v51 }
 0x26d   : > { %1272 = vst.msk [vmem:[%s1930_s29 + $0x60] sm:$0xff] %vm1259_vm2, %v1239_v52  ;;  %1275 = vst.msk [vmem:[%s1930_s29 + $0x78] sm:$0xff] %vm1259_vm2, %v1242_v16 }
 0x26f   : > { %v1210_v9 = vpop.permute.xlu1 %1209  ;;  %v1135_v21 = vpop.permute.xlu0 %1134 }
 0x270   : > { %v1255_v56 = vsel %vm874_vm1, %v1050_v14, %v1210_v9  ;;  %v1240_v54 = vsel %vm874_vm1, %v975_v57, %v1135_v21 }
 0x271   : > { %1288 = vst.msk [vmem:[%s1930_s29 + $0xe0] sm:$0xff] %vm1259_vm2, %v1255_v56  ;;  %1273 = vst.msk [vmem:[%s1930_s29 + $0x68] sm:$0xff] %vm1259_vm2, %v1240_v54 }
 0x273   : > { %v1220_v32 = vpop.permute.xlu1 %1219  ;;  %v1215_v2 = vpop.permute.xlu0 %1214 }
 0x274   : > { %v1257_v8 = vsel %vm874_vm1, %v1060_v4, %v1220_v32  ;;  %v1256_v19 = vsel %vm874_vm1, %v1055_v17, %v1215_v2 }
 0x275   : > { %1290 = vst.msk [vmem:[%s1930_s29 + $0xf0] sm:$0xff] %vm1259_vm2, %v1257_v8  ;;  %1289 = vst.msk [vmem:[%s1930_s29 + $0xe8] sm:$0xff] %vm1259_vm2, %v1256_v19 }
 0x277   : > { %v1225_v55 = vpop.permute.xlu0 %1224 }
 0x278   : > { %v1258_v11 = vsel %vm874_vm1, %v1065_v29, %v1225_v55 }
 0x279   : > { %1291 = vst.msk [vmem:[%s1930_s29 + $0xf8] sm:$0xff] %vm1259_vm2, %v1258_v11 }
 0x27a PF: > { %s13_s12 = sadd.s32 1, %s1648_s12  }
 0x27b   : > { %p10_p4 = scmp.ge.s32.totalorder %s13_s12, 10  }
 0x27d   :  { %12 = sbr.rel (!%p10_p4) target bundleno = 1 (0x1), region = 62 }

</bundles_post_ra>
